<compile_context>
chip_gen: v7x
topology: tpu7x:2x2x1
jax: 0.10.0
libtpu: 0.0.40
codegen_flags: <defaults>
</compile_context>

<pallas_src>
import functools
import math

import jax
import jax.numpy as jnp
from jax.experimental import pallas as pl
from jax.experimental.pallas import tpu as pltpu

ENC_NF = [2, 16, 32, 32, 32, 32]
DEC_NF = [32, 32, 32, 32, 16, 16, 3]
BN_EPS = 1e-5
LRELU_SLOPE = 0.2
LANE = 128
MAX_TILE_M = 512

# Static per-layer conv strides (kept OUT of the jitted params pytree).
STRIDES = {
    "inconv": 1, "down1": 2, "down2": 2, "down3": 2, "down4": 2,
    "up1": 1, "up2": 1, "up3": 1, "same_conv1": 1, "up4": 1,
    "same_conv2": 1, "outconv": 1,
}


# ----------------------------- Pallas kernels ------------------------------

def _conv_stats_kernel(p_ref, w_ref, y_ref, sum_ref, sq_ref):
    """One M-tile of y = W @ P (bf16 in, f32 acc) + per-channel sum / sumsq.

    p_ref: (K, TM) bf16 patches tile
    w_ref: (Cout, K) bf16 weights (VMEM-resident across the grid)
    y_ref: (Cout, TM) f32 conv output tile (lane-dense store)
    sum_ref / sq_ref: (Cout, 1) f32 accumulators (resident across the grid)
    """
    i = pl.program_id(0)

    @pl.when(i == 0)
    def _init():
        sum_ref[...] = jnp.zeros_like(sum_ref)
        sq_ref[...] = jnp.zeros_like(sq_ref)

    y = jnp.dot(w_ref[...], p_ref[...], preferred_element_type=jnp.float32)
    y_ref[...] = y
    sum_ref[...] += jnp.sum(y, axis=1, keepdims=True)
    sq_ref[...] += jnp.sum(y * y, axis=1, keepdims=True)


def _bn_lrelu_kernel(y_ref, sum_ref, sq_ref, o_ref, *, inv_m):
    """Train-mode BatchNorm (identity affine) + LeakyReLU(0.2), f32 math."""
    mean = sum_ref[...] * inv_m
    var = sq_ref[...] * inv_m - mean * mean
    rstd = jax.lax.rsqrt(var + BN_EPS)
    yn = (y_ref[...] - mean) * rstd
    o_ref[...] = jnp.where(yn >= 0, yn, LRELU_SLOPE * yn).astype(o_ref.dtype)


def _conv_bias_kernel(p_ref, w_ref, b_ref, o_ref):
    o_ref[...] = (
        jnp.dot(w_ref[...], p_ref[...], preferred_element_type=jnp.float32)
        + b_ref[...]
    )


# ------------------------------ JAX glue ------------------------------------

def _im2col_cm(x, stride):
    """x: (C, N, D, H, W) -> patches (27*C, M_pad), channels-first layout.

    M is zero-padded up to a multiple of 128 lanes; zero columns contribute
    exactly 0 to the (bias-free) conv output and to the BN statistics.
    """
    C, N, D, H, W = x.shape
    xp = jnp.pad(x, ((0, 0), (0, 0), (1, 1), (1, 1), (1, 1)))
    Do = (D - 1) // stride + 1
    Ho = (H - 1) // stride + 1
    Wo = (W - 1) // stride + 1
    M = N * Do * Ho * Wo
    pieces = []
    for kd in range(3):
        for kh in range(3):
            for kw in range(3):
                sl = xp[:, :,
                        kd:kd + stride * (Do - 1) + 1:stride,
                        kh:kh + stride * (Ho - 1) + 1:stride,
                        kw:kw + stride * (Wo - 1) + 1:stride]
                pieces.append(sl.reshape(C, M))
    patches = jnp.concatenate(pieces, axis=0)          # (27*C, M)
    m_pad = ((M + LANE - 1) // LANE) * LANE
    if m_pad != M:
        patches = jnp.pad(patches, ((0, 0), (0, m_pad - M)))
    return patches, M, (N, Do, Ho, Wo)


def _pick_tile(m_pad):
    for tm in (MAX_TILE_M, 256, LANE):
        if m_pad % tm == 0:
            return tm
    return m_pad


def _upsample_nearest_x2(x):
    # (C, N, D, H, W) nearest-neighbour x2 on D, H, W
    x = jnp.repeat(x, 2, axis=2)
    x = jnp.repeat(x, 2, axis=3)
    x = jnp.repeat(x, 2, axis=4)
    return x


# ------------------------- conv block wrappers -------------------------------

def _conv_bn_lrelu(x, w, stride):
    """Conv3d(k=3, p=1, stride) + BatchNorm3d(train stats) + LeakyReLU(0.2).

    x: (Cin, N, D, H, W) bf16, w: (Cout, 27*Cin) f32 -> (Cout, N, Do, Ho, Wo) bf16.
    """
    patches, m, (N, Do, Ho, Wo) = _im2col_cm(x, stride)
    K, m_pad = patches.shape
    Cout = w.shape[0]
    tm = _pick_tile(m_pad)
    grid = (m_pad // tm,)
    w_bf = w.astype(jnp.bfloat16)

    # Pass 1: tiled matmul + per-channel stats accumulation.
    y, s1, s2 = pl.pallas_call(
        _conv_stats_kernel,
        grid=grid,
        in_specs=[
            pl.BlockSpec((K, tm), lambda i: (0, i)),
            pl.BlockSpec((Cout, K), lambda i: (0, 0)),
        ],
        out_specs=(
            pl.BlockSpec((Cout, tm), lambda i: (0, i)),
            pl.BlockSpec((Cout, 1), lambda i: (0, 0)),
            pl.BlockSpec((Cout, 1), lambda i: (0, 0)),
        ),
        out_shape=(
            jax.ShapeDtypeStruct((Cout, m_pad), jnp.float32),
            jax.ShapeDtypeStruct((Cout, 1), jnp.float32),
            jax.ShapeDtypeStruct((Cout, 1), jnp.float32),
        ),
        compiler_params=pltpu.CompilerParams(
            dimension_semantics=("arbitrary",)),
    )(patches, w_bf)

    # Pass 2: normalize + LeakyReLU, lane-dense stores, parallel grid axis.
    out = pl.pallas_call(
        functools.partial(_bn_lrelu_kernel, inv_m=1.0 / m),
        grid=grid,
        in_specs=[
            pl.BlockSpec((Cout, tm), lambda i: (0, i)),
            pl.BlockSpec((Cout, 1), lambda i: (0, 0)),
            pl.BlockSpec((Cout, 1), lambda i: (0, 0)),
        ],
        out_specs=pl.BlockSpec((Cout, tm), lambda i: (0, i)),
        out_shape=jax.ShapeDtypeStruct((Cout, m_pad), jnp.bfloat16),
        compiler_params=pltpu.CompilerParams(
            dimension_semantics=("parallel",)),
    )(y, s1, s2)

    return out[:, :m].reshape(Cout, N, Do, Ho, Wo)


def _conv_bias(x, w, b, stride=1):
    """Plain Conv3d(k=3, p=1) + bias (the final outconv), f32 output."""
    patches, m, (N, Do, Ho, Wo) = _im2col_cm(x, stride)
    K, m_pad = patches.shape
    Cout = w.shape[0]
    tm = _pick_tile(m_pad)
    grid = (m_pad // tm,)
    out = pl.pallas_call(
        _conv_bias_kernel,
        grid=grid,
        in_specs=[
            pl.BlockSpec((K, tm), lambda i: (0, i)),
            pl.BlockSpec((Cout, K), lambda i: (0, 0)),
            pl.BlockSpec((Cout, 1), lambda i: (0, 0)),
        ],
        out_specs=pl.BlockSpec((Cout, tm), lambda i: (0, i)),
        out_shape=jax.ShapeDtypeStruct((Cout, m_pad), jnp.float32),
        compiler_params=pltpu.CompilerParams(
            dimension_semantics=("parallel",)),
    )(patches, w.astype(jnp.bfloat16), b.reshape(Cout, 1))
    return out[:, :m].reshape(Cout, N, Do, Ho, Wo)


# --------------------------- parameter creation -----------------------------

def _kaiming_w(key, cin, cout, a=LRELU_SLOPE):
    gain = math.sqrt(2.0 / (1.0 + a * a))
    std = gain / math.sqrt(cin * 27)
    return std * jax.random.normal(key, (cout, 27 * cin), jnp.float32)


def init_unet_params(key):
    chans = {
        "inconv": (ENC_NF[0], ENC_NF[1]),
        "down1": (ENC_NF[1], ENC_NF[2]),
        "down2": (ENC_NF[2], ENC_NF[3]),
        "down3": (ENC_NF[3], ENC_NF[4]),
        "down4": (ENC_NF[4], ENC_NF[5]),
        "up1": (ENC_NF[-1], DEC_NF[0]),
        "up2": (DEC_NF[0] + ENC_NF[4], DEC_NF[1]),
        "up3": (DEC_NF[1] + ENC_NF[3], DEC_NF[2]),
        "same_conv1": (DEC_NF[2] + ENC_NF[2], DEC_NF[3]),
        "up4": (DEC_NF[3], DEC_NF[4]),
        "same_conv2": (DEC_NF[4] + ENC_NF[1], DEC_NF[5]),
    }
    keys = jax.random.split(key, len(chans) + 1)
    params = {}
    for i, (name, (cin, cout)) in enumerate(chans.items()):
        # Conv bias is zero-init AND cancelled by train-mode BN mean
        # subtraction -> BN-path blocks carry no bias parameter.
        params[name] = {"w": _kaiming_w(keys[i], cin, cout)}
    cin, cout = DEC_NF[5], DEC_NF[6]
    params["outconv"] = {
        "w": 1e-5 * jax.random.normal(keys[-1], (cout, 27 * cin), jnp.float32),
        "b": jnp.zeros((cout,), jnp.float32),
    }
    return params


# ------------------------------ Unet forward --------------------------------

def unet_forward(params, x_ncdhw):
    """x_ncdhw: (N, 2, D, H, W) float32 -> (N, 3, D, H, W) float32."""
    x = jnp.transpose(x_ncdhw, (1, 0, 2, 3, 4)).astype(jnp.bfloat16)  # (C,N,D,H,W)

    def blk(name, h):
        return _conv_bn_lrelu(h, params[name]["w"], STRIDES[name])

    skip1 = blk("inconv", x)
    skip2 = blk("down1", skip1)
    skip3 = blk("down2", skip2)
    skip4 = blk("down3", skip3)
    h = blk("down4", skip4)

    h = blk("up1", h)
    h = _upsample_nearest_x2(h)
    h = jnp.concatenate((h, skip4), axis=0)
    h = blk("up2", h)
    h = _upsample_nearest_x2(h)
    h = jnp.concatenate((h, skip3), axis=0)
    h = blk("up3", h)
    h = _upsample_nearest_x2(h)
    h = jnp.concatenate((h, skip2), axis=0)
    h = blk("same_conv1", h)
    h = blk("up4", h)
    h = _upsample_nearest_x2(h)
    h = jnp.concatenate((h, skip1), axis=0)
    h = blk("same_conv2", h)

    h = _conv_bias(h, params["outconv"]["w"], params["outconv"]["b"])
    return jnp.transpose(h, (1, 0, 2, 3, 4)).astype(jnp.float32)  # -> NCDHW


# ----------------------------------- main ------------------------------------

if __name__ == "__main__":
    key = jax.random.PRNGKey(0)
    kp, kx = jax.random.split(key)
    params = init_unet_params(kp)

    # PyTorch-style NCDHW input: batch=1, channels=2 (moving+fixed), 16^3 volume
    x = jax.random.normal(kx, (1, 2, 16, 16, 16), jnp.float32)

    out = jax.block_until_ready(jax.jit(unet_forward)(params, x))

    assert out.shape == (1, 3, 16, 16, 16), out.shape
    assert out.dtype == jnp.float32, out.dtype
    assert bool(jnp.isfinite(out).all())
    print("KERNEL_OK")
</pallas_src>

<mosaic_0001>
module attributes {stable_mosaic.version = 11 : i64} {
  func.func @_conv_stats_kernel(%arg0: i32, %arg1: memref<54x512xbf16, #tpu.memory_space<vmem>>, %arg2: memref<16x54xbf16, #tpu.memory_space<vmem>>, %arg3: memref<16x512xf32, #tpu.memory_space<vmem>>, %arg4: memref<16x1xf32, #tpu.memory_space<vmem>>, %arg5: memref<16x1xf32, #tpu.memory_space<vmem>>) attributes {dimension_semantics = [#tpu.dimension_semantics<arbitrary>], iteration_bounds = array<i64: 8>, scalar_prefetch = 0 : i64, scratch_operands = 0 : i64, tpu.core_type = #tpu.core_type<tc>, window_params = [{transform_indices = @transform_0, window_bounds = array<i64: 54, 512>}, {pipeline_mode = #tpu.pipeline_mode<synchronous>, transform_indices = @transform_1, window_bounds = array<i64: 16, 54>}, {transform_indices = @transform_2, window_bounds = array<i64: 16, 512>}, {pipeline_mode = #tpu.pipeline_mode<synchronous>, transform_indices = @transform_3, window_bounds = array<i64: 16, 1>}, {pipeline_mode = #tpu.pipeline_mode<synchronous>, transform_indices = @transform_4, window_bounds = array<i64: 16, 1>}]} {
    %c0_i32 = arith.constant 0 : i32
    %0 = arith.cmpi eq, %arg0, %c0_i32 : i32
    %1 = arith.extui %0 : i1 to i32
    %c0_i32_0 = arith.constant 0 : i32
    %2 = arith.cmpi ne, %1, %c0_i32_0 : i32
    scf.if %2 {
      %cst_16 = arith.constant 0.000000e+00 : f32
      %18 = vector.broadcast %cst_16 : f32 to vector<16x1xf32>
      %c0_17 = arith.constant 0 : index
      %c0_18 = arith.constant 0 : index
      %19 = vector.load %arg4[%c0_17, %c0_18] : memref<16x1xf32, #tpu.memory_space<vmem>>, vector<16x1xf32>
      tpu.vector_store %arg4[%c0_17, %c0_18], %18 {strides = array<i32>} : memref<16x1xf32, #tpu.memory_space<vmem>>, vector<16x1xf32>,
      %cst_19 = arith.constant 0.000000e+00 : f32
      %20 = vector.broadcast %cst_19 : f32 to vector<16x1xf32>
      %c0_20 = arith.constant 0 : index
      %c0_21 = arith.constant 0 : index
      %21 = vector.load %arg5[%c0_20, %c0_21] : memref<16x1xf32, #tpu.memory_space<vmem>>, vector<16x1xf32>
      tpu.vector_store %arg5[%c0_20, %c0_21], %20 {strides = array<i32>} : memref<16x1xf32, #tpu.memory_space<vmem>>, vector<16x1xf32>,
    } else {
    }
    %c0 = arith.constant 0 : index
    %c0_1 = arith.constant 0 : index
    %3 = vector.load %arg2[%c0, %c0_1] : memref<16x54xbf16, #tpu.memory_space<vmem>>, vector<16x54xbf16>
    %c0_2 = arith.constant 0 : index
    %c0_3 = arith.constant 0 : index
    %4 = vector.load %arg1[%c0_2, %c0_3] : memref<54x512xbf16, #tpu.memory_space<vmem>>, vector<54x512xbf16>
    %cst = arith.constant dense<0.000000e+00> : vector<16x512xf32>
    %5 = tpu.matmul %3, %4, %cst {dimension_numbers = #tpu.dot_dimension_numbers<[1], [0], [0], [1], [0, 0, 1, 1], [], []>} : vector<16x54xbf16>, vector<54x512xbf16>, vector<16x512xf32> -> vector<16x512xf32>
    %c0_4 = arith.constant 0 : index
    %c0_5 = arith.constant 0 : index
    %6 = vector.load %arg3[%c0_4, %c0_5] : memref<16x512xf32, #tpu.memory_space<vmem>>, vector<16x512xf32>
    tpu.vector_store %arg3[%c0_4, %c0_5], %5 {strides = array<i32>} : memref<16x512xf32, #tpu.memory_space<vmem>>, vector<16x512xf32>,
    %c0_6 = arith.constant 0 : index
    %c0_7 = arith.constant 0 : index
    %7 = vector.load %arg4[%c0_6, %c0_7] : memref<16x1xf32, #tpu.memory_space<vmem>>, vector<16x1xf32>
    %cst_8 = arith.constant dense<0.000000e+00> : vector<16xf32>
    %8 = vector.multi_reduction <add>, %5, %cst_8 [1] : vector<16x512xf32> to vector<16xf32>
    %9 = vector.shape_cast %8 : vector<16xf32> to vector<16x1xf32>
    %10 = arith.addf %7, %9 : vector<16x1xf32>
    %c0_9 = arith.constant 0 : index
    %c0_10 = arith.constant 0 : index
    %11 = vector.load %arg4[%c0_9, %c0_10] : memref<16x1xf32, #tpu.memory_space<vmem>>, vector<16x1xf32>
    tpu.vector_store %arg4[%c0_9, %c0_10], %10 {strides = array<i32>} : memref<16x1xf32, #tpu.memory_space<vmem>>, vector<16x1xf32>,
    %c0_11 = arith.constant 0 : index
    %c0_12 = arith.constant 0 : index
    %12 = vector.load %arg5[%c0_11, %c0_12] : memref<16x1xf32, #tpu.memory_space<vmem>>, vector<16x1xf32>
    %13 = arith.mulf %5, %5 : vector<16x512xf32>
    %cst_13 = arith.constant dense<0.000000e+00> : vector<16xf32>
    %14 = vector.multi_reduction <add>, %13, %cst_13 [1] : vector<16x512xf32> to vector<16xf32>
    %15 = vector.shape_cast %14 : vector<16xf32> to vector<16x1xf32>
    %16 = arith.addf %12, %15 : vector<16x1xf32>
    %c0_14 = arith.constant 0 : index
    %c0_15 = arith.constant 0 : index
    %17 = vector.load %arg5[%c0_14, %c0_15] : memref<16x1xf32, #tpu.memory_space<vmem>>, vector<16x1xf32>
    tpu.vector_store %arg5[%c0_14, %c0_15], %16 {strides = array<i32>} : memref<16x1xf32, #tpu.memory_space<vmem>>, vector<16x1xf32>,
    return
  }
  func.func @transform_0(%arg0: i32) -> (i32, i32) {
    %c0_i32 = arith.constant 0 : i32
    %c0_i32_0 = arith.constant 0 : i32
    return %c0_i32, %arg0 : i32, i32
  }
  func.func @transform_1(%arg0: i32) -> (i32, i32) {
    %c0_i32 = arith.constant 0 : i32
    %c0_i32_0 = arith.constant 0 : i32
    %c0_i32_1 = arith.constant 0 : i32
    return %c0_i32, %c0_i32_0 : i32, i32
  }
  func.func @transform_2(%arg0: i32) -> (i32, i32) {
    %c0_i32 = arith.constant 0 : i32
    %c0_i32_0 = arith.constant 0 : i32
    return %c0_i32, %arg0 : i32, i32
  }
  func.func @transform_3(%arg0: i32) -> (i32, i32) {
    %c0_i32 = arith.constant 0 : i32
    %c0_i32_0 = arith.constant 0 : i32
    %c0_i32_1 = arith.constant 0 : i32
    return %c0_i32, %c0_i32_0 : i32, i32
  }
  func.func @transform_4(%arg0: i32) -> (i32, i32) {
    %c0_i32 = arith.constant 0 : i32
    %c0_i32_0 = arith.constant 0 : i32
    %c0_i32_1 = arith.constant 0 : i32
    return %c0_i32, %c0_i32_0 : i32, i32
  }
}

module attributes {stable_mosaic.version = 11 : i64} {
  func.func @_bn_lrelu_kernel(%arg0: i32, %arg1: memref<16x512xf32, #tpu.memory_space<vmem>>, %arg2: memref<16x1xf32, #tpu.memory_space<vmem>>, %arg3: memref<16x1xf32, #tpu.memory_space<vmem>>, %arg4: memref<16x512xbf16, #tpu.memory_space<vmem>>) attributes {dimension_semantics = [#tpu.dimension_semantics<parallel>], iteration_bounds = array<i64: 8>, scalar_prefetch = 0 : i64, scratch_operands = 0 : i64, tpu.core_type = #tpu.core_type<tc>, window_params = [{transform_indices = @transform_0, window_bounds = array<i64: 16, 512>}, {pipeline_mode = #tpu.pipeline_mode<synchronous>, transform_indices = @transform_1, window_bounds = array<i64: 16, 1>}, {pipeline_mode = #tpu.pipeline_mode<synchronous>, transform_indices = @transform_2, window_bounds = array<i64: 16, 1>}, {transform_indices = @transform_3, window_bounds = array<i64: 16, 512>}]} {
    %c0 = arith.constant 0 : index
    %c0_0 = arith.constant 0 : index
    %0 = vector.load %arg2[%c0, %c0_0] : memref<16x1xf32, #tpu.memory_space<vmem>>, vector<16x1xf32>
    %cst = arith.constant 2.44140625E-4 : f32
    %1 = vector.broadcast %cst : f32 to vector<16x1xf32>
    %2 = arith.mulf %0, %1 : vector<16x1xf32>
    %c0_1 = arith.constant 0 : index
    %c0_2 = arith.constant 0 : index
    %3 = vector.load %arg3[%c0_1, %c0_2] : memref<16x1xf32, #tpu.memory_space<vmem>>, vector<16x1xf32>
    %cst_3 = arith.constant 2.44140625E-4 : f32
    %4 = vector.broadcast %cst_3 : f32 to vector<16x1xf32>
    %5 = arith.mulf %3, %4 : vector<16x1xf32>
    %6 = arith.mulf %2, %2 : vector<16x1xf32>
    %7 = arith.subf %5, %6 : vector<16x1xf32>
    %cst_4 = arith.constant 9.99999974E-6 : f32
    %8 = vector.broadcast %cst_4 : f32 to vector<16x1xf32>
    %9 = arith.addf %7, %8 : vector<16x1xf32>
    %10 = math.rsqrt %9 : vector<16x1xf32>
    %c0_5 = arith.constant 0 : index
    %c0_6 = arith.constant 0 : index
    %11 = vector.load %arg1[%c0_5, %c0_6] : memref<16x512xf32, #tpu.memory_space<vmem>>, vector<16x512xf32>
    %12 = vector.broadcast %2 : vector<16x1xf32> to vector<16x512xf32>
    %13 = arith.subf %11, %12 : vector<16x512xf32>
    %14 = vector.broadcast %10 : vector<16x1xf32> to vector<16x512xf32>
    %15 = arith.mulf %13, %14 : vector<16x512xf32>
    %cst_7 = arith.constant 0.000000e+00 : f32
    %16 = vector.broadcast %cst_7 : f32 to vector<16x512xf32>
    %17 = arith.cmpf oge, %15, %16 : vector<16x512xf32>
    %cst_8 = arith.constant 2.000000e-01 : f32
    %18 = vector.broadcast %cst_8 : f32 to vector<16x512xf32>
    %19 = arith.mulf %18, %15 : vector<16x512xf32>
    %20 = arith.select %17, %15, %19 : vector<16x512xi1>, vector<16x512xf32>
    %21 = arith.truncf %20 : vector<16x512xf32> to vector<16x512xbf16>
    %c0_9 = arith.constant 0 : index
    %c0_10 = arith.constant 0 : index
    %22 = vector.load %arg4[%c0_9, %c0_10] : memref<16x512xbf16, #tpu.memory_space<vmem>>, vector<16x512xbf16>
    tpu.vector_store %arg4[%c0_9, %c0_10], %21 {strides = array<i32>} : memref<16x512xbf16, #tpu.memory_space<vmem>>, vector<16x512xbf16>,
    return
  }
  func.func @transform_0(%arg0: i32) -> (i32, i32) {
    %c0_i32 = arith.constant 0 : i32
    %c0_i32_0 = arith.constant 0 : i32
    return %c0_i32, %arg0 : i32, i32
  }
  func.func @transform_1(%arg0: i32) -> (i32, i32) {
    %c0_i32 = arith.constant 0 : i32
    %c0_i32_0 = arith.constant 0 : i32
    %c0_i32_1 = arith.constant 0 : i32
    return %c0_i32, %c0_i32_0 : i32, i32
  }
  func.func @transform_2(%arg0: i32) -> (i32, i32) {
    %c0_i32 = arith.constant 0 : i32
    %c0_i32_0 = arith.constant 0 : i32
    %c0_i32_1 = arith.constant 0 : i32
    return %c0_i32, %c0_i32_0 : i32, i32
  }
  func.func @transform_3(%arg0: i32) -> (i32, i32) {
    %c0_i32 = arith.constant 0 : i32
    %c0_i32_0 = arith.constant 0 : i32
    return %c0_i32, %arg0 : i32, i32
  }
}

module attributes {stable_mosaic.version = 11 : i64} {
  func.func @_bn_lrelu_kernel(%arg0: i32, %arg1: memref<32x512xf32, #tpu.memory_space<vmem>>, %arg2: memref<32x1xf32, #tpu.memory_space<vmem>>, %arg3: memref<32x1xf32, #tpu.memory_space<vmem>>, %arg4: memref<32x512xbf16, #tpu.memory_space<vmem>>) attributes {dimension_semantics = [#tpu.dimension_semantics<parallel>], iteration_bounds = array<i64: 1>, scalar_prefetch = 0 : i64, scratch_operands = 0 : i64, tpu.core_type = #tpu.core_type<tc>, window_params = [{transform_indices = @transform_0, window_bounds = array<i64: 32, 512>}, {pipeline_mode = #tpu.pipeline_mode<synchronous>, transform_indices = @transform_1, window_bounds = array<i64: 32, 1>}, {pipeline_mode = #tpu.pipeline_mode<synchronous>, transform_indices = @transform_2, window_bounds = array<i64: 32, 1>}, {transform_indices = @transform_3, window_bounds = array<i64: 32, 512>}]} {
    %c0 = arith.constant 0 : index
    %c0_0 = arith.constant 0 : index
    %0 = vector.load %arg2[%c0, %c0_0] : memref<32x1xf32, #tpu.memory_space<vmem>>, vector<32x1xf32>
    %cst = arith.constant 0.001953125 : f32
    %1 = vector.broadcast %cst : f32 to vector<32x1xf32>
    %2 = arith.mulf %0, %1 : vector<32x1xf32>
    %c0_1 = arith.constant 0 : index
    %c0_2 = arith.constant 0 : index
    %3 = vector.load %arg3[%c0_1, %c0_2] : memref<32x1xf32, #tpu.memory_space<vmem>>, vector<32x1xf32>
    %cst_3 = arith.constant 0.001953125 : f32
    %4 = vector.broadcast %cst_3 : f32 to vector<32x1xf32>
    %5 = arith.mulf %3, %4 : vector<32x1xf32>
    %6 = arith.mulf %2, %2 : vector<32x1xf32>
    %7 = arith.subf %5, %6 : vector<32x1xf32>
    %cst_4 = arith.constant 9.99999974E-6 : f32
    %8 = vector.broadcast %cst_4 : f32 to vector<32x1xf32>
    %9 = arith.addf %7, %8 : vector<32x1xf32>
    %10 = math.rsqrt %9 : vector<32x1xf32>
    %c0_5 = arith.constant 0 : index
    %c0_6 = arith.constant 0 : index
    %11 = vector.load %arg1[%c0_5, %c0_6] : memref<32x512xf32, #tpu.memory_space<vmem>>, vector<32x512xf32>
    %12 = vector.broadcast %2 : vector<32x1xf32> to vector<32x512xf32>
    %13 = arith.subf %11, %12 : vector<32x512xf32>
    %14 = vector.broadcast %10 : vector<32x1xf32> to vector<32x512xf32>
    %15 = arith.mulf %13, %14 : vector<32x512xf32>
    %cst_7 = arith.constant 0.000000e+00 : f32
    %16 = vector.broadcast %cst_7 : f32 to vector<32x512xf32>
    %17 = arith.cmpf oge, %15, %16 : vector<32x512xf32>
    %cst_8 = arith.constant 2.000000e-01 : f32
    %18 = vector.broadcast %cst_8 : f32 to vector<32x512xf32>
    %19 = arith.mulf %18, %15 : vector<32x512xf32>
    %20 = arith.select %17, %15, %19 : vector<32x512xi1>, vector<32x512xf32>
    %21 = arith.truncf %20 : vector<32x512xf32> to vector<32x512xbf16>
    %c0_9 = arith.constant 0 : index
    %c0_10 = arith.constant 0 : index
    %22 = vector.load %arg4[%c0_9, %c0_10] : memref<32x512xbf16, #tpu.memory_space<vmem>>, vector<32x512xbf16>
    tpu.vector_store %arg4[%c0_9, %c0_10], %21 {strides = array<i32>} : memref<32x512xbf16, #tpu.memory_space<vmem>>, vector<32x512xbf16>,
    return
  }
  func.func @transform_0(%arg0: i32) -> (i32, i32) {
    %c0_i32 = arith.constant 0 : i32
    %c0_i32_0 = arith.constant 0 : i32
    return %c0_i32, %arg0 : i32, i32
  }
  func.func @transform_1(%arg0: i32) -> (i32, i32) {
    %c0_i32 = arith.constant 0 : i32
    %c0_i32_0 = arith.constant 0 : i32
    %c0_i32_1 = arith.constant 0 : i32
    return %c0_i32, %c0_i32_0 : i32, i32
  }
  func.func @transform_2(%arg0: i32) -> (i32, i32) {
    %c0_i32 = arith.constant 0 : i32
    %c0_i32_0 = arith.constant 0 : i32
    %c0_i32_1 = arith.constant 0 : i32
    return %c0_i32, %c0_i32_0 : i32, i32
  }
  func.func @transform_3(%arg0: i32) -> (i32, i32) {
    %c0_i32 = arith.constant 0 : i32
    %c0_i32_0 = arith.constant 0 : i32
    return %c0_i32, %arg0 : i32, i32
  }
}

module attributes {stable_mosaic.version = 11 : i64} {
  func.func @_conv_stats_kernel(%arg0: i32, %arg1: memref<432x512xbf16, #tpu.memory_space<vmem>>, %arg2: memref<32x432xbf16, #tpu.memory_space<vmem>>, %arg3: memref<32x512xf32, #tpu.memory_space<vmem>>, %arg4: memref<32x1xf32, #tpu.memory_space<vmem>>, %arg5: memref<32x1xf32, #tpu.memory_space<vmem>>) attributes {dimension_semantics = [#tpu.dimension_semantics<arbitrary>], iteration_bounds = array<i64: 1>, scalar_prefetch = 0 : i64, scratch_operands = 0 : i64, tpu.core_type = #tpu.core_type<tc>, window_params = [{transform_indices = @transform_0, window_bounds = array<i64: 432, 512>}, {pipeline_mode = #tpu.pipeline_mode<synchronous>, transform_indices = @transform_1, window_bounds = array<i64: 32, 432>}, {transform_indices = @transform_2, window_bounds = array<i64: 32, 512>}, {pipeline_mode = #tpu.pipeline_mode<synchronous>, transform_indices = @transform_3, window_bounds = array<i64: 32, 1>}, {pipeline_mode = #tpu.pipeline_mode<synchronous>, transform_indices = @transform_4, window_bounds = array<i64: 32, 1>}]} {
    %c0_i32 = arith.constant 0 : i32
    %0 = arith.cmpi eq, %arg0, %c0_i32 : i32
    %1 = arith.extui %0 : i1 to i32
    %c0_i32_0 = arith.constant 0 : i32
    %2 = arith.cmpi ne, %1, %c0_i32_0 : i32
    scf.if %2 {
      %cst_16 = arith.constant 0.000000e+00 : f32
      %18 = vector.broadcast %cst_16 : f32 to vector<32x1xf32>
      %c0_17 = arith.constant 0 : index
      %c0_18 = arith.constant 0 : index
      %19 = vector.load %arg4[%c0_17, %c0_18] : memref<32x1xf32, #tpu.memory_space<vmem>>, vector<32x1xf32>
      tpu.vector_store %arg4[%c0_17, %c0_18], %18 {strides = array<i32>} : memref<32x1xf32, #tpu.memory_space<vmem>>, vector<32x1xf32>,
      %cst_19 = arith.constant 0.000000e+00 : f32
      %20 = vector.broadcast %cst_19 : f32 to vector<32x1xf32>
      %c0_20 = arith.constant 0 : index
      %c0_21 = arith.constant 0 : index
      %21 = vector.load %arg5[%c0_20, %c0_21] : memref<32x1xf32, #tpu.memory_space<vmem>>, vector<32x1xf32>
      tpu.vector_store %arg5[%c0_20, %c0_21], %20 {strides = array<i32>} : memref<32x1xf32, #tpu.memory_space<vmem>>, vector<32x1xf32>,
    } else {
    }
    %c0 = arith.constant 0 : index
    %c0_1 = arith.constant 0 : index
    %3 = vector.load %arg2[%c0, %c0_1] : memref<32x432xbf16, #tpu.memory_space<vmem>>, vector<32x432xbf16>
    %c0_2 = arith.constant 0 : index
    %c0_3 = arith.constant 0 : index
    %4 = vector.load %arg1[%c0_2, %c0_3] : memref<432x512xbf16, #tpu.memory_space<vmem>>, vector<432x512xbf16>
    %cst = arith.constant dense<0.000000e+00> : vector<32x512xf32>
    %5 = tpu.matmul %3, %4, %cst {dimension_numbers = #tpu.dot_dimension_numbers<[1], [0], [0], [1], [0, 0, 1, 1], [], []>} : vector<32x432xbf16>, vector<432x512xbf16>, vector<32x512xf32> -> vector<32x512xf32>
    %c0_4 = arith.constant 0 : index
    %c0_5 = arith.constant 0 : index
    %6 = vector.load %arg3[%c0_4, %c0_5] : memref<32x512xf32, #tpu.memory_space<vmem>>, vector<32x512xf32>
    tpu.vector_store %arg3[%c0_4, %c0_5], %5 {strides = array<i32>} : memref<32x512xf32, #tpu.memory_space<vmem>>, vector<32x512xf32>,
    %c0_6 = arith.constant 0 : index
    %c0_7 = arith.constant 0 : index
    %7 = vector.load %arg4[%c0_6, %c0_7] : memref<32x1xf32, #tpu.memory_space<vmem>>, vector<32x1xf32>
    %cst_8 = arith.constant dense<0.000000e+00> : vector<32xf32>
    %8 = vector.multi_reduction <add>, %5, %cst_8 [1] : vector<32x512xf32> to vector<32xf32>
    %9 = vector.shape_cast %8 : vector<32xf32> to vector<32x1xf32>
    %10 = arith.addf %7, %9 : vector<32x1xf32>
    %c0_9 = arith.constant 0 : index
    %c0_10 = arith.constant 0 : index
    %11 = vector.load %arg4[%c0_9, %c0_10] : memref<32x1xf32, #tpu.memory_space<vmem>>, vector<32x1xf32>
    tpu.vector_store %arg4[%c0_9, %c0_10], %10 {strides = array<i32>} : memref<32x1xf32, #tpu.memory_space<vmem>>, vector<32x1xf32>,
    %c0_11 = arith.constant 0 : index
    %c0_12 = arith.constant 0 : index
    %12 = vector.load %arg5[%c0_11, %c0_12] : memref<32x1xf32, #tpu.memory_space<vmem>>, vector<32x1xf32>
    %13 = arith.mulf %5, %5 : vector<32x512xf32>
    %cst_13 = arith.constant dense<0.000000e+00> : vector<32xf32>
    %14 = vector.multi_reduction <add>, %13, %cst_13 [1] : vector<32x512xf32> to vector<32xf32>
    %15 = vector.shape_cast %14 : vector<32xf32> to vector<32x1xf32>
    %16 = arith.addf %12, %15 : vector<32x1xf32>
    %c0_14 = arith.constant 0 : index
    %c0_15 = arith.constant 0 : index
    %17 = vector.load %arg5[%c0_14, %c0_15] : memref<32x1xf32, #tpu.memory_space<vmem>>, vector<32x1xf32>
    tpu.vector_store %arg5[%c0_14, %c0_15], %16 {strides = array<i32>} : memref<32x1xf32, #tpu.memory_space<vmem>>, vector<32x1xf32>,
    return
  }
  func.func @transform_0(%arg0: i32) -> (i32, i32) {
    %c0_i32 = arith.constant 0 : i32
    %c0_i32_0 = arith.constant 0 : i32
    return %c0_i32, %arg0 : i32, i32
  }
  func.func @transform_1(%arg0: i32) -> (i32, i32) {
    %c0_i32 = arith.constant 0 : i32
    %c0_i32_0 = arith.constant 0 : i32
    %c0_i32_1 = arith.constant 0 : i32
    return %c0_i32, %c0_i32_0 : i32, i32
  }
  func.func @transform_2(%arg0: i32) -> (i32, i32) {
    %c0_i32 = arith.constant 0 : i32
    %c0_i32_0 = arith.constant 0 : i32
    return %c0_i32, %arg0 : i32, i32
  }
  func.func @transform_3(%arg0: i32) -> (i32, i32) {
    %c0_i32 = arith.constant 0 : i32
    %c0_i32_0 = arith.constant 0 : i32
    %c0_i32_1 = arith.constant 0 : i32
    return %c0_i32, %c0_i32_0 : i32, i32
  }
  func.func @transform_4(%arg0: i32) -> (i32, i32) {
    %c0_i32 = arith.constant 0 : i32
    %c0_i32_0 = arith.constant 0 : i32
    %c0_i32_1 = arith.constant 0 : i32
    return %c0_i32, %c0_i32_0 : i32, i32
  }
}

module attributes {stable_mosaic.version = 11 : i64} {
  func.func @_bn_lrelu_kernel(%arg0: i32, %arg1: memref<32x128xf32, #tpu.memory_space<vmem>>, %arg2: memref<32x1xf32, #tpu.memory_space<vmem>>, %arg3: memref<32x1xf32, #tpu.memory_space<vmem>>, %arg4: memref<32x128xbf16, #tpu.memory_space<vmem>>) attributes {dimension_semantics = [#tpu.dimension_semantics<parallel>], iteration_bounds = array<i64: 1>, scalar_prefetch = 0 : i64, scratch_operands = 0 : i64, tpu.core_type = #tpu.core_type<tc>, window_params = [{transform_indices = @transform_0, window_bounds = array<i64: 32, 128>}, {pipeline_mode = #tpu.pipeline_mode<synchronous>, transform_indices = @transform_1, window_bounds = array<i64: 32, 1>}, {pipeline_mode = #tpu.pipeline_mode<synchronous>, transform_indices = @transform_2, window_bounds = array<i64: 32, 1>}, {transform_indices = @transform_3, window_bounds = array<i64: 32, 128>}]} {
    %c0 = arith.constant 0 : index
    %c0_0 = arith.constant 0 : index
    %0 = vector.load %arg2[%c0, %c0_0] : memref<32x1xf32, #tpu.memory_space<vmem>>, vector<32x1xf32>
    %cst = arith.constant 1.562500e-02 : f32
    %1 = vector.broadcast %cst : f32 to vector<32x1xf32>
    %2 = arith.mulf %0, %1 : vector<32x1xf32>
    %c0_1 = arith.constant 0 : index
    %c0_2 = arith.constant 0 : index
    %3 = vector.load %arg3[%c0_1, %c0_2] : memref<32x1xf32, #tpu.memory_space<vmem>>, vector<32x1xf32>
    %cst_3 = arith.constant 1.562500e-02 : f32
    %4 = vector.broadcast %cst_3 : f32 to vector<32x1xf32>
    %5 = arith.mulf %3, %4 : vector<32x1xf32>
    %6 = arith.mulf %2, %2 : vector<32x1xf32>
    %7 = arith.subf %5, %6 : vector<32x1xf32>
    %cst_4 = arith.constant 9.99999974E-6 : f32
    %8 = vector.broadcast %cst_4 : f32 to vector<32x1xf32>
    %9 = arith.addf %7, %8 : vector<32x1xf32>
    %10 = math.rsqrt %9 : vector<32x1xf32>
    %c0_5 = arith.constant 0 : index
    %c0_6 = arith.constant 0 : index
    %11 = vector.load %arg1[%c0_5, %c0_6] : memref<32x128xf32, #tpu.memory_space<vmem>>, vector<32x128xf32>
    %12 = vector.broadcast %2 : vector<32x1xf32> to vector<32x128xf32>
    %13 = arith.subf %11, %12 : vector<32x128xf32>
    %14 = vector.broadcast %10 : vector<32x1xf32> to vector<32x128xf32>
    %15 = arith.mulf %13, %14 : vector<32x128xf32>
    %cst_7 = arith.constant 0.000000e+00 : f32
    %16 = vector.broadcast %cst_7 : f32 to vector<32x128xf32>
    %17 = arith.cmpf oge, %15, %16 : vector<32x128xf32>
    %cst_8 = arith.constant 2.000000e-01 : f32
    %18 = vector.broadcast %cst_8 : f32 to vector<32x128xf32>
    %19 = arith.mulf %18, %15 : vector<32x128xf32>
    %20 = arith.select %17, %15, %19 : vector<32x128xi1>, vector<32x128xf32>
    %21 = arith.truncf %20 : vector<32x128xf32> to vector<32x128xbf16>
    %c0_9 = arith.constant 0 : index
    %c0_10 = arith.constant 0 : index
    %22 = vector.load %arg4[%c0_9, %c0_10] : memref<32x128xbf16, #tpu.memory_space<vmem>>, vector<32x128xbf16>
    tpu.vector_store %arg4[%c0_9, %c0_10], %21 {strides = array<i32>} : memref<32x128xbf16, #tpu.memory_space<vmem>>, vector<32x128xbf16>,
    return
  }
  func.func @transform_0(%arg0: i32) -> (i32, i32) {
    %c0_i32 = arith.constant 0 : i32
    %c0_i32_0 = arith.constant 0 : i32
    return %c0_i32, %arg0 : i32, i32
  }
  func.func @transform_1(%arg0: i32) -> (i32, i32) {
    %c0_i32 = arith.constant 0 : i32
    %c0_i32_0 = arith.constant 0 : i32
    %c0_i32_1 = arith.constant 0 : i32
    return %c0_i32, %c0_i32_0 : i32, i32
  }
  func.func @transform_2(%arg0: i32) -> (i32, i32) {
    %c0_i32 = arith.constant 0 : i32
    %c0_i32_0 = arith.constant 0 : i32
    %c0_i32_1 = arith.constant 0 : i32
    return %c0_i32, %c0_i32_0 : i32, i32
  }
  func.func @transform_3(%arg0: i32) -> (i32, i32) {
    %c0_i32 = arith.constant 0 : i32
    %c0_i32_0 = arith.constant 0 : i32
    return %c0_i32, %arg0 : i32, i32
  }
}

module attributes {stable_mosaic.version = 11 : i64} {
  func.func @_conv_stats_kernel(%arg0: i32, %arg1: memref<864x128xbf16, #tpu.memory_space<vmem>>, %arg2: memref<32x864xbf16, #tpu.memory_space<vmem>>, %arg3: memref<32x128xf32, #tpu.memory_space<vmem>>, %arg4: memref<32x1xf32, #tpu.memory_space<vmem>>, %arg5: memref<32x1xf32, #tpu.memory_space<vmem>>) attributes {dimension_semantics = [#tpu.dimension_semantics<arbitrary>], iteration_bounds = array<i64: 1>, scalar_prefetch = 0 : i64, scratch_operands = 0 : i64, tpu.core_type = #tpu.core_type<tc>, window_params = [{transform_indices = @transform_0, window_bounds = array<i64: 864, 128>}, {pipeline_mode = #tpu.pipeline_mode<synchronous>, transform_indices = @transform_1, window_bounds = array<i64: 32, 864>}, {transform_indices = @transform_2, window_bounds = array<i64: 32, 128>}, {pipeline_mode = #tpu.pipeline_mode<synchronous>, transform_indices = @transform_3, window_bounds = array<i64: 32, 1>}, {pipeline_mode = #tpu.pipeline_mode<synchronous>, transform_indices = @transform_4, window_bounds = array<i64: 32, 1>}]} {
    %c0_i32 = arith.constant 0 : i32
    %0 = arith.cmpi eq, %arg0, %c0_i32 : i32
    %1 = arith.extui %0 : i1 to i32
    %c0_i32_0 = arith.constant 0 : i32
    %2 = arith.cmpi ne, %1, %c0_i32_0 : i32
    scf.if %2 {
      %cst_16 = arith.constant 0.000000e+00 : f32
      %18 = vector.broadcast %cst_16 : f32 to vector<32x1xf32>
      %c0_17 = arith.constant 0 : index
      %c0_18 = arith.constant 0 : index
      %19 = vector.load %arg4[%c0_17, %c0_18] : memref<32x1xf32, #tpu.memory_space<vmem>>, vector<32x1xf32>
      tpu.vector_store %arg4[%c0_17, %c0_18], %18 {strides = array<i32>} : memref<32x1xf32, #tpu.memory_space<vmem>>, vector<32x1xf32>,
      %cst_19 = arith.constant 0.000000e+00 : f32
      %20 = vector.broadcast %cst_19 : f32 to vector<32x1xf32>
      %c0_20 = arith.constant 0 : index
      %c0_21 = arith.constant 0 : index
      %21 = vector.load %arg5[%c0_20, %c0_21] : memref<32x1xf32, #tpu.memory_space<vmem>>, vector<32x1xf32>
      tpu.vector_store %arg5[%c0_20, %c0_21], %20 {strides = array<i32>} : memref<32x1xf32, #tpu.memory_space<vmem>>, vector<32x1xf32>,
    } else {
    }
    %c0 = arith.constant 0 : index
    %c0_1 = arith.constant 0 : index
    %3 = vector.load %arg2[%c0, %c0_1] : memref<32x864xbf16, #tpu.memory_space<vmem>>, vector<32x864xbf16>
    %c0_2 = arith.constant 0 : index
    %c0_3 = arith.constant 0 : index
    %4 = vector.load %arg1[%c0_2, %c0_3] : memref<864x128xbf16, #tpu.memory_space<vmem>>, vector<864x128xbf16>
    %cst = arith.constant dense<0.000000e+00> : vector<32x128xf32>
    %5 = tpu.matmul %3, %4, %cst {dimension_numbers = #tpu.dot_dimension_numbers<[1], [0], [0], [1], [0, 0, 1, 1], [], []>} : vector<32x864xbf16>, vector<864x128xbf16>, vector<32x128xf32> -> vector<32x128xf32>
    %c0_4 = arith.constant 0 : index
    %c0_5 = arith.constant 0 : index
    %6 = vector.load %arg3[%c0_4, %c0_5] : memref<32x128xf32, #tpu.memory_space<vmem>>, vector<32x128xf32>
    tpu.vector_store %arg3[%c0_4, %c0_5], %5 {strides = array<i32>} : memref<32x128xf32, #tpu.memory_space<vmem>>, vector<32x128xf32>,
    %c0_6 = arith.constant 0 : index
    %c0_7 = arith.constant 0 : index
    %7 = vector.load %arg4[%c0_6, %c0_7] : memref<32x1xf32, #tpu.memory_space<vmem>>, vector<32x1xf32>
    %cst_8 = arith.constant dense<0.000000e+00> : vector<32xf32>
    %8 = vector.multi_reduction <add>, %5, %cst_8 [1] : vector<32x128xf32> to vector<32xf32>
    %9 = vector.shape_cast %8 : vector<32xf32> to vector<32x1xf32>
    %10 = arith.addf %7, %9 : vector<32x1xf32>
    %c0_9 = arith.constant 0 : index
    %c0_10 = arith.constant 0 : index
    %11 = vector.load %arg4[%c0_9, %c0_10] : memref<32x1xf32, #tpu.memory_space<vmem>>, vector<32x1xf32>
    tpu.vector_store %arg4[%c0_9, %c0_10], %10 {strides = array<i32>} : memref<32x1xf32, #tpu.memory_space<vmem>>, vector<32x1xf32>,
    %c0_11 = arith.constant 0 : index
    %c0_12 = arith.constant 0 : index
    %12 = vector.load %arg5[%c0_11, %c0_12] : memref<32x1xf32, #tpu.memory_space<vmem>>, vector<32x1xf32>
    %13 = arith.mulf %5, %5 : vector<32x128xf32>
    %cst_13 = arith.constant dense<0.000000e+00> : vector<32xf32>
    %14 = vector.multi_reduction <add>, %13, %cst_13 [1] : vector<32x128xf32> to vector<32xf32>
    %15 = vector.shape_cast %14 : vector<32xf32> to vector<32x1xf32>
    %16 = arith.addf %12, %15 : vector<32x1xf32>
    %c0_14 = arith.constant 0 : index
    %c0_15 = arith.constant 0 : index
    %17 = vector.load %arg5[%c0_14, %c0_15] : memref<32x1xf32, #tpu.memory_space<vmem>>, vector<32x1xf32>
    tpu.vector_store %arg5[%c0_14, %c0_15], %16 {strides = array<i32>} : memref<32x1xf32, #tpu.memory_space<vmem>>, vector<32x1xf32>,
    return
  }
  func.func @transform_0(%arg0: i32) -> (i32, i32) {
    %c0_i32 = arith.constant 0 : i32
    %c0_i32_0 = arith.constant 0 : i32
    return %c0_i32, %arg0 : i32, i32
  }
  func.func @transform_1(%arg0: i32) -> (i32, i32) {
    %c0_i32 = arith.constant 0 : i32
    %c0_i32_0 = arith.constant 0 : i32
    %c0_i32_1 = arith.constant 0 : i32
    return %c0_i32, %c0_i32_0 : i32, i32
  }
  func.func @transform_2(%arg0: i32) -> (i32, i32) {
    %c0_i32 = arith.constant 0 : i32
    %c0_i32_0 = arith.constant 0 : i32
    return %c0_i32, %arg0 : i32, i32
  }
  func.func @transform_3(%arg0: i32) -> (i32, i32) {
    %c0_i32 = arith.constant 0 : i32
    %c0_i32_0 = arith.constant 0 : i32
    %c0_i32_1 = arith.constant 0 : i32
    return %c0_i32, %c0_i32_0 : i32, i32
  }
  func.func @transform_4(%arg0: i32) -> (i32, i32) {
    %c0_i32 = arith.constant 0 : i32
    %c0_i32_0 = arith.constant 0 : i32
    %c0_i32_1 = arith.constant 0 : i32
    return %c0_i32, %c0_i32_0 : i32, i32
  }
}

module attributes {stable_mosaic.version = 11 : i64} {
  func.func @_bn_lrelu_kernel(%arg0: i32, %arg1: memref<32x128xf32, #tpu.memory_space<vmem>>, %arg2: memref<32x1xf32, #tpu.memory_space<vmem>>, %arg3: memref<32x1xf32, #tpu.memory_space<vmem>>, %arg4: memref<32x128xbf16, #tpu.memory_space<vmem>>) attributes {dimension_semantics = [#tpu.dimension_semantics<parallel>], iteration_bounds = array<i64: 1>, scalar_prefetch = 0 : i64, scratch_operands = 0 : i64, tpu.core_type = #tpu.core_type<tc>, window_params = [{transform_indices = @transform_0, window_bounds = array<i64: 32, 128>}, {pipeline_mode = #tpu.pipeline_mode<synchronous>, transform_indices = @transform_1, window_bounds = array<i64: 32, 1>}, {pipeline_mode = #tpu.pipeline_mode<synchronous>, transform_indices = @transform_2, window_bounds = array<i64: 32, 1>}, {transform_indices = @transform_3, window_bounds = array<i64: 32, 128>}]} {
    %c0 = arith.constant 0 : index
    %c0_0 = arith.constant 0 : index
    %0 = vector.load %arg2[%c0, %c0_0] : memref<32x1xf32, #tpu.memory_space<vmem>>, vector<32x1xf32>
    %cst = arith.constant 1.250000e-01 : f32
    %1 = vector.broadcast %cst : f32 to vector<32x1xf32>
    %2 = arith.mulf %0, %1 : vector<32x1xf32>
    %c0_1 = arith.constant 0 : index
    %c0_2 = arith.constant 0 : index
    %3 = vector.load %arg3[%c0_1, %c0_2] : memref<32x1xf32, #tpu.memory_space<vmem>>, vector<32x1xf32>
    %cst_3 = arith.constant 1.250000e-01 : f32
    %4 = vector.broadcast %cst_3 : f32 to vector<32x1xf32>
    %5 = arith.mulf %3, %4 : vector<32x1xf32>
    %6 = arith.mulf %2, %2 : vector<32x1xf32>
    %7 = arith.subf %5, %6 : vector<32x1xf32>
    %cst_4 = arith.constant 9.99999974E-6 : f32
    %8 = vector.broadcast %cst_4 : f32 to vector<32x1xf32>
    %9 = arith.addf %7, %8 : vector<32x1xf32>
    %10 = math.rsqrt %9 : vector<32x1xf32>
    %c0_5 = arith.constant 0 : index
    %c0_6 = arith.constant 0 : index
    %11 = vector.load %arg1[%c0_5, %c0_6] : memref<32x128xf32, #tpu.memory_space<vmem>>, vector<32x128xf32>
    %12 = vector.broadcast %2 : vector<32x1xf32> to vector<32x128xf32>
    %13 = arith.subf %11, %12 : vector<32x128xf32>
    %14 = vector.broadcast %10 : vector<32x1xf32> to vector<32x128xf32>
    %15 = arith.mulf %13, %14 : vector<32x128xf32>
    %cst_7 = arith.constant 0.000000e+00 : f32
    %16 = vector.broadcast %cst_7 : f32 to vector<32x128xf32>
    %17 = arith.cmpf oge, %15, %16 : vector<32x128xf32>
    %cst_8 = arith.constant 2.000000e-01 : f32
    %18 = vector.broadcast %cst_8 : f32 to vector<32x128xf32>
    %19 = arith.mulf %18, %15 : vector<32x128xf32>
    %20 = arith.select %17, %15, %19 : vector<32x128xi1>, vector<32x128xf32>
    %21 = arith.truncf %20 : vector<32x128xf32> to vector<32x128xbf16>
    %c0_9 = arith.constant 0 : index
    %c0_10 = arith.constant 0 : index
    %22 = vector.load %arg4[%c0_9, %c0_10] : memref<32x128xbf16, #tpu.memory_space<vmem>>, vector<32x128xbf16>
    tpu.vector_store %arg4[%c0_9, %c0_10], %21 {strides = array<i32>} : memref<32x128xbf16, #tpu.memory_space<vmem>>, vector<32x128xbf16>,
    return
  }
  func.func @transform_0(%arg0: i32) -> (i32, i32) {
    %c0_i32 = arith.constant 0 : i32
    %c0_i32_0 = arith.constant 0 : i32
    return %c0_i32, %arg0 : i32, i32
  }
  func.func @transform_1(%arg0: i32) -> (i32, i32) {
    %c0_i32 = arith.constant 0 : i32
    %c0_i32_0 = arith.constant 0 : i32
    %c0_i32_1 = arith.constant 0 : i32
    return %c0_i32, %c0_i32_0 : i32, i32
  }
  func.func @transform_2(%arg0: i32) -> (i32, i32) {
    %c0_i32 = arith.constant 0 : i32
    %c0_i32_0 = arith.constant 0 : i32
    %c0_i32_1 = arith.constant 0 : i32
    return %c0_i32, %c0_i32_0 : i32, i32
  }
  func.func @transform_3(%arg0: i32) -> (i32, i32) {
    %c0_i32 = arith.constant 0 : i32
    %c0_i32_0 = arith.constant 0 : i32
    return %c0_i32, %arg0 : i32, i32
  }
}

module attributes {stable_mosaic.version = 11 : i64} {
  func.func @_bn_lrelu_kernel(%arg0: i32, %arg1: memref<32x128xf32, #tpu.memory_space<vmem>>, %arg2: memref<32x1xf32, #tpu.memory_space<vmem>>, %arg3: memref<32x1xf32, #tpu.memory_space<vmem>>, %arg4: memref<32x128xbf16, #tpu.memory_space<vmem>>) attributes {dimension_semantics = [#tpu.dimension_semantics<parallel>], iteration_bounds = array<i64: 1>, scalar_prefetch = 0 : i64, scratch_operands = 0 : i64, tpu.core_type = #tpu.core_type<tc>, window_params = [{transform_indices = @transform_0, window_bounds = array<i64: 32, 128>}, {pipeline_mode = #tpu.pipeline_mode<synchronous>, transform_indices = @transform_1, window_bounds = array<i64: 32, 1>}, {pipeline_mode = #tpu.pipeline_mode<synchronous>, transform_indices = @transform_2, window_bounds = array<i64: 32, 1>}, {transform_indices = @transform_3, window_bounds = array<i64: 32, 128>}]} {
    %c0 = arith.constant 0 : index
    %c0_0 = arith.constant 0 : index
    %0 = vector.load %arg2[%c0, %c0_0] : memref<32x1xf32, #tpu.memory_space<vmem>>, vector<32x1xf32>
    %cst = arith.constant 1.000000e+00 : f32
    %1 = vector.broadcast %cst : f32 to vector<32x1xf32>
    %2 = arith.mulf %0, %1 : vector<32x1xf32>
    %c0_1 = arith.constant 0 : index
    %c0_2 = arith.constant 0 : index
    %3 = vector.load %arg3[%c0_1, %c0_2] : memref<32x1xf32, #tpu.memory_space<vmem>>, vector<32x1xf32>
    %cst_3 = arith.constant 1.000000e+00 : f32
    %4 = vector.broadcast %cst_3 : f32 to vector<32x1xf32>
    %5 = arith.mulf %3, %4 : vector<32x1xf32>
    %6 = arith.mulf %2, %2 : vector<32x1xf32>
    %7 = arith.subf %5, %6 : vector<32x1xf32>
    %cst_4 = arith.constant 9.99999974E-6 : f32
    %8 = vector.broadcast %cst_4 : f32 to vector<32x1xf32>
    %9 = arith.addf %7, %8 : vector<32x1xf32>
    %10 = math.rsqrt %9 : vector<32x1xf32>
    %c0_5 = arith.constant 0 : index
    %c0_6 = arith.constant 0 : index
    %11 = vector.load %arg1[%c0_5, %c0_6] : memref<32x128xf32, #tpu.memory_space<vmem>>, vector<32x128xf32>
    %12 = vector.broadcast %2 : vector<32x1xf32> to vector<32x128xf32>
    %13 = arith.subf %11, %12 : vector<32x128xf32>
    %14 = vector.broadcast %10 : vector<32x1xf32> to vector<32x128xf32>
    %15 = arith.mulf %13, %14 : vector<32x128xf32>
    %cst_7 = arith.constant 0.000000e+00 : f32
    %16 = vector.broadcast %cst_7 : f32 to vector<32x128xf32>
    %17 = arith.cmpf oge, %15, %16 : vector<32x128xf32>
    %cst_8 = arith.constant 2.000000e-01 : f32
    %18 = vector.broadcast %cst_8 : f32 to vector<32x128xf32>
    %19 = arith.mulf %18, %15 : vector<32x128xf32>
    %20 = arith.select %17, %15, %19 : vector<32x128xi1>, vector<32x128xf32>
    %21 = arith.truncf %20 : vector<32x128xf32> to vector<32x128xbf16>
    %c0_9 = arith.constant 0 : index
    %c0_10 = arith.constant 0 : index
    %22 = vector.load %arg4[%c0_9, %c0_10] : memref<32x128xbf16, #tpu.memory_space<vmem>>, vector<32x128xbf16>
    tpu.vector_store %arg4[%c0_9, %c0_10], %21 {strides = array<i32>} : memref<32x128xbf16, #tpu.memory_space<vmem>>, vector<32x128xbf16>,
    return
  }
  func.func @transform_0(%arg0: i32) -> (i32, i32) {
    %c0_i32 = arith.constant 0 : i32
    %c0_i32_0 = arith.constant 0 : i32
    return %c0_i32, %arg0 : i32, i32
  }
  func.func @transform_1(%arg0: i32) -> (i32, i32) {
    %c0_i32 = arith.constant 0 : i32
    %c0_i32_0 = arith.constant 0 : i32
    %c0_i32_1 = arith.constant 0 : i32
    return %c0_i32, %c0_i32_0 : i32, i32
  }
  func.func @transform_2(%arg0: i32) -> (i32, i32) {
    %c0_i32 = arith.constant 0 : i32
    %c0_i32_0 = arith.constant 0 : i32
    %c0_i32_1 = arith.constant 0 : i32
    return %c0_i32, %c0_i32_0 : i32, i32
  }
  func.func @transform_3(%arg0: i32) -> (i32, i32) {
    %c0_i32 = arith.constant 0 : i32
    %c0_i32_0 = arith.constant 0 : i32
    return %c0_i32, %arg0 : i32, i32
  }
}

module attributes {stable_mosaic.version = 11 : i64} {
  func.func @_conv_stats_kernel(%arg0: i32, %arg1: memref<1728x128xbf16, #tpu.memory_space<vmem>>, %arg2: memref<32x1728xbf16, #tpu.memory_space<vmem>>, %arg3: memref<32x128xf32, #tpu.memory_space<vmem>>, %arg4: memref<32x1xf32, #tpu.memory_space<vmem>>, %arg5: memref<32x1xf32, #tpu.memory_space<vmem>>) attributes {dimension_semantics = [#tpu.dimension_semantics<arbitrary>], iteration_bounds = array<i64: 1>, scalar_prefetch = 0 : i64, scratch_operands = 0 : i64, tpu.core_type = #tpu.core_type<tc>, window_params = [{transform_indices = @transform_0, window_bounds = array<i64: 1728, 128>}, {pipeline_mode = #tpu.pipeline_mode<synchronous>, transform_indices = @transform_1, window_bounds = array<i64: 32, 1728>}, {transform_indices = @transform_2, window_bounds = array<i64: 32, 128>}, {pipeline_mode = #tpu.pipeline_mode<synchronous>, transform_indices = @transform_3, window_bounds = array<i64: 32, 1>}, {pipeline_mode = #tpu.pipeline_mode<synchronous>, transform_indices = @transform_4, window_bounds = array<i64: 32, 1>}]} {
    %c0_i32 = arith.constant 0 : i32
    %0 = arith.cmpi eq, %arg0, %c0_i32 : i32
    %1 = arith.extui %0 : i1 to i32
    %c0_i32_0 = arith.constant 0 : i32
    %2 = arith.cmpi ne, %1, %c0_i32_0 : i32
    scf.if %2 {
      %cst_16 = arith.constant 0.000000e+00 : f32
      %18 = vector.broadcast %cst_16 : f32 to vector<32x1xf32>
      %c0_17 = arith.constant 0 : index
      %c0_18 = arith.constant 0 : index
      %19 = vector.load %arg4[%c0_17, %c0_18] : memref<32x1xf32, #tpu.memory_space<vmem>>, vector<32x1xf32>
      tpu.vector_store %arg4[%c0_17, %c0_18], %18 {strides = array<i32>} : memref<32x1xf32, #tpu.memory_space<vmem>>, vector<32x1xf32>,
      %cst_19 = arith.constant 0.000000e+00 : f32
      %20 = vector.broadcast %cst_19 : f32 to vector<32x1xf32>
      %c0_20 = arith.constant 0 : index
      %c0_21 = arith.constant 0 : index
      %21 = vector.load %arg5[%c0_20, %c0_21] : memref<32x1xf32, #tpu.memory_space<vmem>>, vector<32x1xf32>
      tpu.vector_store %arg5[%c0_20, %c0_21], %20 {strides = array<i32>} : memref<32x1xf32, #tpu.memory_space<vmem>>, vector<32x1xf32>,
    } else {
    }
    %c0 = arith.constant 0 : index
    %c0_1 = arith.constant 0 : index
    %3 = vector.load %arg2[%c0, %c0_1] : memref<32x1728xbf16, #tpu.memory_space<vmem>>, vector<32x1728xbf16>
    %c0_2 = arith.constant 0 : index
    %c0_3 = arith.constant 0 : index
    %4 = vector.load %arg1[%c0_2, %c0_3] : memref<1728x128xbf16, #tpu.memory_space<vmem>>, vector<1728x128xbf16>
    %cst = arith.constant dense<0.000000e+00> : vector<32x128xf32>
    %5 = tpu.matmul %3, %4, %cst {dimension_numbers = #tpu.dot_dimension_numbers<[1], [0], [0], [1], [0, 0, 1, 1], [], []>} : vector<32x1728xbf16>, vector<1728x128xbf16>, vector<32x128xf32> -> vector<32x128xf32>
    %c0_4 = arith.constant 0 : index
    %c0_5 = arith.constant 0 : index
    %6 = vector.load %arg3[%c0_4, %c0_5] : memref<32x128xf32, #tpu.memory_space<vmem>>, vector<32x128xf32>
    tpu.vector_store %arg3[%c0_4, %c0_5], %5 {strides = array<i32>} : memref<32x128xf32, #tpu.memory_space<vmem>>, vector<32x128xf32>,
    %c0_6 = arith.constant 0 : index
    %c0_7 = arith.constant 0 : index
    %7 = vector.load %arg4[%c0_6, %c0_7] : memref<32x1xf32, #tpu.memory_space<vmem>>, vector<32x1xf32>
    %cst_8 = arith.constant dense<0.000000e+00> : vector<32xf32>
    %8 = vector.multi_reduction <add>, %5, %cst_8 [1] : vector<32x128xf32> to vector<32xf32>
    %9 = vector.shape_cast %8 : vector<32xf32> to vector<32x1xf32>
    %10 = arith.addf %7, %9 : vector<32x1xf32>
    %c0_9 = arith.constant 0 : index
    %c0_10 = arith.constant 0 : index
    %11 = vector.load %arg4[%c0_9, %c0_10] : memref<32x1xf32, #tpu.memory_space<vmem>>, vector<32x1xf32>
    tpu.vector_store %arg4[%c0_9, %c0_10], %10 {strides = array<i32>} : memref<32x1xf32, #tpu.memory_space<vmem>>, vector<32x1xf32>,
    %c0_11 = arith.constant 0 : index
    %c0_12 = arith.constant 0 : index
    %12 = vector.load %arg5[%c0_11, %c0_12] : memref<32x1xf32, #tpu.memory_space<vmem>>, vector<32x1xf32>
    %13 = arith.mulf %5, %5 : vector<32x128xf32>
    %cst_13 = arith.constant dense<0.000000e+00> : vector<32xf32>
    %14 = vector.multi_reduction <add>, %13, %cst_13 [1] : vector<32x128xf32> to vector<32xf32>
    %15 = vector.shape_cast %14 : vector<32xf32> to vector<32x1xf32>
    %16 = arith.addf %12, %15 : vector<32x1xf32>
    %c0_14 = arith.constant 0 : index
    %c0_15 = arith.constant 0 : index
    %17 = vector.load %arg5[%c0_14, %c0_15] : memref<32x1xf32, #tpu.memory_space<vmem>>, vector<32x1xf32>
    tpu.vector_store %arg5[%c0_14, %c0_15], %16 {strides = array<i32>} : memref<32x1xf32, #tpu.memory_space<vmem>>, vector<32x1xf32>,
    return
  }
  func.func @transform_0(%arg0: i32) -> (i32, i32) {
    %c0_i32 = arith.constant 0 : i32
    %c0_i32_0 = arith.constant 0 : i32
    return %c0_i32, %arg0 : i32, i32
  }
  func.func @transform_1(%arg0: i32) -> (i32, i32) {
    %c0_i32 = arith.constant 0 : i32
    %c0_i32_0 = arith.constant 0 : i32
    %c0_i32_1 = arith.constant 0 : i32
    return %c0_i32, %c0_i32_0 : i32, i32
  }
  func.func @transform_2(%arg0: i32) -> (i32, i32) {
    %c0_i32 = arith.constant 0 : i32
    %c0_i32_0 = arith.constant 0 : i32
    return %c0_i32, %arg0 : i32, i32
  }
  func.func @transform_3(%arg0: i32) -> (i32, i32) {
    %c0_i32 = arith.constant 0 : i32
    %c0_i32_0 = arith.constant 0 : i32
    %c0_i32_1 = arith.constant 0 : i32
    return %c0_i32, %c0_i32_0 : i32, i32
  }
  func.func @transform_4(%arg0: i32) -> (i32, i32) {
    %c0_i32 = arith.constant 0 : i32
    %c0_i32_0 = arith.constant 0 : i32
    %c0_i32_1 = arith.constant 0 : i32
    return %c0_i32, %c0_i32_0 : i32, i32
  }
}

module attributes {stable_mosaic.version = 11 : i64} {
  func.func @_conv_stats_kernel(%arg0: i32, %arg1: memref<1728x512xbf16, #tpu.memory_space<vmem>>, %arg2: memref<32x1728xbf16, #tpu.memory_space<vmem>>, %arg3: memref<32x512xf32, #tpu.memory_space<vmem>>, %arg4: memref<32x1xf32, #tpu.memory_space<vmem>>, %arg5: memref<32x1xf32, #tpu.memory_space<vmem>>) attributes {dimension_semantics = [#tpu.dimension_semantics<arbitrary>], iteration_bounds = array<i64: 1>, scalar_prefetch = 0 : i64, scratch_operands = 0 : i64, tpu.core_type = #tpu.core_type<tc>, window_params = [{transform_indices = @transform_0, window_bounds = array<i64: 1728, 512>}, {pipeline_mode = #tpu.pipeline_mode<synchronous>, transform_indices = @transform_1, window_bounds = array<i64: 32, 1728>}, {transform_indices = @transform_2, window_bounds = array<i64: 32, 512>}, {pipeline_mode = #tpu.pipeline_mode<synchronous>, transform_indices = @transform_3, window_bounds = array<i64: 32, 1>}, {pipeline_mode = #tpu.pipeline_mode<synchronous>, transform_indices = @transform_4, window_bounds = array<i64: 32, 1>}]} {
    %c0_i32 = arith.constant 0 : i32
    %0 = arith.cmpi eq, %arg0, %c0_i32 : i32
    %1 = arith.extui %0 : i1 to i32
    %c0_i32_0 = arith.constant 0 : i32
    %2 = arith.cmpi ne, %1, %c0_i32_0 : i32
    scf.if %2 {
      %cst_16 = arith.constant 0.000000e+00 : f32
      %18 = vector.broadcast %cst_16 : f32 to vector<32x1xf32>
      %c0_17 = arith.constant 0 : index
      %c0_18 = arith.constant 0 : index
      %19 = vector.load %arg4[%c0_17, %c0_18] : memref<32x1xf32, #tpu.memory_space<vmem>>, vector<32x1xf32>
      tpu.vector_store %arg4[%c0_17, %c0_18], %18 {strides = array<i32>} : memref<32x1xf32, #tpu.memory_space<vmem>>, vector<32x1xf32>,
      %cst_19 = arith.constant 0.000000e+00 : f32
      %20 = vector.broadcast %cst_19 : f32 to vector<32x1xf32>
      %c0_20 = arith.constant 0 : index
      %c0_21 = arith.constant 0 : index
      %21 = vector.load %arg5[%c0_20, %c0_21] : memref<32x1xf32, #tpu.memory_space<vmem>>, vector<32x1xf32>
      tpu.vector_store %arg5[%c0_20, %c0_21], %20 {strides = array<i32>} : memref<32x1xf32, #tpu.memory_space<vmem>>, vector<32x1xf32>,
    } else {
    }
    %c0 = arith.constant 0 : index
    %c0_1 = arith.constant 0 : index
    %3 = vector.load %arg2[%c0, %c0_1] : memref<32x1728xbf16, #tpu.memory_space<vmem>>, vector<32x1728xbf16>
    %c0_2 = arith.constant 0 : index
    %c0_3 = arith.constant 0 : index
    %4 = vector.load %arg1[%c0_2, %c0_3] : memref<1728x512xbf16, #tpu.memory_space<vmem>>, vector<1728x512xbf16>
    %cst = arith.constant dense<0.000000e+00> : vector<32x512xf32>
    %5 = tpu.matmul %3, %4, %cst {dimension_numbers = #tpu.dot_dimension_numbers<[1], [0], [0], [1], [0, 0, 1, 1], [], []>} : vector<32x1728xbf16>, vector<1728x512xbf16>, vector<32x512xf32> -> vector<32x512xf32>
    %c0_4 = arith.constant 0 : index
    %c0_5 = arith.constant 0 : index
    %6 = vector.load %arg3[%c0_4, %c0_5] : memref<32x512xf32, #tpu.memory_space<vmem>>, vector<32x512xf32>
    tpu.vector_store %arg3[%c0_4, %c0_5], %5 {strides = array<i32>} : memref<32x512xf32, #tpu.memory_space<vmem>>, vector<32x512xf32>,
    %c0_6 = arith.constant 0 : index
    %c0_7 = arith.constant 0 : index
    %7 = vector.load %arg4[%c0_6, %c0_7] : memref<32x1xf32, #tpu.memory_space<vmem>>, vector<32x1xf32>
    %cst_8 = arith.constant dense<0.000000e+00> : vector<32xf32>
    %8 = vector.multi_reduction <add>, %5, %cst_8 [1] : vector<32x512xf32> to vector<32xf32>
    %9 = vector.shape_cast %8 : vector<32xf32> to vector<32x1xf32>
    %10 = arith.addf %7, %9 : vector<32x1xf32>
    %c0_9 = arith.constant 0 : index
    %c0_10 = arith.constant 0 : index
    %11 = vector.load %arg4[%c0_9, %c0_10] : memref<32x1xf32, #tpu.memory_space<vmem>>, vector<32x1xf32>
    tpu.vector_store %arg4[%c0_9, %c0_10], %10 {strides = array<i32>} : memref<32x1xf32, #tpu.memory_space<vmem>>, vector<32x1xf32>,
    %c0_11 = arith.constant 0 : index
    %c0_12 = arith.constant 0 : index
    %12 = vector.load %arg5[%c0_11, %c0_12] : memref<32x1xf32, #tpu.memory_space<vmem>>, vector<32x1xf32>
    %13 = arith.mulf %5, %5 : vector<32x512xf32>
    %cst_13 = arith.constant dense<0.000000e+00> : vector<32xf32>
    %14 = vector.multi_reduction <add>, %13, %cst_13 [1] : vector<32x512xf32> to vector<32xf32>
    %15 = vector.shape_cast %14 : vector<32xf32> to vector<32x1xf32>
    %16 = arith.addf %12, %15 : vector<32x1xf32>
    %c0_14 = arith.constant 0 : index
    %c0_15 = arith.constant 0 : index
    %17 = vector.load %arg5[%c0_14, %c0_15] : memref<32x1xf32, #tpu.memory_space<vmem>>, vector<32x1xf32>
    tpu.vector_store %arg5[%c0_14, %c0_15], %16 {strides = array<i32>} : memref<32x1xf32, #tpu.memory_space<vmem>>, vector<32x1xf32>,
    return
  }
  func.func @transform_0(%arg0: i32) -> (i32, i32) {
    %c0_i32 = arith.constant 0 : i32
    %c0_i32_0 = arith.constant 0 : i32
    return %c0_i32, %arg0 : i32, i32
  }
  func.func @transform_1(%arg0: i32) -> (i32, i32) {
    %c0_i32 = arith.constant 0 : i32
    %c0_i32_0 = arith.constant 0 : i32
    %c0_i32_1 = arith.constant 0 : i32
    return %c0_i32, %c0_i32_0 : i32, i32
  }
  func.func @transform_2(%arg0: i32) -> (i32, i32) {
    %c0_i32 = arith.constant 0 : i32
    %c0_i32_0 = arith.constant 0 : i32
    return %c0_i32, %arg0 : i32, i32
  }
  func.func @transform_3(%arg0: i32) -> (i32, i32) {
    %c0_i32 = arith.constant 0 : i32
    %c0_i32_0 = arith.constant 0 : i32
    %c0_i32_1 = arith.constant 0 : i32
    return %c0_i32, %c0_i32_0 : i32, i32
  }
  func.func @transform_4(%arg0: i32) -> (i32, i32) {
    %c0_i32 = arith.constant 0 : i32
    %c0_i32_0 = arith.constant 0 : i32
    %c0_i32_1 = arith.constant 0 : i32
    return %c0_i32, %c0_i32_0 : i32, i32
  }
}

module attributes {stable_mosaic.version = 11 : i64} {
  func.func @_conv_stats_kernel(%arg0: i32, %arg1: memref<864x512xbf16, #tpu.memory_space<vmem>>, %arg2: memref<16x864xbf16, #tpu.memory_space<vmem>>, %arg3: memref<16x512xf32, #tpu.memory_space<vmem>>, %arg4: memref<16x1xf32, #tpu.memory_space<vmem>>, %arg5: memref<16x1xf32, #tpu.memory_space<vmem>>) attributes {dimension_semantics = [#tpu.dimension_semantics<arbitrary>], iteration_bounds = array<i64: 1>, scalar_prefetch = 0 : i64, scratch_operands = 0 : i64, tpu.core_type = #tpu.core_type<tc>, window_params = [{transform_indices = @transform_0, window_bounds = array<i64: 864, 512>}, {pipeline_mode = #tpu.pipeline_mode<synchronous>, transform_indices = @transform_1, window_bounds = array<i64: 16, 864>}, {transform_indices = @transform_2, window_bounds = array<i64: 16, 512>}, {pipeline_mode = #tpu.pipeline_mode<synchronous>, transform_indices = @transform_3, window_bounds = array<i64: 16, 1>}, {pipeline_mode = #tpu.pipeline_mode<synchronous>, transform_indices = @transform_4, window_bounds = array<i64: 16, 1>}]} {
    %c0_i32 = arith.constant 0 : i32
    %0 = arith.cmpi eq, %arg0, %c0_i32 : i32
    %1 = arith.extui %0 : i1 to i32
    %c0_i32_0 = arith.constant 0 : i32
    %2 = arith.cmpi ne, %1, %c0_i32_0 : i32
    scf.if %2 {
      %cst_16 = arith.constant 0.000000e+00 : f32
      %18 = vector.broadcast %cst_16 : f32 to vector<16x1xf32>
      %c0_17 = arith.constant 0 : index
      %c0_18 = arith.constant 0 : index
      %19 = vector.load %arg4[%c0_17, %c0_18] : memref<16x1xf32, #tpu.memory_space<vmem>>, vector<16x1xf32>
      tpu.vector_store %arg4[%c0_17, %c0_18], %18 {strides = array<i32>} : memref<16x1xf32, #tpu.memory_space<vmem>>, vector<16x1xf32>,
      %cst_19 = arith.constant 0.000000e+00 : f32
      %20 = vector.broadcast %cst_19 : f32 to vector<16x1xf32>
      %c0_20 = arith.constant 0 : index
      %c0_21 = arith.constant 0 : index
      %21 = vector.load %arg5[%c0_20, %c0_21] : memref<16x1xf32, #tpu.memory_space<vmem>>, vector<16x1xf32>
      tpu.vector_store %arg5[%c0_20, %c0_21], %20 {strides = array<i32>} : memref<16x1xf32, #tpu.memory_space<vmem>>, vector<16x1xf32>,
    } else {
    }
    %c0 = arith.constant 0 : index
    %c0_1 = arith.constant 0 : index
    %3 = vector.load %arg2[%c0, %c0_1] : memref<16x864xbf16, #tpu.memory_space<vmem>>, vector<16x864xbf16>
    %c0_2 = arith.constant 0 : index
    %c0_3 = arith.constant 0 : index
    %4 = vector.load %arg1[%c0_2, %c0_3] : memref<864x512xbf16, #tpu.memory_space<vmem>>, vector<864x512xbf16>
    %cst = arith.constant dense<0.000000e+00> : vector<16x512xf32>
    %5 = tpu.matmul %3, %4, %cst {dimension_numbers = #tpu.dot_dimension_numbers<[1], [0], [0], [1], [0, 0, 1, 1], [], []>} : vector<16x864xbf16>, vector<864x512xbf16>, vector<16x512xf32> -> vector<16x512xf32>
    %c0_4 = arith.constant 0 : index
    %c0_5 = arith.constant 0 : index
    %6 = vector.load %arg3[%c0_4, %c0_5] : memref<16x512xf32, #tpu.memory_space<vmem>>, vector<16x512xf32>
    tpu.vector_store %arg3[%c0_4, %c0_5], %5 {strides = array<i32>} : memref<16x512xf32, #tpu.memory_space<vmem>>, vector<16x512xf32>,
    %c0_6 = arith.constant 0 : index
    %c0_7 = arith.constant 0 : index
    %7 = vector.load %arg4[%c0_6, %c0_7] : memref<16x1xf32, #tpu.memory_space<vmem>>, vector<16x1xf32>
    %cst_8 = arith.constant dense<0.000000e+00> : vector<16xf32>
    %8 = vector.multi_reduction <add>, %5, %cst_8 [1] : vector<16x512xf32> to vector<16xf32>
    %9 = vector.shape_cast %8 : vector<16xf32> to vector<16x1xf32>
    %10 = arith.addf %7, %9 : vector<16x1xf32>
    %c0_9 = arith.constant 0 : index
    %c0_10 = arith.constant 0 : index
    %11 = vector.load %arg4[%c0_9, %c0_10] : memref<16x1xf32, #tpu.memory_space<vmem>>, vector<16x1xf32>
    tpu.vector_store %arg4[%c0_9, %c0_10], %10 {strides = array<i32>} : memref<16x1xf32, #tpu.memory_space<vmem>>, vector<16x1xf32>,
    %c0_11 = arith.constant 0 : index
    %c0_12 = arith.constant 0 : index
    %12 = vector.load %arg5[%c0_11, %c0_12] : memref<16x1xf32, #tpu.memory_space<vmem>>, vector<16x1xf32>
    %13 = arith.mulf %5, %5 : vector<16x512xf32>
    %cst_13 = arith.constant dense<0.000000e+00> : vector<16xf32>
    %14 = vector.multi_reduction <add>, %13, %cst_13 [1] : vector<16x512xf32> to vector<16xf32>
    %15 = vector.shape_cast %14 : vector<16xf32> to vector<16x1xf32>
    %16 = arith.addf %12, %15 : vector<16x1xf32>
    %c0_14 = arith.constant 0 : index
    %c0_15 = arith.constant 0 : index
    %17 = vector.load %arg5[%c0_14, %c0_15] : memref<16x1xf32, #tpu.memory_space<vmem>>, vector<16x1xf32>
    tpu.vector_store %arg5[%c0_14, %c0_15], %16 {strides = array<i32>} : memref<16x1xf32, #tpu.memory_space<vmem>>, vector<16x1xf32>,
    return
  }
  func.func @transform_0(%arg0: i32) -> (i32, i32) {
    %c0_i32 = arith.constant 0 : i32
    %c0_i32_0 = arith.constant 0 : i32
    return %c0_i32, %arg0 : i32, i32
  }
  func.func @transform_1(%arg0: i32) -> (i32, i32) {
    %c0_i32 = arith.constant 0 : i32
    %c0_i32_0 = arith.constant 0 : i32
    %c0_i32_1 = arith.constant 0 : i32
    return %c0_i32, %c0_i32_0 : i32, i32
  }
  func.func @transform_2(%arg0: i32) -> (i32, i32) {
    %c0_i32 = arith.constant 0 : i32
    %c0_i32_0 = arith.constant 0 : i32
    return %c0_i32, %arg0 : i32, i32
  }
  func.func @transform_3(%arg0: i32) -> (i32, i32) {
    %c0_i32 = arith.constant 0 : i32
    %c0_i32_0 = arith.constant 0 : i32
    %c0_i32_1 = arith.constant 0 : i32
    return %c0_i32, %c0_i32_0 : i32, i32
  }
  func.func @transform_4(%arg0: i32) -> (i32, i32) {
    %c0_i32 = arith.constant 0 : i32
    %c0_i32_0 = arith.constant 0 : i32
    %c0_i32_1 = arith.constant 0 : i32
    return %c0_i32, %c0_i32_0 : i32, i32
  }
}

module attributes {stable_mosaic.version = 11 : i64} {
  func.func @_bn_lrelu_kernel(%arg0: i32, %arg1: memref<16x512xf32, #tpu.memory_space<vmem>>, %arg2: memref<16x1xf32, #tpu.memory_space<vmem>>, %arg3: memref<16x1xf32, #tpu.memory_space<vmem>>, %arg4: memref<16x512xbf16, #tpu.memory_space<vmem>>) attributes {dimension_semantics = [#tpu.dimension_semantics<parallel>], iteration_bounds = array<i64: 1>, scalar_prefetch = 0 : i64, scratch_operands = 0 : i64, tpu.core_type = #tpu.core_type<tc>, window_params = [{transform_indices = @transform_0, window_bounds = array<i64: 16, 512>}, {pipeline_mode = #tpu.pipeline_mode<synchronous>, transform_indices = @transform_1, window_bounds = array<i64: 16, 1>}, {pipeline_mode = #tpu.pipeline_mode<synchronous>, transform_indices = @transform_2, window_bounds = array<i64: 16, 1>}, {transform_indices = @transform_3, window_bounds = array<i64: 16, 512>}]} {
    %c0 = arith.constant 0 : index
    %c0_0 = arith.constant 0 : index
    %0 = vector.load %arg2[%c0, %c0_0] : memref<16x1xf32, #tpu.memory_space<vmem>>, vector<16x1xf32>
    %cst = arith.constant 0.001953125 : f32
    %1 = vector.broadcast %cst : f32 to vector<16x1xf32>
    %2 = arith.mulf %0, %1 : vector<16x1xf32>
    %c0_1 = arith.constant 0 : index
    %c0_2 = arith.constant 0 : index
    %3 = vector.load %arg3[%c0_1, %c0_2] : memref<16x1xf32, #tpu.memory_space<vmem>>, vector<16x1xf32>
    %cst_3 = arith.constant 0.001953125 : f32
    %4 = vector.broadcast %cst_3 : f32 to vector<16x1xf32>
    %5 = arith.mulf %3, %4 : vector<16x1xf32>
    %6 = arith.mulf %2, %2 : vector<16x1xf32>
    %7 = arith.subf %5, %6 : vector<16x1xf32>
    %cst_4 = arith.constant 9.99999974E-6 : f32
    %8 = vector.broadcast %cst_4 : f32 to vector<16x1xf32>
    %9 = arith.addf %7, %8 : vector<16x1xf32>
    %10 = math.rsqrt %9 : vector<16x1xf32>
    %c0_5 = arith.constant 0 : index
    %c0_6 = arith.constant 0 : index
    %11 = vector.load %arg1[%c0_5, %c0_6] : memref<16x512xf32, #tpu.memory_space<vmem>>, vector<16x512xf32>
    %12 = vector.broadcast %2 : vector<16x1xf32> to vector<16x512xf32>
    %13 = arith.subf %11, %12 : vector<16x512xf32>
    %14 = vector.broadcast %10 : vector<16x1xf32> to vector<16x512xf32>
    %15 = arith.mulf %13, %14 : vector<16x512xf32>
    %cst_7 = arith.constant 0.000000e+00 : f32
    %16 = vector.broadcast %cst_7 : f32 to vector<16x512xf32>
    %17 = arith.cmpf oge, %15, %16 : vector<16x512xf32>
    %cst_8 = arith.constant 2.000000e-01 : f32
    %18 = vector.broadcast %cst_8 : f32 to vector<16x512xf32>
    %19 = arith.mulf %18, %15 : vector<16x512xf32>
    %20 = arith.select %17, %15, %19 : vector<16x512xi1>, vector<16x512xf32>
    %21 = arith.truncf %20 : vector<16x512xf32> to vector<16x512xbf16>
    %c0_9 = arith.constant 0 : index
    %c0_10 = arith.constant 0 : index
    %22 = vector.load %arg4[%c0_9, %c0_10] : memref<16x512xbf16, #tpu.memory_space<vmem>>, vector<16x512xbf16>
    tpu.vector_store %arg4[%c0_9, %c0_10], %21 {strides = array<i32>} : memref<16x512xbf16, #tpu.memory_space<vmem>>, vector<16x512xbf16>,
    return
  }
  func.func @transform_0(%arg0: i32) -> (i32, i32) {
    %c0_i32 = arith.constant 0 : i32
    %c0_i32_0 = arith.constant 0 : i32
    return %c0_i32, %arg0 : i32, i32
  }
  func.func @transform_1(%arg0: i32) -> (i32, i32) {
    %c0_i32 = arith.constant 0 : i32
    %c0_i32_0 = arith.constant 0 : i32
    %c0_i32_1 = arith.constant 0 : i32
    return %c0_i32, %c0_i32_0 : i32, i32
  }
  func.func @transform_2(%arg0: i32) -> (i32, i32) {
    %c0_i32 = arith.constant 0 : i32
    %c0_i32_0 = arith.constant 0 : i32
    %c0_i32_1 = arith.constant 0 : i32
    return %c0_i32, %c0_i32_0 : i32, i32
  }
  func.func @transform_3(%arg0: i32) -> (i32, i32) {
    %c0_i32 = arith.constant 0 : i32
    %c0_i32_0 = arith.constant 0 : i32
    return %c0_i32, %arg0 : i32, i32
  }
}

module attributes {stable_mosaic.version = 11 : i64} {
  func.func @_conv_stats_kernel(%arg0: i32, %arg1: memref<864x512xbf16, #tpu.memory_space<vmem>>, %arg2: memref<16x864xbf16, #tpu.memory_space<vmem>>, %arg3: memref<16x512xf32, #tpu.memory_space<vmem>>, %arg4: memref<16x1xf32, #tpu.memory_space<vmem>>, %arg5: memref<16x1xf32, #tpu.memory_space<vmem>>) attributes {dimension_semantics = [#tpu.dimension_semantics<arbitrary>], iteration_bounds = array<i64: 8>, scalar_prefetch = 0 : i64, scratch_operands = 0 : i64, tpu.core_type = #tpu.core_type<tc>, window_params = [{transform_indices = @transform_0, window_bounds = array<i64: 864, 512>}, {pipeline_mode = #tpu.pipeline_mode<synchronous>, transform_indices = @transform_1, window_bounds = array<i64: 16, 864>}, {transform_indices = @transform_2, window_bounds = array<i64: 16, 512>}, {pipeline_mode = #tpu.pipeline_mode<synchronous>, transform_indices = @transform_3, window_bounds = array<i64: 16, 1>}, {pipeline_mode = #tpu.pipeline_mode<synchronous>, transform_indices = @transform_4, window_bounds = array<i64: 16, 1>}]} {
    %c0_i32 = arith.constant 0 : i32
    %0 = arith.cmpi eq, %arg0, %c0_i32 : i32
    %1 = arith.extui %0 : i1 to i32
    %c0_i32_0 = arith.constant 0 : i32
    %2 = arith.cmpi ne, %1, %c0_i32_0 : i32
    scf.if %2 {
      %cst_16 = arith.constant 0.000000e+00 : f32
      %18 = vector.broadcast %cst_16 : f32 to vector<16x1xf32>
      %c0_17 = arith.constant 0 : index
      %c0_18 = arith.constant 0 : index
      %19 = vector.load %arg4[%c0_17, %c0_18] : memref<16x1xf32, #tpu.memory_space<vmem>>, vector<16x1xf32>
      tpu.vector_store %arg4[%c0_17, %c0_18], %18 {strides = array<i32>} : memref<16x1xf32, #tpu.memory_space<vmem>>, vector<16x1xf32>,
      %cst_19 = arith.constant 0.000000e+00 : f32
      %20 = vector.broadcast %cst_19 : f32 to vector<16x1xf32>
      %c0_20 = arith.constant 0 : index
      %c0_21 = arith.constant 0 : index
      %21 = vector.load %arg5[%c0_20, %c0_21] : memref<16x1xf32, #tpu.memory_space<vmem>>, vector<16x1xf32>
      tpu.vector_store %arg5[%c0_20, %c0_21], %20 {strides = array<i32>} : memref<16x1xf32, #tpu.memory_space<vmem>>, vector<16x1xf32>,
    } else {
    }
    %c0 = arith.constant 0 : index
    %c0_1 = arith.constant 0 : index
    %3 = vector.load %arg2[%c0, %c0_1] : memref<16x864xbf16, #tpu.memory_space<vmem>>, vector<16x864xbf16>
    %c0_2 = arith.constant 0 : index
    %c0_3 = arith.constant 0 : index
    %4 = vector.load %arg1[%c0_2, %c0_3] : memref<864x512xbf16, #tpu.memory_space<vmem>>, vector<864x512xbf16>
    %cst = arith.constant dense<0.000000e+00> : vector<16x512xf32>
    %5 = tpu.matmul %3, %4, %cst {dimension_numbers = #tpu.dot_dimension_numbers<[1], [0], [0], [1], [0, 0, 1, 1], [], []>} : vector<16x864xbf16>, vector<864x512xbf16>, vector<16x512xf32> -> vector<16x512xf32>
    %c0_4 = arith.constant 0 : index
    %c0_5 = arith.constant 0 : index
    %6 = vector.load %arg3[%c0_4, %c0_5] : memref<16x512xf32, #tpu.memory_space<vmem>>, vector<16x512xf32>
    tpu.vector_store %arg3[%c0_4, %c0_5], %5 {strides = array<i32>} : memref<16x512xf32, #tpu.memory_space<vmem>>, vector<16x512xf32>,
    %c0_6 = arith.constant 0 : index
    %c0_7 = arith.constant 0 : index
    %7 = vector.load %arg4[%c0_6, %c0_7] : memref<16x1xf32, #tpu.memory_space<vmem>>, vector<16x1xf32>
    %cst_8 = arith.constant dense<0.000000e+00> : vector<16xf32>
    %8 = vector.multi_reduction <add>, %5, %cst_8 [1] : vector<16x512xf32> to vector<16xf32>
    %9 = vector.shape_cast %8 : vector<16xf32> to vector<16x1xf32>
    %10 = arith.addf %7, %9 : vector<16x1xf32>
    %c0_9 = arith.constant 0 : index
    %c0_10 = arith.constant 0 : index
    %11 = vector.load %arg4[%c0_9, %c0_10] : memref<16x1xf32, #tpu.memory_space<vmem>>, vector<16x1xf32>
    tpu.vector_store %arg4[%c0_9, %c0_10], %10 {strides = array<i32>} : memref<16x1xf32, #tpu.memory_space<vmem>>, vector<16x1xf32>,
    %c0_11 = arith.constant 0 : index
    %c0_12 = arith.constant 0 : index
    %12 = vector.load %arg5[%c0_11, %c0_12] : memref<16x1xf32, #tpu.memory_space<vmem>>, vector<16x1xf32>
    %13 = arith.mulf %5, %5 : vector<16x512xf32>
    %cst_13 = arith.constant dense<0.000000e+00> : vector<16xf32>
    %14 = vector.multi_reduction <add>, %13, %cst_13 [1] : vector<16x512xf32> to vector<16xf32>
    %15 = vector.shape_cast %14 : vector<16xf32> to vector<16x1xf32>
    %16 = arith.addf %12, %15 : vector<16x1xf32>
    %c0_14 = arith.constant 0 : index
    %c0_15 = arith.constant 0 : index
    %17 = vector.load %arg5[%c0_14, %c0_15] : memref<16x1xf32, #tpu.memory_space<vmem>>, vector<16x1xf32>
    tpu.vector_store %arg5[%c0_14, %c0_15], %16 {strides = array<i32>} : memref<16x1xf32, #tpu.memory_space<vmem>>, vector<16x1xf32>,
    return
  }
  func.func @transform_0(%arg0: i32) -> (i32, i32) {
    %c0_i32 = arith.constant 0 : i32
    %c0_i32_0 = arith.constant 0 : i32
    return %c0_i32, %arg0 : i32, i32
  }
  func.func @transform_1(%arg0: i32) -> (i32, i32) {
    %c0_i32 = arith.constant 0 : i32
    %c0_i32_0 = arith.constant 0 : i32
    %c0_i32_1 = arith.constant 0 : i32
    return %c0_i32, %c0_i32_0 : i32, i32
  }
  func.func @transform_2(%arg0: i32) -> (i32, i32) {
    %c0_i32 = arith.constant 0 : i32
    %c0_i32_0 = arith.constant 0 : i32
    return %c0_i32, %arg0 : i32, i32
  }
  func.func @transform_3(%arg0: i32) -> (i32, i32) {
    %c0_i32 = arith.constant 0 : i32
    %c0_i32_0 = arith.constant 0 : i32
    %c0_i32_1 = arith.constant 0 : i32
    return %c0_i32, %c0_i32_0 : i32, i32
  }
  func.func @transform_4(%arg0: i32) -> (i32, i32) {
    %c0_i32 = arith.constant 0 : i32
    %c0_i32_0 = arith.constant 0 : i32
    %c0_i32_1 = arith.constant 0 : i32
    return %c0_i32, %c0_i32_0 : i32, i32
  }
}

module attributes {stable_mosaic.version = 11 : i64} {
  func.func @_conv_bias_kernel(%arg0: i32, %arg1: memref<432x512xbf16, #tpu.memory_space<vmem>>, %arg2: memref<3x432xbf16, #tpu.memory_space<vmem>>, %arg3: memref<3x1xf32, #tpu.memory_space<vmem>>, %arg4: memref<3x512xf32, #tpu.memory_space<vmem>>) attributes {dimension_semantics = [#tpu.dimension_semantics<parallel>], iteration_bounds = array<i64: 8>, scalar_prefetch = 0 : i64, scratch_operands = 0 : i64, tpu.core_type = #tpu.core_type<tc>, window_params = [{transform_indices = @transform_0, window_bounds = array<i64: 432, 512>}, {pipeline_mode = #tpu.pipeline_mode<synchronous>, transform_indices = @transform_1, window_bounds = array<i64: 3, 432>}, {pipeline_mode = #tpu.pipeline_mode<synchronous>, transform_indices = @transform_2, window_bounds = array<i64: 3, 1>}, {transform_indices = @transform_3, window_bounds = array<i64: 3, 512>}]} {
    %c0 = arith.constant 0 : index
    %c0_0 = arith.constant 0 : index
    %0 = vector.load %arg2[%c0, %c0_0] : memref<3x432xbf16, #tpu.memory_space<vmem>>, vector<3x432xbf16>
    %c0_1 = arith.constant 0 : index
    %c0_2 = arith.constant 0 : index
    %1 = vector.load %arg1[%c0_1, %c0_2] : memref<432x512xbf16, #tpu.memory_space<vmem>>, vector<432x512xbf16>
    %cst = arith.constant dense<0.000000e+00> : vector<3x512xf32>
    %2 = tpu.matmul %0, %1, %cst {dimension_numbers = #tpu.dot_dimension_numbers<[1], [0], [0], [1], [0, 0, 1, 1], [], []>} : vector<3x432xbf16>, vector<432x512xbf16>, vector<3x512xf32> -> vector<3x512xf32>
    %c0_3 = arith.constant 0 : index
    %c0_4 = arith.constant 0 : index
    %3 = vector.load %arg3[%c0_3, %c0_4] : memref<3x1xf32, #tpu.memory_space<vmem>>, vector<3x1xf32>
    %4 = vector.broadcast %3 : vector<3x1xf32> to vector<3x512xf32>
    %5 = arith.addf %2, %4 : vector<3x512xf32>
    %c0_5 = arith.constant 0 : index
    %c0_6 = arith.constant 0 : index
    %6 = vector.load %arg4[%c0_5, %c0_6] : memref<3x512xf32, #tpu.memory_space<vmem>>, vector<3x512xf32>
    tpu.vector_store %arg4[%c0_5, %c0_6], %5 {strides = array<i32>} : memref<3x512xf32, #tpu.memory_space<vmem>>, vector<3x512xf32>,
    return
  }
  func.func @transform_0(%arg0: i32) -> (i32, i32) {
    %c0_i32 = arith.constant 0 : i32
    %c0_i32_0 = arith.constant 0 : i32
    return %c0_i32, %arg0 : i32, i32
  }
  func.func @transform_1(%arg0: i32) -> (i32, i32) {
    %c0_i32 = arith.constant 0 : i32
    %c0_i32_0 = arith.constant 0 : i32
    %c0_i32_1 = arith.constant 0 : i32
    return %c0_i32, %c0_i32_0 : i32, i32
  }
  func.func @transform_2(%arg0: i32) -> (i32, i32) {
    %c0_i32 = arith.constant 0 : i32
    %c0_i32_0 = arith.constant 0 : i32
    %c0_i32_1 = arith.constant 0 : i32
    return %c0_i32, %c0_i32_0 : i32, i32
  }
  func.func @transform_3(%arg0: i32) -> (i32, i32) {
    %c0_i32 = arith.constant 0 : i32
    %c0_i32_0 = arith.constant 0 : i32
    return %c0_i32, %arg0 : i32, i32
  }
}

</mosaic_0001>

<bundles_post_ra>
// kernel: unet_forward.23
= control target key start
LH: loop header
LB: loop body
LE: loop exit
PB: predicated region body
PF: predicated region fallthrough
CT: control target
= control target key end

     0   :  { %s736_s15 = smov 0   ;;  %s738_s16 = smov 0   ;;  %s870_s0 = inlined_call_operand.vmem [shape: bf16[54,4096], index: 0, kind: input, shape index: {}]   ;;  %s871_s1 = inlined_call_operand.vmem [shape: bf16[16,54], index: 1, kind: input, shape index: {}]   ;;  %s872_s2 = inlined_call_operand.vmem [shape: f32[16,4096], index: 2, kind: output, shape index: {0}]   ;;  %s873_s3 = inlined_call_operand.vmem [shape: f32[16,1], index: 3, kind: output, shape index: {1}]   ;;  %s874_s4 = inlined_call_operand.vmem [shape: f32[16,1], index: 4, kind: output, shape index: {2}]  }
   0x1   :  { %s740_s17 = smov 0  }
   0x2 LB: > { %s752_s18 = sadd.s32 4294967295, %s707_s17   ;;  %s755_s19 = sadd.s32 1, %s707_s17   ;;  %s707_s17 = sphi %s740_s17, %s878_s17   ;;  %s703_s16 = sphi %s738_s16, %s877_s16   ;;  %s699_s15 = sphi %s736_s15, %s876_s15  }
   0x3   : > { %s19_s20 = ssub.s32 %s707_s17, %s755_s19  ;;  %s22_s21 = sadd.s32 1, %s703_s16 }
   0x4   : > { %p20_p0 = scmp.eq.s32.totalorder %s19_s20, 0  ;;  %p29_p1 = scmp.ne.s32.totalorder %s703_s16, %s699_s15 }
   0x5   : > { %p30_p2 = scmp.eq.s32.totalorder %s707_s17, 0  ;;  %p80_p3 = scmp.eq.s32.totalorder %s752_s18, 7 }
   0x6   : > { %s765_s22 = scalar_select %p20_p0, %s703_s16, %s22_s21  }
   0x7   : > { %p31_p4 = por %p30_p2, %p29_p1  ;;  %p767_p5 = por %p80_p3, %p29_p1 }
   0x8   : > { %p600_p6 = scmp.ge.s32.totalorder %s707_s17, 8 }
   0xa   : > { %147 = sbr.rel (%p600_p6) target bundleno = 28 (0x1c), region = 20 }
  0x11   : > { %150 = sbr.rel (!%p31_p4) target bundleno = 28 (0x1c), region = 24  ;;  %s152_s24 = sand.u32 (%p31_p4), 1, %s703_s16  }
  0x12   : > { %s632_s25 = sshll.u32 (%p31_p4), %s707_s17, 4  ;;  %s634_s26 = smul.u32 (%p31_p4), 112, %s152_s24 }
  0x13   : > { %s157_s29 = scalar_lea.vmem (%p31_p4), %s870_s0, %s632_s25 }
  0x14   : > { %v170_v0 = vld [vmem:[%s157_s29] sm:$0xff] (%p31_p4)  ;;  %v172_v1 = vld [vmem:[%s157_s29 + $0x8] sm:$0xff] (%p31_p4)  ;;  %s154_s30 = scalar_lea.vmem (%p31_p4), [#allocation2], %s634_s26 }
  0x15   : > { %v174_v2 = vld [vmem:[%s157_s29 + $0x80] sm:$0xff] (%p31_p4)  ;;  %v176_v3 = vld [vmem:[%s157_s29 + $0x88] sm:$0xff] (%p31_p4)  ;;  %171 = vst [vmem:[%s154_s30] sm:$0xff] (%p31_p4), %v170_v0  ;;  %173 = vst [vmem:[%s154_s30 + $0x8] sm:$0xff] (%p31_p4), %v172_v1 }
  0x16   : > { %v178_v4 = vld [vmem:[%s157_s29 + $0x100] sm:$0xff] (%p31_p4)  ;;  %v180_v5 = vld [vmem:[%s157_s29 + $0x108] sm:$0xff] (%p31_p4)  ;;  %175 = vst [vmem:[%s154_s30 + $0x10] sm:$0xff] (%p31_p4), %v174_v2  ;;  %177 = vst [vmem:[%s154_s30 + $0x18] sm:$0xff] (%p31_p4), %v176_v3 }
  0x17   : > { %179 = vst [vmem:[%s154_s30 + $0x20] sm:$0xff] (%p31_p4), %v178_v4  ;;  %181 = vst [vmem:[%s154_s30 + $0x28] sm:$0xff] (%p31_p4), %v180_v5  ;;  %v182_v6 = vld [vmem:[%s157_s29 + $0x180] sm:$0xff] (%p31_p4)  ;;  %v184_v7 = vld [vmem:[%s157_s29 + $0x188] sm:$0xff] (%p31_p4) }
  0x18   : > { %v186_v8 = vld [vmem:[%s157_s29 + $0x200] sm:$0xff]  ;;  %183 = vst [vmem:[%s154_s30 + $0x30] sm:$0xff] %v182_v6  ;;  %185 = vst [vmem:[%s154_s30 + $0x38] sm:$0xff] %v184_v7  ;;  %v188_v9 = vld [vmem:[%s157_s29 + $0x208] sm:$0xff] }
  0x19   : > { %187 = vst [vmem:[%s154_s30 + $0x40] sm:$0xff] %v186_v8  ;;  %v190_v10 = vld [vmem:[%s157_s29 + $0x280] sm:$0xff]  ;;  %v192_v11 = vld [vmem:[%s157_s29 + $0x288] sm:$0xff]  ;;  %189 = vst [vmem:[%s154_s30 + $0x48] sm:$0xff] %v188_v9 }
  0x1a   : > { %191 = vst [vmem:[%s154_s30 + $0x50] sm:$0xff] %v190_v10  ;;  %193 = vst [vmem:[%s154_s30 + $0x58] sm:$0xff] %v192_v11  ;;  %v194_v12 = vld [vmem:[%s157_s29 + $0x300] sm:$0xff]  ;;  %v196_v13 = vld [vmem:[%s157_s29 + $0x308] sm:$0xff] }
  0x1b   : > { %195 = vst [vmem:[%s154_s30 + $0x60] sm:$0xff] %v194_v12  ;;  %197 = vst [vmem:[%s154_s30 + $0x68] sm:$0xff] %v196_v13 }
  0x1c PF: > { %p603_p7 = scmp.ge.s32.totalorder %s707_s17, 1  ;;  %p202_p8 = scmp.lt.s32.totalorder %s707_s17, 9 }
  0x1e   : > { %p203_p9 = pnand %p603_p7, %p202_p8 }
  0x1f   : > { %s209_s5 = sand.u32 (!%p203_p9), 1, %s699_s15   ;;  %p605_p10 = scmp.ne.s32.totalorder (!%p203_p9), %s752_s18, 0 }
  0x20   : > { %206 = sbr.rel (%p203_p9) target bundleno = 435 (0x1b3), region = 47  ;;  %s604_s7 = sshll.u32 (!%p203_p9), %s209_s5, 6 }
  0x21   : > { %s635_s6 = smul.u32 (!%p203_p9), 112, %s209_s5  ;;  %s782_s9 = scalar_lea.vmem (!%p203_p9), [#allocation3], %s604_s7 }
  0x23   : > { %s780_s8 = scalar_lea.vmem (!%p203_p9), [#allocation2], %s635_s6 }
  0x27   : > { %239 = sbr.rel (%p605_p10) target bundleno = 46 (0x2e), region = 55  ;;  %vm240_vm0 = vcmask (!%p605_p10), 7168   ;;  %v709_v14 = vmov (!%p605_p10), 0.0  }
  0x28   : > { %241 = vst.msk [vmem:[%s873_s3] sm:$0xff] (!%p605_p10), %vm240_vm0, %v709_v14  ;;  %242 = vst.msk [vmem:[%s873_s3 + $0x8] sm:$0xff] (!%p605_p10), %vm240_vm0, %v709_v14 }
  0x29   : > { %243 = vst.msk [vmem:[%s874_s4] sm:$0xff] (!%p605_p10), %vm240_vm0, %v709_v14  ;;  %244 = vst.msk [vmem:[%s874_s4 + $0x8] sm:$0xff] (!%p605_p10), %vm240_vm0, %v709_v14 }
  0x2e PF: > { %v662_v15 = vld [vmem:[%s780_s8 + $0x4] ss:$16 sps:$4 sm:$0xff]   ;;  %v664_v16 = vld [vmem:[%s780_s8 + $0xc] ss:$16 sps:$4 sm:$0xff]   ;;  %v710_v17 = vmov 0   ;;  %vm340_vm1 = vcmask 1042432  }
  0x2f   : > { %385 = vmatprep.mubr.bf16.mxu0 %v710_v17  ;;  %428 = vmatprep.mubr.bf16.mxu1 %v710_v17  ;;  %v666_v18 = vld [vmem:[%s780_s8] ss:$16 sps:$4 sm:$0xff]   ;;  %v667_v19 = vld [vmem:[%s780_s8 + $0x8] ss:$16 sps:$4 sm:$0xff]   ;;  %v668_v20 = vld [vmem:[%s780_s8 + $0x24] ss:$16 sps:$4 sm:$0xff]  }
  0x30   : > { %353 = vmatprep.subr.bf16.mxu0 %v662_v15  ;;  %396 = vmatprep.subr.bf16.mxu1 %v664_v16  ;;  %v670_v21 = vld [vmem:[%s780_s8 + $0x2c] ss:$16 sps:$4 sm:$0xff]   ;;  %v672_v22 = vld [vmem:[%s780_s8 + $0x20] ss:$16 sps:$4 sm:$0xff]   ;;  %v673_v23 = vld [vmem:[%s780_s8 + $0x28] ss:$16 sps:$4 sm:$0xff]  }
  0x31   : > { %354 = vmatpush1.bf16.msra.mxu0 %v666_v18  ;;  %397 = vmatpush1.bf16.msra.mxu1 %v667_v19  ;;  %v674_v24 = vld [vmem:[%s780_s8 + $0x44] ss:$16 sps:$4 sm:$0xff]   ;;  %v676_v25 = vld [vmem:[%s780_s8 + $0x4c] ss:$16 sps:$4 sm:$0xff]   ;;  %v678_v26 = vld [vmem:[%s780_s8 + $0x40] ss:$16 sps:$4 sm:$0xff]  }
  0x32   : > { %355 = vmatprep.subr.bf16.mxu0 %v668_v20  ;;  %398 = vmatprep.subr.bf16.mxu1 %v670_v21  ;;  %v679_v27 = vld [vmem:[%s780_s8 + $0x48] ss:$16 sps:$4 sm:$0xff]   ;;  %v259_v28 = vld [vmem:[%s780_s8 + $0x60] sm:$0x77]  ;;  %vm336_vm2 = vcmask 441344   ;;  %vm461_vm3 = vcmask 7168  }
  0x33   : > { %v260_v29 = vld [vmem:[%s780_s8 + $0x68] sm:$0x77]  ;;  %v620_v30 = vcombine.high %v259_v28, %v259_v28  ;;  %v619_v32 = vcombine.low %v259_v28, %v259_v28  ;;  %v684_v36 = vld [vmem:[%s871_s1] sm:$0xff]   ;;  %s633_s17 = sshll.u32 (%p767_p5), %s752_s18, 5 }
  0x34   : > { %v622_v31 = vcombine.high %v260_v29, %v260_v29  ;;  %v621_v33 = vcombine.low %v260_v29, %v260_v29  ;;  %v447_v1 = vld [vmem:[%s873_s3] sm:$0xff]  ;;  %v448_v5 = vld [vmem:[%s873_s3 + $0x8] sm:$0xff]  ;;  %s497_s24 = scalar_lea.vmem (%p767_p5), %s872_s2, %s633_s17 }
  0x35   : > { %356 = vmatpush1.bf16.msra.mxu0 %v672_v22  ;;  %399 = vmatpush1.bf16.msra.mxu1 %v673_v23  ;;  %v342_v34 = vsel %vm340_vm1, %v619_v32, 0  ;;  %v464_v4 = vld [vmem:[%s874_s4] sm:$0xff]  ;;  %v465_v10 = vld [vmem:[%s874_s4 + $0x8] sm:$0xff] }
  0x36   : > { %357 = vmatprep.subr.bf16.mxu0 %v674_v24  ;;  %400 = vmatprep.subr.bf16.mxu1 %v676_v25  ;;  %v348_v35 = vsel %vm340_vm1, %v621_v33, 0 }
  0x39   : > { %358 = vmatpush1.bf16.msra.mxu0 %v678_v26  ;;  %401 = vmatpush1.bf16.msra.mxu1 %v679_v27 }
  0x3a   : > { %623 = vmatprep.subr.msk.bf16.mxu0 %vm340_vm1, %v620_v30  ;;  %625 = vmatprep.subr.msk.bf16.mxu1 %vm340_vm1, %v622_v31 }
  0x3d   : > { %360 = vmatpush1.bf16.msra.mxu0 %v342_v34  ;;  %403 = vmatpush1.bf16.msra.mxu1 %v348_v35 }
  0x40   : > { %624 = vmatmul.mubr.msk.bf16.vlgmr.msra.gmra.mrb[0].mxu0 %vm336_vm2, %v684_v36  ;;  %626 = vmatmul.mubr.msk.bf16.vlgmr.msra.gmra.mrb[0].mxu1 %vm336_vm2, %v684_v36 }
 0x113   : > { %v387_v37 = vpop.f32.mrb[0].mxu0  ;;  %v430_v38 = vpop.f32.mrb[0].mxu1 }
 0x114   : > { %439 = vst [vmem:[%s782_s9] sm:$0xff] %v387_v37  ;;  %v466_v39 = vmul.f32 %v387_v37, %v387_v37  ;;  %441 = vst [vmem:[%s782_s9 + $0x10] sm:$0xff] %v430_v38  ;;  %v389_v40 = vpop.f32.mrb[1].mxu0  ;;  %v432_v41 = vpop.f32.mrb[1].mxu1  ;;  %v468_v46 = vmul.f32 %v430_v38, %v430_v38 }
 0x115   : > { %440 = vst [vmem:[%s782_s9 + $0x8] sm:$0xff] %v389_v40  ;;  %v449_v42 = vadd.f32 %v389_v40, %v387_v37  ;;  %v467_v43 = vmul.f32 %v389_v40, %v389_v40  ;;  %442 = vst [vmem:[%s782_s9 + $0x18] sm:$0xff] %v432_v41  ;;  %v391_v44 = vpop.f32.mrb[2].mxu0  ;;  %v434_v45 = vpop.f32.mrb[2].mxu1  ;;  %v469_v58 = vmul.f32 %v432_v41, %v432_v41 }
 0x116   : > { %443 = vst [vmem:[%s782_s9 + $0x20] sm:$0xff] %v391_v44  ;;  %v470_v47 = vmul.f32 %v391_v44, %v391_v44  ;;  %445 = vst [vmem:[%s782_s9 + $0x30] sm:$0xff] %v434_v45  ;;  %v393_v48 = vpop.f32.mrb[3].mxu0  ;;  %v436_v49 = vpop.f32.mrb[3].mxu1  ;;  %v472_v54 = vmul.f32 %v434_v45, %v434_v45 }
 0x117   : > { %444 = vst [vmem:[%s782_s9 + $0x28] sm:$0xff] %v393_v48  ;;  %v454_v50 = vadd.f32 %v393_v48, %v391_v44  ;;  %v471_v51 = vmul.f32 %v393_v48, %v393_v48  ;;  %446 = vst [vmem:[%s782_s9 + $0x38] sm:$0xff] %v436_v49  ;;  %v450_v52 = vadd.f32 %v449_v42, %v430_v38 }
 0x118   : > { %v474_v53 = vadd.f32 %v467_v43, %v466_v39  ;;  %v473_v60 = vmul.f32 %v436_v49, %v436_v49 }
 0x119   : > { %v479_v55 = vadd.f32 %v471_v51, %v470_v47  ;;  %v451_v56 = vadd.f32 %v450_v52, %v432_v41  ;;  %v455_v57 = vadd.f32 %v454_v50, %v434_v45 }
 0x11a   : > { %v475_v59 = vadd.f32 %v474_v53, %v468_v46 }
 0x11b   : > { %452 = vadd.xlane.f32.xlu0 %v451_v56  ;;  %v456_v61 = vadd.f32 %v455_v57, %v436_v49  ;;  %v480_v62 = vadd.f32 %v479_v55, %v472_v54  ;;  %v510_v13 = vld [vmem:[%s782_s9] sm:$0xff] (%p767_p5)  ;;  %v514_v15 = vld [vmem:[%s782_s9 + $0x10] sm:$0xff] (%p767_p5) }
 0x11c   : > { %v476_v63 = vadd.f32 %v475_v59, %v469_v58  ;;  %v512_v14 = vld [vmem:[%s782_s9 + $0x8] sm:$0xff] (%p767_p5)  ;;  %v516_v16 = vld [vmem:[%s782_s9 + $0x18] sm:$0xff] (%p767_p5)  ;;  %511 = vst [vmem:[%s497_s24] sm:$0xff] (%p767_p5), %v510_v13  ;;  %515 = vst [vmem:[%s497_s24 + $0x10] sm:$0xff] (%p767_p5), %v514_v15 }
 0x11d   : > { %v481_v0 = vadd.f32 %v480_v62, %v473_v60  ;;  %v518_v17 = vld [vmem:[%s782_s9 + $0x20] sm:$0xff] (%p767_p5)  ;;  %513 = vst [vmem:[%s497_s24 + $0x8] sm:$0xff] (%p767_p5), %v512_v14  ;;  %517 = vst [vmem:[%s497_s24 + $0x18] sm:$0xff] (%p767_p5), %v516_v16  ;;  %v522_v19 = vld [vmem:[%s782_s9 + $0x30] sm:$0xff] (%p767_p5) }
 0x11e   : > { %477 = vadd.xlane.f32.xlu1 %v476_v63  ;;  %v520_v18 = vld [vmem:[%s782_s9 + $0x28] sm:$0xff] (%p767_p5)  ;;  %519 = vst [vmem:[%s497_s24 + $0x100] sm:$0xff] (%p767_p5), %v518_v17  ;;  %v524_v20 = vld [vmem:[%s782_s9 + $0x38] sm:$0xff] (%p767_p5)  ;;  %523 = vst [vmem:[%s497_s24 + $0x110] sm:$0xff] (%p767_p5), %v522_v19 }
 0x11f   : > { %457 = vadd.xlane.f32.xlu0 %v456_v61  ;;  %521 = vst [vmem:[%s497_s24 + $0x108] sm:$0xff] (%p767_p5), %v520_v18  ;;  %525 = vst [vmem:[%s497_s24 + $0x118] sm:$0xff] (%p767_p5), %v524_v20 }
 0x122   : > { %482 = vadd.xlane.f32.xlu1 %v481_v0 }
 0x1a8   : > { %v453_v2 = vpop.xlane.xlu0 %452 }
 0x1a9   : > { %v459_v3 = vadd.f32 %v453_v2, %v447_v1 }
 0x1ab   : > { %462 = vst.msk [vmem:[%s873_s3] sm:$0xff] %vm461_vm3, %v459_v3  ;;  %v478_v6 = vpop.xlane.xlu1 %477 }
 0x1ac   : > { %v484_v7 = vadd.f32 %v478_v6, %v464_v4  ;;  %v458_v8 = vpop.xlane.xlu0 %457  ;;  %494 = sbr.rel (!%p767_p5) target bundleno = 435 (0x1b3), region = 59 }
 0x1ad   : > { %v460_v9 = vadd.f32 %v458_v8, %v448_v5 }
 0x1ae   : > { %486 = vst.msk [vmem:[%s874_s4] sm:$0xff] %vm461_vm3, %v484_v7 }
 0x1af   : > { %463 = vst.msk [vmem:[%s873_s3 + $0x8] sm:$0xff] %vm461_vm3, %v460_v9  ;;  %v483_v11 = vpop.xlane.xlu1 %482 }
 0x1b0   : > { %v485_v12 = vadd.f32 %v483_v11, %v465_v10 }
 0x1b2   : > { %487 = vst.msk [vmem:[%s874_s4 + $0x8] sm:$0xff] %vm461_vm3, %v485_v12 }
 0x1b3 PF: > { %p12_p11 = scmp.ge.s32.totalorder %s755_s19, 10   ;;  %s876_s15 = smov %s703_s16 }
 0x1b4   : > { %s877_s16 = smov %s765_s22  ;;  %s878_s17 = smov %s755_s19 }
 0x1b5   :  { %14 = sbr.rel (!%p12_p11) target bundleno = 2 (0x2), region = 129 }

// kernel: unet_forward.24
= control target key start
LH: loop header
LB: loop body
LE: loop exit
PB: predicated region body
PF: predicated region fallthrough
CT: control target
= control target key end

     0   :  { %s503_s12 = smov 0   ;;  %s505_s13 = smov 0   ;;  %s575_s0 = inlined_call_operand.vmem [shape: f32[16,4096], index: 0, kind: input, shape index: {}]   ;;  %s576_s1 = inlined_call_operand.vmem [shape: f32[16,1], index: 1, kind: input, shape index: {}]   ;;  %s577_s2 = inlined_call_operand.vmem [shape: f32[16,1], index: 2, kind: input, shape index: {}]   ;;  %s578_s3 = inlined_call_operand.vmem [shape: bf16[16,4096], index: 3, kind: output, shape index: {}]  }
   0x1   :  { %s507_s14 = smov 0  }
   0x2 LB: > { %s402_s15 = sadd.s32 4294967295, %s480_s14   ;;  %s520_s16 = sadd.s32 1, %s480_s14   ;;  %s480_s14 = sphi %s507_s14, %s582_s14   ;;  %s476_s13 = sphi %s505_s13, %s581_s13   ;;  %s472_s12 = sphi %s503_s12, %s580_s12  }
   0x3   : > { %s17_s17 = ssub.s32 %s480_s14, %s520_s16  ;;  %s20_s18 = sadd.s32 1, %s476_s13 }
   0x4   : > { %p18_p0 = scmp.eq.s32.totalorder %s17_s17, 0  ;;  %p27_p1 = scmp.ne.s32.totalorder %s476_s13, %s472_s12 }
   0x5   : > { %p28_p2 = scmp.eq.s32.totalorder %s480_s14, 0  ;;  %p99_p3 = scmp.eq.s32.totalorder %s402_s15, 7 }
   0x6   : > { %s531_s19 = scalar_select %p18_p0, %s476_s13, %s20_s18  }
   0x7   : > { %p29_p4 = por %p28_p2, %p27_p1  ;;  %p533_p5 = por %p99_p3, %p27_p1 }
   0x8   : > { %p405_p6 = scmp.ge.s32.totalorder %s480_s14, 8 }
   0xa   : > { %127 = sbr.rel (%p405_p6) target bundleno = 25 (0x19), region = 24 }
  0x11   : > { %130 = sbr.rel (!%p29_p4) target bundleno = 25 (0x19), region = 28  ;;  %s132_s21 = sand.u32 (%p29_p4), 1, %s476_s13  }
  0x12   : > { %s421_s22 = sshll.u32 (%p29_p4), %s480_s14, 5  ;;  %s406_s23 = sshll.u32 (%p29_p4), %s132_s21, 6 }
  0x13   : > { %s137_s26 = scalar_lea.vmem (%p29_p4), %s575_s0, %s421_s22  ;;  %s134_s27 = scalar_lea.vmem (%p29_p4), [#allocation2], %s406_s23 }
  0x14   : > { %v150_v0 = vld [vmem:[%s137_s26] sm:$0xff] (%p29_p4)  ;;  %v152_v1 = vld [vmem:[%s137_s26 + $0x8] sm:$0xff] (%p29_p4)  ;;  %v154_v2 = vld [vmem:[%s137_s26 + $0x10] sm:$0xff] (%p29_p4) }
  0x15   : > { %151 = vst [vmem:[%s134_s27] sm:$0xff] (%p29_p4), %v150_v0  ;;  %153 = vst [vmem:[%s134_s27 + $0x8] sm:$0xff] (%p29_p4), %v152_v1  ;;  %v156_v3 = vld [vmem:[%s137_s26 + $0x18] sm:$0xff] (%p29_p4)  ;;  %v158_v4 = vld [vmem:[%s137_s26 + $0x100] sm:$0xff] (%p29_p4) }
  0x16   : > { %155 = vst [vmem:[%s134_s27 + $0x10] sm:$0xff] (%p29_p4), %v154_v2  ;;  %v160_v5 = vld [vmem:[%s137_s26 + $0x108] sm:$0xff] (%p29_p4)  ;;  %157 = vst [vmem:[%s134_s27 + $0x18] sm:$0xff] (%p29_p4), %v156_v3  ;;  %v162_v6 = vld [vmem:[%s137_s26 + $0x110] sm:$0xff] (%p29_p4) }
  0x17   : > { %159 = vst [vmem:[%s134_s27 + $0x20] sm:$0xff] (%p29_p4), %v158_v4  ;;  %161 = vst [vmem:[%s134_s27 + $0x28] sm:$0xff] (%p29_p4), %v160_v5  ;;  %v164_v7 = vld [vmem:[%s137_s26 + $0x118] sm:$0xff] (%p29_p4) }
  0x18   : > { %163 = vst [vmem:[%s134_s27 + $0x30] sm:$0xff] %v162_v6  ;;  %165 = vst [vmem:[%s134_s27 + $0x38] sm:$0xff] %v164_v7 }
  0x19 PF: > { %p409_p7 = scmp.ge.s32.totalorder %s480_s14, 1  ;;  %p170_p8 = scmp.lt.s32.totalorder %s480_s14, 9 }
  0x1b   : > { %p171_p9 = pnand %p409_p7, %p170_p8 }
  0x1c   : > { %v201_v8 = vld [vmem:[%s576_s1] sm:$0xff] (!%p171_p9)  ;;  %v202_v10 = vld [vmem:[%s576_s1 + $0x8] sm:$0xff] (!%p171_p9)  ;;  %v482_v11 = vmov (!%p171_p9), 0   ;;  %s177_s9 = sand.u32 (!%p171_p9), 1, %s472_s12  }
  0x1d   : > { %174 = sbr.rel (%p171_p9) target bundleno = 198 (0xc6), region = 51  ;;  %v205_v9 = vld [vmem:[%s577_s2] sm:$0xff] (!%p171_p9)  ;;  %452 = vset.pattern.permute.xlu0 (!%p171_p9), %v482_v11  ;;  %v203_v12 = vmul.f32 (!%p171_p9), 0.00024414063, %v201_v8  ;;  %v204_v14 = vmul.f32 (!%p171_p9), 0.00024414063, %v202_v10  ;;  %v206_v15 = vld [vmem:[%s577_s2 + $0x8] sm:$0xff] (!%p171_p9)  ;;  %453 = vset.pattern.permute.xlu1 (!%p171_p9), %v482_v11  ;;  %s410_s10 = sshll.u32 (!%p171_p9), %s177_s9, 6 }
  0x1e   : > { %v207_v13 = vmul.f32 (!%p171_p9), 0.00024414063, %v205_v9  ;;  %v208_v16 = vmul.f32 (!%p171_p9), 0.00024414063, %v206_v15  ;;  %s179_s11 = scalar_lea.vmem (!%p171_p9), [#allocation2], %s410_s10  ;;  %s411_s12 = sshll.u32 (!%p171_p9), %s177_s9, 5 }
  0x1f   : > { %227 = vperm.xlu0 (!%p171_p9), %452, %v203_v12   ;;  %v209_v17 = vmul.f32 (!%p171_p9), %v203_v12, %v203_v12  ;;  %v210_v18 = vmul.f32 (!%p171_p9), %v204_v14, %v204_v14  ;;  %v217_v26 = vld [vmem:[%s179_s11] sm:$0xff] (!%p171_p9)  ;;  %v218_v27 = vld [vmem:[%s179_s11 + $0x8] sm:$0xff] (!%p171_p9)  ;;  %v219_v28 = vld [vmem:[%s179_s11 + $0x10] sm:$0xff] (!%p171_p9)  ;;  %s198_s17 = scalar_lea.vmem (!%p171_p9), [#allocation3], %s411_s12 }
  0x20   : > { %v220_v29 = vld [vmem:[%s179_s11 + $0x18] sm:$0xff] (!%p171_p9)  ;;  %v221_v35 = vld [vmem:[%s179_s11 + $0x20] sm:$0xff] (!%p171_p9)  ;;  %v222_v36 = vld [vmem:[%s179_s11 + $0x28] sm:$0xff] (!%p171_p9) }
  0x21   : > { %v211_v19 = vsub.f32 (!%p171_p9), %v207_v13, %v209_v17  ;;  %v212_v20 = vsub.f32 (!%p171_p9), %v208_v16, %v210_v18  ;;  %v223_v37 = vld [vmem:[%s179_s11 + $0x30] sm:$0xff] (!%p171_p9)  ;;  %v224_v39 = vld [vmem:[%s179_s11 + $0x38] sm:$0xff] (!%p171_p9) }
  0x23   : > { %v213_v21 = vadd.f32 (!%p171_p9), 1e-05, %v211_v19  ;;  %v214_v22 = vadd.f32 (!%p171_p9), 1e-05, %v212_v20  ;;  %232 = vperm.xlu0 (!%p171_p9), %452, %v204_v14  }
  0x24   : > { %s426_s18 = sshll.u32 (%p533_p5), %s402_s15, 4 }
  0x25   : > { %454 = vrsqrt.f32 %v213_v21  ;;  %s322_s23 = scalar_lea.vmem (%p533_p5), %s578_s3, %s426_s18 }
  0x26   : > { %456 = vrsqrt.f32 %v214_v22 }
  0x2f   : > { %v455_v23 = vpop.eup %454 }
  0x30   : > { %245 = vperm.xlu1 %453, %v455_v23   ;;  %v457_v24 = vpop.eup %456 }
  0x34   : > { %250 = vperm.xlu1 %453, %v457_v24  }
  0x9e   : > { %v228_v25 = vpop.permute.xlu0 %227 }
  0x9f   : > { %v235_v30 = vsub.f32 %v217_v26, %v228_v25  ;;  %v236_v31 = vsub.f32 %v218_v27, %v228_v25  ;;  %v237_v32 = vsub.f32 %v219_v28, %v228_v25  ;;  %v238_v33 = vsub.f32 %v220_v29, %v228_v25 }
  0xa2   : > { %v233_v34 = vpop.permute.xlu0 %232 }
  0xa3   : > { %v239_v44 = vsub.f32 %v221_v35, %v233_v34  ;;  %v240_v45 = vsub.f32 %v222_v36, %v233_v34  ;;  %v241_v46 = vsub.f32 %v223_v37, %v233_v34  ;;  %v242_v47 = vsub.f32 %v224_v39, %v233_v34 }
  0xaf   : > { %v246_v38 = vpop.permute.xlu1 %245 }
  0xb0   : > { %v253_v40 = vmul.f32 %v246_v38, %v235_v30  ;;  %v254_v41 = vmul.f32 %v246_v38, %v236_v31  ;;  %v255_v42 = vmul.f32 %v246_v38, %v237_v32  ;;  %v256_v43 = vmul.f32 %v246_v38, %v238_v33 }
  0xb2   : > { %vm261_vm0 = vcmp.ge.f32.partialorder %v253_v40, 0.0  ;;  %vm262_vm1 = vcmp.ge.f32.partialorder %v254_v41, 0.0  ;;  %vm263_vm2 = vcmp.ge.f32.partialorder %v255_v42, 0.0  ;;  %vm264_vm3 = vcmp.ge.f32.partialorder %v256_v43, 0.0 }
  0xb3   : > { %v269_v48 = vmul.f32 0.2, %v253_v40  ;;  %v270_v49 = vmul.f32 0.2, %v254_v41  ;;  %v271_v50 = vmul.f32 0.2, %v255_v42  ;;  %v251_v51 = vpop.permute.xlu1 %250 }
  0xb4   : > { %v272_v52 = vmul.f32 0.2, %v256_v43  ;;  %v257_v53 = vmul.f32 %v251_v51, %v239_v44  ;;  %v258_v54 = vmul.f32 %v251_v51, %v240_v45  ;;  %v259_v55 = vmul.f32 %v251_v51, %v241_v46 }
  0xb5   : > { %v277_v56 = vsel %vm261_vm0, %v253_v40, %v269_v48  ;;  %v278_v57 = vsel %vm262_vm1, %v254_v41, %v270_v49  ;;  %v279_v58 = vsel %vm263_vm2, %v255_v42, %v271_v50  ;;  %v260_v59 = vmul.f32 %v251_v51, %v242_v47 }
  0xb6   : > { %v280_v60 = vsel %vm264_vm3, %v256_v43, %v272_v52  ;;  %v422_v61 = vpack.c.bf16 %v278_v57, %v277_v56  ;;  %vm265_vm4 = vcmp.ge.f32.partialorder %v257_v53, 0.0  ;;  %vm266_vm5 = vcmp.ge.f32.partialorder %v258_v54, 0.0 }
  0xb7   : > { %v423_v62 = vpack.c.bf16 %v280_v60, %v279_v58  ;;  %vm267_vm6 = vcmp.ge.f32.partialorder %v259_v55, 0.0  ;;  %vm268_vm7 = vcmp.ge.f32.partialorder %v260_v59, 0.0  ;;  %v273_v63 = vmul.f32 0.2, %v257_v53  ;;  %319 = sbr.rel (!%p533_p5) target bundleno = 198 (0xc6), region = 59 }
  0xb8   : > { %309 = vst [vmem:[%s198_s17] sm:$0xff] %v422_v61  ;;  %v274_v0 = vmul.f32 0.2, %v258_v54  ;;  %v275_v1 = vmul.f32 0.2, %v259_v55  ;;  %v276_v2 = vmul.f32 0.2, %v260_v59 }
  0xb9   : > { %310 = vst [vmem:[%s198_s17 + $0x8] sm:$0xff] %v423_v62  ;;  %v281_v3 = vsel %vm265_vm4, %v257_v53, %v273_v63 }
  0xba   : > { %v282_v4 = vsel %vm266_vm5, %v258_v54, %v274_v0  ;;  %v283_v5 = vsel %vm267_vm6, %v259_v55, %v275_v1  ;;  %v284_v6 = vsel %vm268_vm7, %v260_v59, %v276_v2 }
  0xbb   : > { %v424_v7 = vpack.c.bf16 %v282_v4, %v281_v3  ;;  %v425_v8 = vpack.c.bf16 %v284_v6, %v283_v5 }
  0xbd   : > { %311 = vst [vmem:[%s198_s17 + $0x10] sm:$0xff] %v424_v7  ;;  %312 = vst [vmem:[%s198_s17 + $0x18] sm:$0xff] %v425_v8 }
  0xbf   : > { %v335_v9 = vld [vmem:[%s198_s17] sm:$0xff] }
  0xc0   : > { %v337_v10 = vld [vmem:[%s198_s17 + $0x8] sm:$0xff]  ;;  %336 = vst [vmem:[%s322_s23] sm:$0xff] %v335_v9 }
  0xc1   : > { %338 = vst [vmem:[%s322_s23 + $0x8] sm:$0xff] %v337_v10 }
  0xc4   : > { %v339_v11 = vld [vmem:[%s198_s17 + $0x10] sm:$0xff]  ;;  %v341_v12 = vld [vmem:[%s198_s17 + $0x18] sm:$0xff] }
  0xc5   : > { %340 = vst [vmem:[%s322_s23 + $0x80] sm:$0xff] %v339_v11  ;;  %342 = vst [vmem:[%s322_s23 + $0x88] sm:$0xff] %v341_v12 }
  0xc6 PF: > { %p10_p10 = scmp.ge.s32.totalorder %s520_s16, 10   ;;  %s580_s12 = smov %s476_s13 }
  0xc7   : > { %s581_s13 = smov %s531_s19  ;;  %s582_s14 = smov %s520_s16 }
  0xc8   :  { %12 = sbr.rel (!%p10_p10) target bundleno = 2 (0x2), region = 113 }

// kernel: unet_forward.26
= control target key start
LH: loop header
LB: loop body
LE: loop exit
PB: predicated region body
PF: predicated region fallthrough
CT: control target
= control target key end

     0   :  { %v269_v0 = vmov 0   ;;  %s420_s1 = inlined_call_operand.vmem [shape: f32[32,1], index: 1, kind: input, shape index: {}]   ;;  %s421_s2 = inlined_call_operand.vmem [shape: f32[32,1], index: 2, kind: input, shape index: {}]   ;;  %s422_s0 = inlined_call_operand.vmem [shape: f32[32,512], index: 0, kind: input, shape index: {}]   ;;  %s423_s3 = inlined_call_operand.vmem [shape: bf16[32,512], index: 3, kind: output, shape index: {}]  }
   0x1   :  { %260 = vset.pattern.permute.xlu1 %v269_v0  ;;  %259 = vset.pattern.permute.xlu0 %v269_v0  ;;  %v16_v1 = vld [vmem:[%s420_s1 + $0x10] sm:$0xff]  ;;  %v14_v3 = vld [vmem:[%s420_s1] sm:$0xff]  ;;  %v17_v8 = vld [vmem:[%s420_s1 + $0x18] sm:$0xff] }
   0x2   :  { %v24_v2 = vld [vmem:[%s421_s2 + $0x10] sm:$0xff]  ;;  %v20_v4 = vmul.f32 0.001953125, %v16_v1  ;;  %v18_v6 = vmul.f32 0.001953125, %v14_v3  ;;  %v22_v7 = vld [vmem:[%s421_s2] sm:$0xff]  ;;  %v25_v9 = vld [vmem:[%s421_s2 + $0x18] sm:$0xff]  ;;  %v21_v11 = vmul.f32 0.001953125, %v17_v8 }
   0x3   :  { %v28_v5 = vmul.f32 0.001953125, %v24_v2  ;;  %v26_v10 = vmul.f32 0.001953125, %v22_v7  ;;  %v29_v12 = vmul.f32 0.001953125, %v25_v9  ;;  %v15_v13 = vld [vmem:[%s420_s1 + $0x8] sm:$0xff]  ;;  %v46_v35 = vld [vmem:[%s422_s0] sm:$0xff]  ;;  %v48_v37 = vld [vmem:[%s422_s0 + $0x10] sm:$0xff] }
   0x4   :  { %v23_v14 = vld [vmem:[%s421_s2 + $0x8] sm:$0xff]  ;;  %74 = vperm.xlu1 %260, %v20_v4   ;;  %v32_v15 = vmul.f32 %v20_v4, %v20_v4  ;;  %64 = vperm.xlu0 %259, %v18_v6   ;;  %v30_v16 = vmul.f32 %v18_v6, %v18_v6  ;;  %v19_v17 = vmul.f32 0.001953125, %v15_v13  ;;  %v33_v19 = vmul.f32 %v21_v11, %v21_v11  ;;  %v49_v38 = vld [vmem:[%s422_s0 + $0x18] sm:$0xff]  ;;  %v50_v39 = vld [vmem:[%s422_s0 + $0x20] sm:$0xff] }
   0x5   :  { %v27_v18 = vmul.f32 0.001953125, %v23_v14  ;;  %v47_v36 = vld [vmem:[%s422_s0 + $0x8] sm:$0xff]  ;;  %v54_v40 = vld [vmem:[%s422_s0 + $0x40] sm:$0xff]  ;;  %v342_v43 = vld [vmem:[%s422_s0 + $0x50] sm:$0xff] }
   0x6   :  { %v36_v20 = vsub.f32 %v28_v5, %v32_v15  ;;  %v34_v21 = vsub.f32 %v26_v10, %v30_v16  ;;  %v31_v22 = vmul.f32 %v19_v17, %v19_v17  ;;  %v37_v23 = vsub.f32 %v29_v12, %v33_v19  ;;  %v337_v42 = vld [vmem:[%s422_s0 + $0x48] sm:$0xff]  ;;  %v347_v44 = vld [vmem:[%s422_s0 + $0x58] sm:$0xff]  ;;  %v52_v46 = vld [vmem:[%s422_s0 + $0x30] sm:$0xff] }
   0x7   :  { %v51_v45 = vld [vmem:[%s422_s0 + $0x28] sm:$0xff]  ;;  %v53_v47 = vld [vmem:[%s422_s0 + $0x38] sm:$0xff]  ;;  %v58_v53 = vld [vmem:[%s422_s0 + $0x60] sm:$0xff] }
   0x8   :  { %v40_v24 = vadd.f32 1e-05, %v36_v20  ;;  %v38_v25 = vadd.f32 1e-05, %v34_v21  ;;  %79 = vperm.xlu1 %260, %v21_v11   ;;  %v35_v26 = vsub.f32 %v27_v18, %v31_v22  ;;  %69 = vperm.xlu0 %259, %v19_v17   ;;  %v41_v28 = vadd.f32 1e-05, %v37_v23 }
   0x9   :  { %v59_v54 = vld [vmem:[%s422_s0 + $0x68] sm:$0xff]  ;;  %v60_v55 = vld [vmem:[%s422_s0 + $0x70] sm:$0xff]  ;;  %v61_v56 = vld [vmem:[%s422_s0 + $0x78] sm:$0xff] }
   0xa   :  { %v39_v27 = vadd.f32 1e-05, %v35_v26  ;;  %261 = vrsqrt.f32 %v38_v25 }
   0xb   :  { %263 = vrsqrt.f32 %v40_v24 }
   0xc   :  { %265 = vrsqrt.f32 %v39_v27 }
   0xd   :  { %267 = vrsqrt.f32 %v41_v28 }
  0x14   :  { %v262_v29 = vpop.eup %261 }
  0x15   :  { %v264_v30 = vpop.eup %263  ;;  %100 = vperm.xlu0 %259, %v262_v29  }
  0x16   :  { %v266_v31 = vpop.eup %265 }
  0x17   :  { %105 = vperm.xlu1 %260, %v266_v31   ;;  %v268_v32 = vpop.eup %267 }
  0x19   :  { %110 = vperm.xlu0 %259, %v264_v30  }
  0x1b   :  { %115 = vperm.xlu1 %260, %v268_v32  }
  0x83   :  { %v65_v33 = vpop.permute.xlu0 %64  ;;  %v314_v34 = vpop.permute.xlu1 %74 }
  0x84   :  { %v82_v48 = vsub.f32 %v46_v35, %v65_v33  ;;  %v83_v49 = vsub.f32 %v47_v36, %v65_v33  ;;  %v84_v50 = vsub.f32 %v48_v37, %v65_v33  ;;  %v85_v51 = vsub.f32 %v49_v38, %v65_v33 }
  0x85   :  { %v90_v57 = vsub.f32 %v54_v40, %v314_v34  ;;  %v91_v58 = vsub.f32 %v337_v42, %v314_v34  ;;  %v92_v59 = vsub.f32 %v342_v43, %v314_v34  ;;  %v93_v60 = vsub.f32 %v347_v44, %v314_v34 }
  0x87   :  { %v70_v41 = vpop.permute.xlu0 %69  ;;  %v358_v52 = vpop.permute.xlu1 %79 }
  0x88   :  { %v86_v61 = vsub.f32 %v50_v39, %v70_v41  ;;  %v87_v62 = vsub.f32 %v51_v45, %v70_v41  ;;  %v88_v63 = vsub.f32 %v52_v46, %v70_v41  ;;  %v89_v0 = vsub.f32 %v53_v47, %v70_v41 }
  0x89   :  { %v94_v7 = vsub.f32 %v58_v53, %v358_v52  ;;  %v95_v8 = vsub.f32 %v59_v54, %v358_v52  ;;  %v96_v9 = vsub.f32 %v60_v55, %v358_v52  ;;  %v97_v10 = vsub.f32 %v61_v56, %v358_v52 }
  0x94   :  { %v101_v1 = vpop.permute.xlu0 %100 }
  0x95   :  { %v118_v2 = vmul.f32 %v101_v1, %v82_v48  ;;  %v119_v3 = vmul.f32 %v101_v1, %v83_v49  ;;  %v120_v4 = vmul.f32 %v101_v1, %v84_v50  ;;  %v121_v5 = vmul.f32 %v101_v1, %v85_v51 }
  0x96   :  { %v106_v6 = vpop.permute.xlu1 %105 }
  0x97   :  { %v122_v11 = vmul.f32 %v106_v6, %v86_v61  ;;  %v123_v12 = vmul.f32 %v106_v6, %v87_v62  ;;  %v124_v13 = vmul.f32 %v106_v6, %v88_v63  ;;  %v125_v14 = vmul.f32 %v106_v6, %v89_v0 }
  0x98   :  { %vm134_vm0 = vcmp.ge.f32.partialorder %v118_v2, 0.0  ;;  %vm135_vm1 = vcmp.ge.f32.partialorder %v119_v3, 0.0  ;;  %vm136_vm2 = vcmp.ge.f32.partialorder %v120_v4, 0.0  ;;  %vm137_vm3 = vcmp.ge.f32.partialorder %v121_v5, 0.0  ;;  %v111_v15 = vpop.permute.xlu0 %110 }
  0x99   :  { %vm138_vm4 = vcmp.ge.f32.partialorder %v122_v11, 0.0  ;;  %vm139_vm5 = vcmp.ge.f32.partialorder %v123_v12, 0.0  ;;  %vm140_vm6 = vcmp.ge.f32.partialorder %v124_v13, 0.0  ;;  %vm141_vm7 = vcmp.ge.f32.partialorder %v125_v14, 0.0 }
  0x9a   :  { %v154_v16 = vmul.f32 0.2, %v122_v11  ;;  %v155_v17 = vmul.f32 0.2, %v123_v12  ;;  %v156_v18 = vmul.f32 0.2, %v124_v13  ;;  %v116_v19 = vpop.permute.xlu1 %115  ;;  %v126_v20 = vmul.f32 %v111_v15, %v90_v57 }
  0x9b   :  { %v157_v21 = vmul.f32 0.2, %v125_v14  ;;  %v150_v22 = vmul.f32 0.2, %v118_v2  ;;  %v151_v23 = vmul.f32 0.2, %v119_v3  ;;  %v130_v24 = vmul.f32 %v116_v19, %v94_v7 }
  0x9c   :  { %v170_v25 = vsel %vm138_vm4, %v122_v11, %v154_v16  ;;  %v171_v26 = vsel %vm139_vm5, %v123_v12, %v155_v17  ;;  %v172_v27 = vsel %vm140_vm6, %v124_v13, %v156_v18  ;;  %v152_v28 = vmul.f32 0.2, %v120_v4 }
  0x9d   :  { %v173_v29 = vsel %vm141_vm7, %v125_v14, %v157_v21  ;;  %v252_v30 = vpack.c.bf16 %v171_v26, %v170_v25  ;;  %v153_v31 = vmul.f32 0.2, %v121_v5  ;;  %v166_v32 = vsel %vm134_vm0, %v118_v2, %v150_v22 }
  0x9e   :  { %v253_v33 = vpack.c.bf16 %v173_v29, %v172_v27  ;;  %v167_v35 = vsel %vm135_vm1, %v119_v3, %v151_v23  ;;  %v168_v36 = vsel %vm136_vm2, %v120_v4, %v152_v28  ;;  %v131_v37 = vmul.f32 %v116_v19, %v95_v8 }
  0x9f   :  { %232 = vst [vmem:[%s423_s3 + $0x10] sm:$0xff] %v252_v30  ;;  %v169_v38 = vsel %vm137_vm3, %v121_v5, %v153_v31  ;;  %v250_v39 = vpack.c.bf16 %v167_v35, %v166_v32  ;;  %v132_v40 = vmul.f32 %v116_v19, %v96_v9  ;;  %v133_v41 = vmul.f32 %v116_v19, %v97_v10 }
  0xa0   :  { %233 = vst [vmem:[%s423_s3 + $0x18] sm:$0xff] %v253_v33  ;;  %v251_v45 = vpack.c.bf16 %v169_v38, %v168_v36  ;;  %vm146_vm8 = vcmp.ge.f32.partialorder %v130_v24, 0.0  ;;  %vm147_vm9 = vcmp.ge.f32.partialorder %v131_v37, 0.0  ;;  %v162_v46 = vmul.f32 0.2, %v130_v24 }
  0xa1   :  { %230 = vst [vmem:[%s423_s3] sm:$0xff] %v250_v39  ;;  %vm148_vm10 = vcmp.ge.f32.partialorder %v132_v40, 0.0  ;;  %vm149_vm11 = vcmp.ge.f32.partialorder %v133_v41, 0.0  ;;  %v163_v47 = vmul.f32 0.2, %v131_v37  ;;  %v164_v48 = vmul.f32 0.2, %v132_v40 }
  0xa2   :  { %231 = vst [vmem:[%s423_s3 + $0x8] sm:$0xff] %v251_v45  ;;  %v165_v49 = vmul.f32 0.2, %v133_v41  ;;  %v178_v50 = vsel %vm146_vm8, %v130_v24, %v162_v46  ;;  %v127_v51 = vmul.f32 %v111_v15, %v91_v58  ;;  %v128_v52 = vmul.f32 %v111_v15, %v92_v59 }
  0xa3   :  { %v179_v53 = vsel %vm147_vm9, %v131_v37, %v163_v47  ;;  %v180_v54 = vsel %vm148_vm10, %v132_v40, %v164_v48  ;;  %v129_v55 = vmul.f32 %v111_v15, %v93_v60  ;;  %vm142_vm12 = vcmp.ge.f32.partialorder %v126_v20, 0.0 }
  0xa4   :  { %v181_v56 = vsel %vm149_vm11, %v133_v41, %v165_v49  ;;  %v256_v57 = vpack.c.bf16 %v179_v53, %v178_v50  ;;  %vm143_vm13 = vcmp.ge.f32.partialorder %v127_v51, 0.0  ;;  %vm144_vm14 = vcmp.ge.f32.partialorder %v128_v52, 0.0 }
  0xa5   :  { %v257_v61 = vpack.c.bf16 %v181_v56, %v180_v54  ;;  %vm145_vm15 = vcmp.ge.f32.partialorder %v129_v55, 0.0  ;;  %v158_v62 = vmul.f32 0.2, %v126_v20  ;;  %v159_v42 = vmul.f32 0.2, %v127_v51 }
  0xa6   :  { %236 = vst [vmem:[%s423_s3 + $0x30] sm:$0xff] %v256_v57  ;;  %v160_v43 = vmul.f32 0.2, %v128_v52  ;;  %v161_v58 = vmul.f32 0.2, %v129_v55 }
  0xa7   :  { %237 = vst [vmem:[%s423_s3 + $0x38] sm:$0xff] %v257_v61  ;;  %v174_v34 = vsel %vm142_vm12, %v126_v20, %v158_v62  ;;  %v175_v44 = vsel %vm143_vm13, %v127_v51, %v159_v42 }
  0xa8   :  { %v176_v59 = vsel %vm144_vm14, %v128_v52, %v160_v43  ;;  %v177_v60 = vsel %vm145_vm15, %v129_v55, %v161_v58  ;;  %v254_v63 = vpack.c.bf16 %v175_v44, %v174_v34 }
  0xa9   :  { %v255_v0 = vpack.c.bf16 %v177_v60, %v176_v59 }
  0xaa   :  { %234 = vst [vmem:[%s423_s3 + $0x20] sm:$0xff] %v254_v63 }
  0xab   :  { %235 = vst [vmem:[%s423_s3 + $0x28] sm:$0xff] %v255_v0 }

// kernel: unet_forward.25
= control target key start
LH: loop header
LB: loop body
LE: loop exit
PB: predicated region body
PF: predicated region fallthrough
CT: control target
= control target key end

     0   :  { %vm722_vm0 = vcmask 392192   ;;  %vm19_vm1 = vcmask 7168   ;;  %s1883_s0 = inlined_call_operand.vmem [shape: bf16[432,512], index: 0, kind: input, shape index: {}]   ;;  %s1884_s1 = inlined_call_operand.vmem [shape: bf16[32,432], index: 1, kind: input, shape index: {}]   ;;  %s1885_s3 = inlined_call_operand.vmem [shape: f32[32,1], index: 3, kind: output, shape index: {1}]   ;;  %s1886_s2 = inlined_call_operand.vmem [shape: f32[32,512], index: 2, kind: output, shape index: {0}]   ;;  %s1887_s4 = inlined_call_operand.vmem [shape: f32[32,1], index: 4, kind: output, shape index: {2}]  }
   0x1   :  { %v1187_v0 = vld [vmem:[%s1883_s0 + $0x4] ss:$16 sps:$4 sm:$0xff]   ;;  %v1189_v1 = vld [vmem:[%s1883_s0 + $0xc] ss:$16 sps:$4 sm:$0xff]   ;;  %v1191_v2 = vld [vmem:[%s1883_s0] ss:$16 sps:$4 sm:$0xff]  }
   0x2   :  { %729 = vmatprep.subr.bf16.mxu0 %v1187_v0  ;;  %v1192_v3 = vld [vmem:[%s1883_s0 + $0x8] ss:$16 sps:$4 sm:$0xff]   ;;  %835 = vmatprep.subr.bf16.mxu1 %v1189_v1  ;;  %v1193_v4 = vld [vmem:[%s1883_s0 + $0x24] ss:$16 sps:$4 sm:$0xff]   ;;  %v1195_v5 = vld [vmem:[%s1883_s0 + $0x2c] ss:$16 sps:$4 sm:$0xff]  }
   0x3   :  { %730 = vmatpush1.bf16.msra.mxu0 %v1191_v2  ;;  %836 = vmatpush1.bf16.msra.mxu1 %v1192_v3  ;;  %v1197_v6 = vld [vmem:[%s1883_s0 + $0x20] ss:$16 sps:$4 sm:$0xff]   ;;  %v1198_v7 = vld [vmem:[%s1883_s0 + $0x28] ss:$16 sps:$4 sm:$0xff]   ;;  %v1199_v8 = vld [vmem:[%s1883_s0 + $0x44] ss:$16 sps:$4 sm:$0xff]  }
   0x4   :  { %731 = vmatprep.subr.bf16.mxu0 %v1193_v4  ;;  %837 = vmatprep.subr.bf16.mxu1 %v1195_v5  ;;  %v1201_v9 = vld [vmem:[%s1883_s0 + $0x4c] ss:$16 sps:$4 sm:$0xff]   ;;  %v1203_v10 = vld [vmem:[%s1883_s0 + $0x40] ss:$16 sps:$4 sm:$0xff]   ;;  %v1204_v11 = vld [vmem:[%s1883_s0 + $0x48] ss:$16 sps:$4 sm:$0xff]  }
   0x5   :  { %v1205_v12 = vld [vmem:[%s1883_s0 + $0x64] ss:$16 sps:$4 sm:$0xff]   ;;  %v1207_v13 = vld [vmem:[%s1883_s0 + $0x6c] ss:$16 sps:$4 sm:$0xff]   ;;  %v1209_v14 = vld [vmem:[%s1883_s0 + $0x60] ss:$16 sps:$4 sm:$0xff]  }
   0x6   :  { %v1210_v15 = vld [vmem:[%s1883_s0 + $0x68] ss:$16 sps:$4 sm:$0xff]   ;;  %v1211_v16 = vld [vmem:[%s1883_s0 + $0x84] ss:$16 sps:$4 sm:$0xff]   ;;  %v1213_v17 = vld [vmem:[%s1883_s0 + $0x8c] ss:$16 sps:$4 sm:$0xff]  }
   0x7   :  { %732 = vmatpush1.bf16.msra.mxu0 %v1197_v6  ;;  %838 = vmatpush1.bf16.msra.mxu1 %v1198_v7  ;;  %v1215_v18 = vld [vmem:[%s1883_s0 + $0x80] ss:$16 sps:$4 sm:$0xff]   ;;  %v1216_v19 = vld [vmem:[%s1883_s0 + $0x88] ss:$16 sps:$4 sm:$0xff]   ;;  %v1217_v20 = vld [vmem:[%s1883_s0 + $0xa4] ss:$16 sps:$4 sm:$0xff]  }
   0x8   :  { %733 = vmatprep.subr.bf16.mxu0 %v1199_v8  ;;  %839 = vmatprep.subr.bf16.mxu1 %v1201_v9  ;;  %v1219_v21 = vld [vmem:[%s1883_s0 + $0xac] ss:$16 sps:$4 sm:$0xff]   ;;  %v1221_v22 = vld [vmem:[%s1883_s0 + $0xa0] ss:$16 sps:$4 sm:$0xff]   ;;  %v1222_v23 = vld [vmem:[%s1883_s0 + $0xa8] ss:$16 sps:$4 sm:$0xff]  }
   0x9   :  { %v1223_v24 = vld [vmem:[%s1883_s0 + $0xc4] ss:$16 sps:$4 sm:$0xff]   ;;  %v1225_v25 = vld [vmem:[%s1883_s0 + $0xcc] ss:$16 sps:$4 sm:$0xff]   ;;  %v1227_v26 = vld [vmem:[%s1883_s0 + $0xc0] ss:$16 sps:$4 sm:$0xff]  }
   0xa   :  { %v1228_v27 = vld [vmem:[%s1883_s0 + $0xc8] ss:$16 sps:$4 sm:$0xff]   ;;  %v1229_v28 = vld [vmem:[%s1883_s0 + $0xe4] ss:$16 sps:$4 sm:$0xff]   ;;  %v1231_v29 = vld [vmem:[%s1883_s0 + $0xec] ss:$16 sps:$4 sm:$0xff]  }
   0xb   :  { %734 = vmatpush1.bf16.msra.mxu0 %v1203_v10  ;;  %840 = vmatpush1.bf16.msra.mxu1 %v1204_v11  ;;  %v1233_v30 = vld [vmem:[%s1883_s0 + $0xe0] ss:$16 sps:$4 sm:$0xff]   ;;  %v1234_v31 = vld [vmem:[%s1883_s0 + $0xe8] ss:$16 sps:$4 sm:$0xff]   ;;  %v1235_v32 = vld [vmem:[%s1883_s0 + $0x104] ss:$16 sps:$4 sm:$0xff]  }
   0xc   :  { %735 = vmatprep.subr.bf16.mxu0 %v1205_v12  ;;  %841 = vmatprep.subr.bf16.mxu1 %v1207_v13  ;;  %v1237_v33 = vld [vmem:[%s1883_s0 + $0x10c] ss:$16 sps:$4 sm:$0xff]   ;;  %v1239_v34 = vld [vmem:[%s1883_s0 + $0x100] ss:$16 sps:$4 sm:$0xff]   ;;  %v1240_v35 = vld [vmem:[%s1883_s0 + $0x108] ss:$16 sps:$4 sm:$0xff]  }
   0xd   :  { %v1241_v36 = vld [vmem:[%s1883_s0 + $0x124] ss:$16 sps:$4 sm:$0xff]   ;;  %v1243_v37 = vld [vmem:[%s1883_s0 + $0x12c] ss:$16 sps:$4 sm:$0xff]   ;;  %v1245_v38 = vld [vmem:[%s1883_s0 + $0x120] ss:$16 sps:$4 sm:$0xff]  }
   0xe   :  { %v1246_v39 = vld [vmem:[%s1883_s0 + $0x128] ss:$16 sps:$4 sm:$0xff]   ;;  %v1247_v40 = vld [vmem:[%s1883_s0 + $0x144] ss:$16 sps:$4 sm:$0xff]   ;;  %v1249_v41 = vld [vmem:[%s1883_s0 + $0x14c] ss:$16 sps:$4 sm:$0xff]  }
   0xf   :  { %736 = vmatpush1.bf16.msra.mxu0 %v1209_v14  ;;  %842 = vmatpush1.bf16.msra.mxu1 %v1210_v15  ;;  %v1251_v42 = vld [vmem:[%s1883_s0 + $0x140] ss:$16 sps:$4 sm:$0xff]   ;;  %v1252_v43 = vld [vmem:[%s1883_s0 + $0x148] ss:$16 sps:$4 sm:$0xff]   ;;  %v1253_v44 = vld [vmem:[%s1883_s0 + $0x164] ss:$16 sps:$4 sm:$0xff]  }
  0x10   :  { %737 = vmatprep.subr.bf16.mxu0 %v1211_v16  ;;  %843 = vmatprep.subr.bf16.mxu1 %v1213_v17  ;;  %v1255_v45 = vld [vmem:[%s1883_s0 + $0x16c] ss:$16 sps:$4 sm:$0xff]   ;;  %v1257_v46 = vld [vmem:[%s1883_s0 + $0x160] ss:$16 sps:$4 sm:$0xff]   ;;  %v1258_v47 = vld [vmem:[%s1883_s0 + $0x168] ss:$16 sps:$4 sm:$0xff]  }
  0x11   :  { %v1285_v48 = vld [vmem:[%s1884_s1 + $0x4] ss:$16 sps:$4 sm:$0xff]   ;;  %v1261_v50 = vld [vmem:[%s1883_s0 + $0x18c] ss:$16 sps:$4 sm:$0xff]   ;;  %v1263_v51 = vld [vmem:[%s1883_s0 + $0x180] ss:$16 sps:$4 sm:$0xff]  }
  0x12   :  { %v1259_v49 = vld [vmem:[%s1883_s0 + $0x184] ss:$16 sps:$4 sm:$0xff]   ;;  %761 = vmatprep.mubr.bf16.mxu0 %v1285_v48  ;;  %867 = vmatprep.mubr.bf16.mxu1 %v1285_v48  ;;  %v1264_v52 = vld [vmem:[%s1883_s0 + $0x188] ss:$16 sps:$4 sm:$0xff]   ;;  %v1267_v54 = vld [vmem:[%s1883_s0 + $0x1ac] ss:$16 sps:$4 sm:$0xff]  }
  0x13   :  { %738 = vmatpush1.bf16.msra.mxu0 %v1215_v18  ;;  %844 = vmatpush1.bf16.msra.mxu1 %v1216_v19  ;;  %v1265_v53 = vld [vmem:[%s1883_s0 + $0x1a4] ss:$16 sps:$4 sm:$0xff]   ;;  %v1269_v55 = vld [vmem:[%s1883_s0 + $0x1a0] ss:$16 sps:$4 sm:$0xff]   ;;  %v1270_v56 = vld [vmem:[%s1883_s0 + $0x1a8] ss:$16 sps:$4 sm:$0xff]  }
  0x14   :  { %739 = vmatprep.subr.bf16.mxu0 %v1217_v20  ;;  %845 = vmatprep.subr.bf16.mxu1 %v1219_v21  ;;  %v1271_v57 = vld [vmem:[%s1883_s0 + $0x1c4] ss:$16 sps:$4 sm:$0xff]   ;;  %v1273_v58 = vld [vmem:[%s1883_s0 + $0x1cc] ss:$16 sps:$4 sm:$0xff]   ;;  %v1275_v59 = vld [vmem:[%s1883_s0 + $0x1c0] ss:$16 sps:$4 sm:$0xff]  }
  0x15   :  { %v1276_v60 = vld [vmem:[%s1883_s0 + $0x1c8] ss:$16 sps:$4 sm:$0xff]   ;;  %v1277_v61 = vld [vmem:[%s1883_s0 + $0x1e4] ss:$16 sps:$4 sm:$0xff]   ;;  %v1279_v62 = vld [vmem:[%s1883_s0 + $0x1ec] ss:$16 sps:$4 sm:$0xff]  }
  0x16   :  { %v1281_v63 = vld [vmem:[%s1883_s0 + $0x1e0] ss:$16 sps:$4 sm:$0xff]   ;;  %v1282_v0 = vld [vmem:[%s1883_s0 + $0x1e8] ss:$16 sps:$4 sm:$0xff]   ;;  %v1288_v1 = vld [vmem:[%s1883_s0 + $0x204] ss:$16 sps:$4 sm:$0xff]  }
  0x17   :  { %740 = vmatpush1.bf16.msra.mxu0 %v1221_v22  ;;  %846 = vmatpush1.bf16.msra.mxu1 %v1222_v23  ;;  %v1291_v2 = vld [vmem:[%s1883_s0 + $0x20c] ss:$16 sps:$4 sm:$0xff]   ;;  %v1283_v3 = vld [vmem:[%s1884_s1] ss:$16 sps:$4 sm:$0xff]   ;;  %v1289_v5 = vld [vmem:[%s1883_s0 + $0x208] ss:$16 sps:$4 sm:$0xff]  }
  0x18   :  { %741 = vmatprep.subr.bf16.mxu0 %v1223_v24  ;;  %847 = vmatprep.subr.bf16.mxu1 %v1225_v25  ;;  %v1286_v4 = vld [vmem:[%s1883_s0 + $0x200] ss:$16 sps:$4 sm:$0xff]   ;;  %v1294_v6 = vld [vmem:[%s1883_s0 + $0x224] ss:$16 sps:$4 sm:$0xff]   ;;  %v1297_v7 = vld [vmem:[%s1883_s0 + $0x22c] ss:$16 sps:$4 sm:$0xff]  }
  0x19   :  { %v1292_v8 = vld [vmem:[%s1883_s0 + $0x220] ss:$16 sps:$4 sm:$0xff]   ;;  %v1295_v9 = vld [vmem:[%s1883_s0 + $0x228] ss:$16 sps:$4 sm:$0xff]   ;;  %v1300_v10 = vld [vmem:[%s1883_s0 + $0x244] ss:$16 sps:$4 sm:$0xff]  }
  0x1a   :  { %v1340_v11 = vld [vmem:[%s1884_s1 + $0x24] ss:$16 sps:$4 sm:$0xff]   ;;  %v1303_v12 = vld [vmem:[%s1883_s0 + $0x24c] ss:$16 sps:$4 sm:$0xff]   ;;  %v1298_v13 = vld [vmem:[%s1883_s0 + $0x240] ss:$16 sps:$4 sm:$0xff]  }
  0x1b   :  { %742 = vmatpush1.bf16.msra.mxu0 %v1227_v26  ;;  %848 = vmatpush1.bf16.msra.mxu1 %v1228_v27  ;;  %v1301_v14 = vld [vmem:[%s1883_s0 + $0x248] ss:$16 sps:$4 sm:$0xff]   ;;  %v1342_v15 = vld [vmem:[%s1884_s1 + $0x20] ss:$16 sps:$4 sm:$0xff]   ;;  %v1306_v16 = vld [vmem:[%s1883_s0 + $0x264] ss:$16 sps:$4 sm:$0xff]  }
  0x1c   :  { %743 = vmatprep.subr.bf16.mxu0 %v1229_v28  ;;  %849 = vmatprep.subr.bf16.mxu1 %v1231_v29  ;;  %v1309_v17 = vld [vmem:[%s1883_s0 + $0x26c] ss:$16 sps:$4 sm:$0xff]   ;;  %v1304_v18 = vld [vmem:[%s1883_s0 + $0x260] ss:$16 sps:$4 sm:$0xff]   ;;  %v1307_v20 = vld [vmem:[%s1883_s0 + $0x268] ss:$16 sps:$4 sm:$0xff]  }
  0x1d   :  { %v1357_v19 = vld [vmem:[%s1884_s1 + $0xc] ss:$16 sps:$4 sm:$0xff]   ;;  %v1312_v21 = vld [vmem:[%s1883_s0 + $0x284] ss:$16 sps:$4 sm:$0xff]   ;;  %v1310_v23 = vld [vmem:[%s1883_s0 + $0x280] ss:$16 sps:$4 sm:$0xff]  }
  0x1e   :  { %v1315_v22 = vld [vmem:[%s1883_s0 + $0x28c] ss:$16 sps:$4 sm:$0xff]   ;;  %v1313_v24 = vld [vmem:[%s1883_s0 + $0x288] ss:$16 sps:$4 sm:$0xff]   ;;  %v1318_v25 = vld [vmem:[%s1883_s0 + $0x2a4] ss:$16 sps:$4 sm:$0xff]  }
  0x1f   :  { %744 = vmatpush1.bf16.msra.mxu0 %v1233_v30  ;;  %850 = vmatpush1.bf16.msra.mxu1 %v1234_v31  ;;  %v1321_v26 = vld [vmem:[%s1883_s0 + $0x2ac] ss:$16 sps:$4 sm:$0xff]   ;;  %v1316_v27 = vld [vmem:[%s1883_s0 + $0x2a0] ss:$16 sps:$4 sm:$0xff]   ;;  %v1319_v28 = vld [vmem:[%s1883_s0 + $0x2a8] ss:$16 sps:$4 sm:$0xff]  }
  0x20   :  { %745 = vmatprep.subr.bf16.mxu0 %v1235_v32  ;;  %851 = vmatprep.subr.bf16.mxu1 %v1237_v33  ;;  %v1324_v29 = vld [vmem:[%s1883_s0 + $0x2c4] ss:$16 sps:$4 sm:$0xff]   ;;  %v1327_v30 = vld [vmem:[%s1883_s0 + $0x2cc] ss:$16 sps:$4 sm:$0xff]   ;;  %v1322_v31 = vld [vmem:[%s1883_s0 + $0x2c0] ss:$16 sps:$4 sm:$0xff]  }
  0x21   :  { %v1325_v32 = vld [vmem:[%s1883_s0 + $0x2c8] ss:$16 sps:$4 sm:$0xff]   ;;  %v1330_v33 = vld [vmem:[%s1883_s0 + $0x2e4] ss:$16 sps:$4 sm:$0xff]  }
  0x22   :  { %v1352_v48 = vld [vmem:[%s1883_s0 + $0x348] ss:$16 sps:$4 sm:$0xff]  }
  0x23   :  { %746 = vmatpush1.bf16.msra.mxu0 %v1239_v34  ;;  %852 = vmatpush1.bf16.msra.mxu1 %v1240_v35  ;;  %v1333_v34 = vld [vmem:[%s1883_s0 + $0x2ec] ss:$16 sps:$4 sm:$0xff]   ;;  %v1328_v35 = vld [vmem:[%s1883_s0 + $0x2e0] ss:$16 sps:$4 sm:$0xff]  }
  0x24   :  { %747 = vmatprep.subr.bf16.mxu0 %v1241_v36  ;;  %853 = vmatprep.subr.bf16.mxu1 %v1243_v37  ;;  %v1331_v36 = vld [vmem:[%s1883_s0 + $0x2e8] ss:$16 sps:$4 sm:$0xff]   ;;  %v1336_v37 = vld [vmem:[%s1883_s0 + $0x304] ss:$16 sps:$4 sm:$0xff]  }
  0x27   :  { %748 = vmatpush1.bf16.msra.mxu0 %v1245_v38  ;;  %854 = vmatpush1.bf16.msra.mxu1 %v1246_v39  ;;  %v1339_v38 = vld [vmem:[%s1883_s0 + $0x30c] ss:$16 sps:$4 sm:$0xff]   ;;  %v1334_v39 = vld [vmem:[%s1883_s0 + $0x300] ss:$16 sps:$4 sm:$0xff]  }
  0x28   :  { %749 = vmatprep.subr.bf16.mxu0 %v1247_v40  ;;  %855 = vmatprep.subr.bf16.mxu1 %v1249_v41  ;;  %v1337_v40 = vld [vmem:[%s1883_s0 + $0x308] ss:$16 sps:$4 sm:$0xff]   ;;  %v1345_v41 = vld [vmem:[%s1883_s0 + $0x324] ss:$16 sps:$4 sm:$0xff]  }
  0x2b   :  { %750 = vmatpush1.bf16.msra.mxu0 %v1251_v42  ;;  %856 = vmatpush1.bf16.msra.mxu1 %v1252_v43  ;;  %v1348_v42 = vld [vmem:[%s1883_s0 + $0x32c] ss:$16 sps:$4 sm:$0xff]   ;;  %v1343_v43 = vld [vmem:[%s1883_s0 + $0x320] ss:$16 sps:$4 sm:$0xff]  }
  0x2c   :  { %751 = vmatprep.subr.bf16.mxu0 %v1253_v44  ;;  %857 = vmatprep.subr.bf16.mxu1 %v1255_v45  ;;  %v1346_v44 = vld [vmem:[%s1883_s0 + $0x328] ss:$16 sps:$4 sm:$0xff]   ;;  %v1351_v45 = vld [vmem:[%s1883_s0 + $0x344] ss:$16 sps:$4 sm:$0xff]  }
  0x2f   :  { %752 = vmatpush1.bf16.msra.mxu0 %v1257_v46  ;;  %858 = vmatpush1.bf16.msra.mxu1 %v1258_v47  ;;  %v1354_v46 = vld [vmem:[%s1883_s0 + $0x34c] ss:$16 sps:$4 sm:$0xff]   ;;  %v1349_v47 = vld [vmem:[%s1883_s0 + $0x340] ss:$16 sps:$4 sm:$0xff]  }
  0x30   :  { %753 = vmatprep.subr.bf16.mxu0 %v1259_v49  ;;  %859 = vmatprep.subr.bf16.mxu1 %v1261_v50  ;;  %v1355_v49 = vld [vmem:[%s1884_s1 + $0x8] ss:$16 sps:$4 sm:$0xff]   ;;  %v1358_v50 = vld [vmem:[%s1884_s1 + $0x2c] ss:$16 sps:$4 sm:$0xff]  }
  0x33   :  { %754 = vmatpush1.bf16.msra.mxu0 %v1263_v51  ;;  %860 = vmatpush1.bf16.msra.mxu1 %v1264_v52  ;;  %v1360_v51 = vld [vmem:[%s1884_s1 + $0x28] ss:$16 sps:$4 sm:$0xff]   ;;  %v1361_v52 = vmov 0.0  }
  0x34   :  { %755 = vmatprep.subr.bf16.mxu0 %v1265_v53  ;;  %861 = vmatprep.subr.bf16.mxu1 %v1267_v54  ;;  %20 = vst.msk [vmem:[%s1885_s3] sm:$0xff] %vm19_vm1, %v1361_v52  ;;  %21 = vst.msk [vmem:[%s1885_s3 + $0x8] sm:$0xff] %vm19_vm1, %v1361_v52 }
  0x35   :  { %22 = vst.msk [vmem:[%s1885_s3 + $0x10] sm:$0xff] %vm19_vm1, %v1361_v52  ;;  %23 = vst.msk [vmem:[%s1885_s3 + $0x18] sm:$0xff] %vm19_vm1, %v1361_v52 }
  0x36   :  { %25 = vst.msk [vmem:[%s1887_s4 + $0x8] sm:$0xff] %vm19_vm1, %v1361_v52  ;;  %24 = vst.msk [vmem:[%s1887_s4] sm:$0xff] %vm19_vm1, %v1361_v52 }
  0x37   :  { %756 = vmatpush1.bf16.msra.mxu0 %v1269_v55  ;;  %862 = vmatpush1.bf16.msra.mxu1 %v1270_v56  ;;  %26 = vst.msk [vmem:[%s1887_s4 + $0x10] sm:$0xff] %vm19_vm1, %v1361_v52  ;;  %27 = vst.msk [vmem:[%s1887_s4 + $0x18] sm:$0xff] %vm19_vm1, %v1361_v52 }
  0x38   :  { %757 = vmatprep.subr.bf16.mxu0 %v1271_v57  ;;  %863 = vmatprep.subr.bf16.mxu1 %v1273_v58 }
  0x3b   :  { %758 = vmatpush1.bf16.msra.mxu0 %v1275_v59  ;;  %864 = vmatpush1.bf16.msra.mxu1 %v1276_v60 }
  0x3c   :  { %759 = vmatprep.subr.bf16.mxu0 %v1277_v61  ;;  %865 = vmatprep.subr.bf16.mxu1 %v1279_v62 }
  0x3f   :  { %760 = vmatpush1.bf16.msra.mxu0 %v1281_v63  ;;  %866 = vmatpush1.bf16.msra.mxu1 %v1282_v0 }
  0x40   :  { %782 = vmatprep.subr.bf16.mxu0 %v1288_v1  ;;  %888 = vmatprep.subr.bf16.mxu1 %v1291_v2 }
  0x42   :  { %762 = vmatmul.mubr.bf16.vlgmr.msra.gmra.mrb[0].mxu0 %v1283_v3  ;;  %868 = vmatmul.mubr.bf16.vlgmr.msra.gmra.mrb[0].mxu1 %v1283_v3 }
  0x43   :  { %783 = vmatpush1.bf16.msra.mxu0 %v1286_v4  ;;  %889 = vmatpush1.bf16.msra.mxu1 %v1289_v5 }
  0x44   :  { %784 = vmatprep.subr.bf16.mxu0 %v1294_v6  ;;  %890 = vmatprep.subr.bf16.mxu1 %v1297_v7 }
  0x45   :  { %771 = vmatprep.mubr.bf16.mxu0 %v1340_v11  ;;  %877 = vmatprep.mubr.bf16.mxu1 %v1340_v11 }
  0x47   :  { %785 = vmatpush1.bf16.msra.mxu0 %v1292_v8  ;;  %891 = vmatpush1.bf16.msra.mxu1 %v1295_v9 }
  0x48   :  { %786 = vmatprep.subr.bf16.mxu0 %v1300_v10  ;;  %892 = vmatprep.subr.bf16.mxu1 %v1303_v12 }
  0x4a   :  { %772 = vmatmul.mubr.bf16.gmra.mrb[4].mxu0 %v1342_v15  ;;  %878 = vmatmul.mubr.bf16.gmra.mrb[4].mxu1 %v1342_v15 }
  0x4b   :  { %787 = vmatpush1.bf16.msra.mxu0 %v1298_v13  ;;  %893 = vmatpush1.bf16.msra.mxu1 %v1301_v14 }
  0x4c   :  { %788 = vmatprep.subr.bf16.mxu0 %v1306_v16  ;;  %894 = vmatprep.subr.bf16.mxu1 %v1309_v17 }
  0x4d   :  { %1166 = vmatprep.mubr.msk.bf16.mxu0 %vm722_vm0, %v1357_v19  ;;  %1168 = vmatprep.mubr.msk.bf16.mxu1 %vm722_vm0, %v1357_v19 }
  0x4f   :  { %789 = vmatpush1.bf16.msra.mxu0 %v1304_v18  ;;  %895 = vmatpush1.bf16.msra.mxu1 %v1307_v20 }
  0x50   :  { %790 = vmatprep.subr.bf16.mxu0 %v1312_v21  ;;  %896 = vmatprep.subr.bf16.mxu1 %v1315_v22 }
  0x53   :  { %791 = vmatpush1.bf16.msra.mxu0 %v1310_v23  ;;  %897 = vmatpush1.bf16.msra.mxu1 %v1313_v24 }
  0x54   :  { %792 = vmatprep.subr.bf16.mxu0 %v1318_v25  ;;  %898 = vmatprep.subr.bf16.mxu1 %v1321_v26 }
  0x57   :  { %793 = vmatpush1.bf16.msra.mxu0 %v1316_v27  ;;  %899 = vmatpush1.bf16.msra.mxu1 %v1319_v28 }
  0x58   :  { %794 = vmatprep.subr.bf16.mxu0 %v1324_v29  ;;  %900 = vmatprep.subr.bf16.mxu1 %v1327_v30 }
  0x5b   :  { %795 = vmatpush1.bf16.msra.mxu0 %v1322_v31  ;;  %901 = vmatpush1.bf16.msra.mxu1 %v1325_v32 }
  0x5c   :  { %796 = vmatprep.subr.bf16.mxu0 %v1330_v33  ;;  %902 = vmatprep.subr.bf16.mxu1 %v1333_v34 }
  0x5f   :  { %797 = vmatpush1.bf16.msra.mxu0 %v1328_v35  ;;  %903 = vmatpush1.bf16.msra.mxu1 %v1331_v36 }
  0x60   :  { %798 = vmatprep.subr.bf16.mxu0 %v1336_v37  ;;  %904 = vmatprep.subr.bf16.mxu1 %v1339_v38 }
  0x63   :  { %799 = vmatpush1.bf16.msra.mxu0 %v1334_v39  ;;  %905 = vmatpush1.bf16.msra.mxu1 %v1337_v40 }
  0x64   :  { %800 = vmatprep.subr.bf16.mxu0 %v1345_v41  ;;  %906 = vmatprep.subr.bf16.mxu1 %v1348_v42 }
  0x67   :  { %801 = vmatpush1.bf16.msra.mxu0 %v1343_v43  ;;  %907 = vmatpush1.bf16.msra.mxu1 %v1346_v44 }
  0x68   :  { %802 = vmatprep.subr.bf16.mxu0 %v1351_v45  ;;  %908 = vmatprep.subr.bf16.mxu1 %v1354_v46  ;;  %v957_v45 = vld [vmem:[%s1885_s3] sm:$0xff] }
  0x6b   :  { %803 = vmatpush1.bf16.msra.mxu0 %v1349_v47  ;;  %909 = vmatpush1.bf16.msra.mxu1 %v1352_v48  ;;  %v991_v48 = vld [vmem:[%s1887_s4 + $0x8] sm:$0xff] }
  0x6e   :  { %815 = vmatmul.mubr.bf16.vlgmr.msra.gmra.mrb[0].mxu0 %v1355_v49  ;;  %921 = vmatmul.mubr.bf16.vlgmr.msra.gmra.mrb[0].mxu1 %v1355_v49  ;;  %v958_v49 = vld [vmem:[%s1885_s3 + $0x8] sm:$0xff] }
  0x6f   :  { %1167 = vmatprep.mubr.msk.bf16.mxu0 %vm722_vm0, %v1358_v50  ;;  %1169 = vmatprep.mubr.msk.bf16.mxu1 %vm722_vm0, %v1358_v50 }
  0x76   :  { %825 = vmatmul.mubr.bf16.gmra.mrb[4].mxu0 %v1360_v51  ;;  %931 = vmatmul.mubr.bf16.gmra.mrb[4].mxu1 %v1360_v51 }
 0x141   :  { %v816_v53 = vpop.f32.mrb[0].mxu0  ;;  %v922_v54 = vpop.f32.mrb[0].mxu1 }
 0x142   :  { %941 = vst [vmem:[%s1886_s2] sm:$0xff] %v816_v53  ;;  %v994_v55 = vmul.f32 %v816_v53, %v816_v53  ;;  %943 = vst [vmem:[%s1886_s2 + $0x10] sm:$0xff] %v922_v54  ;;  %v818_v56 = vpop.f32.mrb[1].mxu0  ;;  %v924_v57 = vpop.f32.mrb[1].mxu1  ;;  %v996_v4 = vmul.f32 %v922_v54, %v922_v54 }
 0x143   :  { %942 = vst [vmem:[%s1886_s2 + $0x8] sm:$0xff] %v818_v56  ;;  %v961_v58 = vadd.f32 %v818_v56, %v816_v53  ;;  %v995_v59 = vmul.f32 %v818_v56, %v818_v56  ;;  %944 = vst [vmem:[%s1886_s2 + $0x18] sm:$0xff] %v924_v57  ;;  %v820_v60 = vpop.f32.mrb[2].mxu0  ;;  %v926_v61 = vpop.f32.mrb[2].mxu1  ;;  %v997_v10 = vmul.f32 %v924_v57, %v924_v57 }
 0x144   :  { %945 = vst [vmem:[%s1886_s2 + $0x20] sm:$0xff] %v820_v60  ;;  %v998_v62 = vmul.f32 %v820_v60, %v820_v60  ;;  %947 = vst [vmem:[%s1886_s2 + $0x30] sm:$0xff] %v926_v61  ;;  %v822_v63 = vpop.f32.mrb[3].mxu0  ;;  %v928_v0 = vpop.f32.mrb[3].mxu1  ;;  %v1000_v6 = vmul.f32 %v926_v61, %v926_v61 }
 0x145   :  { %946 = vst [vmem:[%s1886_s2 + $0x28] sm:$0xff] %v822_v63  ;;  %v966_v1 = vadd.f32 %v822_v63, %v820_v60  ;;  %v999_v2 = vmul.f32 %v822_v63, %v822_v63  ;;  %948 = vst [vmem:[%s1886_s2 + $0x38] sm:$0xff] %v928_v0  ;;  %v962_v3 = vadd.f32 %v961_v58, %v922_v54  ;;  %v990_v54 = vld [vmem:[%s1887_s4] sm:$0xff]  ;;  %v992_v60 = vld [vmem:[%s1887_s4 + $0x10] sm:$0xff] }
 0x146   :  { %v1010_v5 = vadd.f32 %v995_v59, %v994_v55  ;;  %v1001_v14 = vmul.f32 %v928_v0, %v928_v0  ;;  %v959_v55 = vld [vmem:[%s1885_s3 + $0x10] sm:$0xff] }
 0x147   :  { %v963_v7 = vadd.f32 %v962_v3, %v924_v57  ;;  %v1015_v8 = vadd.f32 %v999_v2, %v998_v62  ;;  %v967_v9 = vadd.f32 %v966_v1, %v926_v61  ;;  %v960_v61 = vld [vmem:[%s1885_s3 + $0x18] sm:$0xff] }
 0x148   :  { %v1011_v11 = vadd.f32 %v1010_v5, %v996_v4  ;;  %v993_v2 = vld [vmem:[%s1887_s4 + $0x18] sm:$0xff] }
 0x149   :  { %v932_v12 = vpop.f32.mrb[4].mxu1  ;;  %964 = vadd.xlane.f32.xlu0 %v963_v7  ;;  %v826_v13 = vpop.f32.mrb[4].mxu0  ;;  %v1016_v15 = vadd.f32 %v1015_v8, %v1000_v6  ;;  %v968_v16 = vadd.f32 %v967_v9, %v928_v0 }
 0x14a   :  { %951 = vst [vmem:[%s1886_s2 + $0x50] sm:$0xff] %v932_v12  ;;  %949 = vst [vmem:[%s1886_s2 + $0x40] sm:$0xff] %v826_v13  ;;  %v1002_v17 = vmul.f32 %v826_v13, %v826_v13  ;;  %v828_v18 = vpop.f32.mrb[5].mxu0  ;;  %v934_v19 = vpop.f32.mrb[5].mxu1  ;;  %v1012_v20 = vadd.f32 %v1011_v11, %v997_v10  ;;  %v1004_v31 = vmul.f32 %v932_v12, %v932_v12 }
 0x14b   :  { %950 = vst [vmem:[%s1886_s2 + $0x48] sm:$0xff] %v828_v18  ;;  %v971_v21 = vadd.f32 %v828_v18, %v826_v13  ;;  %v1003_v22 = vmul.f32 %v828_v18, %v828_v18  ;;  %952 = vst [vmem:[%s1886_s2 + $0x58] sm:$0xff] %v934_v19  ;;  %v830_v23 = vpop.f32.mrb[6].mxu0  ;;  %v936_v24 = vpop.f32.mrb[6].mxu1  ;;  %v1017_v25 = vadd.f32 %v1016_v15, %v1001_v14 }
 0x14c   :  { %953 = vst [vmem:[%s1886_s2 + $0x60] sm:$0xff] %v830_v23  ;;  %v1006_v26 = vmul.f32 %v830_v23, %v830_v23  ;;  %955 = vst [vmem:[%s1886_s2 + $0x70] sm:$0xff] %v936_v24  ;;  %v832_v27 = vpop.f32.mrb[7].mxu0  ;;  %v938_v28 = vpop.f32.mrb[7].mxu1  ;;  %v1008_v34 = vmul.f32 %v936_v24, %v936_v24  ;;  %v1005_v38 = vmul.f32 %v934_v19, %v934_v19 }
 0x14d   :  { %954 = vst [vmem:[%s1886_s2 + $0x68] sm:$0xff] %v832_v27  ;;  %v976_v29 = vadd.f32 %v832_v27, %v830_v23  ;;  %v1007_v30 = vmul.f32 %v832_v27, %v832_v27  ;;  %956 = vst [vmem:[%s1886_s2 + $0x78] sm:$0xff] %v938_v28  ;;  %1018 = vadd.xlane.f32.xlu1 %v1017_v25  ;;  %969 = vadd.xlane.f32.xlu0 %v968_v16 }
 0x14e   :  { %v972_v32 = vadd.f32 %v971_v21, %v932_v12  ;;  %v1020_v33 = vadd.f32 %v1003_v22, %v1002_v17  ;;  %v1009_v40 = vmul.f32 %v938_v28, %v938_v28 }
 0x14f   :  { %v1025_v35 = vadd.f32 %v1007_v30, %v1006_v26  ;;  %v977_v36 = vadd.f32 %v976_v29, %v936_v24 }
 0x150   :  { %v973_v37 = vadd.f32 %v972_v32, %v934_v19  ;;  %v1021_v39 = vadd.f32 %v1020_v33, %v1004_v31 }
 0x151   :  { %1013 = vadd.xlane.f32.xlu0 %v1012_v20  ;;  %v978_v41 = vadd.f32 %v977_v36, %v938_v28  ;;  %v1026_v42 = vadd.f32 %v1025_v35, %v1008_v34 }
 0x152   :  { %974 = vadd.xlane.f32.xlu1 %v973_v37  ;;  %v1022_v43 = vadd.f32 %v1021_v39, %v1005_v38 }
 0x153   :  { %v1027_v44 = vadd.f32 %v1026_v42, %v1009_v40 }
 0x155   :  { %1023 = vadd.xlane.f32.xlu0 %v1022_v43 }
 0x156   :  { %979 = vadd.xlane.f32.xlu1 %v978_v41 }
 0x15a   :  { %1028 = vadd.xlane.f32.xlu1 %v1027_v44 }
 0x1d6   :  { %v965_v46 = vpop.xlane.xlu0 %964 }
 0x1d7   :  { %v981_v47 = vadd.f32 %v965_v46, %v957_v45 }
 0x1d9   :  { %986 = vst.msk [vmem:[%s1885_s3] sm:$0xff] %vm19_vm1, %v981_v47 }
 0x1da   :  { %v1019_v50 = vpop.xlane.xlu1 %1018  ;;  %v970_v51 = vpop.xlane.xlu0 %969 }
 0x1db   :  { %v1031_v52 = vadd.f32 %v1019_v50, %v991_v48  ;;  %v982_v53 = vadd.f32 %v970_v51, %v958_v49 }
 0x1dd   :  { %1035 = vst.msk [vmem:[%s1887_s4 + $0x8] sm:$0xff] %vm19_vm1, %v1031_v52  ;;  %987 = vst.msk [vmem:[%s1885_s3 + $0x8] sm:$0xff] %vm19_vm1, %v982_v53 }
 0x1de   :  { %v1014_v56 = vpop.xlane.xlu0 %1013 }
 0x1df   :  { %v1030_v57 = vadd.f32 %v1014_v56, %v990_v54  ;;  %v975_v58 = vpop.xlane.xlu1 %974 }
 0x1e0   :  { %v983_v59 = vadd.f32 %v975_v58, %v959_v55 }
 0x1e1   :  { %1034 = vst.msk [vmem:[%s1887_s4] sm:$0xff] %vm19_vm1, %v1030_v57 }
 0x1e2   :  { %988 = vst.msk [vmem:[%s1885_s3 + $0x10] sm:$0xff] %vm19_vm1, %v983_v59  ;;  %v1024_v62 = vpop.xlane.xlu0 %1023 }
 0x1e3   :  { %v1032_v63 = vadd.f32 %v1024_v62, %v992_v60  ;;  %v980_v0 = vpop.xlane.xlu1 %979 }
 0x1e4   :  { %v984_v1 = vadd.f32 %v980_v0, %v960_v61 }
 0x1e5   :  { %1036 = vst.msk [vmem:[%s1887_s4 + $0x10] sm:$0xff] %vm19_vm1, %v1032_v63 }
 0x1e6   :  { %989 = vst.msk [vmem:[%s1885_s3 + $0x18] sm:$0xff] %vm19_vm1, %v984_v1 }
 0x1e7   :  { %v1029_v3 = vpop.xlane.xlu1 %1028 }
 0x1e8   :  { %v1033_v4 = vadd.f32 %v1029_v3, %v993_v2 }
 0x1ea   :  { %1037 = vst.msk [vmem:[%s1887_s4 + $0x18] sm:$0xff] %vm19_vm1, %v1033_v4 }

// kernel: unet_forward.28
= control target key start
LH: loop header
LB: loop body
LE: loop exit
PB: predicated region body
PF: predicated region fallthrough
CT: control target
= control target key end

     0   :  { %v164_v0 = vmov 0   ;;  %s227_s1 = inlined_call_operand.vmem [shape: f32[32,1], index: 1, kind: input, shape index: {}]   ;;  %s228_s2 = inlined_call_operand.vmem [shape: f32[32,1], index: 2, kind: input, shape index: {}]   ;;  %s229_s0 = inlined_call_operand.vmem [shape: f32[32,128], index: 0, kind: input, shape index: {}]   ;;  %s230_s3 = inlined_call_operand.vmem [shape: bf16[32,128], index: 3, kind: output, shape index: {}]  }
   0x1   :  { %155 = vset.pattern.permute.xlu1 %v164_v0  ;;  %154 = vset.pattern.permute.xlu0 %v164_v0  ;;  %v16_v1 = vld [vmem:[%s227_s1 + $0x10] sm:$0xff]  ;;  %v14_v3 = vld [vmem:[%s227_s1] sm:$0xff]  ;;  %v17_v8 = vld [vmem:[%s227_s1 + $0x18] sm:$0xff] }
   0x2   :  { %v24_v2 = vld [vmem:[%s228_s2 + $0x10] sm:$0xff]  ;;  %v20_v4 = vmul.f32 0.015625, %v16_v1  ;;  %v18_v6 = vmul.f32 0.015625, %v14_v3  ;;  %v22_v7 = vld [vmem:[%s228_s2] sm:$0xff]  ;;  %v25_v9 = vld [vmem:[%s228_s2 + $0x18] sm:$0xff]  ;;  %v21_v11 = vmul.f32 0.015625, %v17_v8 }
   0x3   :  { %v28_v5 = vmul.f32 0.015625, %v24_v2  ;;  %v26_v10 = vmul.f32 0.015625, %v22_v7  ;;  %v29_v12 = vmul.f32 0.015625, %v25_v9  ;;  %v15_v13 = vld [vmem:[%s227_s1 + $0x8] sm:$0xff]  ;;  %v46_v35 = vld [vmem:[%s229_s0] sm:$0xff]  ;;  %v48_v40 = vld [vmem:[%s229_s0 + $0x10] sm:$0xff] }
   0x4   :  { %v23_v14 = vld [vmem:[%s228_s2 + $0x8] sm:$0xff]  ;;  %62 = vperm.xlu1 %155, %v20_v4   ;;  %v32_v15 = vmul.f32 %v20_v4, %v20_v4  ;;  %52 = vperm.xlu0 %154, %v18_v6   ;;  %v30_v16 = vmul.f32 %v18_v6, %v18_v6  ;;  %v19_v17 = vmul.f32 0.015625, %v15_v13  ;;  %v33_v19 = vmul.f32 %v21_v11, %v21_v11  ;;  %v49_v42 = vld [vmem:[%s229_s0 + $0x18] sm:$0xff] }
   0x5   :  { %v27_v18 = vmul.f32 0.015625, %v23_v14  ;;  %v47_v38 = vld [vmem:[%s229_s0 + $0x8] sm:$0xff] }
   0x6   :  { %v36_v20 = vsub.f32 %v28_v5, %v32_v15  ;;  %v34_v21 = vsub.f32 %v26_v10, %v30_v16  ;;  %v31_v22 = vmul.f32 %v19_v17, %v19_v17  ;;  %v37_v23 = vsub.f32 %v29_v12, %v33_v19 }
   0x8   :  { %v40_v24 = vadd.f32 1e-05, %v36_v20  ;;  %v38_v25 = vadd.f32 1e-05, %v34_v21  ;;  %67 = vperm.xlu1 %155, %v21_v11   ;;  %v35_v26 = vsub.f32 %v27_v18, %v31_v22  ;;  %57 = vperm.xlu0 %154, %v19_v17   ;;  %v41_v28 = vadd.f32 1e-05, %v37_v23 }
   0xa   :  { %v39_v27 = vadd.f32 1e-05, %v35_v26  ;;  %156 = vrsqrt.f32 %v38_v25 }
   0xb   :  { %158 = vrsqrt.f32 %v40_v24 }
   0xc   :  { %160 = vrsqrt.f32 %v39_v27 }
   0xd   :  { %162 = vrsqrt.f32 %v41_v28 }
  0x14   :  { %v157_v29 = vpop.eup %156 }
  0x15   :  { %v159_v30 = vpop.eup %158  ;;  %76 = vperm.xlu0 %154, %v157_v29  }
  0x16   :  { %v161_v31 = vpop.eup %160 }
  0x17   :  { %81 = vperm.xlu1 %155, %v161_v31   ;;  %v163_v32 = vpop.eup %162 }
  0x19   :  { %86 = vperm.xlu0 %154, %v159_v30  }
  0x1b   :  { %91 = vperm.xlu1 %155, %v163_v32  }
  0x83   :  { %v53_v33 = vpop.permute.xlu0 %52  ;;  %v63_v34 = vpop.permute.xlu1 %62 }
  0x84   :  { %v70_v39 = vsub.f32 %v46_v35, %v53_v33  ;;  %v72_v46 = vsub.f32 %v48_v40, %v63_v34 }
  0x87   :  { %v58_v36 = vpop.permute.xlu0 %57  ;;  %v68_v37 = vpop.permute.xlu1 %67 }
  0x88   :  { %v71_v43 = vsub.f32 %v47_v38, %v58_v36  ;;  %v73_v49 = vsub.f32 %v49_v42, %v68_v37 }
  0x94   :  { %v77_v41 = vpop.permute.xlu0 %76 }
  0x95   :  { %v94_v44 = vmul.f32 %v77_v41, %v70_v39 }
  0x96   :  { %v82_v45 = vpop.permute.xlu1 %81 }
  0x97   :  { %v95_v47 = vmul.f32 %v82_v45, %v71_v43  ;;  %vm98_vm0 = vcmp.ge.f32.partialorder %v94_v44, 0.0  ;;  %v102_v48 = vmul.f32 0.2, %v94_v44 }
  0x98   :  { %v87_v50 = vpop.permute.xlu0 %86 }
  0x99   :  { %vm99_vm1 = vcmp.ge.f32.partialorder %v95_v47, 0.0  ;;  %v103_v51 = vmul.f32 0.2, %v95_v47  ;;  %v106_v52 = vsel %vm98_vm0, %v94_v44, %v102_v48  ;;  %v96_v53 = vmul.f32 %v87_v50, %v72_v46 }
  0x9a   :  { %v92_v54 = vpop.permute.xlu1 %91 }
  0x9b   :  { %v107_v55 = vsel %vm99_vm1, %v95_v47, %v103_v51  ;;  %v97_v56 = vmul.f32 %v92_v54, %v73_v49  ;;  %vm100_vm2 = vcmp.ge.f32.partialorder %v96_v53, 0.0  ;;  %v104_v57 = vmul.f32 0.2, %v96_v53 }
  0x9c   :  { %v145_v58 = vpack.c.bf16 %v107_v55, %v106_v52 }
  0x9d   :  { %vm101_vm3 = vcmp.ge.f32.partialorder %v97_v56, 0.0  ;;  %v105_v59 = vmul.f32 0.2, %v97_v56  ;;  %v108_v60 = vsel %vm100_vm2, %v96_v53, %v104_v57 }
  0x9e   :  { %146 = vst [vmem:[%s230_s3] sm:$0xff] %v145_v58  }
  0x9f   :  { %v109_v61 = vsel %vm101_vm3, %v97_v56, %v105_v59 }
  0xa0   :  { %v150_v62 = vpack.c.bf16 %v109_v61, %v108_v60 }
  0xa2   :  { %152 = vst [vmem:[%s230_s3 + $0x8] sm:$0xff] %v150_v62  }

// kernel: unet_forward.27
= control target key start
LH: loop header
LB: loop body
LE: loop exit
PB: predicated region body
PF: predicated region fallthrough
CT: control target
= control target key end

     0   :  { %vm546_vm0 = vcmask 785408   ;;  %vm19_vm1 = vcmask 7168   ;;  %s1401_s0 = inlined_call_operand.vmem [shape: bf16[864,128], index: 0, kind: input, shape index: {}]   ;;  %s1402_s1 = inlined_call_operand.vmem [shape: bf16[32,864], index: 1, kind: input, shape index: {}]   ;;  %s1403_s3 = inlined_call_operand.vmem [shape: f32[32,1], index: 3, kind: output, shape index: {1}]   ;;  %s1404_s2 = inlined_call_operand.vmem [shape: f32[32,128], index: 2, kind: output, shape index: {0}]   ;;  %s1405_s4 = inlined_call_operand.vmem [shape: f32[32,1], index: 4, kind: output, shape index: {2}]  }
   0x1   :  { %v989_v0 = vld [vmem:[%s1401_s0 + $0x40] sm:$0xff]   ;;  %v993_v4 = vld [vmem:[%s1401_s0 + $0x48] sm:$0xff]   ;;  %v997_v8 = vld [vmem:[%s1401_s0 + $0x50] sm:$0xff]  }
   0x2   :  { %v990_v1 = vld [vmem:[%s1401_s0 + $0xc0] sm:$0xff]   ;;  %880 = vmatprep.subr.bf16.mxu0 %v989_v0  ;;  %v994_v5 = vld [vmem:[%s1401_s0 + $0xc8] sm:$0xff]   ;;  %v998_v9 = vld [vmem:[%s1401_s0 + $0xd0] sm:$0xff]  }
   0x3   :  { %v991_v2 = vld [vmem:[%s1401_s0] sm:$0xff]   ;;  %908 = vmatprep.subr.bf16.mxu1 %v990_v1  ;;  %v995_v6 = vld [vmem:[%s1401_s0 + $0x8] sm:$0xff]   ;;  %v999_v10 = vld [vmem:[%s1401_s0 + $0x10] sm:$0xff]  }
   0x4   :  { %v992_v3 = vld [vmem:[%s1401_s0 + $0x80] sm:$0xff]   ;;  %881 = vmatpush3.bf16.msra.mxu0 %v991_v2  ;;  %v996_v7 = vld [vmem:[%s1401_s0 + $0x88] sm:$0xff]   ;;  %v1000_v11 = vld [vmem:[%s1401_s0 + $0x90] sm:$0xff]  }
   0x5   :  { %909 = vmatpush3.bf16.msra.mxu1 %v992_v3  ;;  %882 = vmatprep.subr.bf16.mxu0 %v993_v4  ;;  %v1001_v12 = vld [vmem:[%s1401_s0 + $0x58] sm:$0xff]   ;;  %v1005_v16 = vld [vmem:[%s1401_s0 + $0x60] sm:$0xff]   ;;  %v1009_v20 = vld [vmem:[%s1401_s0 + $0x68] sm:$0xff]   ;;  %v1063_v4 = vmov 0.0  }
   0x6   :  { %910 = vmatprep.subr.bf16.mxu1 %v994_v5  ;;  %v1002_v13 = vld [vmem:[%s1401_s0 + $0xd8] sm:$0xff]   ;;  %v1006_v17 = vld [vmem:[%s1401_s0 + $0xe0] sm:$0xff]   ;;  %v1010_v21 = vld [vmem:[%s1401_s0 + $0xe8] sm:$0xff]   ;;  %20 = vst.msk [vmem:[%s1403_s3] sm:$0xff] %vm19_vm1, %v1063_v4 }
   0x7   :  { %v1003_v14 = vld [vmem:[%s1401_s0 + $0x18] sm:$0xff]   ;;  %v1007_v18 = vld [vmem:[%s1401_s0 + $0x20] sm:$0xff]   ;;  %v1011_v22 = vld [vmem:[%s1401_s0 + $0x28] sm:$0xff]   ;;  %21 = vst.msk [vmem:[%s1403_s3 + $0x8] sm:$0xff] %vm19_vm1, %v1063_v4 }
   0x8   :  { %883 = vmatpush3.bf16.msra.mxu0 %v995_v6  ;;  %v1004_v15 = vld [vmem:[%s1401_s0 + $0x98] sm:$0xff]   ;;  %v1008_v19 = vld [vmem:[%s1401_s0 + $0xa0] sm:$0xff]   ;;  %v1012_v23 = vld [vmem:[%s1401_s0 + $0xa8] sm:$0xff]   ;;  %22 = vst.msk [vmem:[%s1403_s3 + $0x10] sm:$0xff] %vm19_vm1, %v1063_v4 }
   0x9   :  { %911 = vmatpush3.bf16.msra.mxu1 %v996_v7  ;;  %884 = vmatprep.subr.bf16.mxu0 %v997_v8  ;;  %v1013_v24 = vld [vmem:[%s1401_s0 + $0x70] sm:$0xff]   ;;  %v1017_v28 = vld [vmem:[%s1401_s0 + $0x78] sm:$0xff]   ;;  %v1023_v33 = vld [vmem:[%s1402_s1 + $0x4] ss:$28 sps:$4 sm:$0xff]   ;;  %23 = vst.msk [vmem:[%s1403_s3 + $0x18] sm:$0xff] %vm19_vm1, %v1063_v4 }
   0xa   :  { %912 = vmatprep.subr.bf16.mxu1 %v998_v9  ;;  %v1014_v25 = vld [vmem:[%s1401_s0 + $0xf0] sm:$0xff]   ;;  %v1018_v29 = vld [vmem:[%s1401_s0 + $0xf8] sm:$0xff]   ;;  %v1024_v34 = vld [vmem:[%s1402_s1 + $0x8] ss:$28 sps:$4 sm:$0xff]   ;;  %585 = vmatprep.mubr.bf16.mxu0 %v1023_v33  ;;  %25 = vst.msk [vmem:[%s1405_s4 + $0x8] sm:$0xff] %vm19_vm1, %v1063_v4 }
   0xb   :  { %v1015_v26 = vld [vmem:[%s1401_s0 + $0x30] sm:$0xff]   ;;  %v1019_v30 = vld [vmem:[%s1401_s0 + $0x38] sm:$0xff]   ;;  %v1026_v35 = vld [vmem:[%s1402_s1 + $0xc] ss:$28 sps:$4 sm:$0xff]   ;;  %24 = vst.msk [vmem:[%s1405_s4] sm:$0xff] %vm19_vm1, %v1063_v4 }
   0xc   :  { %885 = vmatpush3.bf16.msra.mxu0 %v999_v10  ;;  %v1016_v27 = vld [vmem:[%s1401_s0 + $0xb0] sm:$0xff]   ;;  %v1020_v31 = vld [vmem:[%s1401_s0 + $0xb8] sm:$0xff]   ;;  %v1027_v36 = vld [vmem:[%s1401_s0 + $0x140] sm:$0xff]   ;;  %634 = vmatprep.mubr.bf16.mxu1 %v1026_v35  ;;  %26 = vst.msk [vmem:[%s1405_s4 + $0x10] sm:$0xff] %vm19_vm1, %v1063_v4 }
   0xd   :  { %913 = vmatpush3.bf16.msra.mxu1 %v1000_v11  ;;  %886 = vmatprep.subr.bf16.mxu0 %v1001_v12  ;;  %v1021_v32 = vld [vmem:[%s1402_s1] ss:$28 sps:$4 sm:$0xff]   ;;  %v1029_v38 = vld [vmem:[%s1401_s0 + $0x148] sm:$0xff]   ;;  %v1031_v40 = vld [vmem:[%s1401_s0 + $0x150] sm:$0xff]   ;;  %27 = vst.msk [vmem:[%s1405_s4 + $0x18] sm:$0xff] %vm19_vm1, %v1063_v4 }
   0xe   :  { %914 = vmatprep.subr.bf16.mxu1 %v1002_v13  ;;  %v1028_v37 = vld [vmem:[%s1401_s0 + $0x100] sm:$0xff]   ;;  %v1030_v39 = vld [vmem:[%s1401_s0 + $0x108] sm:$0xff]   ;;  %v1032_v42 = vld [vmem:[%s1401_s0 + $0x110] sm:$0xff]  }
   0xf   :  { %v1033_v41 = vld [vmem:[%s1401_s0 + $0x180] sm:$0xff]   ;;  %v1034_v43 = vld [vmem:[%s1401_s0 + $0x158] sm:$0xff]   ;;  %v1036_v44 = vld [vmem:[%s1401_s0 + $0x188] sm:$0xff]  }
  0x10   :  { %887 = vmatpush3.bf16.msra.mxu0 %v1003_v14  ;;  %v1035_v45 = vld [vmem:[%s1401_s0 + $0x118] sm:$0xff]   ;;  %v1037_v46 = vld [vmem:[%s1401_s0 + $0x160] sm:$0xff]   ;;  %v1039_v47 = vld [vmem:[%s1401_s0 + $0x190] sm:$0xff]  }
  0x11   :  { %915 = vmatpush3.bf16.msra.mxu1 %v1004_v15  ;;  %888 = vmatprep.subr.bf16.mxu0 %v1005_v16  ;;  %v1038_v48 = vld [vmem:[%s1401_s0 + $0x120] sm:$0xff]   ;;  %v1040_v49 = vld [vmem:[%s1402_s1 + $0x3c] ss:$28 sps:$4 sm:$0xff]   ;;  %v1044_v51 = vld [vmem:[%s1401_s0 + $0x168] sm:$0xff]  }
  0x12   :  { %916 = vmatprep.subr.bf16.mxu1 %v1006_v17  ;;  %v1042_v50 = vld [vmem:[%s1402_s1 + $0x44] ss:$28 sps:$4 sm:$0xff]   ;;  %v1045_v52 = vld [vmem:[%s1402_s1 + $0x38] ss:$28 sps:$4 sm:$0xff]   ;;  %v1047_v55 = vld [vmem:[%s1401_s0 + $0x128] sm:$0xff]  }
  0x13   :  { %v1046_v53 = vld [vmem:[%s1402_s1 + $0x40] ss:$28 sps:$4 sm:$0xff]   ;;  %v1049_v56 = vld [vmem:[%s1401_s0 + $0x170] sm:$0xff]   ;;  %v1054_v60 = vld [vmem:[%s1401_s0 + $0x1a8] sm:$0xff]  }
  0x14   :  { %889 = vmatpush3.bf16.msra.mxu0 %v1007_v18  ;;  %v1048_v54 = vld [vmem:[%s1401_s0 + $0x198] sm:$0xff]   ;;  %v1051_v57 = vld [vmem:[%s1401_s0 + $0x1a0] sm:$0xff]   ;;  %v1050_v58 = vld [vmem:[%s1401_s0 + $0x130] sm:$0xff]  }
  0x15   :  { %917 = vmatpush3.bf16.msra.mxu1 %v1008_v19  ;;  %890 = vmatprep.subr.bf16.mxu0 %v1009_v20  ;;  %v1052_v59 = vld [vmem:[%s1401_s0 + $0x178] sm:$0xff]   ;;  %v1057_v61 = vld [vmem:[%s1402_s1 + $0x14] ss:$28 sps:$4 sm:$0xff]   ;;  %v1060_v2 = vld [vmem:[%s1402_s1 + $0x4c] ss:$28 sps:$4 sm:$0xff]  }
  0x16   :  { %918 = vmatprep.subr.bf16.mxu1 %v1010_v21  ;;  %v1058_v62 = vld [vmem:[%s1402_s1 + $0x18] ss:$28 sps:$4 sm:$0xff]   ;;  %v1059_v0 = vld [vmem:[%s1402_s1 + $0x50] ss:$28 sps:$4 sm:$0xff]   ;;  %v1062_v3 = vld [vmem:[%s1402_s1 + $0x48] ss:$28 sps:$4 sm:$0xff]  }
  0x17   :  { %v1053_v63 = vld [vmem:[%s1401_s0 + $0x138] sm:$0xff]   ;;  %v1055_v1 = vld [vmem:[%s1402_s1 + $0x10] ss:$28 sps:$4 sm:$0xff]  }
  0x18   :  { %891 = vmatpush3.bf16.msra.mxu0 %v1011_v22 }
  0x19   :  { %919 = vmatpush3.bf16.msra.mxu1 %v1012_v23  ;;  %892 = vmatprep.subr.bf16.mxu0 %v1013_v24 }
  0x1a   :  { %920 = vmatprep.subr.bf16.mxu1 %v1014_v25 }
  0x1c   :  { %893 = vmatpush3.bf16.msra.mxu0 %v1015_v26 }
  0x1d   :  { %921 = vmatpush3.bf16.msra.mxu1 %v1016_v27  ;;  %894 = vmatprep.subr.bf16.mxu0 %v1017_v28 }
  0x1e   :  { %922 = vmatprep.subr.bf16.mxu1 %v1018_v29 }
  0x20   :  { %895 = vmatpush3.bf16.msra.mxu0 %v1019_v30 }
  0x21   :  { %923 = vmatpush3.bf16.msra.mxu1 %v1020_v31  ;;  %936 = vmatprep.subr.bf16.mxu0 %v1027_v36 }
  0x22   :  { %972 = vmatprep.subr.bf16.mxu1 %v1033_v41 }
  0x23   :  { %586 = vmatmul.mubr.bf16.vlgmr.msra.gmra.mrb[0].mxu0 %v1021_v32 }
  0x24   :  { %635 = vmatmul.mubr.bf16.vlgmr.msra.gmra.mrb[0].mxu1 %v1024_v34  ;;  %937 = vmatpush3.bf16.msra.mxu0 %v1028_v37 }
  0x25   :  { %938 = vmatprep.subr.bf16.mxu0 %v1029_v38  ;;  %973 = vmatpush3.bf16.msra.mxu1 %v1033_v41 }
  0x26   :  { %974 = vmatprep.subr.bf16.mxu1 %v1036_v44  ;;  %593 = vmatprep.mubr.bf16.mxu0 %v1040_v49 }
  0x27   :  { %642 = vmatprep.mubr.bf16.mxu1 %v1042_v50 }
  0x28   :  { %939 = vmatpush3.bf16.msra.mxu0 %v1030_v39 }
  0x29   :  { %940 = vmatprep.subr.bf16.mxu0 %v1031_v40  ;;  %975 = vmatpush3.bf16.msra.mxu1 %v1036_v44 }
  0x2a   :  { %976 = vmatprep.subr.bf16.mxu1 %v1039_v47 }
  0x2b   :  { %594 = vmatmul.mubr.bf16.gmra.mrb[4].mxu0 %v1045_v52 }
  0x2c   :  { %941 = vmatpush3.bf16.msra.mxu0 %v1032_v42  ;;  %643 = vmatmul.mubr.bf16.gmra.mrb[4].mxu1 %v1046_v53 }
  0x2d   :  { %942 = vmatprep.subr.bf16.mxu0 %v1034_v43  ;;  %977 = vmatpush3.bf16.msra.mxu1 %v1039_v47 }
  0x2e   :  { %978 = vmatprep.subr.bf16.mxu1 %v1048_v54  ;;  %683 = vmatprep.mubr.bf16.mxu0 %v1057_v61  ;;  %v753_v61 = vld [vmem:[%s1403_s3] sm:$0xff] }
  0x2f   :  { %984 = vmatprep.mubr.msk.bf16.mxu1 %vm546_vm0, %v1058_v62 }
  0x30   :  { %943 = vmatpush3.bf16.msra.mxu0 %v1035_v45 }
  0x31   :  { %944 = vmatprep.subr.bf16.mxu0 %v1037_v46  ;;  %979 = vmatpush3.bf16.msra.mxu1 %v1048_v54 }
  0x32   :  { %980 = vmatprep.subr.bf16.mxu1 %v1051_v57 }
  0x34   :  { %945 = vmatpush3.bf16.msra.mxu0 %v1038_v48 }
  0x35   :  { %946 = vmatprep.subr.bf16.mxu0 %v1044_v51  ;;  %981 = vmatpush3.bf16.msra.mxu1 %v1051_v57 }
  0x36   :  { %982 = vmatprep.subr.bf16.mxu1 %v1054_v60 }
  0x38   :  { %947 = vmatpush3.bf16.msra.mxu0 %v1047_v55 }
  0x39   :  { %948 = vmatprep.subr.bf16.mxu0 %v1049_v56  ;;  %983 = vmatpush3.bf16.msra.mxu1 %v1054_v60 }
  0x3c   :  { %949 = vmatpush3.bf16.msra.mxu0 %v1050_v58  ;;  %985 = vmatmul.mubr.msk.bf16.vlgmr.msra.gmra.mrb[8].mxu1 %vm546_vm0, %v1059_v0  ;;  %v775_v0 = vld [vmem:[%s1405_s4 + $0x8] sm:$0xff] }
  0x3d   :  { %950 = vmatprep.subr.bf16.mxu0 %v1052_v59 }
  0x40   :  { %951 = vmatpush3.bf16.msra.mxu0 %v1053_v63 }
  0x43   :  { %684 = vmatmul.mubr.bf16.vlgmr.msra.gmra.mrb[8].mxu0 %v1055_v1  ;;  %v754_v1 = vld [vmem:[%s1403_s3 + $0x8] sm:$0xff] }
  0x44   :  { %691 = vmatprep.mubr.bf16.mxu0 %v1060_v2 }
  0x4b   :  { %692 = vmatmul.mubr.bf16.gmra.mrb[12].mxu0 %v1062_v3 }
  0xf6   :  { %v896_v5 = vpop.f32.mrb[0].mxu0 }
  0xf7   :  { %v924_v6 = vpop.f32.mrb[0].mxu1  ;;  %v897_v7 = vpop.f32.mrb[1].mxu0 }
  0xf8   :  { %v898_v8 = vadd.f32 %v897_v7, %v896_v5  ;;  %v925_v9 = vpop.f32.mrb[1].mxu1  ;;  %v899_v10 = vpop.f32.mrb[2].mxu0  ;;  %v774_v7 = vld [vmem:[%s1405_s4] sm:$0xff] }
  0xf9   :  { %v926_v11 = vadd.f32 %v925_v9, %v924_v6  ;;  %v927_v12 = vpop.f32.mrb[2].mxu1  ;;  %v900_v13 = vpop.f32.mrb[3].mxu0  ;;  %v755_v6 = vld [vmem:[%s1403_s3 + $0x10] sm:$0xff] }
  0xfa   :  { %v901_v14 = vadd.f32 %v900_v13, %v899_v10  ;;  %v928_v15 = vpop.f32.mrb[3].mxu1  ;;  %v776_v13 = vld [vmem:[%s1405_s4 + $0x10] sm:$0xff] }
  0xfb   :  { %v637_v16 = vadd.f32 %v926_v11, %v898_v8  ;;  %v929_v17 = vadd.f32 %v928_v15, %v927_v12  ;;  %v756_v12 = vld [vmem:[%s1403_s3 + $0x18] sm:$0xff] }
  0xfd   :  { %v640_v18 = vadd.f32 %v929_v17, %v901_v14 }
  0xfe   :  { %v902_v19 = vpop.f32.mrb[4].mxu0 }
  0xff   :  { %v930_v20 = vpop.f32.mrb[4].mxu1  ;;  %v903_v21 = vpop.f32.mrb[5].mxu0 }
 0x100   :  { %v904_v22 = vadd.f32 %v903_v21, %v902_v19  ;;  %v931_v23 = vpop.f32.mrb[5].mxu1  ;;  %v905_v24 = vpop.f32.mrb[6].mxu0 }
 0x101   :  { %v932_v25 = vadd.f32 %v931_v23, %v930_v20  ;;  %v933_v26 = vpop.f32.mrb[6].mxu1  ;;  %v906_v27 = vpop.f32.mrb[7].mxu0 }
 0x102   :  { %v907_v28 = vadd.f32 %v906_v27, %v905_v24  ;;  %v934_v29 = vpop.f32.mrb[7].mxu1 }
 0x103   :  { %v645_v30 = vadd.f32 %v932_v25, %v904_v22  ;;  %v935_v31 = vadd.f32 %v934_v29, %v933_v26 }
 0x105   :  { %v648_v32 = vadd.f32 %v935_v31, %v907_v28 }
 0x10f   :  { %v986_v33 = vpop.f32.mrb[8].mxu1 }
 0x110   :  { %v734_v34 = vpop.f32.mrb[9].mxu1 }
 0x111   :  { %v987_v36 = vpop.f32.mrb[10].mxu1 }
 0x112   :  { %v737_v38 = vpop.f32.mrb[11].mxu1 }
 0x116   :  { %v952_v35 = vpop.f32.mrb[8].mxu0 }
 0x117   :  { %v953_v37 = vpop.f32.mrb[9].mxu0 }
 0x118   :  { %v954_v39 = vadd.f32 %v953_v37, %v952_v35  ;;  %v955_v40 = vpop.f32.mrb[10].mxu0 }
 0x119   :  { %v956_v41 = vpop.f32.mrb[11].mxu0 }
 0x11a   :  { %v686_v42 = vadd.f32 %v954_v39, %v637_v16  ;;  %v957_v43 = vadd.f32 %v956_v41, %v955_v40 }
 0x11c   :  { %v735_v44 = vadd.f32 %v734_v34, %v686_v42  ;;  %v689_v45 = vadd.f32 %v957_v43, %v640_v18  ;;  %v777_v18 = vld [vmem:[%s1405_s4 + $0x18] sm:$0xff] }
 0x11e   :  { %749 = vst [vmem:[%s1404_s2] sm:$0xff] %v735_v44  ;;  %v738_v46 = vadd.f32 %v737_v38, %v689_v45  ;;  %v958_v47 = vpop.f32.mrb[12].mxu0  ;;  %757 = vadd.xlane.f32.xlu0 %v735_v44  ;;  %v778_v57 = vmul.f32 %v735_v44, %v735_v44 }
 0x11f   :  { %v959_v48 = vpop.f32.mrb[13].mxu0 }
 0x120   :  { %750 = vst [vmem:[%s1404_s2 + $0x8] sm:$0xff] %v738_v46  ;;  %v960_v49 = vadd.f32 %v959_v48, %v958_v47  ;;  %v961_v50 = vpop.f32.mrb[14].mxu0  ;;  %v779_v51 = vmul.f32 %v738_v46, %v738_v46 }
 0x121   :  { %v962_v52 = vpop.f32.mrb[15].mxu0 }
 0x122   :  { %v694_v53 = vadd.f32 %v960_v49, %v645_v30  ;;  %v963_v54 = vadd.f32 %v962_v52, %v961_v50  ;;  %784 = vadd.xlane.f32.xlu1 %v779_v51  ;;  %759 = vadd.xlane.f32.xlu0 %v738_v46 }
 0x124   :  { %v697_v55 = vadd.f32 %v963_v54, %v648_v32  ;;  %v743_v56 = vadd.f32 %v986_v33, %v694_v53 }
 0x126   :  { %751 = vst [vmem:[%s1404_s2 + $0x10] sm:$0xff] %v743_v56  ;;  %761 = vadd.xlane.f32.xlu1 %v743_v56  ;;  %782 = vadd.xlane.f32.xlu0 %v778_v57  ;;  %v746_v58 = vadd.f32 %v987_v36, %v697_v55  ;;  %v780_v59 = vmul.f32 %v743_v56, %v743_v56 }
 0x128   :  { %752 = vst [vmem:[%s1404_s2 + $0x18] sm:$0xff] %v746_v58  ;;  %v781_v60 = vmul.f32 %v746_v58, %v746_v58 }
 0x12a   :  { %763 = vadd.xlane.f32.xlu1 %v746_v58  ;;  %786 = vadd.xlane.f32.xlu0 %v780_v59 }
 0x12e   :  { %788 = vadd.xlane.f32.xlu1 %v781_v60 }
 0x1ab   :  { %v758_v62 = vpop.xlane.xlu0 %757 }
 0x1ac   :  { %v765_v63 = vadd.f32 %v758_v62, %v753_v61 }
 0x1ae   :  { %770 = vst.msk [vmem:[%s1403_s3] sm:$0xff] %vm19_vm1, %v765_v63 }
 0x1af   :  { %v785_v2 = vpop.xlane.xlu1 %784  ;;  %v760_v3 = vpop.xlane.xlu0 %759 }
 0x1b0   :  { %v791_v4 = vadd.f32 %v785_v2, %v775_v0  ;;  %v766_v5 = vadd.f32 %v760_v3, %v754_v1 }
 0x1b2   :  { %795 = vst.msk [vmem:[%s1405_s4 + $0x8] sm:$0xff] %vm19_vm1, %v791_v4  ;;  %771 = vst.msk [vmem:[%s1403_s3 + $0x8] sm:$0xff] %vm19_vm1, %v766_v5 }
 0x1b3   :  { %v762_v8 = vpop.xlane.xlu1 %761  ;;  %v783_v9 = vpop.xlane.xlu0 %782 }
 0x1b4   :  { %v767_v10 = vadd.f32 %v762_v8, %v755_v6  ;;  %v790_v11 = vadd.f32 %v783_v9, %v774_v7 }
 0x1b6   :  { %772 = vst.msk [vmem:[%s1403_s3 + $0x10] sm:$0xff] %vm19_vm1, %v767_v10  ;;  %794 = vst.msk [vmem:[%s1405_s4] sm:$0xff] %vm19_vm1, %v790_v11 }
 0x1b7   :  { %v764_v14 = vpop.xlane.xlu1 %763  ;;  %v787_v15 = vpop.xlane.xlu0 %786 }
 0x1b8   :  { %v768_v16 = vadd.f32 %v764_v14, %v756_v12  ;;  %v792_v17 = vadd.f32 %v787_v15, %v776_v13 }
 0x1ba   :  { %773 = vst.msk [vmem:[%s1403_s3 + $0x18] sm:$0xff] %vm19_vm1, %v768_v16  ;;  %796 = vst.msk [vmem:[%s1405_s4 + $0x10] sm:$0xff] %vm19_vm1, %v792_v17 }
 0x1bb   :  { %v789_v19 = vpop.xlane.xlu1 %788 }
 0x1bc   :  { %v793_v20 = vadd.f32 %v789_v19, %v777_v18 }
 0x1be   :  { %797 = vst.msk [vmem:[%s1405_s4 + $0x18] sm:$0xff] %vm19_vm1, %v793_v20 }

// kernel: unet_forward.30
= control target key start
LH: loop header
LB: loop body
LE: loop exit
PB: predicated region body
PF: predicated region fallthrough
CT: control target
= control target key end

     0   :  { %v164_v0 = vmov 0   ;;  %s227_s1 = inlined_call_operand.vmem [shape: f32[32,1], index: 1, kind: input, shape index: {}]   ;;  %s228_s2 = inlined_call_operand.vmem [shape: f32[32,1], index: 2, kind: input, shape index: {}]   ;;  %s229_s0 = inlined_call_operand.vmem [shape: f32[32,128], index: 0, kind: input, shape index: {}]   ;;  %s230_s3 = inlined_call_operand.vmem [shape: bf16[32,128], index: 3, kind: output, shape index: {}]  }
   0x1   :  { %155 = vset.pattern.permute.xlu1 %v164_v0  ;;  %154 = vset.pattern.permute.xlu0 %v164_v0  ;;  %v16_v1 = vld [vmem:[%s227_s1 + $0x10] sm:$0xff]  ;;  %v14_v3 = vld [vmem:[%s227_s1] sm:$0xff]  ;;  %v17_v8 = vld [vmem:[%s227_s1 + $0x18] sm:$0xff] }
   0x2   :  { %v24_v2 = vld [vmem:[%s228_s2 + $0x10] sm:$0xff]  ;;  %v20_v4 = vmul.f32 0.125, %v16_v1  ;;  %v18_v6 = vmul.f32 0.125, %v14_v3  ;;  %v22_v7 = vld [vmem:[%s228_s2] sm:$0xff]  ;;  %v25_v9 = vld [vmem:[%s228_s2 + $0x18] sm:$0xff]  ;;  %v21_v11 = vmul.f32 0.125, %v17_v8 }
   0x3   :  { %v28_v5 = vmul.f32 0.125, %v24_v2  ;;  %v26_v10 = vmul.f32 0.125, %v22_v7  ;;  %v29_v12 = vmul.f32 0.125, %v25_v9  ;;  %v15_v13 = vld [vmem:[%s227_s1 + $0x8] sm:$0xff]  ;;  %v46_v35 = vld [vmem:[%s229_s0] sm:$0xff]  ;;  %v48_v40 = vld [vmem:[%s229_s0 + $0x10] sm:$0xff] }
   0x4   :  { %v23_v14 = vld [vmem:[%s228_s2 + $0x8] sm:$0xff]  ;;  %62 = vperm.xlu1 %155, %v20_v4   ;;  %v32_v15 = vmul.f32 %v20_v4, %v20_v4  ;;  %52 = vperm.xlu0 %154, %v18_v6   ;;  %v30_v16 = vmul.f32 %v18_v6, %v18_v6  ;;  %v19_v17 = vmul.f32 0.125, %v15_v13  ;;  %v33_v19 = vmul.f32 %v21_v11, %v21_v11  ;;  %v49_v42 = vld [vmem:[%s229_s0 + $0x18] sm:$0xff] }
   0x5   :  { %v27_v18 = vmul.f32 0.125, %v23_v14  ;;  %v47_v38 = vld [vmem:[%s229_s0 + $0x8] sm:$0xff] }
   0x6   :  { %v36_v20 = vsub.f32 %v28_v5, %v32_v15  ;;  %v34_v21 = vsub.f32 %v26_v10, %v30_v16  ;;  %v31_v22 = vmul.f32 %v19_v17, %v19_v17  ;;  %v37_v23 = vsub.f32 %v29_v12, %v33_v19 }
   0x8   :  { %v40_v24 = vadd.f32 1e-05, %v36_v20  ;;  %v38_v25 = vadd.f32 1e-05, %v34_v21  ;;  %67 = vperm.xlu1 %155, %v21_v11   ;;  %v35_v26 = vsub.f32 %v27_v18, %v31_v22  ;;  %57 = vperm.xlu0 %154, %v19_v17   ;;  %v41_v28 = vadd.f32 1e-05, %v37_v23 }
   0xa   :  { %v39_v27 = vadd.f32 1e-05, %v35_v26  ;;  %156 = vrsqrt.f32 %v38_v25 }
   0xb   :  { %158 = vrsqrt.f32 %v40_v24 }
   0xc   :  { %160 = vrsqrt.f32 %v39_v27 }
   0xd   :  { %162 = vrsqrt.f32 %v41_v28 }
  0x14   :  { %v157_v29 = vpop.eup %156 }
  0x15   :  { %v159_v30 = vpop.eup %158  ;;  %76 = vperm.xlu0 %154, %v157_v29  }
  0x16   :  { %v161_v31 = vpop.eup %160 }
  0x17   :  { %81 = vperm.xlu1 %155, %v161_v31   ;;  %v163_v32 = vpop.eup %162 }
  0x19   :  { %86 = vperm.xlu0 %154, %v159_v30  }
  0x1b   :  { %91 = vperm.xlu1 %155, %v163_v32  }
  0x83   :  { %v53_v33 = vpop.permute.xlu0 %52  ;;  %v63_v34 = vpop.permute.xlu1 %62 }
  0x84   :  { %v70_v39 = vsub.f32 %v46_v35, %v53_v33  ;;  %v72_v46 = vsub.f32 %v48_v40, %v63_v34 }
  0x87   :  { %v58_v36 = vpop.permute.xlu0 %57  ;;  %v68_v37 = vpop.permute.xlu1 %67 }
  0x88   :  { %v71_v43 = vsub.f32 %v47_v38, %v58_v36  ;;  %v73_v49 = vsub.f32 %v49_v42, %v68_v37 }
  0x94   :  { %v77_v41 = vpop.permute.xlu0 %76 }
  0x95   :  { %v94_v44 = vmul.f32 %v77_v41, %v70_v39 }
  0x96   :  { %v82_v45 = vpop.permute.xlu1 %81 }
  0x97   :  { %v95_v47 = vmul.f32 %v82_v45, %v71_v43  ;;  %vm98_vm0 = vcmp.ge.f32.partialorder %v94_v44, 0.0  ;;  %v102_v48 = vmul.f32 0.2, %v94_v44 }
  0x98   :  { %v87_v50 = vpop.permute.xlu0 %86 }
  0x99   :  { %vm99_vm1 = vcmp.ge.f32.partialorder %v95_v47, 0.0  ;;  %v103_v51 = vmul.f32 0.2, %v95_v47  ;;  %v106_v52 = vsel %vm98_vm0, %v94_v44, %v102_v48  ;;  %v96_v53 = vmul.f32 %v87_v50, %v72_v46 }
  0x9a   :  { %v92_v54 = vpop.permute.xlu1 %91 }
  0x9b   :  { %v107_v55 = vsel %vm99_vm1, %v95_v47, %v103_v51  ;;  %v97_v56 = vmul.f32 %v92_v54, %v73_v49  ;;  %vm100_vm2 = vcmp.ge.f32.partialorder %v96_v53, 0.0  ;;  %v104_v57 = vmul.f32 0.2, %v96_v53 }
  0x9c   :  { %v145_v58 = vpack.c.bf16 %v107_v55, %v106_v52 }
  0x9d   :  { %vm101_vm3 = vcmp.ge.f32.partialorder %v97_v56, 0.0  ;;  %v105_v59 = vmul.f32 0.2, %v97_v56  ;;  %v108_v60 = vsel %vm100_vm2, %v96_v53, %v104_v57 }
  0x9e   :  { %146 = vst [vmem:[%s230_s3] sm:$0xff] %v145_v58  }
  0x9f   :  { %v109_v61 = vsel %vm101_vm3, %v97_v56, %v105_v59 }
  0xa0   :  { %v150_v62 = vpack.c.bf16 %v109_v61, %v108_v60 }
  0xa2   :  { %152 = vst [vmem:[%s230_s3 + $0x8] sm:$0xff] %v150_v62  }

// kernel: unet_forward.32
= control target key start
LH: loop header
LB: loop body
LE: loop exit
PB: predicated region body
PF: predicated region fallthrough
CT: control target
= control target key end

     0   :  { %v156_v0 = vmov 0   ;;  %s219_s1 = inlined_call_operand.vmem [shape: f32[32,1], index: 1, kind: input, shape index: {}]   ;;  %s220_s2 = inlined_call_operand.vmem [shape: f32[32,1], index: 2, kind: input, shape index: {}]   ;;  %s221_s0 = inlined_call_operand.vmem [shape: f32[32,128], index: 0, kind: input, shape index: {}]   ;;  %s222_s3 = inlined_call_operand.vmem [shape: bf16[32,128], index: 3, kind: output, shape index: {}]  }
   0x1   :  { %147 = vset.pattern.permute.xlu1 %v156_v0  ;;  %146 = vset.pattern.permute.xlu0 %v156_v0  ;;  %v16_v1 = vld [vmem:[%s219_s1 + $0x10] sm:$0xff]  ;;  %v14_v3 = vld [vmem:[%s219_s1] sm:$0xff]  ;;  %v17_v7 = vld [vmem:[%s219_s1 + $0x18] sm:$0xff] }
   0x2   :  { %v20_v2 = vld [vmem:[%s220_s2 + $0x10] sm:$0xff]  ;;  %54 = vperm.xlu1 %147, %v16_v1   ;;  %v24_v4 = vmul.f32 %v16_v1, %v16_v1  ;;  %v18_v5 = vld [vmem:[%s220_s2] sm:$0xff]  ;;  %44 = vperm.xlu0 %146, %v14_v3   ;;  %v22_v6 = vmul.f32 %v14_v3, %v14_v3  ;;  %v21_v8 = vld [vmem:[%s220_s2 + $0x18] sm:$0xff]  ;;  %v25_v9 = vmul.f32 %v17_v7, %v17_v7 }
   0x3   :  { %v15_v10 = vld [vmem:[%s219_s1 + $0x8] sm:$0xff]  ;;  %v38_v27 = vld [vmem:[%s221_s0] sm:$0xff]  ;;  %v40_v32 = vld [vmem:[%s221_s0 + $0x10] sm:$0xff] }
   0x4   :  { %v19_v11 = vld [vmem:[%s220_s2 + $0x8] sm:$0xff]  ;;  %v28_v12 = vsub.f32 %v20_v2, %v24_v4  ;;  %v26_v13 = vsub.f32 %v18_v5, %v22_v6  ;;  %v23_v14 = vmul.f32 %v15_v10, %v15_v10  ;;  %v29_v15 = vsub.f32 %v21_v8, %v25_v9  ;;  %v41_v34 = vld [vmem:[%s221_s0 + $0x18] sm:$0xff] }
   0x5   :  { %v39_v30 = vld [vmem:[%s221_s0 + $0x8] sm:$0xff] }
   0x6   :  { %v32_v16 = vadd.f32 1e-05, %v28_v12  ;;  %v30_v17 = vadd.f32 1e-05, %v26_v13  ;;  %59 = vperm.xlu1 %147, %v17_v7   ;;  %v27_v18 = vsub.f32 %v19_v11, %v23_v14  ;;  %49 = vperm.xlu0 %146, %v15_v10   ;;  %v33_v20 = vadd.f32 1e-05, %v29_v15 }
   0x8   :  { %v31_v19 = vadd.f32 1e-05, %v27_v18  ;;  %148 = vrsqrt.f32 %v30_v17 }
   0x9   :  { %150 = vrsqrt.f32 %v32_v16 }
   0xa   :  { %152 = vrsqrt.f32 %v31_v19 }
   0xb   :  { %154 = vrsqrt.f32 %v33_v20 }
  0x12   :  { %v149_v21 = vpop.eup %148 }
  0x13   :  { %v151_v22 = vpop.eup %150  ;;  %68 = vperm.xlu0 %146, %v149_v21  }
  0x14   :  { %v153_v23 = vpop.eup %152 }
  0x15   :  { %73 = vperm.xlu1 %147, %v153_v23   ;;  %v155_v24 = vpop.eup %154 }
  0x17   :  { %78 = vperm.xlu0 %146, %v151_v22  }
  0x19   :  { %83 = vperm.xlu1 %147, %v155_v24  }
  0x81   :  { %v45_v25 = vpop.permute.xlu0 %44  ;;  %v55_v26 = vpop.permute.xlu1 %54 }
  0x82   :  { %v62_v31 = vsub.f32 %v38_v27, %v45_v25  ;;  %v64_v38 = vsub.f32 %v40_v32, %v55_v26 }
  0x85   :  { %v50_v28 = vpop.permute.xlu0 %49  ;;  %v60_v29 = vpop.permute.xlu1 %59 }
  0x86   :  { %v63_v35 = vsub.f32 %v39_v30, %v50_v28  ;;  %v65_v41 = vsub.f32 %v41_v34, %v60_v29 }
  0x92   :  { %v69_v33 = vpop.permute.xlu0 %68 }
  0x93   :  { %v86_v36 = vmul.f32 %v69_v33, %v62_v31 }
  0x94   :  { %v74_v37 = vpop.permute.xlu1 %73 }
  0x95   :  { %v87_v39 = vmul.f32 %v74_v37, %v63_v35  ;;  %vm90_vm0 = vcmp.ge.f32.partialorder %v86_v36, 0.0  ;;  %v94_v40 = vmul.f32 0.2, %v86_v36 }
  0x96   :  { %v79_v42 = vpop.permute.xlu0 %78 }
  0x97   :  { %vm91_vm1 = vcmp.ge.f32.partialorder %v87_v39, 0.0  ;;  %v95_v43 = vmul.f32 0.2, %v87_v39  ;;  %v98_v44 = vsel %vm90_vm0, %v86_v36, %v94_v40  ;;  %v88_v45 = vmul.f32 %v79_v42, %v64_v38 }
  0x98   :  { %v84_v46 = vpop.permute.xlu1 %83 }
  0x99   :  { %v99_v47 = vsel %vm91_vm1, %v87_v39, %v95_v43  ;;  %v89_v48 = vmul.f32 %v84_v46, %v65_v41  ;;  %vm92_vm2 = vcmp.ge.f32.partialorder %v88_v45, 0.0  ;;  %v96_v49 = vmul.f32 0.2, %v88_v45 }
  0x9a   :  { %v137_v50 = vpack.c.bf16 %v99_v47, %v98_v44 }
  0x9b   :  { %vm93_vm3 = vcmp.ge.f32.partialorder %v89_v48, 0.0  ;;  %v97_v51 = vmul.f32 0.2, %v89_v48  ;;  %v100_v52 = vsel %vm92_vm2, %v88_v45, %v96_v49 }
  0x9c   :  { %138 = vst [vmem:[%s222_s3] sm:$0xff] %v137_v50  }
  0x9d   :  { %v101_v53 = vsel %vm93_vm3, %v89_v48, %v97_v51 }
  0x9e   :  { %v142_v54 = vpack.c.bf16 %v101_v53, %v100_v52 }
  0xa0   :  { %144 = vst [vmem:[%s222_s3 + $0x8] sm:$0xff] %v142_v54  }

// kernel: unet_forward.35
= control target key start
LH: loop header
LB: loop body
LE: loop exit
PB: predicated region body
PF: predicated region fallthrough
CT: control target
= control target key end

     0   :  { %vm1058_vm0 = vcmask 523264   ;;  %vm19_vm1 = vcmask 7168   ;;  %s2484_s0 = inlined_call_operand.vmem [shape: bf16[1728,128], index: 0, kind: input, shape index: {}]   ;;  %s2485_s1 = inlined_call_operand.vmem [shape: bf16[32,1728], index: 1, kind: input, shape index: {}]   ;;  %s2486_s3 = inlined_call_operand.vmem [shape: f32[32,1], index: 3, kind: output, shape index: {1}]   ;;  %s2487_s2 = inlined_call_operand.vmem [shape: f32[32,128], index: 2, kind: output, shape index: {0}]   ;;  %s2488_s4 = inlined_call_operand.vmem [shape: f32[32,1], index: 4, kind: output, shape index: {2}]  }
   0x1   :  { %v1777_v0 = vld [vmem:[%s2484_s0 + $0x40] sm:$0xff]   ;;  %v1779_v2 = vld [vmem:[%s2484_s0 + $0x48] sm:$0xff]   ;;  %v1781_v4 = vld [vmem:[%s2484_s0 + $0x50] sm:$0xff]  }
   0x2   :  { %v1778_v1 = vld [vmem:[%s2484_s0] sm:$0xff]   ;;  %1607 = vmatprep.subr.bf16.mxu1 %v1777_v0  ;;  %v1780_v3 = vld [vmem:[%s2484_s0 + $0x8] sm:$0xff]   ;;  %v1782_v5 = vld [vmem:[%s2484_s0 + $0x10] sm:$0xff]  }
   0x3   :  { %1608 = vmatpush3.bf16.msra.mxu1 %v1778_v1  ;;  %v1783_v6 = vld [vmem:[%s2484_s0 + $0x58] sm:$0xff]   ;;  %v1787_v8 = vld [vmem:[%s2484_s0 + $0x140] sm:$0xff]   ;;  %v1791_v12 = vld [vmem:[%s2484_s0 + $0x148] sm:$0xff]  }
   0x4   :  { %1609 = vmatprep.subr.bf16.mxu1 %v1779_v2  ;;  %v1784_v7 = vld [vmem:[%s2484_s0 + $0x18] sm:$0xff]   ;;  %v1788_v9 = vld [vmem:[%s2484_s0 + $0x100] sm:$0xff]   ;;  %1663 = vmatprep.subr.bf16.mxu0 %v1787_v8  ;;  %v1792_v13 = vld [vmem:[%s2484_s0 + $0x108] sm:$0xff]  }
   0x5   :  { %v1785_v10 = vld [vmem:[%s2484_s0 + $0x60] sm:$0xff]   ;;  %1664 = vmatpush3.bf16.msra.mxu0 %v1788_v9  ;;  %v1789_v14 = vld [vmem:[%s2484_s0 + $0x68] sm:$0xff]   ;;  %v1795_v16 = vld [vmem:[%s2484_s0 + $0x150] sm:$0xff]  }
   0x6   :  { %v1786_v11 = vld [vmem:[%s2484_s0 + $0x20] sm:$0xff]   ;;  %1665 = vmatprep.subr.bf16.mxu0 %v1791_v12  ;;  %v1790_v15 = vld [vmem:[%s2484_s0 + $0x28] sm:$0xff]   ;;  %v1796_v17 = vld [vmem:[%s2484_s0 + $0x110] sm:$0xff]  }
   0x7   :  { %1610 = vmatpush3.bf16.msra.mxu1 %v1780_v3  ;;  %v1793_v18 = vld [vmem:[%s2484_s0 + $0x70] sm:$0xff]   ;;  %v1799_v20 = vld [vmem:[%s2484_s0 + $0x158] sm:$0xff]   ;;  %v1804_v25 = vld [vmem:[%s2484_s0 + $0xc0] sm:$0xff]  }
   0x8   :  { %1611 = vmatprep.subr.bf16.mxu1 %v1781_v4  ;;  %v1794_v19 = vld [vmem:[%s2484_s0 + $0x30] sm:$0xff]   ;;  %v1797_v21 = vld [vmem:[%s2484_s0 + $0x78] sm:$0xff]   ;;  %v1806_v27 = vld [vmem:[%s2484_s0 + $0x160] sm:$0xff]  }
   0x9   :  { %1666 = vmatpush3.bf16.msra.mxu0 %v1792_v13  ;;  %v1802_v22 = vld [vmem:[%s2485_s1 + $0x4] ss:$56 sps:$4 sm:$0xff]   ;;  %v1800_v26 = vld [vmem:[%s2485_s1] ss:$56 sps:$4 sm:$0xff]   ;;  %v1808_v30 = vld [vmem:[%s2484_s0 + $0xc8] sm:$0xff]  }
   0xa   :  { %1667 = vmatprep.subr.bf16.mxu0 %v1795_v16  ;;  %v1803_v23 = vld [vmem:[%s2484_s0 + $0x118] sm:$0xff]   ;;  %1097 = vmatprep.mubr.bf16.mxu1 %v1802_v22  ;;  %v1807_v28 = vld [vmem:[%s2484_s0 + $0x120] sm:$0xff]   ;;  %v1810_v31 = vld [vmem:[%s2484_s0 + $0x168] sm:$0xff]  }
   0xb   :  { %1612 = vmatpush3.bf16.msra.mxu1 %v1782_v5  ;;  %v1798_v24 = vld [vmem:[%s2484_s0 + $0x38] sm:$0xff]   ;;  %v1805_v29 = vld [vmem:[%s2484_s0 + $0x80] sm:$0xff]   ;;  %v1811_v32 = vld [vmem:[%s2484_s0 + $0x128] sm:$0xff]  }
   0xc   :  { %1613 = vmatprep.subr.bf16.mxu1 %v1783_v6  ;;  %v1809_v33 = vld [vmem:[%s2484_s0 + $0x88] sm:$0xff]   ;;  %v1812_v34 = vld [vmem:[%s2484_s0 + $0xd0] sm:$0xff]   ;;  %v1816_v38 = vld [vmem:[%s2484_s0 + $0xd8] sm:$0xff]  }
   0xd   :  { %1668 = vmatpush3.bf16.msra.mxu0 %v1796_v17  ;;  %v1814_v35 = vld [vmem:[%s2484_s0 + $0x170] sm:$0xff]   ;;  %v1818_v39 = vld [vmem:[%s2484_s0 + $0x178] sm:$0xff]   ;;  %v1820_v42 = vld [vmem:[%s2484_s0 + $0xe0] sm:$0xff]  }
   0xe   :  { %1669 = vmatprep.subr.bf16.mxu0 %v1799_v20  ;;  %v1815_v36 = vld [vmem:[%s2484_s0 + $0x130] sm:$0xff]   ;;  %v1819_v40 = vld [vmem:[%s2484_s0 + $0x138] sm:$0xff]   ;;  %v1821_v45 = vld [vmem:[%s2484_s0 + $0xa0] sm:$0xff]  }
   0xf   :  { %1614 = vmatpush3.bf16.msra.mxu1 %v1784_v7  ;;  %v1813_v37 = vld [vmem:[%s2484_s0 + $0x90] sm:$0xff]   ;;  %v1817_v41 = vld [vmem:[%s2484_s0 + $0x98] sm:$0xff]   ;;  %v1825_v46 = vld [vmem:[%s2484_s0 + $0x240] sm:$0xff]  }
  0x10   :  { %1615 = vmatprep.subr.bf16.mxu1 %v1785_v10  ;;  %v1822_v43 = vld [vmem:[%s2485_s1 + $0x10] ss:$56 sps:$4 sm:$0xff]   ;;  %v1824_v44 = vld [vmem:[%s2485_s1 + $0x14] ss:$56 sps:$4 sm:$0xff]   ;;  %v1826_v47 = vld [vmem:[%s2484_s0 + $0x200] sm:$0xff]  }
  0x11   :  { %1670 = vmatpush3.bf16.msra.mxu0 %v1803_v23  ;;  %1195 = vmatprep.mubr.bf16.mxu0 %v1824_v44  ;;  %v1827_v48 = vld [vmem:[%s2484_s0 + $0xe8] sm:$0xff]   ;;  %v1834_v54 = vld [vmem:[%s2484_s0 + $0xf0] sm:$0xff]   ;;  %v1838_v58 = vld [vmem:[%s2484_s0 + $0xf8] sm:$0xff]   ;;  %v1927_v23 = vmov 0  }
  0x12   :  { %1671 = vmatprep.subr.bf16.mxu0 %v1806_v27  ;;  %v1828_v49 = vld [vmem:[%s2485_s1 + $0x74] ss:$56 sps:$4 sm:$0xff]   ;;  %v1831_v51 = vld [vmem:[%s2485_s1 + $0x70] ss:$56 sps:$4 sm:$0xff]   ;;  %v1840_v59 = vld [vmem:[%s2484_s0 + $0x258] sm:$0xff]  }
  0x13   :  { %1616 = vmatpush3.bf16.msra.mxu1 %v1786_v11  ;;  %v1830_v50 = vld [vmem:[%s2484_s0 + $0xa8] sm:$0xff]   ;;  %v1835_v55 = vld [vmem:[%s2484_s0 + $0xb0] sm:$0xff]   ;;  %v1839_v60 = vld [vmem:[%s2484_s0 + $0xb8] sm:$0xff]  }
  0x14   :  { %1617 = vmatprep.subr.bf16.mxu1 %v1789_v14  ;;  %v1832_v52 = vld [vmem:[%s2484_s0 + $0x248] sm:$0xff]   ;;  %v1836_v56 = vld [vmem:[%s2484_s0 + $0x250] sm:$0xff]   ;;  %v1844_v63 = vld [vmem:[%s2484_s0 + $0x218] sm:$0xff]  }
  0x15   :  { %1672 = vmatpush3.bf16.msra.mxu0 %v1807_v28  ;;  %v1833_v53 = vld [vmem:[%s2484_s0 + $0x208] sm:$0xff]   ;;  %v1837_v57 = vld [vmem:[%s2484_s0 + $0x210] sm:$0xff]   ;;  %v1845_v0 = vld [vmem:[%s2484_s0 + $0x1c0] sm:$0xff]  }
  0x16   :  { %1673 = vmatprep.subr.bf16.mxu0 %v1810_v31  ;;  %v1841_v61 = vld [vmem:[%s2485_s1 + $0x8] ss:$56 sps:$4 sm:$0xff]   ;;  %v1843_v62 = vld [vmem:[%s2485_s1 + $0xc] ss:$56 sps:$4 sm:$0xff]   ;;  %v1852_v7 = vld [vmem:[%s2485_s1 + $0x7c] ss:$56 sps:$4 sm:$0xff]  }
  0x17   :  { %1618 = vmatpush3.bf16.msra.mxu1 %v1790_v15  ;;  %v1846_v1 = vld [vmem:[%s2484_s0 + $0x180] sm:$0xff]   ;;  %v1849_v4 = vld [vmem:[%s2484_s0 + $0x1c8] sm:$0xff]   ;;  %v1855_v9 = vld [vmem:[%s2485_s1 + $0x78] ss:$56 sps:$4 sm:$0xff]  }
  0x18   :  { %1619 = vmatprep.subr.bf16.mxu1 %v1793_v18  ;;  %v1847_v2 = vld [vmem:[%s2484_s0 + $0x260] sm:$0xff]   ;;  %v1850_v5 = vld [vmem:[%s2484_s0 + $0x188] sm:$0xff]   ;;  %v1856_v10 = vld [vmem:[%s2484_s0 + $0x1d0] sm:$0xff]  }
  0x19   :  { %1674 = vmatpush3.bf16.msra.mxu0 %v1811_v32  ;;  %v1848_v3 = vld [vmem:[%s2484_s0 + $0x220] sm:$0xff]   ;;  %v1851_v6 = vld [vmem:[%s2484_s0 + $0x268] sm:$0xff]   ;;  %v1859_v12 = vld [vmem:[%s2484_s0 + $0x190] sm:$0xff]  }
  0x1a   :  { %1675 = vmatprep.subr.bf16.mxu0 %v1814_v35  ;;  %v1854_v8 = vld [vmem:[%s2484_s0 + $0x228] sm:$0xff]   ;;  %v1857_v11 = vld [vmem:[%s2485_s1 + $0x84] ss:$56 sps:$4 sm:$0xff]   ;;  %v1860_v13 = vld [vmem:[%s2485_s1 + $0x80] ss:$56 sps:$4 sm:$0xff]  }
  0x1b   :  { %1620 = vmatpush3.bf16.msra.mxu1 %v1794_v19  ;;  %v1861_v14 = vld [vmem:[%s2484_s0 + $0x270] sm:$0xff]   ;;  %v1863_v16 = vld [vmem:[%s2484_s0 + $0x1d8] sm:$0xff]   ;;  %v1867_v20 = vld [vmem:[%s2484_s0 + $0x1e0] sm:$0xff]  }
  0x1c   :  { %1621 = vmatprep.subr.bf16.mxu1 %v1797_v21  ;;  %v1862_v15 = vld [vmem:[%s2484_s0 + $0x230] sm:$0xff]   ;;  %v1864_v17 = vld [vmem:[%s2484_s0 + $0x198] sm:$0xff]   ;;  %v1868_v21 = vld [vmem:[%s2484_s0 + $0x1a0] sm:$0xff]  }
  0x1d   :  { %1676 = vmatpush3.bf16.msra.mxu0 %v1815_v36  ;;  %v1865_v18 = vld [vmem:[%s2484_s0 + $0x278] sm:$0xff]   ;;  %v1874_v27 = vld [vmem:[%s2484_s0 + $0x1a8] sm:$0xff]   ;;  %v1878_v31 = vld [vmem:[%s2484_s0 + $0x310] sm:$0xff]  }
  0x1e   :  { %1677 = vmatprep.subr.bf16.mxu0 %v1818_v39  ;;  %v1866_v19 = vld [vmem:[%s2484_s0 + $0x238] sm:$0xff]   ;;  %v1875_v28 = vld [vmem:[%s2484_s0 + $0x308] sm:$0xff]   ;;  %v1887_v39 = vld [vmem:[%s2484_s0 + $0x320] sm:$0xff]  }
  0x1f   :  { %1622 = vmatpush3.bf16.msra.mxu1 %v1798_v24  ;;  %v1869_v22 = vld [vmem:[%s2485_s1 + $0x20] ss:$56 sps:$4 sm:$0xff]   ;;  %v1871_v24 = vld [vmem:[%s2485_s1 + $0x24] ss:$56 sps:$4 sm:$0xff]  }
  0x20   :  { %1635 = vmatprep.subr.bf16.mxu1 %v1804_v25  ;;  %v1872_v25 = vld [vmem:[%s2484_s0 + $0x300] sm:$0xff]   ;;  %v1879_v32 = vld [vmem:[%s2484_s0 + $0x1f8] sm:$0xff]  }
  0x21   :  { %1678 = vmatpush3.bf16.msra.mxu0 %v1819_v40  ;;  %v1883_v35 = vld [vmem:[%s2485_s1 + $0x1c] ss:$56 sps:$4 sm:$0xff]   ;;  %v1888_v40 = vld [vmem:[%s2484_s0 + $0x2c8] sm:$0xff]  }
  0x22   :  { %1098 = vmatmul.mubr.bf16.vlgmr.msra.gmra.mrb[0].mxu1 %v1800_v26  ;;  %1719 = vmatprep.subr.bf16.mxu0 %v1825_v46  ;;  %v1873_v26 = vld [vmem:[%s2484_s0 + $0x1e8] sm:$0xff]   ;;  %v1884_v36 = vld [vmem:[%s2484_s0 + $0x318] sm:$0xff]  }
  0x23   :  { %1636 = vmatpush3.bf16.msra.mxu1 %v1805_v29  ;;  %1105 = vmatprep.mubr.bf16.mxu1 %v1828_v49  ;;  %v1876_v29 = vld [vmem:[%s2484_s0 + $0x1f0] sm:$0xff]   ;;  %v1893_v44 = vld [vmem:[%s2485_s1 + $0x88] ss:$56 sps:$4 sm:$0xff]  }
  0x24   :  { %1637 = vmatprep.subr.bf16.mxu1 %v1808_v30  ;;  %1196 = vmatmul.mubr.bf16.vlgmr.msra.gmra.mrb[0].mxu0 %v1822_v43  ;;  %v1877_v30 = vld [vmem:[%s2484_s0 + $0x1b0] sm:$0xff]   ;;  %v1892_v43 = vld [vmem:[%s2484_s0 + $0x328] sm:$0xff]  }
  0x25   :  { %1720 = vmatpush3.bf16.msra.mxu0 %v1826_v47  ;;  %1203 = vmatprep.mubr.bf16.mxu0 %v1857_v11  ;;  %v1895_v46 = vld [vmem:[%s2485_s1 + $0x94] ss:$56 sps:$4 sm:$0xff]  }
  0x26   :  { %1721 = vmatprep.subr.bf16.mxu0 %v1832_v52  ;;  %v1897_v47 = vld [vmem:[%s2484_s0 + $0x290] sm:$0xff]   ;;  %v1903_v52 = vld [vmem:[%s2484_s0 + $0x2e0] sm:$0xff]  }
  0x27   :  { %1638 = vmatpush3.bf16.msra.mxu1 %v1809_v33  ;;  %v1880_v33 = vld [vmem:[%s2484_s0 + $0x1b8] sm:$0xff]   ;;  %v1899_v49 = vld [vmem:[%s2484_s0 + $0x330] sm:$0xff]  }
  0x28   :  { %1639 = vmatprep.subr.bf16.mxu1 %v1812_v34  ;;  %v1881_v34 = vld [vmem:[%s2485_s1 + $0x18] ss:$56 sps:$4 sm:$0xff]  }
  0x29   :  { %1722 = vmatpush3.bf16.msra.mxu0 %v1833_v53  ;;  %v1902_v53 = vld [vmem:[%s2484_s0 + $0x338] sm:$0xff]  }
  0x2a   :  { %1106 = vmatmul.mubr.bf16.gmra.mrb[4].mxu1 %v1831_v51  ;;  %1723 = vmatprep.subr.bf16.mxu0 %v1836_v56  ;;  %v1901_v51 = vld [vmem:[%s2484_s0 + $0x298] sm:$0xff]   ;;  %v1905_v56 = vld [vmem:[%s2484_s0 + $0x340] sm:$0xff]  }
  0x2b   :  { %1640 = vmatpush3.bf16.msra.mxu1 %v1813_v37  ;;  %1146 = vmatprep.mubr.bf16.mxu1 %v1843_v62  ;;  %v1885_v37 = vld [vmem:[%s2484_s0 + $0x2c0] sm:$0xff]  }
  0x2c   :  { %1641 = vmatprep.subr.bf16.mxu1 %v1816_v38  ;;  %1204 = vmatmul.mubr.bf16.gmra.mrb[4].mxu0 %v1860_v13  ;;  %v1886_v38 = vld [vmem:[%s2484_s0 + $0x280] sm:$0xff]  }
  0x2d   :  { %1724 = vmatpush3.bf16.msra.mxu0 %v1837_v57  ;;  %1293 = vmatprep.mubr.bf16.mxu0 %v1871_v24  ;;  %v1907_v57 = vld [vmem:[%s2484_s0 + $0x2a8] sm:$0xff]  }
  0x2e   :  { %1725 = vmatprep.subr.bf16.mxu0 %v1840_v59  ;;  %v1908_v59 = vld [vmem:[%s2484_s0 + $0x348] sm:$0xff]  }
  0x2f   :  { %1642 = vmatpush3.bf16.msra.mxu1 %v1817_v41  ;;  %v1889_v41 = vld [vmem:[%s2484_s0 + $0x288] sm:$0xff]  }
  0x30   :  { %1643 = vmatprep.subr.bf16.mxu1 %v1820_v42  ;;  %v1890_v42 = vld [vmem:[%s2485_s1 + $0x8c] ss:$56 sps:$4 sm:$0xff]  }
  0x31   :  { %1726 = vmatpush3.bf16.msra.mxu0 %v1844_v63  ;;  %v1916_v62 = vld [vmem:[%s2485_s1 + $0x2c] ss:$56 sps:$4 sm:$0xff]   ;;  %v1911_v63 = vld [vmem:[%s2484_s0 + $0x350] sm:$0xff]  }
  0x32   :  { %1727 = vmatprep.subr.bf16.mxu0 %v1847_v2  ;;  %v1914_v2 = vld [vmem:[%s2485_s1 + $0x28] ss:$56 sps:$4 sm:$0xff]  }
  0x33   :  { %1644 = vmatpush3.bf16.msra.mxu1 %v1821_v45  ;;  %v1894_v45 = vld [vmem:[%s2484_s0 + $0x2d0] sm:$0xff]  }
  0x34   :  { %1645 = vmatprep.subr.bf16.mxu1 %v1827_v48  ;;  %v1898_v48 = vld [vmem:[%s2485_s1 + $0x90] ss:$56 sps:$4 sm:$0xff]  }
  0x35   :  { %1728 = vmatpush3.bf16.msra.mxu0 %v1848_v3  ;;  %v1917_v3 = vld [vmem:[%s2484_s0 + $0x358] sm:$0xff]  }
  0x36   :  { %1729 = vmatprep.subr.bf16.mxu0 %v1851_v6  ;;  %v1924_v6 = vld [vmem:[%s2485_s1 + $0xa4] ss:$56 sps:$4 sm:$0xff]  }
  0x37   :  { %1646 = vmatpush3.bf16.msra.mxu1 %v1830_v50  ;;  %v1900_v50 = vld [vmem:[%s2484_s0 + $0x2d8] sm:$0xff]  }
  0x38   :  { %1647 = vmatprep.subr.bf16.mxu1 %v1834_v54  ;;  %v1904_v54 = vld [vmem:[%s2484_s0 + $0x2a0] sm:$0xff]  }
  0x39   :  { %1730 = vmatpush3.bf16.msra.mxu0 %v1854_v8  ;;  %v1926_v8 = vld [vmem:[%s2485_s1 + $0xa0] ss:$56 sps:$4 sm:$0xff]  }
  0x3a   :  { %1731 = vmatprep.subr.bf16.mxu0 %v1861_v14 }
  0x3b   :  { %1648 = vmatpush3.bf16.msra.mxu1 %v1835_v55  ;;  %v1906_v55 = vld [vmem:[%s2484_s0 + $0x2e8] sm:$0xff]  }
  0x3c   :  { %1649 = vmatprep.subr.bf16.mxu1 %v1838_v58  ;;  %v1909_v58 = vld [vmem:[%s2484_s0 + $0x2f0] sm:$0xff]  }
  0x3d   :  { %1732 = vmatpush3.bf16.msra.mxu0 %v1862_v15 }
  0x3e   :  { %1733 = vmatprep.subr.bf16.mxu0 %v1865_v18 }
  0x3f   :  { %1650 = vmatpush3.bf16.msra.mxu1 %v1839_v60  ;;  %v1910_v60 = vld [vmem:[%s2484_s0 + $0x2b0] sm:$0xff]  }
  0x40   :  { %1691 = vmatprep.subr.bf16.mxu1 %v1845_v0  ;;  %v1920_v0 = vld [vmem:[%s2485_s1 + $0x34] ss:$56 sps:$4 sm:$0xff]  }
  0x41   :  { %1734 = vmatpush3.bf16.msra.mxu0 %v1866_v19 }
  0x42   :  { %1147 = vmatmul.mubr.bf16.vlgmr.msra.gmra.mrb[8].mxu1 %v1841_v61  ;;  %1359 = vmatprep.subr.bf16.mxu0 %v1927_v23  ;;  %v1912_v61 = vld [vmem:[%s2484_s0 + $0x2f8] sm:$0xff]  }
  0x43   :  { %1692 = vmatpush3.bf16.msra.mxu1 %v1846_v1  ;;  %1154 = vmatprep.mubr.bf16.mxu1 %v1852_v7  ;;  %v1913_v1 = vld [vmem:[%s2484_s0 + $0x2b8] sm:$0xff]  }
  0x44   :  { %1693 = vmatprep.subr.bf16.mxu1 %v1849_v4  ;;  %1294 = vmatmul.mubr.bf16.vlgmr.msra.gmra.mrb[8].mxu0 %v1869_v22  ;;  %v1921_v4 = vld [vmem:[%s2485_s1 + $0x9c] ss:$56 sps:$4 sm:$0xff]   ;;  %v1923_v7 = vld [vmem:[%s2485_s1 + $0x98] ss:$56 sps:$4 sm:$0xff]  }
  0x45   :  { %1360 = vmatpush1.bf16.msra.mxu0 %v1872_v25  ;;  %1301 = vmatprep.mubr.bf16.mxu0 %v1895_v46 }
  0x46   :  { %1361 = vmatprep.subr.bf16.mxu0 %v1927_v23 }
  0x47   :  { %1694 = vmatpush3.bf16.msra.mxu1 %v1850_v5  ;;  %v1918_v5 = vld [vmem:[%s2485_s1 + $0x30] ss:$56 sps:$4 sm:$0xff]  }
  0x48   :  { %1695 = vmatprep.subr.bf16.mxu1 %v1856_v10 }
  0x49   :  { %1362 = vmatpush1.bf16.msra.mxu0 %v1875_v28 }
  0x4a   :  { %1155 = vmatmul.mubr.bf16.gmra.mrb[12].mxu1 %v1855_v9  ;;  %1363 = vmatprep.subr.bf16.mxu0 %v1927_v23  ;;  %v1928_v9 = vmov 0.0  }
  0x4b   :  { %1696 = vmatpush3.bf16.msra.mxu1 %v1859_v12  ;;  %1244 = vmatprep.mubr.bf16.mxu1 %v1883_v35  ;;  %20 = vst.msk [vmem:[%s2486_s3] sm:$0xff] %vm19_vm1, %v1928_v9  ;;  %21 = vst.msk [vmem:[%s2486_s3 + $0x8] sm:$0xff] %vm19_vm1, %v1928_v9 }
  0x4c   :  { %1697 = vmatprep.subr.bf16.mxu1 %v1863_v16  ;;  %1302 = vmatmul.mubr.bf16.gmra.mrb[12].mxu0 %v1898_v48  ;;  %22 = vst.msk [vmem:[%s2486_s3 + $0x10] sm:$0xff] %vm19_vm1, %v1928_v9  ;;  %23 = vst.msk [vmem:[%s2486_s3 + $0x18] sm:$0xff] %vm19_vm1, %v1928_v9 }
  0x4d   :  { %1364 = vmatpush1.bf16.msra.mxu0 %v1878_v31  ;;  %1605 = vmatprep.mubr.msk.bf16.mxu0 %vm1058_vm0, %v1920_v0  ;;  %25 = vst.msk [vmem:[%s2488_s4 + $0x8] sm:$0xff] %vm19_vm1, %v1928_v9  ;;  %24 = vst.msk [vmem:[%s2488_s4] sm:$0xff] %vm19_vm1, %v1928_v9 }
  0x4e   :  { %1365 = vmatprep.subr.bf16.mxu0 %v1927_v23  ;;  %26 = vst.msk [vmem:[%s2488_s4 + $0x10] sm:$0xff] %vm19_vm1, %v1928_v9  ;;  %27 = vst.msk [vmem:[%s2488_s4 + $0x18] sm:$0xff] %vm19_vm1, %v1928_v9 }
  0x4f   :  { %1698 = vmatpush3.bf16.msra.mxu1 %v1864_v17 }
  0x50   :  { %1699 = vmatprep.subr.bf16.mxu1 %v1867_v20 }
  0x51   :  { %1366 = vmatpush1.bf16.msra.mxu0 %v1884_v36 }
  0x52   :  { %1367 = vmatprep.subr.bf16.mxu0 %v1927_v23 }
  0x53   :  { %1700 = vmatpush3.bf16.msra.mxu1 %v1868_v21 }
  0x54   :  { %1701 = vmatprep.subr.bf16.mxu1 %v1873_v26 }
  0x55   :  { %1368 = vmatpush1.bf16.msra.mxu0 %v1887_v39 }
  0x56   :  { %1369 = vmatprep.subr.bf16.mxu0 %v1927_v23 }
  0x57   :  { %1702 = vmatpush3.bf16.msra.mxu1 %v1874_v27 }
  0x58   :  { %1703 = vmatprep.subr.bf16.mxu1 %v1876_v29 }
  0x59   :  { %1370 = vmatpush1.bf16.msra.mxu0 %v1892_v43 }
  0x5a   :  { %1371 = vmatprep.subr.bf16.mxu0 %v1927_v23 }
  0x5b   :  { %1704 = vmatpush3.bf16.msra.mxu1 %v1877_v30 }
  0x5c   :  { %1705 = vmatprep.subr.bf16.mxu1 %v1879_v32 }
  0x5d   :  { %1372 = vmatpush1.bf16.msra.mxu0 %v1899_v49 }
  0x5e   :  { %1373 = vmatprep.subr.bf16.mxu0 %v1927_v23 }
  0x5f   :  { %1706 = vmatpush3.bf16.msra.mxu1 %v1880_v33 }
  0x60   :  { %1747 = vmatprep.subr.bf16.mxu1 %v1885_v37 }
  0x61   :  { %1374 = vmatpush1.bf16.msra.mxu0 %v1902_v53 }
  0x62   :  { %1245 = vmatmul.mubr.bf16.vlgmr.msra.gmra.mrb[16].mxu1 %v1881_v34  ;;  %1375 = vmatprep.subr.bf16.mxu0 %v1927_v23 }
  0x63   :  { %1748 = vmatpush3.bf16.msra.mxu1 %v1886_v38  ;;  %1252 = vmatprep.mubr.bf16.mxu1 %v1890_v42 }
  0x64   :  { %1749 = vmatprep.subr.bf16.mxu1 %v1888_v40 }
  0x65   :  { %1376 = vmatpush1.bf16.msra.mxu0 %v1905_v56 }
  0x66   :  { %1377 = vmatprep.subr.bf16.mxu0 %v1927_v23 }
  0x67   :  { %1750 = vmatpush3.bf16.msra.mxu1 %v1889_v41 }
  0x68   :  { %1751 = vmatprep.subr.bf16.mxu1 %v1894_v45 }
  0x69   :  { %1378 = vmatpush1.bf16.msra.mxu0 %v1908_v59 }
  0x6a   :  { %1253 = vmatmul.mubr.bf16.gmra.mrb[20].mxu1 %v1893_v44  ;;  %1379 = vmatprep.subr.bf16.mxu0 %v1927_v23 }
  0x6b   :  { %1752 = vmatpush3.bf16.msra.mxu1 %v1897_v47  ;;  %1342 = vmatprep.mubr.bf16.mxu1 %v1916_v62 }
  0x6c   :  { %1753 = vmatprep.subr.bf16.mxu1 %v1900_v50 }
  0x6d   :  { %1380 = vmatpush1.bf16.msra.mxu0 %v1911_v63 }
  0x6e   :  { %1381 = vmatprep.subr.bf16.mxu0 %v1927_v23 }
  0x6f   :  { %1754 = vmatpush3.bf16.msra.mxu1 %v1901_v51 }
  0x70   :  { %1755 = vmatprep.subr.bf16.mxu1 %v1903_v52 }
  0x71   :  { %1382 = vmatpush1.bf16.msra.mxu0 %v1917_v3 }
  0x73   :  { %1756 = vmatpush3.bf16.msra.mxu1 %v1904_v54 }
  0x74   :  { %1757 = vmatprep.subr.bf16.mxu1 %v1906_v55  ;;  %1392 = vmatmul.mubr.bf16.vlgmr.msra.gmra.mrb[16].mxu0 %v1918_v5 }
  0x75   :  { %1606 = vmatprep.mubr.msk.bf16.mxu0 %vm1058_vm0, %v1924_v6 }
  0x77   :  { %1758 = vmatpush3.bf16.msra.mxu1 %v1907_v57 }
  0x78   :  { %1759 = vmatprep.subr.bf16.mxu1 %v1909_v58 }
  0x7b   :  { %1760 = vmatpush3.bf16.msra.mxu1 %v1910_v60 }
  0x7c   :  { %1761 = vmatprep.subr.bf16.mxu1 %v1912_v61  ;;  %1400 = vmatmul.mubr.bf16.gmra.mrb[20].mxu0 %v1926_v8 }
  0x7f   :  { %1762 = vmatpush3.bf16.msra.mxu1 %v1913_v1 }
  0x82   :  { %1343 = vmatmul.mubr.bf16.vlgmr.msra.gmra.mrb[24].mxu1 %v1914_v2 }
  0x83   :  { %1350 = vmatprep.mubr.bf16.mxu1 %v1921_v4 }
  0x8a   :  { %1351 = vmatmul.mubr.bf16.gmra.mrb[28].mxu1 %v1923_v7 }
  0xf5   :  { %v1623_v10 = vpop.f32.mrb[0].mxu1 }
  0xf6   :  { %v1624_v11 = vpop.f32.mrb[1].mxu1 }
  0xf7   :  { %v1625_v12 = vadd.f32 %v1624_v11, %v1623_v10  ;;  %v1626_v13 = vpop.f32.mrb[2].mxu1  ;;  %v1679_v16 = vpop.f32.mrb[0].mxu0 }
  0xf8   :  { %v1627_v14 = vpop.f32.mrb[3].mxu1  ;;  %v1680_v17 = vpop.f32.mrb[1].mxu0 }
  0xf9   :  { %v1628_v15 = vadd.f32 %v1627_v14, %v1626_v13  ;;  %v1681_v18 = vadd.f32 %v1680_v17, %v1679_v16  ;;  %v1682_v19 = vpop.f32.mrb[2].mxu0 }
  0xfa   :  { %v1683_v20 = vpop.f32.mrb[3].mxu0 }
  0xfb   :  { %v1684_v22 = vadd.f32 %v1683_v20, %v1682_v19 }
  0xfd   :  { %v1629_v21 = vpop.f32.mrb[4].mxu1 }
  0xfe   :  { %v1630_v23 = vpop.f32.mrb[5].mxu1 }
  0xff   :  { %v1631_v24 = vadd.f32 %v1630_v23, %v1629_v21  ;;  %v1632_v25 = vpop.f32.mrb[6].mxu1  ;;  %v1685_v40 = vpop.f32.mrb[4].mxu0 }
 0x100   :  { %v1633_v26 = vpop.f32.mrb[7].mxu1  ;;  %v1686_v43 = vpop.f32.mrb[5].mxu0 }
 0x101   :  { %v1634_v27 = vadd.f32 %v1633_v26, %v1632_v25  ;;  %v1687_v45 = vadd.f32 %v1686_v43, %v1685_v40  ;;  %v1688_v46 = vpop.f32.mrb[6].mxu0 }
 0x102   :  { %v1689_v49 = vpop.f32.mrb[7].mxu0 }
 0x103   :  { %v1690_v50 = vadd.f32 %v1689_v49, %v1688_v46 }
 0x115   :  { %v1651_v28 = vpop.f32.mrb[8].mxu1 }
 0x116   :  { %v1652_v29 = vpop.f32.mrb[9].mxu1 }
 0x117   :  { %v1653_v30 = vadd.f32 %v1652_v29, %v1651_v28  ;;  %v1654_v31 = vpop.f32.mrb[10].mxu1  ;;  %v1735_v54 = vpop.f32.mrb[8].mxu0 }
 0x118   :  { %v1655_v32 = vpop.f32.mrb[11].mxu1  ;;  %v1736_v55 = vpop.f32.mrb[9].mxu0 }
 0x119   :  { %v1149_v33 = vadd.f32 %v1653_v30, %v1625_v12  ;;  %v1656_v34 = vadd.f32 %v1655_v32, %v1654_v31  ;;  %v1737_v56 = vadd.f32 %v1736_v55, %v1735_v54  ;;  %v1738_v57 = vpop.f32.mrb[10].mxu0  ;;  %v1412_v55 = vld [vmem:[%s2486_s3] sm:$0xff] }
 0x11a   :  { %v1739_v58 = vpop.f32.mrb[11].mxu0 }
 0x11b   :  { %v1152_v35 = vadd.f32 %v1656_v34, %v1628_v15  ;;  %v1198_v36 = vadd.f32 %v1681_v18, %v1149_v33  ;;  %v1740_v59 = vadd.f32 %v1739_v58, %v1738_v57  ;;  %v1434_v58 = vld [vmem:[%s2488_s4 + $0x8] sm:$0xff] }
 0x11d   :  { %v1657_v37 = vpop.f32.mrb[12].mxu1  ;;  %v1201_v38 = vadd.f32 %v1684_v22, %v1152_v35 }
 0x11e   :  { %v1658_v39 = vpop.f32.mrb[13].mxu1 }
 0x11f   :  { %v1659_v41 = vadd.f32 %v1658_v39, %v1657_v37  ;;  %v1660_v42 = vpop.f32.mrb[14].mxu1  ;;  %v1741_v8 = vpop.f32.mrb[12].mxu0 }
 0x120   :  { %v1661_v44 = vpop.f32.mrb[15].mxu1  ;;  %v1742_v12 = vpop.f32.mrb[13].mxu0 }
 0x121   :  { %v1157_v47 = vadd.f32 %v1659_v41, %v1631_v24  ;;  %v1662_v48 = vadd.f32 %v1661_v44, %v1660_v42  ;;  %v1743_v14 = vadd.f32 %v1742_v12, %v1741_v8  ;;  %v1744_v15 = vpop.f32.mrb[14].mxu0  ;;  %v1436_v12 = vld [vmem:[%s2488_s4 + $0x18] sm:$0xff] }
 0x122   :  { %v1745_v18 = vpop.f32.mrb[15].mxu0 }
 0x123   :  { %v1160_v51 = vadd.f32 %v1662_v48, %v1634_v27  ;;  %v1206_v52 = vadd.f32 %v1687_v45, %v1157_v47  ;;  %v1746_v19 = vadd.f32 %v1745_v18, %v1744_v15 }
 0x125   :  { %v1209_v53 = vadd.f32 %v1690_v50, %v1160_v51 }
 0x135   :  { %v1707_v60 = vpop.f32.mrb[16].mxu1 }
 0x136   :  { %v1708_v61 = vpop.f32.mrb[17].mxu1 }
 0x137   :  { %v1709_v62 = vadd.f32 %v1708_v61, %v1707_v60  ;;  %v1710_v63 = vpop.f32.mrb[18].mxu1 }
 0x138   :  { %v1711_v0 = vpop.f32.mrb[19].mxu1 }
 0x139   :  { %v1247_v1 = vadd.f32 %v1709_v62, %v1198_v36  ;;  %v1712_v2 = vadd.f32 %v1711_v0, %v1710_v63  ;;  %v1414_v63 = vld [vmem:[%s2486_s3 + $0x10] sm:$0xff]  ;;  %v1433_v0 = vld [vmem:[%s2488_s4] sm:$0xff] }
 0x13b   :  { %v1250_v3 = vadd.f32 %v1712_v2, %v1201_v38  ;;  %v1296_v4 = vadd.f32 %v1737_v56, %v1247_v1 }
 0x13d   :  { %v1713_v5 = vpop.f32.mrb[20].mxu1  ;;  %v1299_v6 = vadd.f32 %v1740_v59, %v1250_v3  ;;  %v1413_v59 = vld [vmem:[%s2486_s3 + $0x8] sm:$0xff] }
 0x13e   :  { %v1714_v7 = vpop.f32.mrb[21].mxu1 }
 0x13f   :  { %v1715_v10 = vadd.f32 %v1714_v7, %v1713_v5  ;;  %v1716_v11 = vpop.f32.mrb[22].mxu1  ;;  %v1415_v5 = vld [vmem:[%s2486_s3 + $0x18] sm:$0xff] }
 0x140   :  { %v1717_v13 = vpop.f32.mrb[23].mxu1 }
 0x141   :  { %v1255_v16 = vadd.f32 %v1715_v10, %v1206_v52  ;;  %v1718_v17 = vadd.f32 %v1717_v13, %v1716_v11 }
 0x143   :  { %v1258_v20 = vadd.f32 %v1718_v17, %v1209_v53  ;;  %v1304_v21 = vadd.f32 %v1743_v14, %v1255_v16 }
 0x145   :  { %v1307_v22 = vadd.f32 %v1746_v19, %v1258_v20 }
 0x147   :  { %v1393_v27 = vpop.f32.mrb[16].mxu0 }
 0x148   :  { %v1395_v31 = vpop.f32.mrb[17].mxu0 }
 0x149   :  { %v1396_v32 = vpop.f32.mrb[18].mxu0 }
 0x14a   :  { %v1398_v35 = vpop.f32.mrb[19].mxu0 }
 0x14f   :  { %v1401_v42 = vpop.f32.mrb[20].mxu0 }
 0x150   :  { %v1403_v46 = vpop.f32.mrb[21].mxu0 }
 0x151   :  { %v1404_v47 = vpop.f32.mrb[22].mxu0 }
 0x152   :  { %v1406_v50 = vpop.f32.mrb[23].mxu0 }
 0x155   :  { %v1763_v23 = vpop.f32.mrb[24].mxu1 }
 0x156   :  { %v1764_v24 = vpop.f32.mrb[25].mxu1 }
 0x157   :  { %v1765_v25 = vadd.f32 %v1764_v24, %v1763_v23  ;;  %v1766_v26 = vpop.f32.mrb[26].mxu1 }
 0x158   :  { %v1767_v28 = vpop.f32.mrb[27].mxu1 }
 0x159   :  { %v1345_v29 = vadd.f32 %v1765_v25, %v1296_v4  ;;  %v1768_v30 = vadd.f32 %v1767_v28, %v1766_v26 }
 0x15b   :  { %v1394_v33 = vadd.f32 %v1393_v27, %v1345_v29  ;;  %v1348_v34 = vadd.f32 %v1768_v30, %v1299_v6  ;;  %v1435_v6 = vld [vmem:[%s2488_s4 + $0x10] sm:$0xff] }
 0x15d   :  { %1408 = vst [vmem:[%s2487_s2] sm:$0xff] %v1394_v33  ;;  %v1397_v36 = vadd.f32 %v1396_v32, %v1348_v34  ;;  %v1769_v37 = vpop.f32.mrb[28].mxu1  ;;  %1416 = vadd.xlane.f32.xlu0 %v1394_v33  ;;  %v1437_v51 = vmul.f32 %v1394_v33, %v1394_v33 }
 0x15e   :  { %v1770_v38 = vpop.f32.mrb[29].mxu1 }
 0x15f   :  { %1409 = vst [vmem:[%s2487_s2 + $0x8] sm:$0xff] %v1397_v36  ;;  %v1771_v39 = vadd.f32 %v1770_v38, %v1769_v37  ;;  %v1772_v40 = vpop.f32.mrb[30].mxu1  ;;  %v1438_v41 = vmul.f32 %v1397_v36, %v1397_v36 }
 0x160   :  { %v1773_v43 = vpop.f32.mrb[31].mxu1 }
 0x161   :  { %v1353_v44 = vadd.f32 %v1771_v39, %v1304_v21  ;;  %v1774_v45 = vadd.f32 %v1773_v43, %v1772_v40  ;;  %1443 = vadd.xlane.f32.xlu1 %v1438_v41  ;;  %1418 = vadd.xlane.f32.xlu0 %v1397_v36 }
 0x163   :  { %v1402_v48 = vadd.f32 %v1401_v42, %v1353_v44  ;;  %v1356_v49 = vadd.f32 %v1774_v45, %v1307_v22 }
 0x165   :  { %1410 = vst [vmem:[%s2487_s2 + $0x10] sm:$0xff] %v1402_v48  ;;  %v1405_v52 = vadd.f32 %v1404_v47, %v1356_v49  ;;  %1420 = vadd.xlane.f32.xlu1 %v1402_v48  ;;  %1441 = vadd.xlane.f32.xlu0 %v1437_v51  ;;  %v1439_v53 = vmul.f32 %v1402_v48, %v1402_v48 }
 0x167   :  { %1411 = vst [vmem:[%s2487_s2 + $0x18] sm:$0xff] %v1405_v52  ;;  %v1440_v54 = vmul.f32 %v1405_v52, %v1405_v52 }
 0x169   :  { %1422 = vadd.xlane.f32.xlu1 %v1405_v52  ;;  %1445 = vadd.xlane.f32.xlu0 %v1439_v53 }
 0x16d   :  { %1447 = vadd.xlane.f32.xlu1 %v1440_v54 }
 0x1ea   :  { %v1417_v56 = vpop.xlane.xlu0 %1416 }
 0x1eb   :  { %v1424_v57 = vadd.f32 %v1417_v56, %v1412_v55 }
 0x1ed   :  { %1429 = vst.msk [vmem:[%s2486_s3] sm:$0xff] %vm19_vm1, %v1424_v57 }
 0x1ee   :  { %v1444_v9 = vpop.xlane.xlu1 %1443  ;;  %v1419_v60 = vpop.xlane.xlu0 %1418 }
 0x1ef   :  { %v1450_v61 = vadd.f32 %v1444_v9, %v1434_v58  ;;  %v1425_v62 = vadd.f32 %v1419_v60, %v1413_v59 }
 0x1f1   :  { %1454 = vst.msk [vmem:[%s2488_s4 + $0x8] sm:$0xff] %vm19_vm1, %v1450_v61  ;;  %1430 = vst.msk [vmem:[%s2486_s3 + $0x8] sm:$0xff] %vm19_vm1, %v1425_v62 }
 0x1f2   :  { %v1421_v1 = vpop.xlane.xlu1 %1420  ;;  %v1442_v2 = vpop.xlane.xlu0 %1441 }
 0x1f3   :  { %v1426_v3 = vadd.f32 %v1421_v1, %v1414_v63  ;;  %v1449_v4 = vadd.f32 %v1442_v2, %v1433_v0 }
 0x1f5   :  { %1431 = vst.msk [vmem:[%s2486_s3 + $0x10] sm:$0xff] %vm19_vm1, %v1426_v3  ;;  %1453 = vst.msk [vmem:[%s2488_s4] sm:$0xff] %vm19_vm1, %v1449_v4 }
 0x1f6   :  { %v1423_v7 = vpop.xlane.xlu1 %1422  ;;  %v1446_v8 = vpop.xlane.xlu0 %1445 }
 0x1f7   :  { %v1427_v10 = vadd.f32 %v1423_v7, %v1415_v5  ;;  %v1451_v11 = vadd.f32 %v1446_v8, %v1435_v6 }
 0x1f9   :  { %1432 = vst.msk [vmem:[%s2486_s3 + $0x18] sm:$0xff] %vm19_vm1, %v1427_v10  ;;  %1455 = vst.msk [vmem:[%s2488_s4 + $0x10] sm:$0xff] %vm19_vm1, %v1451_v11 }
 0x1fa   :  { %v1448_v13 = vpop.xlane.xlu1 %1447 }
 0x1fb   :  { %v1452_v14 = vadd.f32 %v1448_v13, %v1436_v12 }
 0x1fd   :  { %1456 = vst.msk [vmem:[%s2488_s4 + $0x18] sm:$0xff] %vm19_vm1, %v1452_v14 }

// kernel: unet_forward.39
= control target key start
LH: loop header
LB: loop body
LE: loop exit
PB: predicated region body
PF: predicated region fallthrough
CT: control target
= control target key end

     0   :  { %vm2786_vm0 = vcmask 523264   ;;  %vm19_vm1 = vcmask 7168   ;;  %s6449_s0 = inlined_call_operand.vmem [shape: bf16[1728,512], index: 0, kind: input, shape index: {}]   ;;  %s6450_s1 = inlined_call_operand.vmem [shape: bf16[32,1728], index: 1, kind: input, shape index: {}]   ;;  %s6451_s3 = inlined_call_operand.vmem [shape: f32[32,1], index: 3, kind: output, shape index: {1}]   ;;  %s6452_s2 = inlined_call_operand.vmem [shape: f32[32,512], index: 2, kind: output, shape index: {0}]   ;;  %s6453_s4 = inlined_call_operand.vmem [shape: f32[32,1], index: 4, kind: output, shape index: {2}]  }
   0x1   :  { %v4205_v0 = vld [vmem:[%s6449_s0 + $0x4] ss:$16 sps:$4 sm:$0xff]   ;;  %v4207_v1 = vld [vmem:[%s6449_s0 + $0xc] ss:$16 sps:$4 sm:$0xff]   ;;  %v4209_v2 = vld [vmem:[%s6449_s0] ss:$16 sps:$4 sm:$0xff]  }
   0x2   :  { %2793 = vmatprep.subr.bf16.mxu0 %v4205_v0  ;;  %v4210_v3 = vld [vmem:[%s6449_s0 + $0x8] ss:$16 sps:$4 sm:$0xff]   ;;  %3164 = vmatprep.subr.bf16.mxu1 %v4207_v1  ;;  %v4211_v4 = vld [vmem:[%s6449_s0 + $0x24] ss:$16 sps:$4 sm:$0xff]   ;;  %v4213_v5 = vld [vmem:[%s6449_s0 + $0x2c] ss:$16 sps:$4 sm:$0xff]  }
   0x3   :  { %2794 = vmatpush1.bf16.msra.mxu0 %v4209_v2  ;;  %3165 = vmatpush1.bf16.msra.mxu1 %v4210_v3  ;;  %v4215_v6 = vld [vmem:[%s6449_s0 + $0x20] ss:$16 sps:$4 sm:$0xff]   ;;  %v4216_v7 = vld [vmem:[%s6449_s0 + $0x28] ss:$16 sps:$4 sm:$0xff]   ;;  %v4217_v8 = vld [vmem:[%s6449_s0 + $0x44] ss:$16 sps:$4 sm:$0xff]  }
   0x4   :  { %2795 = vmatprep.subr.bf16.mxu0 %v4211_v4  ;;  %3166 = vmatprep.subr.bf16.mxu1 %v4213_v5  ;;  %v4219_v9 = vld [vmem:[%s6449_s0 + $0x4c] ss:$16 sps:$4 sm:$0xff]   ;;  %v4221_v10 = vld [vmem:[%s6449_s0 + $0x40] ss:$16 sps:$4 sm:$0xff]   ;;  %v4222_v11 = vld [vmem:[%s6449_s0 + $0x48] ss:$16 sps:$4 sm:$0xff]  }
   0x5   :  { %v4223_v12 = vld [vmem:[%s6449_s0 + $0x64] ss:$16 sps:$4 sm:$0xff]   ;;  %v4225_v13 = vld [vmem:[%s6449_s0 + $0x6c] ss:$16 sps:$4 sm:$0xff]   ;;  %v4227_v14 = vld [vmem:[%s6449_s0 + $0x60] ss:$16 sps:$4 sm:$0xff]  }
   0x6   :  { %v4228_v15 = vld [vmem:[%s6449_s0 + $0x68] ss:$16 sps:$4 sm:$0xff]   ;;  %v4229_v16 = vld [vmem:[%s6449_s0 + $0x84] ss:$16 sps:$4 sm:$0xff]   ;;  %v4231_v17 = vld [vmem:[%s6449_s0 + $0x8c] ss:$16 sps:$4 sm:$0xff]  }
   0x7   :  { %2796 = vmatpush1.bf16.msra.mxu0 %v4215_v6  ;;  %3167 = vmatpush1.bf16.msra.mxu1 %v4216_v7  ;;  %v4233_v18 = vld [vmem:[%s6449_s0 + $0x80] ss:$16 sps:$4 sm:$0xff]   ;;  %v4234_v19 = vld [vmem:[%s6449_s0 + $0x88] ss:$16 sps:$4 sm:$0xff]   ;;  %v4235_v20 = vld [vmem:[%s6449_s0 + $0xa4] ss:$16 sps:$4 sm:$0xff]  }
   0x8   :  { %2797 = vmatprep.subr.bf16.mxu0 %v4217_v8  ;;  %3168 = vmatprep.subr.bf16.mxu1 %v4219_v9  ;;  %v4237_v21 = vld [vmem:[%s6449_s0 + $0xac] ss:$16 sps:$4 sm:$0xff]   ;;  %v4239_v22 = vld [vmem:[%s6449_s0 + $0xa0] ss:$16 sps:$4 sm:$0xff]   ;;  %v4240_v23 = vld [vmem:[%s6449_s0 + $0xa8] ss:$16 sps:$4 sm:$0xff]  }
   0x9   :  { %v4241_v24 = vld [vmem:[%s6449_s0 + $0xc4] ss:$16 sps:$4 sm:$0xff]   ;;  %v4243_v25 = vld [vmem:[%s6449_s0 + $0xcc] ss:$16 sps:$4 sm:$0xff]   ;;  %v4245_v26 = vld [vmem:[%s6449_s0 + $0xc0] ss:$16 sps:$4 sm:$0xff]  }
   0xa   :  { %v4246_v27 = vld [vmem:[%s6449_s0 + $0xc8] ss:$16 sps:$4 sm:$0xff]   ;;  %v4247_v28 = vld [vmem:[%s6449_s0 + $0xe4] ss:$16 sps:$4 sm:$0xff]   ;;  %v4249_v29 = vld [vmem:[%s6449_s0 + $0xec] ss:$16 sps:$4 sm:$0xff]  }
   0xb   :  { %2798 = vmatpush1.bf16.msra.mxu0 %v4221_v10  ;;  %3169 = vmatpush1.bf16.msra.mxu1 %v4222_v11  ;;  %v4251_v30 = vld [vmem:[%s6449_s0 + $0xe0] ss:$16 sps:$4 sm:$0xff]   ;;  %v4252_v31 = vld [vmem:[%s6449_s0 + $0xe8] ss:$16 sps:$4 sm:$0xff]   ;;  %v4253_v32 = vld [vmem:[%s6449_s0 + $0x104] ss:$16 sps:$4 sm:$0xff]  }
   0xc   :  { %2799 = vmatprep.subr.bf16.mxu0 %v4223_v12  ;;  %3170 = vmatprep.subr.bf16.mxu1 %v4225_v13  ;;  %v4255_v33 = vld [vmem:[%s6449_s0 + $0x10c] ss:$16 sps:$4 sm:$0xff]   ;;  %v4257_v34 = vld [vmem:[%s6449_s0 + $0x100] ss:$16 sps:$4 sm:$0xff]   ;;  %v4258_v35 = vld [vmem:[%s6449_s0 + $0x108] ss:$16 sps:$4 sm:$0xff]  }
   0xd   :  { %v4259_v36 = vld [vmem:[%s6449_s0 + $0x124] ss:$16 sps:$4 sm:$0xff]   ;;  %v4261_v37 = vld [vmem:[%s6449_s0 + $0x12c] ss:$16 sps:$4 sm:$0xff]   ;;  %v4263_v38 = vld [vmem:[%s6449_s0 + $0x120] ss:$16 sps:$4 sm:$0xff]  }
   0xe   :  { %v4264_v39 = vld [vmem:[%s6449_s0 + $0x128] ss:$16 sps:$4 sm:$0xff]   ;;  %v4265_v40 = vld [vmem:[%s6449_s0 + $0x144] ss:$16 sps:$4 sm:$0xff]   ;;  %v4267_v41 = vld [vmem:[%s6449_s0 + $0x14c] ss:$16 sps:$4 sm:$0xff]  }
   0xf   :  { %2800 = vmatpush1.bf16.msra.mxu0 %v4227_v14  ;;  %3171 = vmatpush1.bf16.msra.mxu1 %v4228_v15  ;;  %v4269_v42 = vld [vmem:[%s6449_s0 + $0x140] ss:$16 sps:$4 sm:$0xff]   ;;  %v4270_v43 = vld [vmem:[%s6449_s0 + $0x148] ss:$16 sps:$4 sm:$0xff]   ;;  %v4271_v44 = vld [vmem:[%s6449_s0 + $0x164] ss:$16 sps:$4 sm:$0xff]  }
  0x10   :  { %2801 = vmatprep.subr.bf16.mxu0 %v4229_v16  ;;  %3172 = vmatprep.subr.bf16.mxu1 %v4231_v17  ;;  %v4273_v45 = vld [vmem:[%s6449_s0 + $0x16c] ss:$16 sps:$4 sm:$0xff]   ;;  %v4275_v46 = vld [vmem:[%s6449_s0 + $0x160] ss:$16 sps:$4 sm:$0xff]   ;;  %v4276_v47 = vld [vmem:[%s6449_s0 + $0x168] ss:$16 sps:$4 sm:$0xff]  }
  0x11   :  { %v4303_v48 = vld [vmem:[%s6450_s1 + $0x4] ss:$56 sps:$4 sm:$0xff]   ;;  %v4281_v51 = vld [vmem:[%s6449_s0 + $0x180] ss:$16 sps:$4 sm:$0xff]   ;;  %v4282_v52 = vld [vmem:[%s6449_s0 + $0x188] ss:$16 sps:$4 sm:$0xff]  }
  0x12   :  { %v4277_v49 = vld [vmem:[%s6449_s0 + $0x184] ss:$16 sps:$4 sm:$0xff]   ;;  %v4279_v50 = vld [vmem:[%s6449_s0 + $0x18c] ss:$16 sps:$4 sm:$0xff]   ;;  %2825 = vmatprep.mubr.bf16.mxu0 %v4303_v48  ;;  %3196 = vmatprep.mubr.bf16.mxu1 %v4303_v48  ;;  %v4287_v55 = vld [vmem:[%s6449_s0 + $0x1a0] ss:$16 sps:$4 sm:$0xff]  }
  0x13   :  { %2802 = vmatpush1.bf16.msra.mxu0 %v4233_v18  ;;  %3173 = vmatpush1.bf16.msra.mxu1 %v4234_v19  ;;  %v4283_v53 = vld [vmem:[%s6449_s0 + $0x1a4] ss:$16 sps:$4 sm:$0xff]   ;;  %v4285_v54 = vld [vmem:[%s6449_s0 + $0x1ac] ss:$16 sps:$4 sm:$0xff]   ;;  %v4288_v56 = vld [vmem:[%s6449_s0 + $0x1a8] ss:$16 sps:$4 sm:$0xff]  }
  0x14   :  { %2803 = vmatprep.subr.bf16.mxu0 %v4235_v20  ;;  %3174 = vmatprep.subr.bf16.mxu1 %v4237_v21  ;;  %v4289_v57 = vld [vmem:[%s6449_s0 + $0x1c4] ss:$16 sps:$4 sm:$0xff]   ;;  %v4291_v58 = vld [vmem:[%s6449_s0 + $0x1cc] ss:$16 sps:$4 sm:$0xff]   ;;  %v4293_v59 = vld [vmem:[%s6449_s0 + $0x1c0] ss:$16 sps:$4 sm:$0xff]  }
  0x15   :  { %v4294_v60 = vld [vmem:[%s6449_s0 + $0x1c8] ss:$16 sps:$4 sm:$0xff]   ;;  %v4295_v61 = vld [vmem:[%s6449_s0 + $0x1e4] ss:$16 sps:$4 sm:$0xff]   ;;  %v4297_v62 = vld [vmem:[%s6449_s0 + $0x1ec] ss:$16 sps:$4 sm:$0xff]  }
  0x16   :  { %v4299_v63 = vld [vmem:[%s6449_s0 + $0x1e0] ss:$16 sps:$4 sm:$0xff]   ;;  %v4300_v0 = vld [vmem:[%s6449_s0 + $0x1e8] ss:$16 sps:$4 sm:$0xff]   ;;  %v4306_v1 = vld [vmem:[%s6449_s0 + $0x204] ss:$16 sps:$4 sm:$0xff]  }
  0x17   :  { %2804 = vmatpush1.bf16.msra.mxu0 %v4239_v22  ;;  %3175 = vmatpush1.bf16.msra.mxu1 %v4240_v23  ;;  %v4309_v2 = vld [vmem:[%s6449_s0 + $0x20c] ss:$16 sps:$4 sm:$0xff]   ;;  %v4301_v3 = vld [vmem:[%s6450_s1] ss:$56 sps:$4 sm:$0xff]   ;;  %v4312_v6 = vld [vmem:[%s6449_s0 + $0x224] ss:$16 sps:$4 sm:$0xff]  }
  0x18   :  { %2805 = vmatprep.subr.bf16.mxu0 %v4241_v24  ;;  %3176 = vmatprep.subr.bf16.mxu1 %v4243_v25  ;;  %v4304_v4 = vld [vmem:[%s6449_s0 + $0x200] ss:$16 sps:$4 sm:$0xff]   ;;  %v4307_v5 = vld [vmem:[%s6449_s0 + $0x208] ss:$16 sps:$4 sm:$0xff]   ;;  %v4315_v7 = vld [vmem:[%s6449_s0 + $0x22c] ss:$16 sps:$4 sm:$0xff]  }
  0x19   :  { %v4310_v8 = vld [vmem:[%s6449_s0 + $0x220] ss:$16 sps:$4 sm:$0xff]   ;;  %v4313_v9 = vld [vmem:[%s6449_s0 + $0x228] ss:$16 sps:$4 sm:$0xff]   ;;  %v4318_v10 = vld [vmem:[%s6449_s0 + $0x244] ss:$16 sps:$4 sm:$0xff]  }
  0x1a   :  { %v4321_v11 = vld [vmem:[%s6449_s0 + $0x24c] ss:$16 sps:$4 sm:$0xff]   ;;  %v4316_v12 = vld [vmem:[%s6449_s0 + $0x240] ss:$16 sps:$4 sm:$0xff]   ;;  %v4319_v13 = vld [vmem:[%s6449_s0 + $0x248] ss:$16 sps:$4 sm:$0xff]  }
  0x1b   :  { %2806 = vmatpush1.bf16.msra.mxu0 %v4245_v26  ;;  %3177 = vmatpush1.bf16.msra.mxu1 %v4246_v27  ;;  %v4324_v14 = vld [vmem:[%s6449_s0 + $0x264] ss:$16 sps:$4 sm:$0xff]   ;;  %v4327_v15 = vld [vmem:[%s6449_s0 + $0x26c] ss:$16 sps:$4 sm:$0xff]   ;;  %v4322_v16 = vld [vmem:[%s6449_s0 + $0x260] ss:$16 sps:$4 sm:$0xff]  }
  0x1c   :  { %2807 = vmatprep.subr.bf16.mxu0 %v4247_v28  ;;  %3178 = vmatprep.subr.bf16.mxu1 %v4249_v29  ;;  %v4325_v17 = vld [vmem:[%s6449_s0 + $0x268] ss:$16 sps:$4 sm:$0xff]   ;;  %v4330_v18 = vld [vmem:[%s6449_s0 + $0x284] ss:$16 sps:$4 sm:$0xff]   ;;  %v4333_v19 = vld [vmem:[%s6449_s0 + $0x28c] ss:$16 sps:$4 sm:$0xff]  }
  0x1d   :  { %v4328_v20 = vld [vmem:[%s6449_s0 + $0x280] ss:$16 sps:$4 sm:$0xff]   ;;  %v4331_v21 = vld [vmem:[%s6449_s0 + $0x288] ss:$16 sps:$4 sm:$0xff]   ;;  %v4336_v22 = vld [vmem:[%s6449_s0 + $0x2a4] ss:$16 sps:$4 sm:$0xff]  }
  0x1e   :  { %v4339_v23 = vld [vmem:[%s6449_s0 + $0x2ac] ss:$16 sps:$4 sm:$0xff]   ;;  %v4334_v25 = vld [vmem:[%s6449_s0 + $0x2a0] ss:$16 sps:$4 sm:$0xff]   ;;  %v4337_v26 = vld [vmem:[%s6449_s0 + $0x2a8] ss:$16 sps:$4 sm:$0xff]  }
  0x1f   :  { %2808 = vmatpush1.bf16.msra.mxu0 %v4251_v30  ;;  %3179 = vmatpush1.bf16.msra.mxu1 %v4252_v31  ;;  %v4388_v24 = vld [vmem:[%s6450_s1 + $0x74] ss:$56 sps:$4 sm:$0xff]   ;;  %v4396_v29 = vld [vmem:[%s6450_s1 + $0x70] ss:$56 sps:$4 sm:$0xff]  }
  0x20   :  { %2809 = vmatprep.subr.bf16.mxu0 %v4253_v32  ;;  %3180 = vmatprep.subr.bf16.mxu1 %v4255_v33  ;;  %v4342_v27 = vld [vmem:[%s6449_s0 + $0x2c4] ss:$16 sps:$4 sm:$0xff]   ;;  %v4345_v28 = vld [vmem:[%s6449_s0 + $0x2cc] ss:$16 sps:$4 sm:$0xff]   ;;  %v4340_v30 = vld [vmem:[%s6449_s0 + $0x2c0] ss:$16 sps:$4 sm:$0xff]  }
  0x21   :  { %v4343_v31 = vld [vmem:[%s6449_s0 + $0x2c8] ss:$16 sps:$4 sm:$0xff]   ;;  %v4348_v32 = vld [vmem:[%s6449_s0 + $0x2e4] ss:$16 sps:$4 sm:$0xff]   ;;  %v4351_v33 = vld [vmem:[%s6449_s0 + $0x2ec] ss:$16 sps:$4 sm:$0xff]  }
  0x22   :  { %v4367_v48 = vld [vmem:[%s6449_s0 + $0x348] ss:$16 sps:$4 sm:$0xff]  }
  0x23   :  { %2810 = vmatpush1.bf16.msra.mxu0 %v4257_v34  ;;  %3181 = vmatpush1.bf16.msra.mxu1 %v4258_v35  ;;  %v4405_v34 = vld [vmem:[%s6450_s1 + $0xc] ss:$56 sps:$4 sm:$0xff]   ;;  %v4346_v35 = vld [vmem:[%s6449_s0 + $0x2e0] ss:$16 sps:$4 sm:$0xff]  }
  0x24   :  { %2811 = vmatprep.subr.bf16.mxu0 %v4259_v36  ;;  %3182 = vmatprep.subr.bf16.mxu1 %v4261_v37  ;;  %v4349_v36 = vld [vmem:[%s6449_s0 + $0x2e8] ss:$16 sps:$4 sm:$0xff]   ;;  %v4354_v37 = vld [vmem:[%s6449_s0 + $0x304] ss:$16 sps:$4 sm:$0xff]  }
  0x27   :  { %2812 = vmatpush1.bf16.msra.mxu0 %v4263_v38  ;;  %3183 = vmatpush1.bf16.msra.mxu1 %v4264_v39  ;;  %v4357_v38 = vld [vmem:[%s6449_s0 + $0x30c] ss:$16 sps:$4 sm:$0xff]   ;;  %v4352_v39 = vld [vmem:[%s6449_s0 + $0x300] ss:$16 sps:$4 sm:$0xff]  }
  0x28   :  { %2813 = vmatprep.subr.bf16.mxu0 %v4265_v40  ;;  %3184 = vmatprep.subr.bf16.mxu1 %v4267_v41  ;;  %v4355_v40 = vld [vmem:[%s6449_s0 + $0x308] ss:$16 sps:$4 sm:$0xff]   ;;  %v4360_v41 = vld [vmem:[%s6449_s0 + $0x324] ss:$16 sps:$4 sm:$0xff]  }
  0x2b   :  { %2814 = vmatpush1.bf16.msra.mxu0 %v4269_v42  ;;  %3185 = vmatpush1.bf16.msra.mxu1 %v4270_v43  ;;  %v4363_v42 = vld [vmem:[%s6449_s0 + $0x32c] ss:$16 sps:$4 sm:$0xff]   ;;  %v4358_v43 = vld [vmem:[%s6449_s0 + $0x320] ss:$16 sps:$4 sm:$0xff]  }
  0x2c   :  { %2815 = vmatprep.subr.bf16.mxu0 %v4271_v44  ;;  %3186 = vmatprep.subr.bf16.mxu1 %v4273_v45  ;;  %v4361_v44 = vld [vmem:[%s6449_s0 + $0x328] ss:$16 sps:$4 sm:$0xff]   ;;  %v4366_v45 = vld [vmem:[%s6449_s0 + $0x344] ss:$16 sps:$4 sm:$0xff]  }
  0x2f   :  { %2816 = vmatpush1.bf16.msra.mxu0 %v4275_v46  ;;  %3187 = vmatpush1.bf16.msra.mxu1 %v4276_v47  ;;  %v4369_v46 = vld [vmem:[%s6449_s0 + $0x34c] ss:$16 sps:$4 sm:$0xff]   ;;  %v4364_v47 = vld [vmem:[%s6449_s0 + $0x340] ss:$16 sps:$4 sm:$0xff]  }
  0x30   :  { %2817 = vmatprep.subr.bf16.mxu0 %v4277_v49  ;;  %3188 = vmatprep.subr.bf16.mxu1 %v4279_v50  ;;  %v4372_v49 = vld [vmem:[%s6449_s0 + $0x364] ss:$16 sps:$4 sm:$0xff]   ;;  %v4375_v50 = vld [vmem:[%s6449_s0 + $0x36c] ss:$16 sps:$4 sm:$0xff]  }
  0x33   :  { %2818 = vmatpush1.bf16.msra.mxu0 %v4281_v51  ;;  %3189 = vmatpush1.bf16.msra.mxu1 %v4282_v52  ;;  %v4370_v51 = vld [vmem:[%s6449_s0 + $0x360] ss:$16 sps:$4 sm:$0xff]   ;;  %v4373_v52 = vld [vmem:[%s6449_s0 + $0x368] ss:$16 sps:$4 sm:$0xff]  }
  0x34   :  { %2819 = vmatprep.subr.bf16.mxu0 %v4283_v53  ;;  %3190 = vmatprep.subr.bf16.mxu1 %v4285_v54  ;;  %v4378_v53 = vld [vmem:[%s6449_s0 + $0x384] ss:$16 sps:$4 sm:$0xff]   ;;  %v4381_v54 = vld [vmem:[%s6449_s0 + $0x38c] ss:$16 sps:$4 sm:$0xff]  }
  0x37   :  { %2820 = vmatpush1.bf16.msra.mxu0 %v4287_v55  ;;  %3191 = vmatpush1.bf16.msra.mxu1 %v4288_v56  ;;  %v4376_v55 = vld [vmem:[%s6449_s0 + $0x380] ss:$16 sps:$4 sm:$0xff]   ;;  %v4379_v56 = vld [vmem:[%s6449_s0 + $0x388] ss:$16 sps:$4 sm:$0xff]  }
  0x38   :  { %2821 = vmatprep.subr.bf16.mxu0 %v4289_v57  ;;  %3192 = vmatprep.subr.bf16.mxu1 %v4291_v58  ;;  %v4384_v57 = vld [vmem:[%s6449_s0 + $0x3a4] ss:$16 sps:$4 sm:$0xff]   ;;  %v4387_v58 = vld [vmem:[%s6449_s0 + $0x3ac] ss:$16 sps:$4 sm:$0xff]  }
  0x3b   :  { %2822 = vmatpush1.bf16.msra.mxu0 %v4293_v59  ;;  %3193 = vmatpush1.bf16.msra.mxu1 %v4294_v60  ;;  %v4382_v59 = vld [vmem:[%s6449_s0 + $0x3a0] ss:$16 sps:$4 sm:$0xff]   ;;  %v4385_v60 = vld [vmem:[%s6449_s0 + $0x3a8] ss:$16 sps:$4 sm:$0xff]  }
  0x3c   :  { %2823 = vmatprep.subr.bf16.mxu0 %v4295_v61  ;;  %3194 = vmatprep.subr.bf16.mxu1 %v4297_v62  ;;  %v4392_v61 = vld [vmem:[%s6449_s0 + $0x3c4] ss:$16 sps:$4 sm:$0xff]   ;;  %v4395_v62 = vld [vmem:[%s6449_s0 + $0x3cc] ss:$16 sps:$4 sm:$0xff]  }
  0x3f   :  { %2824 = vmatpush1.bf16.msra.mxu0 %v4299_v63  ;;  %3195 = vmatpush1.bf16.msra.mxu1 %v4300_v0  ;;  %v4390_v63 = vld [vmem:[%s6449_s0 + $0x3c0] ss:$16 sps:$4 sm:$0xff]   ;;  %v4393_v0 = vld [vmem:[%s6449_s0 + $0x3c8] ss:$16 sps:$4 sm:$0xff]  }
  0x40   :  { %2846 = vmatprep.subr.bf16.mxu0 %v4306_v1  ;;  %3217 = vmatprep.subr.bf16.mxu1 %v4309_v2  ;;  %v4399_v1 = vld [vmem:[%s6449_s0 + $0x3e4] ss:$16 sps:$4 sm:$0xff]   ;;  %v4402_v2 = vld [vmem:[%s6449_s0 + $0x3ec] ss:$16 sps:$4 sm:$0xff]  }
  0x42   :  { %2826 = vmatmul.mubr.bf16.vlgmr.msra.gmra.mrb[0].mxu0 %v4301_v3  ;;  %3197 = vmatmul.mubr.bf16.vlgmr.msra.gmra.mrb[0].mxu1 %v4301_v3  ;;  %v4397_v3 = vld [vmem:[%s6449_s0 + $0x3e0] ss:$16 sps:$4 sm:$0xff]  }
  0x43   :  { %2847 = vmatpush1.bf16.msra.mxu0 %v4304_v4  ;;  %3218 = vmatpush1.bf16.msra.mxu1 %v4307_v5  ;;  %v4400_v4 = vld [vmem:[%s6449_s0 + $0x3e8] ss:$16 sps:$4 sm:$0xff]   ;;  %v4408_v5 = vld [vmem:[%s6449_s0 + $0x404] ss:$16 sps:$4 sm:$0xff]  }
  0x44   :  { %2848 = vmatprep.subr.bf16.mxu0 %v4312_v6  ;;  %3219 = vmatprep.subr.bf16.mxu1 %v4315_v7  ;;  %v4411_v6 = vld [vmem:[%s6449_s0 + $0x40c] ss:$16 sps:$4 sm:$0xff]   ;;  %v4403_v7 = vld [vmem:[%s6450_s1 + $0x8] ss:$56 sps:$4 sm:$0xff]  }
  0x45   :  { %2835 = vmatprep.mubr.bf16.mxu0 %v4388_v24  ;;  %3206 = vmatprep.mubr.bf16.mxu1 %v4388_v24  ;;  %v4427_v24 = vld [vmem:[%s6449_s0 + $0x468] ss:$16 sps:$4 sm:$0xff]  }
  0x47   :  { %2849 = vmatpush1.bf16.msra.mxu0 %v4310_v8  ;;  %3220 = vmatpush1.bf16.msra.mxu1 %v4313_v9  ;;  %v4406_v8 = vld [vmem:[%s6449_s0 + $0x400] ss:$16 sps:$4 sm:$0xff]   ;;  %v4409_v9 = vld [vmem:[%s6449_s0 + $0x408] ss:$16 sps:$4 sm:$0xff]  }
  0x48   :  { %2850 = vmatprep.subr.bf16.mxu0 %v4318_v10  ;;  %3221 = vmatprep.subr.bf16.mxu1 %v4321_v11  ;;  %v4414_v10 = vld [vmem:[%s6449_s0 + $0x424] ss:$16 sps:$4 sm:$0xff]   ;;  %v4417_v11 = vld [vmem:[%s6449_s0 + $0x42c] ss:$16 sps:$4 sm:$0xff]  }
  0x4a   :  { %2836 = vmatmul.mubr.bf16.gmra.mrb[4].mxu0 %v4396_v29  ;;  %3207 = vmatmul.mubr.bf16.gmra.mrb[4].mxu1 %v4396_v29  ;;  %v4438_v29 = vld [vmem:[%s6449_s0 + $0x4a4] ss:$16 sps:$4 sm:$0xff]  }
  0x4b   :  { %2851 = vmatpush1.bf16.msra.mxu0 %v4316_v12  ;;  %3222 = vmatpush1.bf16.msra.mxu1 %v4319_v13  ;;  %v4490_v12 = vld [vmem:[%s6450_s1 + $0x7c] ss:$56 sps:$4 sm:$0xff]   ;;  %v4412_v13 = vld [vmem:[%s6449_s0 + $0x420] ss:$16 sps:$4 sm:$0xff]  }
  0x4c   :  { %2852 = vmatprep.subr.bf16.mxu0 %v4324_v14  ;;  %3223 = vmatprep.subr.bf16.mxu1 %v4327_v15  ;;  %v4415_v14 = vld [vmem:[%s6449_s0 + $0x428] ss:$16 sps:$4 sm:$0xff]   ;;  %v4420_v15 = vld [vmem:[%s6449_s0 + $0x444] ss:$16 sps:$4 sm:$0xff]  }
  0x4d   :  { %2878 = vmatprep.mubr.bf16.mxu0 %v4405_v34  ;;  %3249 = vmatprep.mubr.bf16.mxu1 %v4405_v34  ;;  %v4447_v34 = vld [vmem:[%s6449_s0 + $0x4cc] ss:$16 sps:$4 sm:$0xff]  }
  0x4f   :  { %2853 = vmatpush1.bf16.msra.mxu0 %v4322_v16  ;;  %3224 = vmatpush1.bf16.msra.mxu1 %v4325_v17  ;;  %v4423_v16 = vld [vmem:[%s6449_s0 + $0x44c] ss:$16 sps:$4 sm:$0xff]   ;;  %v4418_v17 = vld [vmem:[%s6449_s0 + $0x440] ss:$16 sps:$4 sm:$0xff]  }
  0x50   :  { %2854 = vmatprep.subr.bf16.mxu0 %v4330_v18  ;;  %3225 = vmatprep.subr.bf16.mxu1 %v4333_v19  ;;  %v4421_v18 = vld [vmem:[%s6449_s0 + $0x448] ss:$16 sps:$4 sm:$0xff]  }
  0x51   :  { %v4498_v19 = vld [vmem:[%s6450_s1 + $0x78] ss:$56 sps:$4 sm:$0xff]  }
  0x53   :  { %2855 = vmatpush1.bf16.msra.mxu0 %v4328_v20  ;;  %3226 = vmatpush1.bf16.msra.mxu1 %v4331_v21  ;;  %v4426_v20 = vld [vmem:[%s6449_s0 + $0x464] ss:$16 sps:$4 sm:$0xff]   ;;  %v4429_v21 = vld [vmem:[%s6449_s0 + $0x46c] ss:$16 sps:$4 sm:$0xff]  }
  0x54   :  { %2856 = vmatprep.subr.bf16.mxu0 %v4336_v22  ;;  %3227 = vmatprep.subr.bf16.mxu1 %v4339_v23  ;;  %v4507_v22 = vld [vmem:[%s6450_s1 + $0x14] ss:$56 sps:$4 sm:$0xff]   ;;  %v4424_v23 = vld [vmem:[%s6449_s0 + $0x460] ss:$16 sps:$4 sm:$0xff]  }
  0x57   :  { %2857 = vmatpush1.bf16.msra.mxu0 %v4334_v25  ;;  %3228 = vmatpush1.bf16.msra.mxu1 %v4337_v26  ;;  %v4432_v25 = vld [vmem:[%s6449_s0 + $0x484] ss:$16 sps:$4 sm:$0xff]   ;;  %v4435_v26 = vld [vmem:[%s6449_s0 + $0x48c] ss:$16 sps:$4 sm:$0xff]  }
  0x58   :  { %2858 = vmatprep.subr.bf16.mxu0 %v4342_v27  ;;  %3229 = vmatprep.subr.bf16.mxu1 %v4345_v28  ;;  %v4430_v27 = vld [vmem:[%s6449_s0 + $0x480] ss:$16 sps:$4 sm:$0xff]   ;;  %v4433_v28 = vld [vmem:[%s6449_s0 + $0x488] ss:$16 sps:$4 sm:$0xff]  }
  0x5b   :  { %2859 = vmatpush1.bf16.msra.mxu0 %v4340_v30  ;;  %3230 = vmatpush1.bf16.msra.mxu1 %v4343_v31  ;;  %v4441_v30 = vld [vmem:[%s6449_s0 + $0x4ac] ss:$16 sps:$4 sm:$0xff]   ;;  %v4436_v31 = vld [vmem:[%s6449_s0 + $0x4a0] ss:$16 sps:$4 sm:$0xff]  }
  0x5c   :  { %2860 = vmatprep.subr.bf16.mxu0 %v4348_v32  ;;  %3231 = vmatprep.subr.bf16.mxu1 %v4351_v33  ;;  %v4439_v32 = vld [vmem:[%s6449_s0 + $0x4a8] ss:$16 sps:$4 sm:$0xff]   ;;  %v4444_v33 = vld [vmem:[%s6449_s0 + $0x4c4] ss:$16 sps:$4 sm:$0xff]  }
  0x5f   :  { %2861 = vmatpush1.bf16.msra.mxu0 %v4346_v35  ;;  %3232 = vmatpush1.bf16.msra.mxu1 %v4349_v36  ;;  %v4442_v35 = vld [vmem:[%s6449_s0 + $0x4c0] ss:$16 sps:$4 sm:$0xff]   ;;  %v4445_v36 = vld [vmem:[%s6449_s0 + $0x4c8] ss:$16 sps:$4 sm:$0xff]  }
  0x60   :  { %2862 = vmatprep.subr.bf16.mxu0 %v4354_v37  ;;  %3233 = vmatprep.subr.bf16.mxu1 %v4357_v38  ;;  %v4450_v37 = vld [vmem:[%s6449_s0 + $0x4e4] ss:$16 sps:$4 sm:$0xff]   ;;  %v4453_v38 = vld [vmem:[%s6449_s0 + $0x4ec] ss:$16 sps:$4 sm:$0xff]  }
  0x63   :  { %2863 = vmatpush1.bf16.msra.mxu0 %v4352_v39  ;;  %3234 = vmatpush1.bf16.msra.mxu1 %v4355_v40  ;;  %v4448_v39 = vld [vmem:[%s6449_s0 + $0x4e0] ss:$16 sps:$4 sm:$0xff]   ;;  %v4451_v40 = vld [vmem:[%s6449_s0 + $0x4e8] ss:$16 sps:$4 sm:$0xff]  }
  0x64   :  { %2864 = vmatprep.subr.bf16.mxu0 %v4360_v41  ;;  %3235 = vmatprep.subr.bf16.mxu1 %v4363_v42  ;;  %v4456_v41 = vld [vmem:[%s6449_s0 + $0x504] ss:$16 sps:$4 sm:$0xff]   ;;  %v4459_v42 = vld [vmem:[%s6449_s0 + $0x50c] ss:$16 sps:$4 sm:$0xff]  }
  0x67   :  { %2865 = vmatpush1.bf16.msra.mxu0 %v4358_v43  ;;  %3236 = vmatpush1.bf16.msra.mxu1 %v4361_v44  ;;  %v4454_v43 = vld [vmem:[%s6449_s0 + $0x500] ss:$16 sps:$4 sm:$0xff]   ;;  %v4457_v44 = vld [vmem:[%s6449_s0 + $0x508] ss:$16 sps:$4 sm:$0xff]  }
  0x68   :  { %2866 = vmatprep.subr.bf16.mxu0 %v4366_v45  ;;  %3237 = vmatprep.subr.bf16.mxu1 %v4369_v46  ;;  %v4462_v45 = vld [vmem:[%s6449_s0 + $0x524] ss:$16 sps:$4 sm:$0xff]   ;;  %v4465_v46 = vld [vmem:[%s6449_s0 + $0x52c] ss:$16 sps:$4 sm:$0xff]  }
  0x6b   :  { %2867 = vmatpush1.bf16.msra.mxu0 %v4364_v47  ;;  %3238 = vmatpush1.bf16.msra.mxu1 %v4367_v48  ;;  %v4460_v47 = vld [vmem:[%s6449_s0 + $0x520] ss:$16 sps:$4 sm:$0xff]   ;;  %v4463_v48 = vld [vmem:[%s6449_s0 + $0x528] ss:$16 sps:$4 sm:$0xff]  }
  0x6c   :  { %2868 = vmatprep.subr.bf16.mxu0 %v4372_v49  ;;  %3239 = vmatprep.subr.bf16.mxu1 %v4375_v50  ;;  %v4468_v49 = vld [vmem:[%s6449_s0 + $0x544] ss:$16 sps:$4 sm:$0xff]   ;;  %v4471_v50 = vld [vmem:[%s6449_s0 + $0x54c] ss:$16 sps:$4 sm:$0xff]  }
  0x6f   :  { %2869 = vmatpush1.bf16.msra.mxu0 %v4370_v51  ;;  %3240 = vmatpush1.bf16.msra.mxu1 %v4373_v52  ;;  %v4466_v51 = vld [vmem:[%s6449_s0 + $0x540] ss:$16 sps:$4 sm:$0xff]   ;;  %v4469_v52 = vld [vmem:[%s6449_s0 + $0x548] ss:$16 sps:$4 sm:$0xff]  }
  0x70   :  { %2870 = vmatprep.subr.bf16.mxu0 %v4378_v53  ;;  %3241 = vmatprep.subr.bf16.mxu1 %v4381_v54  ;;  %v4474_v53 = vld [vmem:[%s6449_s0 + $0x564] ss:$16 sps:$4 sm:$0xff]   ;;  %v4477_v54 = vld [vmem:[%s6449_s0 + $0x56c] ss:$16 sps:$4 sm:$0xff]  }
  0x73   :  { %2871 = vmatpush1.bf16.msra.mxu0 %v4376_v55  ;;  %3242 = vmatpush1.bf16.msra.mxu1 %v4379_v56  ;;  %v4472_v55 = vld [vmem:[%s6449_s0 + $0x560] ss:$16 sps:$4 sm:$0xff]   ;;  %v4475_v56 = vld [vmem:[%s6449_s0 + $0x568] ss:$16 sps:$4 sm:$0xff]  }
  0x74   :  { %2872 = vmatprep.subr.bf16.mxu0 %v4384_v57  ;;  %3243 = vmatprep.subr.bf16.mxu1 %v4387_v58  ;;  %v4480_v57 = vld [vmem:[%s6449_s0 + $0x584] ss:$16 sps:$4 sm:$0xff]   ;;  %v4483_v58 = vld [vmem:[%s6449_s0 + $0x58c] ss:$16 sps:$4 sm:$0xff]  }
  0x77   :  { %2873 = vmatpush1.bf16.msra.mxu0 %v4382_v59  ;;  %3244 = vmatpush1.bf16.msra.mxu1 %v4385_v60  ;;  %v4478_v59 = vld [vmem:[%s6449_s0 + $0x580] ss:$16 sps:$4 sm:$0xff]   ;;  %v4481_v60 = vld [vmem:[%s6449_s0 + $0x588] ss:$16 sps:$4 sm:$0xff]  }
  0x78   :  { %2874 = vmatprep.subr.bf16.mxu0 %v4392_v61  ;;  %3245 = vmatprep.subr.bf16.mxu1 %v4395_v62  ;;  %v4486_v61 = vld [vmem:[%s6449_s0 + $0x5a4] ss:$16 sps:$4 sm:$0xff]   ;;  %v4489_v62 = vld [vmem:[%s6449_s0 + $0x5ac] ss:$16 sps:$4 sm:$0xff]  }
  0x7b   :  { %2875 = vmatpush1.bf16.msra.mxu0 %v4390_v63  ;;  %3246 = vmatpush1.bf16.msra.mxu1 %v4393_v0  ;;  %v4484_v63 = vld [vmem:[%s6449_s0 + $0x5a0] ss:$16 sps:$4 sm:$0xff]   ;;  %v4487_v0 = vld [vmem:[%s6449_s0 + $0x5a8] ss:$16 sps:$4 sm:$0xff]  }
  0x7c   :  { %2876 = vmatprep.subr.bf16.mxu0 %v4399_v1  ;;  %3247 = vmatprep.subr.bf16.mxu1 %v4402_v2  ;;  %v4494_v1 = vld [vmem:[%s6449_s0 + $0x5c4] ss:$16 sps:$4 sm:$0xff]   ;;  %v4497_v2 = vld [vmem:[%s6449_s0 + $0x5cc] ss:$16 sps:$4 sm:$0xff]  }
  0x7f   :  { %2877 = vmatpush1.bf16.msra.mxu0 %v4397_v3  ;;  %3248 = vmatpush1.bf16.msra.mxu1 %v4400_v4  ;;  %v4492_v3 = vld [vmem:[%s6449_s0 + $0x5c0] ss:$16 sps:$4 sm:$0xff]   ;;  %v4495_v4 = vld [vmem:[%s6449_s0 + $0x5c8] ss:$16 sps:$4 sm:$0xff]  }
  0x80   :  { %2899 = vmatprep.subr.bf16.mxu0 %v4408_v5  ;;  %3270 = vmatprep.subr.bf16.mxu1 %v4411_v6  ;;  %v4501_v5 = vld [vmem:[%s6449_s0 + $0x5e4] ss:$16 sps:$4 sm:$0xff]   ;;  %v4504_v6 = vld [vmem:[%s6449_s0 + $0x5ec] ss:$16 sps:$4 sm:$0xff]  }
  0x82   :  { %2879 = vmatmul.mubr.bf16.vlgmr.msra.gmra.mrb[0].mxu0 %v4403_v7  ;;  %3250 = vmatmul.mubr.bf16.vlgmr.msra.gmra.mrb[0].mxu1 %v4403_v7  ;;  %v4499_v7 = vld [vmem:[%s6449_s0 + $0x5e0] ss:$16 sps:$4 sm:$0xff]  }
  0x83   :  { %2900 = vmatpush1.bf16.msra.mxu0 %v4406_v8  ;;  %3271 = vmatpush1.bf16.msra.mxu1 %v4409_v9  ;;  %v4502_v8 = vld [vmem:[%s6449_s0 + $0x5e8] ss:$16 sps:$4 sm:$0xff]   ;;  %v4510_v9 = vld [vmem:[%s6449_s0 + $0x604] ss:$16 sps:$4 sm:$0xff]  }
  0x84   :  { %2901 = vmatprep.subr.bf16.mxu0 %v4414_v10  ;;  %3272 = vmatprep.subr.bf16.mxu1 %v4417_v11  ;;  %v4513_v10 = vld [vmem:[%s6449_s0 + $0x60c] ss:$16 sps:$4 sm:$0xff]   ;;  %v4505_v11 = vld [vmem:[%s6450_s1 + $0x10] ss:$56 sps:$4 sm:$0xff]  }
  0x85   :  { %2888 = vmatprep.mubr.bf16.mxu0 %v4490_v12  ;;  %3259 = vmatprep.mubr.bf16.mxu1 %v4490_v12  ;;  %v4508_v12 = vld [vmem:[%s6449_s0 + $0x600] ss:$16 sps:$4 sm:$0xff]  }
  0x87   :  { %2902 = vmatpush1.bf16.msra.mxu0 %v4412_v13  ;;  %3273 = vmatpush1.bf16.msra.mxu1 %v4415_v14  ;;  %v4511_v13 = vld [vmem:[%s6449_s0 + $0x608] ss:$16 sps:$4 sm:$0xff]   ;;  %v4516_v14 = vld [vmem:[%s6449_s0 + $0x624] ss:$16 sps:$4 sm:$0xff]  }
  0x88   :  { %2903 = vmatprep.subr.bf16.mxu0 %v4420_v15  ;;  %3274 = vmatprep.subr.bf16.mxu1 %v4423_v16  ;;  %v4519_v15 = vld [vmem:[%s6449_s0 + $0x62c] ss:$16 sps:$4 sm:$0xff]  }
  0x89   :  { %v4592_v16 = vld [vmem:[%s6450_s1 + $0x84] ss:$56 sps:$4 sm:$0xff]  }
  0x8a   :  { %2889 = vmatmul.mubr.bf16.gmra.mrb[4].mxu0 %v4498_v19  ;;  %3260 = vmatmul.mubr.bf16.gmra.mrb[4].mxu1 %v4498_v19  ;;  %v4522_v19 = vld [vmem:[%s6449_s0 + $0x644] ss:$16 sps:$4 sm:$0xff]  }
  0x8b   :  { %2904 = vmatpush1.bf16.msra.mxu0 %v4418_v17  ;;  %3275 = vmatpush1.bf16.msra.mxu1 %v4421_v18  ;;  %v4514_v17 = vld [vmem:[%s6449_s0 + $0x620] ss:$16 sps:$4 sm:$0xff]   ;;  %v4517_v18 = vld [vmem:[%s6449_s0 + $0x628] ss:$16 sps:$4 sm:$0xff]  }
  0x8c   :  { %2905 = vmatprep.subr.bf16.mxu0 %v4426_v20  ;;  %3276 = vmatprep.subr.bf16.mxu1 %v4429_v21  ;;  %v4525_v20 = vld [vmem:[%s6449_s0 + $0x64c] ss:$16 sps:$4 sm:$0xff]   ;;  %v4520_v21 = vld [vmem:[%s6449_s0 + $0x640] ss:$16 sps:$4 sm:$0xff]  }
  0x8d   :  { %2931 = vmatprep.mubr.bf16.mxu0 %v4507_v22  ;;  %3302 = vmatprep.mubr.bf16.mxu1 %v4507_v22  ;;  %v4523_v22 = vld [vmem:[%s6449_s0 + $0x648] ss:$16 sps:$4 sm:$0xff]  }
  0x8f   :  { %2906 = vmatpush1.bf16.msra.mxu0 %v4424_v23  ;;  %3277 = vmatpush1.bf16.msra.mxu1 %v4427_v24  ;;  %v4600_v23 = vld [vmem:[%s6450_s1 + $0x80] ss:$56 sps:$4 sm:$0xff]   ;;  %v4528_v24 = vld [vmem:[%s6449_s0 + $0x664] ss:$16 sps:$4 sm:$0xff]  }
  0x90   :  { %2907 = vmatprep.subr.bf16.mxu0 %v4432_v25  ;;  %3278 = vmatprep.subr.bf16.mxu1 %v4435_v26  ;;  %v4531_v25 = vld [vmem:[%s6449_s0 + $0x66c] ss:$16 sps:$4 sm:$0xff]  }
  0x91   :  { %v4609_v26 = vld [vmem:[%s6450_s1 + $0x1c] ss:$56 sps:$4 sm:$0xff]  }
  0x93   :  { %2908 = vmatpush1.bf16.msra.mxu0 %v4430_v27  ;;  %3279 = vmatpush1.bf16.msra.mxu1 %v4433_v28  ;;  %v4526_v27 = vld [vmem:[%s6449_s0 + $0x660] ss:$16 sps:$4 sm:$0xff]   ;;  %v4529_v28 = vld [vmem:[%s6449_s0 + $0x668] ss:$16 sps:$4 sm:$0xff]  }
  0x94   :  { %2909 = vmatprep.subr.bf16.mxu0 %v4438_v29  ;;  %3280 = vmatprep.subr.bf16.mxu1 %v4441_v30  ;;  %v4534_v29 = vld [vmem:[%s6449_s0 + $0x684] ss:$16 sps:$4 sm:$0xff]   ;;  %v4537_v30 = vld [vmem:[%s6449_s0 + $0x68c] ss:$16 sps:$4 sm:$0xff]  }
  0x97   :  { %2910 = vmatpush1.bf16.msra.mxu0 %v4436_v31  ;;  %3281 = vmatpush1.bf16.msra.mxu1 %v4439_v32  ;;  %v4532_v31 = vld [vmem:[%s6449_s0 + $0x680] ss:$16 sps:$4 sm:$0xff]   ;;  %v4535_v32 = vld [vmem:[%s6449_s0 + $0x688] ss:$16 sps:$4 sm:$0xff]  }
  0x98   :  { %2911 = vmatprep.subr.bf16.mxu0 %v4444_v33  ;;  %3282 = vmatprep.subr.bf16.mxu1 %v4447_v34  ;;  %v4540_v33 = vld [vmem:[%s6449_s0 + $0x6a4] ss:$16 sps:$4 sm:$0xff]   ;;  %v4543_v34 = vld [vmem:[%s6449_s0 + $0x6ac] ss:$16 sps:$4 sm:$0xff]  }
  0x9b   :  { %2912 = vmatpush1.bf16.msra.mxu0 %v4442_v35  ;;  %3283 = vmatpush1.bf16.msra.mxu1 %v4445_v36  ;;  %v4538_v35 = vld [vmem:[%s6449_s0 + $0x6a0] ss:$16 sps:$4 sm:$0xff]   ;;  %v4541_v36 = vld [vmem:[%s6449_s0 + $0x6a8] ss:$16 sps:$4 sm:$0xff]  }
  0x9c   :  { %2913 = vmatprep.subr.bf16.mxu0 %v4450_v37  ;;  %3284 = vmatprep.subr.bf16.mxu1 %v4453_v38  ;;  %v4546_v37 = vld [vmem:[%s6449_s0 + $0x6c4] ss:$16 sps:$4 sm:$0xff]   ;;  %v4549_v38 = vld [vmem:[%s6449_s0 + $0x6cc] ss:$16 sps:$4 sm:$0xff]  }
  0x9f   :  { %2914 = vmatpush1.bf16.msra.mxu0 %v4448_v39  ;;  %3285 = vmatpush1.bf16.msra.mxu1 %v4451_v40  ;;  %v4544_v39 = vld [vmem:[%s6449_s0 + $0x6c0] ss:$16 sps:$4 sm:$0xff]   ;;  %v4547_v40 = vld [vmem:[%s6449_s0 + $0x6c8] ss:$16 sps:$4 sm:$0xff]  }
  0xa0   :  { %2915 = vmatprep.subr.bf16.mxu0 %v4456_v41  ;;  %3286 = vmatprep.subr.bf16.mxu1 %v4459_v42  ;;  %v4552_v41 = vld [vmem:[%s6449_s0 + $0x6e4] ss:$16 sps:$4 sm:$0xff]   ;;  %v4555_v42 = vld [vmem:[%s6449_s0 + $0x6ec] ss:$16 sps:$4 sm:$0xff]  }
  0xa3   :  { %2916 = vmatpush1.bf16.msra.mxu0 %v4454_v43  ;;  %3287 = vmatpush1.bf16.msra.mxu1 %v4457_v44  ;;  %v4550_v43 = vld [vmem:[%s6449_s0 + $0x6e0] ss:$16 sps:$4 sm:$0xff]   ;;  %v4553_v44 = vld [vmem:[%s6449_s0 + $0x6e8] ss:$16 sps:$4 sm:$0xff]  }
  0xa4   :  { %2917 = vmatprep.subr.bf16.mxu0 %v4462_v45  ;;  %3288 = vmatprep.subr.bf16.mxu1 %v4465_v46  ;;  %v4558_v45 = vld [vmem:[%s6449_s0 + $0x704] ss:$16 sps:$4 sm:$0xff]   ;;  %v4561_v46 = vld [vmem:[%s6449_s0 + $0x70c] ss:$16 sps:$4 sm:$0xff]  }
  0xa7   :  { %2918 = vmatpush1.bf16.msra.mxu0 %v4460_v47  ;;  %3289 = vmatpush1.bf16.msra.mxu1 %v4463_v48  ;;  %v4556_v47 = vld [vmem:[%s6449_s0 + $0x700] ss:$16 sps:$4 sm:$0xff]   ;;  %v4559_v48 = vld [vmem:[%s6449_s0 + $0x708] ss:$16 sps:$4 sm:$0xff]  }
  0xa8   :  { %2919 = vmatprep.subr.bf16.mxu0 %v4468_v49  ;;  %3290 = vmatprep.subr.bf16.mxu1 %v4471_v50  ;;  %v4564_v49 = vld [vmem:[%s6449_s0 + $0x724] ss:$16 sps:$4 sm:$0xff]   ;;  %v4567_v50 = vld [vmem:[%s6449_s0 + $0x72c] ss:$16 sps:$4 sm:$0xff]  }
  0xab   :  { %2920 = vmatpush1.bf16.msra.mxu0 %v4466_v51  ;;  %3291 = vmatpush1.bf16.msra.mxu1 %v4469_v52  ;;  %v4562_v51 = vld [vmem:[%s6449_s0 + $0x720] ss:$16 sps:$4 sm:$0xff]   ;;  %v4565_v52 = vld [vmem:[%s6449_s0 + $0x728] ss:$16 sps:$4 sm:$0xff]  }
  0xac   :  { %2921 = vmatprep.subr.bf16.mxu0 %v4474_v53  ;;  %3292 = vmatprep.subr.bf16.mxu1 %v4477_v54  ;;  %v4570_v53 = vld [vmem:[%s6449_s0 + $0x744] ss:$16 sps:$4 sm:$0xff]   ;;  %v4573_v54 = vld [vmem:[%s6449_s0 + $0x74c] ss:$16 sps:$4 sm:$0xff]  }
  0xaf   :  { %2922 = vmatpush1.bf16.msra.mxu0 %v4472_v55  ;;  %3293 = vmatpush1.bf16.msra.mxu1 %v4475_v56  ;;  %v4568_v55 = vld [vmem:[%s6449_s0 + $0x740] ss:$16 sps:$4 sm:$0xff]   ;;  %v4571_v56 = vld [vmem:[%s6449_s0 + $0x748] ss:$16 sps:$4 sm:$0xff]  }
  0xb0   :  { %2923 = vmatprep.subr.bf16.mxu0 %v4480_v57  ;;  %3294 = vmatprep.subr.bf16.mxu1 %v4483_v58  ;;  %v4576_v57 = vld [vmem:[%s6449_s0 + $0x764] ss:$16 sps:$4 sm:$0xff]   ;;  %v4579_v58 = vld [vmem:[%s6449_s0 + $0x76c] ss:$16 sps:$4 sm:$0xff]  }
  0xb3   :  { %2924 = vmatpush1.bf16.msra.mxu0 %v4478_v59  ;;  %3295 = vmatpush1.bf16.msra.mxu1 %v4481_v60  ;;  %v4574_v59 = vld [vmem:[%s6449_s0 + $0x760] ss:$16 sps:$4 sm:$0xff]   ;;  %v4577_v60 = vld [vmem:[%s6449_s0 + $0x768] ss:$16 sps:$4 sm:$0xff]  }
  0xb4   :  { %2925 = vmatprep.subr.bf16.mxu0 %v4486_v61  ;;  %3296 = vmatprep.subr.bf16.mxu1 %v4489_v62  ;;  %v4582_v61 = vld [vmem:[%s6449_s0 + $0x784] ss:$16 sps:$4 sm:$0xff]   ;;  %v4585_v62 = vld [vmem:[%s6449_s0 + $0x78c] ss:$16 sps:$4 sm:$0xff]  }
  0xb7   :  { %2926 = vmatpush1.bf16.msra.mxu0 %v4484_v63  ;;  %3297 = vmatpush1.bf16.msra.mxu1 %v4487_v0  ;;  %v4580_v63 = vld [vmem:[%s6449_s0 + $0x780] ss:$16 sps:$4 sm:$0xff]   ;;  %v4583_v0 = vld [vmem:[%s6449_s0 + $0x788] ss:$16 sps:$4 sm:$0xff]  }
  0xb8   :  { %2927 = vmatprep.subr.bf16.mxu0 %v4494_v1  ;;  %3298 = vmatprep.subr.bf16.mxu1 %v4497_v2  ;;  %v4588_v1 = vld [vmem:[%s6449_s0 + $0x7a4] ss:$16 sps:$4 sm:$0xff]   ;;  %v4591_v2 = vld [vmem:[%s6449_s0 + $0x7ac] ss:$16 sps:$4 sm:$0xff]  }
  0xbb   :  { %2928 = vmatpush1.bf16.msra.mxu0 %v4492_v3  ;;  %3299 = vmatpush1.bf16.msra.mxu1 %v4495_v4  ;;  %v4586_v3 = vld [vmem:[%s6449_s0 + $0x7a0] ss:$16 sps:$4 sm:$0xff]   ;;  %v4589_v4 = vld [vmem:[%s6449_s0 + $0x7a8] ss:$16 sps:$4 sm:$0xff]  }
  0xbc   :  { %2929 = vmatprep.subr.bf16.mxu0 %v4501_v5  ;;  %3300 = vmatprep.subr.bf16.mxu1 %v4504_v6  ;;  %v4596_v5 = vld [vmem:[%s6449_s0 + $0x7c4] ss:$16 sps:$4 sm:$0xff]   ;;  %v4599_v6 = vld [vmem:[%s6449_s0 + $0x7cc] ss:$16 sps:$4 sm:$0xff]  }
  0xbf   :  { %2930 = vmatpush1.bf16.msra.mxu0 %v4499_v7  ;;  %3301 = vmatpush1.bf16.msra.mxu1 %v4502_v8  ;;  %v4594_v7 = vld [vmem:[%s6449_s0 + $0x7c0] ss:$16 sps:$4 sm:$0xff]   ;;  %v4597_v8 = vld [vmem:[%s6449_s0 + $0x7c8] ss:$16 sps:$4 sm:$0xff]  }
  0xc0   :  { %2952 = vmatprep.subr.bf16.mxu0 %v4510_v9  ;;  %3323 = vmatprep.subr.bf16.mxu1 %v4513_v10  ;;  %v4603_v9 = vld [vmem:[%s6449_s0 + $0x7e4] ss:$16 sps:$4 sm:$0xff]   ;;  %v4606_v10 = vld [vmem:[%s6449_s0 + $0x7ec] ss:$16 sps:$4 sm:$0xff]  }
  0xc2   :  { %2932 = vmatmul.mubr.bf16.vlgmr.msra.gmra.mrb[0].mxu0 %v4505_v11  ;;  %3303 = vmatmul.mubr.bf16.vlgmr.msra.gmra.mrb[0].mxu1 %v4505_v11  ;;  %v4601_v11 = vld [vmem:[%s6449_s0 + $0x7e0] ss:$16 sps:$4 sm:$0xff]  }
  0xc3   :  { %2953 = vmatpush1.bf16.msra.mxu0 %v4508_v12  ;;  %3324 = vmatpush1.bf16.msra.mxu1 %v4511_v13  ;;  %v4604_v12 = vld [vmem:[%s6449_s0 + $0x7e8] ss:$16 sps:$4 sm:$0xff]   ;;  %v4612_v13 = vld [vmem:[%s6449_s0 + $0x804] ss:$16 sps:$4 sm:$0xff]  }
  0xc4   :  { %2954 = vmatprep.subr.bf16.mxu0 %v4516_v14  ;;  %3325 = vmatprep.subr.bf16.mxu1 %v4519_v15  ;;  %v4615_v14 = vld [vmem:[%s6449_s0 + $0x80c] ss:$16 sps:$4 sm:$0xff]   ;;  %v4607_v15 = vld [vmem:[%s6450_s1 + $0x18] ss:$56 sps:$4 sm:$0xff]  }
  0xc5   :  { %2941 = vmatprep.mubr.bf16.mxu0 %v4592_v16  ;;  %3312 = vmatprep.mubr.bf16.mxu1 %v4592_v16  ;;  %v4610_v16 = vld [vmem:[%s6449_s0 + $0x800] ss:$16 sps:$4 sm:$0xff]  }
  0xc7   :  { %2955 = vmatpush1.bf16.msra.mxu0 %v4514_v17  ;;  %3326 = vmatpush1.bf16.msra.mxu1 %v4517_v18  ;;  %v4613_v17 = vld [vmem:[%s6449_s0 + $0x808] ss:$16 sps:$4 sm:$0xff]   ;;  %v4618_v18 = vld [vmem:[%s6449_s0 + $0x824] ss:$16 sps:$4 sm:$0xff]  }
  0xc8   :  { %2956 = vmatprep.subr.bf16.mxu0 %v4522_v19  ;;  %3327 = vmatprep.subr.bf16.mxu1 %v4525_v20  ;;  %v4621_v19 = vld [vmem:[%s6449_s0 + $0x82c] ss:$16 sps:$4 sm:$0xff]  }
  0xc9   :  { %v4694_v20 = vld [vmem:[%s6450_s1 + $0x8c] ss:$56 sps:$4 sm:$0xff]  }
  0xca   :  { %2942 = vmatmul.mubr.bf16.gmra.mrb[4].mxu0 %v4600_v23  ;;  %3313 = vmatmul.mubr.bf16.gmra.mrb[4].mxu1 %v4600_v23  ;;  %v4624_v23 = vld [vmem:[%s6449_s0 + $0x844] ss:$16 sps:$4 sm:$0xff]  }
  0xcb   :  { %2957 = vmatpush1.bf16.msra.mxu0 %v4520_v21  ;;  %3328 = vmatpush1.bf16.msra.mxu1 %v4523_v22  ;;  %v4616_v21 = vld [vmem:[%s6449_s0 + $0x820] ss:$16 sps:$4 sm:$0xff]   ;;  %v4619_v22 = vld [vmem:[%s6449_s0 + $0x828] ss:$16 sps:$4 sm:$0xff]  }
  0xcc   :  { %2958 = vmatprep.subr.bf16.mxu0 %v4528_v24  ;;  %3329 = vmatprep.subr.bf16.mxu1 %v4531_v25  ;;  %v4627_v24 = vld [vmem:[%s6449_s0 + $0x84c] ss:$16 sps:$4 sm:$0xff]   ;;  %v4622_v25 = vld [vmem:[%s6449_s0 + $0x840] ss:$16 sps:$4 sm:$0xff]  }
  0xcd   :  { %2984 = vmatprep.mubr.bf16.mxu0 %v4609_v26  ;;  %3355 = vmatprep.mubr.bf16.mxu1 %v4609_v26  ;;  %v4702_v26 = vld [vmem:[%s6450_s1 + $0x88] ss:$56 sps:$4 sm:$0xff]  }
  0xcf   :  { %2959 = vmatpush1.bf16.msra.mxu0 %v4526_v27  ;;  %3330 = vmatpush1.bf16.msra.mxu1 %v4529_v28  ;;  %v4625_v27 = vld [vmem:[%s6449_s0 + $0x848] ss:$16 sps:$4 sm:$0xff]   ;;  %v4630_v28 = vld [vmem:[%s6449_s0 + $0x864] ss:$16 sps:$4 sm:$0xff]  }
  0xd0   :  { %2960 = vmatprep.subr.bf16.mxu0 %v4534_v29  ;;  %3331 = vmatprep.subr.bf16.mxu1 %v4537_v30  ;;  %v4633_v29 = vld [vmem:[%s6449_s0 + $0x86c] ss:$16 sps:$4 sm:$0xff]  }
  0xd1   :  { %v4711_v30 = vld [vmem:[%s6450_s1 + $0x24] ss:$56 sps:$4 sm:$0xff]  }
  0xd3   :  { %2961 = vmatpush1.bf16.msra.mxu0 %v4532_v31  ;;  %3332 = vmatpush1.bf16.msra.mxu1 %v4535_v32  ;;  %v4628_v31 = vld [vmem:[%s6449_s0 + $0x860] ss:$16 sps:$4 sm:$0xff]   ;;  %v4631_v32 = vld [vmem:[%s6449_s0 + $0x868] ss:$16 sps:$4 sm:$0xff]  }
  0xd4   :  { %2962 = vmatprep.subr.bf16.mxu0 %v4540_v33  ;;  %3333 = vmatprep.subr.bf16.mxu1 %v4543_v34  ;;  %v4636_v33 = vld [vmem:[%s6449_s0 + $0x884] ss:$16 sps:$4 sm:$0xff]   ;;  %v4639_v34 = vld [vmem:[%s6449_s0 + $0x88c] ss:$16 sps:$4 sm:$0xff]  }
  0xd7   :  { %2963 = vmatpush1.bf16.msra.mxu0 %v4538_v35  ;;  %3334 = vmatpush1.bf16.msra.mxu1 %v4541_v36  ;;  %v4634_v35 = vld [vmem:[%s6449_s0 + $0x880] ss:$16 sps:$4 sm:$0xff]   ;;  %v4637_v36 = vld [vmem:[%s6449_s0 + $0x888] ss:$16 sps:$4 sm:$0xff]  }
  0xd8   :  { %2964 = vmatprep.subr.bf16.mxu0 %v4546_v37  ;;  %3335 = vmatprep.subr.bf16.mxu1 %v4549_v38  ;;  %v4642_v37 = vld [vmem:[%s6449_s0 + $0x8a4] ss:$16 sps:$4 sm:$0xff]   ;;  %v4645_v38 = vld [vmem:[%s6449_s0 + $0x8ac] ss:$16 sps:$4 sm:$0xff]  }
  0xdb   :  { %2965 = vmatpush1.bf16.msra.mxu0 %v4544_v39  ;;  %3336 = vmatpush1.bf16.msra.mxu1 %v4547_v40  ;;  %v4640_v39 = vld [vmem:[%s6449_s0 + $0x8a0] ss:$16 sps:$4 sm:$0xff]   ;;  %v4643_v40 = vld [vmem:[%s6449_s0 + $0x8a8] ss:$16 sps:$4 sm:$0xff]  }
  0xdc   :  { %2966 = vmatprep.subr.bf16.mxu0 %v4552_v41  ;;  %3337 = vmatprep.subr.bf16.mxu1 %v4555_v42  ;;  %v4648_v41 = vld [vmem:[%s6449_s0 + $0x8c4] ss:$16 sps:$4 sm:$0xff]   ;;  %v4651_v42 = vld [vmem:[%s6449_s0 + $0x8cc] ss:$16 sps:$4 sm:$0xff]  }
  0xdf   :  { %2967 = vmatpush1.bf16.msra.mxu0 %v4550_v43  ;;  %3338 = vmatpush1.bf16.msra.mxu1 %v4553_v44  ;;  %v4646_v43 = vld [vmem:[%s6449_s0 + $0x8c0] ss:$16 sps:$4 sm:$0xff]   ;;  %v4649_v44 = vld [vmem:[%s6449_s0 + $0x8c8] ss:$16 sps:$4 sm:$0xff]  }
  0xe0   :  { %2968 = vmatprep.subr.bf16.mxu0 %v4558_v45  ;;  %3339 = vmatprep.subr.bf16.mxu1 %v4561_v46  ;;  %v4654_v45 = vld [vmem:[%s6449_s0 + $0x8e4] ss:$16 sps:$4 sm:$0xff]   ;;  %v4657_v46 = vld [vmem:[%s6449_s0 + $0x8ec] ss:$16 sps:$4 sm:$0xff]  }
  0xe3   :  { %2969 = vmatpush1.bf16.msra.mxu0 %v4556_v47  ;;  %3340 = vmatpush1.bf16.msra.mxu1 %v4559_v48  ;;  %v4652_v47 = vld [vmem:[%s6449_s0 + $0x8e0] ss:$16 sps:$4 sm:$0xff]   ;;  %v4655_v48 = vld [vmem:[%s6449_s0 + $0x8e8] ss:$16 sps:$4 sm:$0xff]  }
  0xe4   :  { %2970 = vmatprep.subr.bf16.mxu0 %v4564_v49  ;;  %3341 = vmatprep.subr.bf16.mxu1 %v4567_v50  ;;  %v4660_v49 = vld [vmem:[%s6449_s0 + $0x904] ss:$16 sps:$4 sm:$0xff]   ;;  %v4663_v50 = vld [vmem:[%s6449_s0 + $0x90c] ss:$16 sps:$4 sm:$0xff]  }
  0xe7   :  { %2971 = vmatpush1.bf16.msra.mxu0 %v4562_v51  ;;  %3342 = vmatpush1.bf16.msra.mxu1 %v4565_v52  ;;  %v4658_v51 = vld [vmem:[%s6449_s0 + $0x900] ss:$16 sps:$4 sm:$0xff]   ;;  %v4661_v52 = vld [vmem:[%s6449_s0 + $0x908] ss:$16 sps:$4 sm:$0xff]  }
  0xe8   :  { %2972 = vmatprep.subr.bf16.mxu0 %v4570_v53  ;;  %3343 = vmatprep.subr.bf16.mxu1 %v4573_v54  ;;  %v4666_v53 = vld [vmem:[%s6449_s0 + $0x924] ss:$16 sps:$4 sm:$0xff]   ;;  %v4669_v54 = vld [vmem:[%s6449_s0 + $0x92c] ss:$16 sps:$4 sm:$0xff]  }
  0xeb   :  { %2973 = vmatpush1.bf16.msra.mxu0 %v4568_v55  ;;  %3344 = vmatpush1.bf16.msra.mxu1 %v4571_v56  ;;  %v4664_v55 = vld [vmem:[%s6449_s0 + $0x920] ss:$16 sps:$4 sm:$0xff]   ;;  %v4667_v56 = vld [vmem:[%s6449_s0 + $0x928] ss:$16 sps:$4 sm:$0xff]  }
  0xec   :  { %2974 = vmatprep.subr.bf16.mxu0 %v4576_v57  ;;  %3345 = vmatprep.subr.bf16.mxu1 %v4579_v58  ;;  %v4672_v57 = vld [vmem:[%s6449_s0 + $0x944] ss:$16 sps:$4 sm:$0xff]   ;;  %v4675_v58 = vld [vmem:[%s6449_s0 + $0x94c] ss:$16 sps:$4 sm:$0xff]  }
  0xef   :  { %2975 = vmatpush1.bf16.msra.mxu0 %v4574_v59  ;;  %3346 = vmatpush1.bf16.msra.mxu1 %v4577_v60  ;;  %v4670_v59 = vld [vmem:[%s6449_s0 + $0x940] ss:$16 sps:$4 sm:$0xff]   ;;  %v4673_v60 = vld [vmem:[%s6449_s0 + $0x948] ss:$16 sps:$4 sm:$0xff]  }
  0xf0   :  { %2976 = vmatprep.subr.bf16.mxu0 %v4582_v61  ;;  %3347 = vmatprep.subr.bf16.mxu1 %v4585_v62  ;;  %v4678_v61 = vld [vmem:[%s6449_s0 + $0x964] ss:$16 sps:$4 sm:$0xff]   ;;  %v4681_v62 = vld [vmem:[%s6449_s0 + $0x96c] ss:$16 sps:$4 sm:$0xff]  }
  0xf3   :  { %2977 = vmatpush1.bf16.msra.mxu0 %v4580_v63  ;;  %3348 = vmatpush1.bf16.msra.mxu1 %v4583_v0  ;;  %v4676_v63 = vld [vmem:[%s6449_s0 + $0x960] ss:$16 sps:$4 sm:$0xff]   ;;  %v4679_v0 = vld [vmem:[%s6449_s0 + $0x968] ss:$16 sps:$4 sm:$0xff]  }
  0xf4   :  { %2978 = vmatprep.subr.bf16.mxu0 %v4588_v1  ;;  %3349 = vmatprep.subr.bf16.mxu1 %v4591_v2  ;;  %v4684_v1 = vld [vmem:[%s6449_s0 + $0x984] ss:$16 sps:$4 sm:$0xff]   ;;  %v4687_v2 = vld [vmem:[%s6449_s0 + $0x98c] ss:$16 sps:$4 sm:$0xff]  }
  0xf7   :  { %2979 = vmatpush1.bf16.msra.mxu0 %v4586_v3  ;;  %3350 = vmatpush1.bf16.msra.mxu1 %v4589_v4  ;;  %v4682_v3 = vld [vmem:[%s6449_s0 + $0x980] ss:$16 sps:$4 sm:$0xff]   ;;  %v4685_v4 = vld [vmem:[%s6449_s0 + $0x988] ss:$16 sps:$4 sm:$0xff]  }
  0xf8   :  { %2980 = vmatprep.subr.bf16.mxu0 %v4596_v5  ;;  %3351 = vmatprep.subr.bf16.mxu1 %v4599_v6  ;;  %v4690_v5 = vld [vmem:[%s6449_s0 + $0x9a4] ss:$16 sps:$4 sm:$0xff]   ;;  %v4693_v6 = vld [vmem:[%s6449_s0 + $0x9ac] ss:$16 sps:$4 sm:$0xff]  }
  0xfb   :  { %2981 = vmatpush1.bf16.msra.mxu0 %v4594_v7  ;;  %3352 = vmatpush1.bf16.msra.mxu1 %v4597_v8  ;;  %v4688_v7 = vld [vmem:[%s6449_s0 + $0x9a0] ss:$16 sps:$4 sm:$0xff]   ;;  %v4691_v8 = vld [vmem:[%s6449_s0 + $0x9a8] ss:$16 sps:$4 sm:$0xff]  }
  0xfc   :  { %2982 = vmatprep.subr.bf16.mxu0 %v4603_v9  ;;  %3353 = vmatprep.subr.bf16.mxu1 %v4606_v10  ;;  %v4698_v9 = vld [vmem:[%s6449_s0 + $0x9c4] ss:$16 sps:$4 sm:$0xff]   ;;  %v4701_v10 = vld [vmem:[%s6449_s0 + $0x9cc] ss:$16 sps:$4 sm:$0xff]  }
  0xff   :  { %2983 = vmatpush1.bf16.msra.mxu0 %v4601_v11  ;;  %3354 = vmatpush1.bf16.msra.mxu1 %v4604_v12  ;;  %v4696_v11 = vld [vmem:[%s6449_s0 + $0x9c0] ss:$16 sps:$4 sm:$0xff]   ;;  %v4699_v12 = vld [vmem:[%s6449_s0 + $0x9c8] ss:$16 sps:$4 sm:$0xff]  }
 0x100   :  { %3005 = vmatprep.subr.bf16.mxu0 %v4612_v13  ;;  %3376 = vmatprep.subr.bf16.mxu1 %v4615_v14  ;;  %v4705_v13 = vld [vmem:[%s6449_s0 + $0x9e4] ss:$16 sps:$4 sm:$0xff]   ;;  %v4708_v14 = vld [vmem:[%s6449_s0 + $0x9ec] ss:$16 sps:$4 sm:$0xff]  }
 0x102   :  { %2985 = vmatmul.mubr.bf16.vlgmr.msra.gmra.mrb[0].mxu0 %v4607_v15  ;;  %3356 = vmatmul.mubr.bf16.vlgmr.msra.gmra.mrb[0].mxu1 %v4607_v15  ;;  %v4703_v15 = vld [vmem:[%s6449_s0 + $0x9e0] ss:$16 sps:$4 sm:$0xff]  }
 0x103   :  { %3006 = vmatpush1.bf16.msra.mxu0 %v4610_v16  ;;  %3377 = vmatpush1.bf16.msra.mxu1 %v4613_v17  ;;  %v4706_v16 = vld [vmem:[%s6449_s0 + $0x9e8] ss:$16 sps:$4 sm:$0xff]   ;;  %v4714_v17 = vld [vmem:[%s6449_s0 + $0xa04] ss:$16 sps:$4 sm:$0xff]  }
 0x104   :  { %3007 = vmatprep.subr.bf16.mxu0 %v4618_v18  ;;  %3378 = vmatprep.subr.bf16.mxu1 %v4621_v19  ;;  %v4717_v18 = vld [vmem:[%s6449_s0 + $0xa0c] ss:$16 sps:$4 sm:$0xff]   ;;  %v4709_v19 = vld [vmem:[%s6450_s1 + $0x20] ss:$56 sps:$4 sm:$0xff]  }
 0x105   :  { %2994 = vmatprep.mubr.bf16.mxu0 %v4694_v20  ;;  %3365 = vmatprep.mubr.bf16.mxu1 %v4694_v20  ;;  %v4712_v20 = vld [vmem:[%s6449_s0 + $0xa00] ss:$16 sps:$4 sm:$0xff]  }
 0x107   :  { %3008 = vmatpush1.bf16.msra.mxu0 %v4616_v21  ;;  %3379 = vmatpush1.bf16.msra.mxu1 %v4619_v22  ;;  %v4715_v21 = vld [vmem:[%s6449_s0 + $0xa08] ss:$16 sps:$4 sm:$0xff]   ;;  %v4720_v22 = vld [vmem:[%s6449_s0 + $0xa24] ss:$16 sps:$4 sm:$0xff]  }
 0x108   :  { %3009 = vmatprep.subr.bf16.mxu0 %v4624_v23  ;;  %3380 = vmatprep.subr.bf16.mxu1 %v4627_v24  ;;  %v4723_v23 = vld [vmem:[%s6449_s0 + $0xa2c] ss:$16 sps:$4 sm:$0xff]  }
 0x109   :  { %v4796_v24 = vld [vmem:[%s6450_s1 + $0x94] ss:$56 sps:$4 sm:$0xff]  }
 0x10a   :  { %2995 = vmatmul.mubr.bf16.gmra.mrb[4].mxu0 %v4702_v26  ;;  %3366 = vmatmul.mubr.bf16.gmra.mrb[4].mxu1 %v4702_v26  ;;  %v4721_v26 = vld [vmem:[%s6449_s0 + $0xa28] ss:$16 sps:$4 sm:$0xff]  }
 0x10b   :  { %3010 = vmatpush1.bf16.msra.mxu0 %v4622_v25  ;;  %3381 = vmatpush1.bf16.msra.mxu1 %v4625_v27  ;;  %v4718_v25 = vld [vmem:[%s6449_s0 + $0xa20] ss:$16 sps:$4 sm:$0xff]   ;;  %v4726_v27 = vld [vmem:[%s6449_s0 + $0xa44] ss:$16 sps:$4 sm:$0xff]  }
 0x10c   :  { %3011 = vmatprep.subr.bf16.mxu0 %v4630_v28  ;;  %3382 = vmatprep.subr.bf16.mxu1 %v4633_v29  ;;  %v4729_v28 = vld [vmem:[%s6449_s0 + $0xa4c] ss:$16 sps:$4 sm:$0xff]   ;;  %v4804_v29 = vld [vmem:[%s6450_s1 + $0x90] ss:$56 sps:$4 sm:$0xff]  }
 0x10d   :  { %3037 = vmatprep.mubr.bf16.mxu0 %v4711_v30  ;;  %3408 = vmatprep.mubr.bf16.mxu1 %v4711_v30  ;;  %v4724_v30 = vld [vmem:[%s6449_s0 + $0xa40] ss:$16 sps:$4 sm:$0xff]  }
 0x10f   :  { %3012 = vmatpush1.bf16.msra.mxu0 %v4628_v31  ;;  %3383 = vmatpush1.bf16.msra.mxu1 %v4631_v32  ;;  %v4727_v31 = vld [vmem:[%s6449_s0 + $0xa48] ss:$16 sps:$4 sm:$0xff]   ;;  %v4732_v32 = vld [vmem:[%s6449_s0 + $0xa64] ss:$16 sps:$4 sm:$0xff]  }
 0x110   :  { %3013 = vmatprep.subr.bf16.mxu0 %v4636_v33  ;;  %3384 = vmatprep.subr.bf16.mxu1 %v4639_v34  ;;  %v4735_v33 = vld [vmem:[%s6449_s0 + $0xa6c] ss:$16 sps:$4 sm:$0xff]  }
 0x111   :  { %v4813_v34 = vld [vmem:[%s6450_s1 + $0x2c] ss:$56 sps:$4 sm:$0xff]  }
 0x113   :  { %3014 = vmatpush1.bf16.msra.mxu0 %v4634_v35  ;;  %3385 = vmatpush1.bf16.msra.mxu1 %v4637_v36  ;;  %v4730_v35 = vld [vmem:[%s6449_s0 + $0xa60] ss:$16 sps:$4 sm:$0xff]   ;;  %v4733_v36 = vld [vmem:[%s6449_s0 + $0xa68] ss:$16 sps:$4 sm:$0xff]  }
 0x114   :  { %3015 = vmatprep.subr.bf16.mxu0 %v4642_v37  ;;  %3386 = vmatprep.subr.bf16.mxu1 %v4645_v38  ;;  %v4738_v37 = vld [vmem:[%s6449_s0 + $0xa84] ss:$16 sps:$4 sm:$0xff]   ;;  %v4741_v38 = vld [vmem:[%s6449_s0 + $0xa8c] ss:$16 sps:$4 sm:$0xff]  }
 0x117   :  { %3016 = vmatpush1.bf16.msra.mxu0 %v4640_v39  ;;  %3387 = vmatpush1.bf16.msra.mxu1 %v4643_v40  ;;  %v4736_v39 = vld [vmem:[%s6449_s0 + $0xa80] ss:$16 sps:$4 sm:$0xff]   ;;  %v4739_v40 = vld [vmem:[%s6449_s0 + $0xa88] ss:$16 sps:$4 sm:$0xff]  }
 0x118   :  { %3017 = vmatprep.subr.bf16.mxu0 %v4648_v41  ;;  %3388 = vmatprep.subr.bf16.mxu1 %v4651_v42  ;;  %v4744_v41 = vld [vmem:[%s6449_s0 + $0xaa4] ss:$16 sps:$4 sm:$0xff]   ;;  %v4747_v42 = vld [vmem:[%s6449_s0 + $0xaac] ss:$16 sps:$4 sm:$0xff]  }
 0x11b   :  { %3018 = vmatpush1.bf16.msra.mxu0 %v4646_v43  ;;  %3389 = vmatpush1.bf16.msra.mxu1 %v4649_v44  ;;  %v4742_v43 = vld [vmem:[%s6449_s0 + $0xaa0] ss:$16 sps:$4 sm:$0xff]   ;;  %v4745_v44 = vld [vmem:[%s6449_s0 + $0xaa8] ss:$16 sps:$4 sm:$0xff]  }
 0x11c   :  { %3019 = vmatprep.subr.bf16.mxu0 %v4654_v45  ;;  %3390 = vmatprep.subr.bf16.mxu1 %v4657_v46  ;;  %v4750_v45 = vld [vmem:[%s6449_s0 + $0xac4] ss:$16 sps:$4 sm:$0xff]   ;;  %v4753_v46 = vld [vmem:[%s6449_s0 + $0xacc] ss:$16 sps:$4 sm:$0xff]  }
 0x11f   :  { %3020 = vmatpush1.bf16.msra.mxu0 %v4652_v47  ;;  %3391 = vmatpush1.bf16.msra.mxu1 %v4655_v48  ;;  %v4748_v47 = vld [vmem:[%s6449_s0 + $0xac0] ss:$16 sps:$4 sm:$0xff]   ;;  %v4751_v48 = vld [vmem:[%s6449_s0 + $0xac8] ss:$16 sps:$4 sm:$0xff]  }
 0x120   :  { %3021 = vmatprep.subr.bf16.mxu0 %v4660_v49  ;;  %3392 = vmatprep.subr.bf16.mxu1 %v4663_v50  ;;  %v4756_v49 = vld [vmem:[%s6449_s0 + $0xae4] ss:$16 sps:$4 sm:$0xff]   ;;  %v4759_v50 = vld [vmem:[%s6449_s0 + $0xaec] ss:$16 sps:$4 sm:$0xff]  }
 0x123   :  { %3022 = vmatpush1.bf16.msra.mxu0 %v4658_v51  ;;  %3393 = vmatpush1.bf16.msra.mxu1 %v4661_v52  ;;  %v4754_v51 = vld [vmem:[%s6449_s0 + $0xae0] ss:$16 sps:$4 sm:$0xff]   ;;  %v4757_v52 = vld [vmem:[%s6449_s0 + $0xae8] ss:$16 sps:$4 sm:$0xff]  }
 0x124   :  { %3023 = vmatprep.subr.bf16.mxu0 %v4666_v53  ;;  %3394 = vmatprep.subr.bf16.mxu1 %v4669_v54  ;;  %v4762_v53 = vld [vmem:[%s6449_s0 + $0xb04] ss:$16 sps:$4 sm:$0xff]   ;;  %v4765_v54 = vld [vmem:[%s6449_s0 + $0xb0c] ss:$16 sps:$4 sm:$0xff]  }
 0x127   :  { %3024 = vmatpush1.bf16.msra.mxu0 %v4664_v55  ;;  %3395 = vmatpush1.bf16.msra.mxu1 %v4667_v56  ;;  %v4760_v55 = vld [vmem:[%s6449_s0 + $0xb00] ss:$16 sps:$4 sm:$0xff]   ;;  %v4763_v56 = vld [vmem:[%s6449_s0 + $0xb08] ss:$16 sps:$4 sm:$0xff]  }
 0x128   :  { %3025 = vmatprep.subr.bf16.mxu0 %v4672_v57  ;;  %3396 = vmatprep.subr.bf16.mxu1 %v4675_v58  ;;  %v4768_v57 = vld [vmem:[%s6449_s0 + $0xb24] ss:$16 sps:$4 sm:$0xff]   ;;  %v4771_v58 = vld [vmem:[%s6449_s0 + $0xb2c] ss:$16 sps:$4 sm:$0xff]  }
 0x12b   :  { %3026 = vmatpush1.bf16.msra.mxu0 %v4670_v59  ;;  %3397 = vmatpush1.bf16.msra.mxu1 %v4673_v60  ;;  %v4766_v59 = vld [vmem:[%s6449_s0 + $0xb20] ss:$16 sps:$4 sm:$0xff]   ;;  %v4769_v60 = vld [vmem:[%s6449_s0 + $0xb28] ss:$16 sps:$4 sm:$0xff]  }
 0x12c   :  { %3027 = vmatprep.subr.bf16.mxu0 %v4678_v61  ;;  %3398 = vmatprep.subr.bf16.mxu1 %v4681_v62  ;;  %v4774_v61 = vld [vmem:[%s6449_s0 + $0xb44] ss:$16 sps:$4 sm:$0xff]   ;;  %v4777_v62 = vld [vmem:[%s6449_s0 + $0xb4c] ss:$16 sps:$4 sm:$0xff]  }
 0x12f   :  { %3028 = vmatpush1.bf16.msra.mxu0 %v4676_v63  ;;  %3399 = vmatpush1.bf16.msra.mxu1 %v4679_v0  ;;  %v4772_v63 = vld [vmem:[%s6449_s0 + $0xb40] ss:$16 sps:$4 sm:$0xff]   ;;  %v4775_v0 = vld [vmem:[%s6449_s0 + $0xb48] ss:$16 sps:$4 sm:$0xff]  }
 0x130   :  { %3029 = vmatprep.subr.bf16.mxu0 %v4684_v1  ;;  %3400 = vmatprep.subr.bf16.mxu1 %v4687_v2  ;;  %v4780_v1 = vld [vmem:[%s6449_s0 + $0xb64] ss:$16 sps:$4 sm:$0xff]   ;;  %v4783_v2 = vld [vmem:[%s6449_s0 + $0xb6c] ss:$16 sps:$4 sm:$0xff]  }
 0x133   :  { %3030 = vmatpush1.bf16.msra.mxu0 %v4682_v3  ;;  %3401 = vmatpush1.bf16.msra.mxu1 %v4685_v4  ;;  %v4778_v3 = vld [vmem:[%s6449_s0 + $0xb60] ss:$16 sps:$4 sm:$0xff]   ;;  %v4781_v4 = vld [vmem:[%s6449_s0 + $0xb68] ss:$16 sps:$4 sm:$0xff]  }
 0x134   :  { %3031 = vmatprep.subr.bf16.mxu0 %v4690_v5  ;;  %3402 = vmatprep.subr.bf16.mxu1 %v4693_v6  ;;  %v4786_v5 = vld [vmem:[%s6449_s0 + $0xb84] ss:$16 sps:$4 sm:$0xff]   ;;  %v4789_v6 = vld [vmem:[%s6449_s0 + $0xb8c] ss:$16 sps:$4 sm:$0xff]  }
 0x137   :  { %3032 = vmatpush1.bf16.msra.mxu0 %v4688_v7  ;;  %3403 = vmatpush1.bf16.msra.mxu1 %v4691_v8  ;;  %v4784_v7 = vld [vmem:[%s6449_s0 + $0xb80] ss:$16 sps:$4 sm:$0xff]   ;;  %v4787_v8 = vld [vmem:[%s6449_s0 + $0xb88] ss:$16 sps:$4 sm:$0xff]  }
 0x138   :  { %3033 = vmatprep.subr.bf16.mxu0 %v4698_v9  ;;  %3404 = vmatprep.subr.bf16.mxu1 %v4701_v10  ;;  %v4792_v9 = vld [vmem:[%s6449_s0 + $0xba4] ss:$16 sps:$4 sm:$0xff]   ;;  %v4795_v10 = vld [vmem:[%s6449_s0 + $0xbac] ss:$16 sps:$4 sm:$0xff]  }
 0x13b   :  { %3034 = vmatpush1.bf16.msra.mxu0 %v4696_v11  ;;  %3405 = vmatpush1.bf16.msra.mxu1 %v4699_v12  ;;  %v4790_v11 = vld [vmem:[%s6449_s0 + $0xba0] ss:$16 sps:$4 sm:$0xff]   ;;  %v4793_v12 = vld [vmem:[%s6449_s0 + $0xba8] ss:$16 sps:$4 sm:$0xff]  }
 0x13c   :  { %3035 = vmatprep.subr.bf16.mxu0 %v4705_v13  ;;  %3406 = vmatprep.subr.bf16.mxu1 %v4708_v14  ;;  %v4800_v13 = vld [vmem:[%s6449_s0 + $0xbc4] ss:$16 sps:$4 sm:$0xff]   ;;  %v4803_v14 = vld [vmem:[%s6449_s0 + $0xbcc] ss:$16 sps:$4 sm:$0xff]  }
 0x13f   :  { %3036 = vmatpush1.bf16.msra.mxu0 %v4703_v15  ;;  %3407 = vmatpush1.bf16.msra.mxu1 %v4706_v16  ;;  %v4798_v15 = vld [vmem:[%s6449_s0 + $0xbc0] ss:$16 sps:$4 sm:$0xff]   ;;  %v4801_v16 = vld [vmem:[%s6449_s0 + $0xbc8] ss:$16 sps:$4 sm:$0xff]  }
 0x140   :  { %3058 = vmatprep.subr.bf16.mxu0 %v4714_v17  ;;  %3429 = vmatprep.subr.bf16.mxu1 %v4717_v18  ;;  %v4807_v17 = vld [vmem:[%s6449_s0 + $0xbe4] ss:$16 sps:$4 sm:$0xff]   ;;  %v4810_v18 = vld [vmem:[%s6449_s0 + $0xbec] ss:$16 sps:$4 sm:$0xff]  }
 0x142   :  { %3038 = vmatmul.mubr.bf16.vlgmr.msra.gmra.mrb[0].mxu0 %v4709_v19  ;;  %3409 = vmatmul.mubr.bf16.vlgmr.msra.gmra.mrb[0].mxu1 %v4709_v19  ;;  %v4805_v19 = vld [vmem:[%s6449_s0 + $0xbe0] ss:$16 sps:$4 sm:$0xff]  }
 0x143   :  { %3059 = vmatpush1.bf16.msra.mxu0 %v4712_v20  ;;  %3430 = vmatpush1.bf16.msra.mxu1 %v4715_v21  ;;  %v4808_v20 = vld [vmem:[%s6449_s0 + $0xbe8] ss:$16 sps:$4 sm:$0xff]   ;;  %v4816_v21 = vld [vmem:[%s6449_s0 + $0xc04] ss:$16 sps:$4 sm:$0xff]  }
 0x144   :  { %3060 = vmatprep.subr.bf16.mxu0 %v4720_v22  ;;  %3431 = vmatprep.subr.bf16.mxu1 %v4723_v23  ;;  %v4819_v22 = vld [vmem:[%s6449_s0 + $0xc0c] ss:$16 sps:$4 sm:$0xff]   ;;  %v4811_v23 = vld [vmem:[%s6450_s1 + $0x28] ss:$56 sps:$4 sm:$0xff]  }
 0x145   :  { %3047 = vmatprep.mubr.bf16.mxu0 %v4796_v24  ;;  %3418 = vmatprep.mubr.bf16.mxu1 %v4796_v24  ;;  %v4814_v24 = vld [vmem:[%s6449_s0 + $0xc00] ss:$16 sps:$4 sm:$0xff]  }
 0x147   :  { %3061 = vmatpush1.bf16.msra.mxu0 %v4718_v25  ;;  %3432 = vmatpush1.bf16.msra.mxu1 %v4721_v26  ;;  %v4817_v25 = vld [vmem:[%s6449_s0 + $0xc08] ss:$16 sps:$4 sm:$0xff]   ;;  %v4822_v26 = vld [vmem:[%s6449_s0 + $0xc24] ss:$16 sps:$4 sm:$0xff]  }
 0x148   :  { %3062 = vmatprep.subr.bf16.mxu0 %v4726_v27  ;;  %3433 = vmatprep.subr.bf16.mxu1 %v4729_v28  ;;  %v4825_v27 = vld [vmem:[%s6449_s0 + $0xc2c] ss:$16 sps:$4 sm:$0xff]  }
 0x149   :  { %v4874_v28 = vld [vmem:[%s6450_s1 + $0x9c] ss:$56 sps:$4 sm:$0xff]  }
 0x14a   :  { %3048 = vmatmul.mubr.bf16.gmra.mrb[4].mxu0 %v4804_v29  ;;  %3419 = vmatmul.mubr.bf16.gmra.mrb[4].mxu1 %v4804_v29  ;;  %v4820_v29 = vld [vmem:[%s6449_s0 + $0xc20] ss:$16 sps:$4 sm:$0xff]  }
 0x14b   :  { %3063 = vmatpush1.bf16.msra.mxu0 %v4724_v30  ;;  %3434 = vmatpush1.bf16.msra.mxu1 %v4727_v31  ;;  %v4823_v30 = vld [vmem:[%s6449_s0 + $0xc28] ss:$16 sps:$4 sm:$0xff]   ;;  %v4828_v31 = vld [vmem:[%s6449_s0 + $0xc44] ss:$16 sps:$4 sm:$0xff]  }
 0x14c   :  { %3064 = vmatprep.subr.bf16.mxu0 %v4732_v32  ;;  %3435 = vmatprep.subr.bf16.mxu1 %v4735_v33  ;;  %v4831_v32 = vld [vmem:[%s6449_s0 + $0xc4c] ss:$16 sps:$4 sm:$0xff]   ;;  %v4876_v33 = vld [vmem:[%s6450_s1 + $0x98] ss:$56 sps:$4 sm:$0xff]  }
 0x14d   :  { %3090 = vmatprep.mubr.bf16.mxu0 %v4813_v34  ;;  %3461 = vmatprep.mubr.bf16.mxu1 %v4813_v34  ;;  %v4826_v34 = vld [vmem:[%s6449_s0 + $0xc40] ss:$16 sps:$4 sm:$0xff]  }
 0x14f   :  { %3065 = vmatpush1.bf16.msra.mxu0 %v4730_v35  ;;  %3436 = vmatpush1.bf16.msra.mxu1 %v4733_v36  ;;  %v4829_v35 = vld [vmem:[%s6449_s0 + $0xc48] ss:$16 sps:$4 sm:$0xff]   ;;  %v4834_v36 = vld [vmem:[%s6449_s0 + $0xc64] ss:$16 sps:$4 sm:$0xff]  }
 0x150   :  { %3066 = vmatprep.subr.bf16.mxu0 %v4738_v37  ;;  %3437 = vmatprep.subr.bf16.mxu1 %v4741_v38  ;;  %v4837_v37 = vld [vmem:[%s6449_s0 + $0xc6c] ss:$16 sps:$4 sm:$0xff]  }
 0x151   :  { %v4891_v38 = vld [vmem:[%s6450_s1 + $0x34] ss:$56 sps:$4 sm:$0xff]  }
 0x153   :  { %3067 = vmatpush1.bf16.msra.mxu0 %v4736_v39  ;;  %3438 = vmatpush1.bf16.msra.mxu1 %v4739_v40  ;;  %v4832_v39 = vld [vmem:[%s6449_s0 + $0xc60] ss:$16 sps:$4 sm:$0xff]   ;;  %v4835_v40 = vld [vmem:[%s6449_s0 + $0xc68] ss:$16 sps:$4 sm:$0xff]  }
 0x154   :  { %3068 = vmatprep.subr.bf16.mxu0 %v4744_v41  ;;  %3439 = vmatprep.subr.bf16.mxu1 %v4747_v42  ;;  %v4840_v41 = vld [vmem:[%s6449_s0 + $0xc84] ss:$16 sps:$4 sm:$0xff]   ;;  %v4843_v42 = vld [vmem:[%s6449_s0 + $0xc8c] ss:$16 sps:$4 sm:$0xff]  }
 0x157   :  { %3069 = vmatpush1.bf16.msra.mxu0 %v4742_v43  ;;  %3440 = vmatpush1.bf16.msra.mxu1 %v4745_v44  ;;  %v4838_v43 = vld [vmem:[%s6449_s0 + $0xc80] ss:$16 sps:$4 sm:$0xff]   ;;  %v4841_v44 = vld [vmem:[%s6449_s0 + $0xc88] ss:$16 sps:$4 sm:$0xff]  }
 0x158   :  { %3070 = vmatprep.subr.bf16.mxu0 %v4750_v45  ;;  %3441 = vmatprep.subr.bf16.mxu1 %v4753_v46  ;;  %v4846_v45 = vld [vmem:[%s6449_s0 + $0xca4] ss:$16 sps:$4 sm:$0xff]   ;;  %v4849_v46 = vld [vmem:[%s6449_s0 + $0xcac] ss:$16 sps:$4 sm:$0xff]  }
 0x15b   :  { %3071 = vmatpush1.bf16.msra.mxu0 %v4748_v47  ;;  %3442 = vmatpush1.bf16.msra.mxu1 %v4751_v48  ;;  %v4844_v47 = vld [vmem:[%s6449_s0 + $0xca0] ss:$16 sps:$4 sm:$0xff]   ;;  %v4847_v48 = vld [vmem:[%s6449_s0 + $0xca8] ss:$16 sps:$4 sm:$0xff]  }
 0x15c   :  { %3072 = vmatprep.subr.bf16.mxu0 %v4756_v49  ;;  %3443 = vmatprep.subr.bf16.mxu1 %v4759_v50  ;;  %v4852_v49 = vld [vmem:[%s6449_s0 + $0xcc4] ss:$16 sps:$4 sm:$0xff]   ;;  %v4855_v50 = vld [vmem:[%s6449_s0 + $0xccc] ss:$16 sps:$4 sm:$0xff]  }
 0x15f   :  { %3073 = vmatpush1.bf16.msra.mxu0 %v4754_v51  ;;  %3444 = vmatpush1.bf16.msra.mxu1 %v4757_v52  ;;  %v4850_v51 = vld [vmem:[%s6449_s0 + $0xcc0] ss:$16 sps:$4 sm:$0xff]   ;;  %v4853_v52 = vld [vmem:[%s6449_s0 + $0xcc8] ss:$16 sps:$4 sm:$0xff]  }
 0x160   :  { %3074 = vmatprep.subr.bf16.mxu0 %v4762_v53  ;;  %3445 = vmatprep.subr.bf16.mxu1 %v4765_v54  ;;  %v4858_v53 = vld [vmem:[%s6449_s0 + $0xce4] ss:$16 sps:$4 sm:$0xff]   ;;  %v4861_v54 = vld [vmem:[%s6449_s0 + $0xcec] ss:$16 sps:$4 sm:$0xff]  }
 0x163   :  { %3075 = vmatpush1.bf16.msra.mxu0 %v4760_v55  ;;  %3446 = vmatpush1.bf16.msra.mxu1 %v4763_v56  ;;  %v4856_v55 = vld [vmem:[%s6449_s0 + $0xce0] ss:$16 sps:$4 sm:$0xff]   ;;  %v4859_v56 = vld [vmem:[%s6449_s0 + $0xce8] ss:$16 sps:$4 sm:$0xff]  }
 0x164   :  { %3076 = vmatprep.subr.bf16.mxu0 %v4768_v57  ;;  %3447 = vmatprep.subr.bf16.mxu1 %v4771_v58  ;;  %v4864_v57 = vld [vmem:[%s6449_s0 + $0xd04] ss:$16 sps:$4 sm:$0xff]   ;;  %v4867_v58 = vld [vmem:[%s6449_s0 + $0xd0c] ss:$16 sps:$4 sm:$0xff]  }
 0x167   :  { %3077 = vmatpush1.bf16.msra.mxu0 %v4766_v59  ;;  %3448 = vmatpush1.bf16.msra.mxu1 %v4769_v60  ;;  %v4862_v59 = vld [vmem:[%s6449_s0 + $0xd00] ss:$16 sps:$4 sm:$0xff]   ;;  %v4865_v60 = vld [vmem:[%s6449_s0 + $0xd08] ss:$16 sps:$4 sm:$0xff]  }
 0x168   :  { %3078 = vmatprep.subr.bf16.mxu0 %v4774_v61  ;;  %3449 = vmatprep.subr.bf16.mxu1 %v4777_v62  ;;  %v4870_v61 = vld [vmem:[%s6449_s0 + $0xd24] ss:$16 sps:$4 sm:$0xff]   ;;  %v4873_v62 = vld [vmem:[%s6449_s0 + $0xd2c] ss:$16 sps:$4 sm:$0xff]  }
 0x16b   :  { %3079 = vmatpush1.bf16.msra.mxu0 %v4772_v63  ;;  %3450 = vmatpush1.bf16.msra.mxu1 %v4775_v0  ;;  %v4868_v63 = vld [vmem:[%s6449_s0 + $0xd20] ss:$16 sps:$4 sm:$0xff]   ;;  %v4871_v0 = vld [vmem:[%s6449_s0 + $0xd28] ss:$16 sps:$4 sm:$0xff]  }
 0x16c   :  { %3080 = vmatprep.subr.bf16.mxu0 %v4780_v1  ;;  %3451 = vmatprep.subr.bf16.mxu1 %v4783_v2  ;;  %v4879_v1 = vld [vmem:[%s6449_s0 + $0xd44] ss:$16 sps:$4 sm:$0xff]   ;;  %v4882_v2 = vld [vmem:[%s6449_s0 + $0xd4c] ss:$16 sps:$4 sm:$0xff]  }
 0x16f   :  { %3081 = vmatpush1.bf16.msra.mxu0 %v4778_v3  ;;  %3452 = vmatpush1.bf16.msra.mxu1 %v4781_v4  ;;  %v4877_v3 = vld [vmem:[%s6449_s0 + $0xd40] ss:$16 sps:$4 sm:$0xff]   ;;  %v4880_v4 = vld [vmem:[%s6449_s0 + $0xd48] ss:$16 sps:$4 sm:$0xff]  }
 0x170   :  { %3082 = vmatprep.subr.bf16.mxu0 %v4786_v5  ;;  %3453 = vmatprep.subr.bf16.mxu1 %v4789_v6  ;;  %v4885_v5 = vld [vmem:[%s6449_s0 + $0xd64] ss:$16 sps:$4 sm:$0xff]   ;;  %v4888_v6 = vld [vmem:[%s6449_s0 + $0xd6c] ss:$16 sps:$4 sm:$0xff]  }
 0x173   :  { %3083 = vmatpush1.bf16.msra.mxu0 %v4784_v7  ;;  %3454 = vmatpush1.bf16.msra.mxu1 %v4787_v8  ;;  %v4883_v7 = vld [vmem:[%s6449_s0 + $0xd60] ss:$16 sps:$4 sm:$0xff]   ;;  %v4886_v8 = vld [vmem:[%s6449_s0 + $0xd68] ss:$16 sps:$4 sm:$0xff]  }
 0x174   :  { %3084 = vmatprep.subr.bf16.mxu0 %v4792_v9  ;;  %3455 = vmatprep.subr.bf16.mxu1 %v4795_v10  ;;  %v4889_v9 = vld [vmem:[%s6450_s1 + $0x30] ss:$56 sps:$4 sm:$0xff]   ;;  %v4892_v10 = vld [vmem:[%s6450_s1 + $0xa4] ss:$56 sps:$4 sm:$0xff]  }
 0x177   :  { %3085 = vmatpush1.bf16.msra.mxu0 %v4790_v11  ;;  %3456 = vmatpush1.bf16.msra.mxu1 %v4793_v12  ;;  %v4894_v11 = vld [vmem:[%s6450_s1 + $0xa0] ss:$56 sps:$4 sm:$0xff]   ;;  %v4895_v12 = vmov 0.0  }
 0x178   :  { %3086 = vmatprep.subr.bf16.mxu0 %v4800_v13  ;;  %3457 = vmatprep.subr.bf16.mxu1 %v4803_v14  ;;  %20 = vst.msk [vmem:[%s6451_s3] sm:$0xff] %vm19_vm1, %v4895_v12  ;;  %21 = vst.msk [vmem:[%s6451_s3 + $0x8] sm:$0xff] %vm19_vm1, %v4895_v12 }
 0x179   :  { %22 = vst.msk [vmem:[%s6451_s3 + $0x10] sm:$0xff] %vm19_vm1, %v4895_v12  ;;  %23 = vst.msk [vmem:[%s6451_s3 + $0x18] sm:$0xff] %vm19_vm1, %v4895_v12 }
 0x17a   :  { %25 = vst.msk [vmem:[%s6453_s4 + $0x8] sm:$0xff] %vm19_vm1, %v4895_v12  ;;  %24 = vst.msk [vmem:[%s6453_s4] sm:$0xff] %vm19_vm1, %v4895_v12 }
 0x17b   :  { %3087 = vmatpush1.bf16.msra.mxu0 %v4798_v15  ;;  %3458 = vmatpush1.bf16.msra.mxu1 %v4801_v16  ;;  %26 = vst.msk [vmem:[%s6453_s4 + $0x10] sm:$0xff] %vm19_vm1, %v4895_v12  ;;  %27 = vst.msk [vmem:[%s6453_s4 + $0x18] sm:$0xff] %vm19_vm1, %v4895_v12 }
 0x17c   :  { %3088 = vmatprep.subr.bf16.mxu0 %v4807_v17  ;;  %3459 = vmatprep.subr.bf16.mxu1 %v4810_v18 }
 0x17f   :  { %3089 = vmatpush1.bf16.msra.mxu0 %v4805_v19  ;;  %3460 = vmatpush1.bf16.msra.mxu1 %v4808_v20 }
 0x180   :  { %3111 = vmatprep.subr.bf16.mxu0 %v4816_v21  ;;  %3482 = vmatprep.subr.bf16.mxu1 %v4819_v22 }
 0x182   :  { %3091 = vmatmul.mubr.bf16.vlgmr.msra.gmra.mrb[0].mxu0 %v4811_v23  ;;  %3462 = vmatmul.mubr.bf16.vlgmr.msra.gmra.mrb[0].mxu1 %v4811_v23 }
 0x183   :  { %3112 = vmatpush1.bf16.msra.mxu0 %v4814_v24  ;;  %3483 = vmatpush1.bf16.msra.mxu1 %v4817_v25 }
 0x184   :  { %3113 = vmatprep.subr.bf16.mxu0 %v4822_v26  ;;  %3484 = vmatprep.subr.bf16.mxu1 %v4825_v27 }
 0x185   :  { %3100 = vmatprep.mubr.bf16.mxu0 %v4874_v28  ;;  %3471 = vmatprep.mubr.bf16.mxu1 %v4874_v28 }
 0x187   :  { %3114 = vmatpush1.bf16.msra.mxu0 %v4820_v29  ;;  %3485 = vmatpush1.bf16.msra.mxu1 %v4823_v30 }
 0x188   :  { %3115 = vmatprep.subr.bf16.mxu0 %v4828_v31  ;;  %3486 = vmatprep.subr.bf16.mxu1 %v4831_v32 }
 0x18a   :  { %3101 = vmatmul.mubr.bf16.gmra.mrb[4].mxu0 %v4876_v33  ;;  %3472 = vmatmul.mubr.bf16.gmra.mrb[4].mxu1 %v4876_v33 }
 0x18b   :  { %3116 = vmatpush1.bf16.msra.mxu0 %v4826_v34  ;;  %3487 = vmatpush1.bf16.msra.mxu1 %v4829_v35 }
 0x18c   :  { %3117 = vmatprep.subr.bf16.mxu0 %v4834_v36  ;;  %3488 = vmatprep.subr.bf16.mxu1 %v4837_v37 }
 0x18d   :  { %4104 = vmatprep.mubr.msk.bf16.mxu0 %vm2786_vm0, %v4891_v38  ;;  %4106 = vmatprep.mubr.msk.bf16.mxu1 %vm2786_vm0, %v4891_v38 }
 0x18f   :  { %3118 = vmatpush1.bf16.msra.mxu0 %v4832_v39  ;;  %3489 = vmatpush1.bf16.msra.mxu1 %v4835_v40 }
 0x190   :  { %3119 = vmatprep.subr.bf16.mxu0 %v4840_v41  ;;  %3490 = vmatprep.subr.bf16.mxu1 %v4843_v42 }
 0x193   :  { %3120 = vmatpush1.bf16.msra.mxu0 %v4838_v43  ;;  %3491 = vmatpush1.bf16.msra.mxu1 %v4841_v44 }
 0x194   :  { %3121 = vmatprep.subr.bf16.mxu0 %v4846_v45  ;;  %3492 = vmatprep.subr.bf16.mxu1 %v4849_v46 }
 0x197   :  { %3122 = vmatpush1.bf16.msra.mxu0 %v4844_v47  ;;  %3493 = vmatpush1.bf16.msra.mxu1 %v4847_v48 }
 0x198   :  { %3123 = vmatprep.subr.bf16.mxu0 %v4852_v49  ;;  %3494 = vmatprep.subr.bf16.mxu1 %v4855_v50 }
 0x19b   :  { %3124 = vmatpush1.bf16.msra.mxu0 %v4850_v51  ;;  %3495 = vmatpush1.bf16.msra.mxu1 %v4853_v52 }
 0x19c   :  { %3125 = vmatprep.subr.bf16.mxu0 %v4858_v53  ;;  %3496 = vmatprep.subr.bf16.mxu1 %v4861_v54 }
 0x19f   :  { %3126 = vmatpush1.bf16.msra.mxu0 %v4856_v55  ;;  %3497 = vmatpush1.bf16.msra.mxu1 %v4859_v56 }
 0x1a0   :  { %3127 = vmatprep.subr.bf16.mxu0 %v4864_v57  ;;  %3498 = vmatprep.subr.bf16.mxu1 %v4867_v58 }
 0x1a3   :  { %3128 = vmatpush1.bf16.msra.mxu0 %v4862_v59  ;;  %3499 = vmatpush1.bf16.msra.mxu1 %v4865_v60 }
 0x1a4   :  { %3129 = vmatprep.subr.bf16.mxu0 %v4870_v61  ;;  %3500 = vmatprep.subr.bf16.mxu1 %v4873_v62 }
 0x1a7   :  { %3130 = vmatpush1.bf16.msra.mxu0 %v4868_v63  ;;  %3501 = vmatpush1.bf16.msra.mxu1 %v4871_v0 }
 0x1a8   :  { %3131 = vmatprep.subr.bf16.mxu0 %v4879_v1  ;;  %3502 = vmatprep.subr.bf16.mxu1 %v4882_v2 }
 0x1ab   :  { %3132 = vmatpush1.bf16.msra.mxu0 %v4877_v3  ;;  %3503 = vmatpush1.bf16.msra.mxu1 %v4880_v4 }
 0x1ac   :  { %3133 = vmatprep.subr.bf16.mxu0 %v4885_v5  ;;  %3504 = vmatprep.subr.bf16.mxu1 %v4888_v6  ;;  %v3551_v5 = vld [vmem:[%s6451_s3] sm:$0xff] }
 0x1af   :  { %3134 = vmatpush1.bf16.msra.mxu0 %v4883_v7  ;;  %3505 = vmatpush1.bf16.msra.mxu1 %v4886_v8  ;;  %v3585_v8 = vld [vmem:[%s6453_s4 + $0x8] sm:$0xff] }
 0x1b2   :  { %3144 = vmatmul.mubr.bf16.vlgmr.msra.gmra.mrb[0].mxu0 %v4889_v9  ;;  %3515 = vmatmul.mubr.bf16.vlgmr.msra.gmra.mrb[0].mxu1 %v4889_v9  ;;  %v3552_v9 = vld [vmem:[%s6451_s3 + $0x8] sm:$0xff] }
 0x1b3   :  { %4105 = vmatprep.mubr.msk.bf16.mxu0 %vm2786_vm0, %v4892_v10  ;;  %4107 = vmatprep.mubr.msk.bf16.mxu1 %vm2786_vm0, %v4892_v10 }
 0x1ba   :  { %3154 = vmatmul.mubr.bf16.gmra.mrb[4].mxu0 %v4894_v11  ;;  %3525 = vmatmul.mubr.bf16.gmra.mrb[4].mxu1 %v4894_v11 }
 0x285   :  { %v3145_v13 = vpop.f32.mrb[0].mxu0  ;;  %v3516_v14 = vpop.f32.mrb[0].mxu1 }
 0x286   :  { %3535 = vst [vmem:[%s6452_s2] sm:$0xff] %v3145_v13  ;;  %v3588_v15 = vmul.f32 %v3145_v13, %v3145_v13  ;;  %3537 = vst [vmem:[%s6452_s2 + $0x10] sm:$0xff] %v3516_v14  ;;  %v3147_v16 = vpop.f32.mrb[1].mxu0  ;;  %v3518_v17 = vpop.f32.mrb[1].mxu1  ;;  %v3590_v28 = vmul.f32 %v3516_v14, %v3516_v14 }
 0x287   :  { %3536 = vst [vmem:[%s6452_s2 + $0x8] sm:$0xff] %v3147_v16  ;;  %v3555_v18 = vadd.f32 %v3147_v16, %v3145_v13  ;;  %v3589_v19 = vmul.f32 %v3147_v16, %v3147_v16  ;;  %3538 = vst [vmem:[%s6452_s2 + $0x18] sm:$0xff] %v3518_v17  ;;  %v3149_v20 = vpop.f32.mrb[2].mxu0  ;;  %v3520_v21 = vpop.f32.mrb[2].mxu1  ;;  %v3591_v34 = vmul.f32 %v3518_v17, %v3518_v17 }
 0x288   :  { %3539 = vst [vmem:[%s6452_s2 + $0x20] sm:$0xff] %v3149_v20  ;;  %v3592_v22 = vmul.f32 %v3149_v20, %v3149_v20  ;;  %3541 = vst [vmem:[%s6452_s2 + $0x30] sm:$0xff] %v3520_v21  ;;  %v3151_v23 = vpop.f32.mrb[3].mxu0  ;;  %v3522_v24 = vpop.f32.mrb[3].mxu1  ;;  %v3594_v30 = vmul.f32 %v3520_v21, %v3520_v21 }
 0x289   :  { %3540 = vst [vmem:[%s6452_s2 + $0x28] sm:$0xff] %v3151_v23  ;;  %v3560_v25 = vadd.f32 %v3151_v23, %v3149_v20  ;;  %v3593_v26 = vmul.f32 %v3151_v23, %v3151_v23  ;;  %3542 = vst [vmem:[%s6452_s2 + $0x38] sm:$0xff] %v3522_v24  ;;  %v3556_v27 = vadd.f32 %v3555_v18, %v3516_v14  ;;  %v3584_v14 = vld [vmem:[%s6453_s4] sm:$0xff]  ;;  %v3586_v20 = vld [vmem:[%s6453_s4 + $0x10] sm:$0xff] }
 0x28a   :  { %v3604_v29 = vadd.f32 %v3589_v19, %v3588_v15  ;;  %v3595_v38 = vmul.f32 %v3522_v24, %v3522_v24  ;;  %v3553_v15 = vld [vmem:[%s6451_s3 + $0x10] sm:$0xff] }
 0x28b   :  { %v3557_v31 = vadd.f32 %v3556_v27, %v3518_v17  ;;  %v3609_v32 = vadd.f32 %v3593_v26, %v3592_v22  ;;  %v3561_v33 = vadd.f32 %v3560_v25, %v3520_v21  ;;  %v3554_v21 = vld [vmem:[%s6451_s3 + $0x18] sm:$0xff] }
 0x28c   :  { %v3605_v35 = vadd.f32 %v3604_v29, %v3590_v28  ;;  %v3587_v26 = vld [vmem:[%s6453_s4 + $0x18] sm:$0xff] }
 0x28d   :  { %v3526_v36 = vpop.f32.mrb[4].mxu1  ;;  %3558 = vadd.xlane.f32.xlu0 %v3557_v31  ;;  %v3155_v37 = vpop.f32.mrb[4].mxu0  ;;  %v3610_v39 = vadd.f32 %v3609_v32, %v3594_v30  ;;  %v3562_v40 = vadd.f32 %v3561_v33, %v3522_v24 }
 0x28e   :  { %3545 = vst [vmem:[%s6452_s2 + $0x50] sm:$0xff] %v3526_v36  ;;  %3543 = vst [vmem:[%s6452_s2 + $0x40] sm:$0xff] %v3155_v37  ;;  %v3596_v41 = vmul.f32 %v3155_v37, %v3155_v37  ;;  %v3157_v42 = vpop.f32.mrb[5].mxu0  ;;  %v3528_v43 = vpop.f32.mrb[5].mxu1  ;;  %v3606_v44 = vadd.f32 %v3605_v35, %v3591_v34  ;;  %v3598_v55 = vmul.f32 %v3526_v36, %v3526_v36 }
 0x28f   :  { %3544 = vst [vmem:[%s6452_s2 + $0x48] sm:$0xff] %v3157_v42  ;;  %v3565_v45 = vadd.f32 %v3157_v42, %v3155_v37  ;;  %v3597_v46 = vmul.f32 %v3157_v42, %v3157_v42  ;;  %3546 = vst [vmem:[%s6452_s2 + $0x58] sm:$0xff] %v3528_v43  ;;  %v3159_v47 = vpop.f32.mrb[6].mxu0  ;;  %v3530_v48 = vpop.f32.mrb[6].mxu1  ;;  %v3611_v49 = vadd.f32 %v3610_v39, %v3595_v38 }
 0x290   :  { %3547 = vst [vmem:[%s6452_s2 + $0x60] sm:$0xff] %v3159_v47  ;;  %v3600_v50 = vmul.f32 %v3159_v47, %v3159_v47  ;;  %3549 = vst [vmem:[%s6452_s2 + $0x70] sm:$0xff] %v3530_v48  ;;  %v3161_v51 = vpop.f32.mrb[7].mxu0  ;;  %v3532_v52 = vpop.f32.mrb[7].mxu1  ;;  %v3602_v58 = vmul.f32 %v3530_v48, %v3530_v48  ;;  %v3599_v62 = vmul.f32 %v3528_v43, %v3528_v43 }
 0x291   :  { %3548 = vst [vmem:[%s6452_s2 + $0x68] sm:$0xff] %v3161_v51  ;;  %v3570_v53 = vadd.f32 %v3161_v51, %v3159_v47  ;;  %v3601_v54 = vmul.f32 %v3161_v51, %v3161_v51  ;;  %3550 = vst [vmem:[%s6452_s2 + $0x78] sm:$0xff] %v3532_v52  ;;  %3612 = vadd.xlane.f32.xlu1 %v3611_v49  ;;  %3563 = vadd.xlane.f32.xlu0 %v3562_v40 }
 0x292   :  { %v3566_v56 = vadd.f32 %v3565_v45, %v3526_v36  ;;  %v3614_v57 = vadd.f32 %v3597_v46, %v3596_v41  ;;  %v3603_v0 = vmul.f32 %v3532_v52, %v3532_v52 }
 0x293   :  { %v3619_v59 = vadd.f32 %v3601_v54, %v3600_v50  ;;  %v3571_v60 = vadd.f32 %v3570_v53, %v3530_v48 }
 0x294   :  { %v3567_v61 = vadd.f32 %v3566_v56, %v3528_v43  ;;  %v3615_v63 = vadd.f32 %v3614_v57, %v3598_v55 }
 0x295   :  { %3607 = vadd.xlane.f32.xlu0 %v3606_v44  ;;  %v3572_v1 = vadd.f32 %v3571_v60, %v3532_v52  ;;  %v3620_v2 = vadd.f32 %v3619_v59, %v3602_v58 }
 0x296   :  { %3568 = vadd.xlane.f32.xlu1 %v3567_v61  ;;  %v3616_v3 = vadd.f32 %v3615_v63, %v3599_v62 }
 0x297   :  { %v3621_v4 = vadd.f32 %v3620_v2, %v3603_v0 }
 0x299   :  { %3617 = vadd.xlane.f32.xlu0 %v3616_v3 }
 0x29a   :  { %3573 = vadd.xlane.f32.xlu1 %v3572_v1 }
 0x29e   :  { %3622 = vadd.xlane.f32.xlu1 %v3621_v4 }
 0x31a   :  { %v3559_v6 = vpop.xlane.xlu0 %3558 }
 0x31b   :  { %v3575_v7 = vadd.f32 %v3559_v6, %v3551_v5 }
 0x31d   :  { %3580 = vst.msk [vmem:[%s6451_s3] sm:$0xff] %vm19_vm1, %v3575_v7 }
 0x31e   :  { %v3613_v10 = vpop.xlane.xlu1 %3612  ;;  %v3564_v11 = vpop.xlane.xlu0 %3563 }
 0x31f   :  { %v3625_v12 = vadd.f32 %v3613_v10, %v3585_v8  ;;  %v3576_v13 = vadd.f32 %v3564_v11, %v3552_v9 }
 0x321   :  { %3629 = vst.msk [vmem:[%s6453_s4 + $0x8] sm:$0xff] %vm19_vm1, %v3625_v12  ;;  %3581 = vst.msk [vmem:[%s6451_s3 + $0x8] sm:$0xff] %vm19_vm1, %v3576_v13 }
 0x322   :  { %v3608_v16 = vpop.xlane.xlu0 %3607 }
 0x323   :  { %v3624_v17 = vadd.f32 %v3608_v16, %v3584_v14  ;;  %v3569_v18 = vpop.xlane.xlu1 %3568 }
 0x324   :  { %v3577_v19 = vadd.f32 %v3569_v18, %v3553_v15 }
 0x325   :  { %3628 = vst.msk [vmem:[%s6453_s4] sm:$0xff] %vm19_vm1, %v3624_v17 }
 0x326   :  { %3582 = vst.msk [vmem:[%s6451_s3 + $0x10] sm:$0xff] %vm19_vm1, %v3577_v19  ;;  %v3618_v22 = vpop.xlane.xlu0 %3617 }
 0x327   :  { %v3626_v23 = vadd.f32 %v3618_v22, %v3586_v20  ;;  %v3574_v24 = vpop.xlane.xlu1 %3573 }
 0x328   :  { %v3578_v25 = vadd.f32 %v3574_v24, %v3554_v21 }
 0x329   :  { %3630 = vst.msk [vmem:[%s6453_s4 + $0x10] sm:$0xff] %vm19_vm1, %v3626_v23 }
 0x32a   :  { %3583 = vst.msk [vmem:[%s6451_s3 + $0x18] sm:$0xff] %vm19_vm1, %v3578_v25 }
 0x32b   :  { %v3623_v27 = vpop.xlane.xlu1 %3622 }
 0x32c   :  { %v3627_v28 = vadd.f32 %v3623_v27, %v3587_v26 }
 0x32e   :  { %3631 = vst.msk [vmem:[%s6453_s4 + $0x18] sm:$0xff] %vm19_vm1, %v3627_v28 }

// kernel: unet_forward.42
= control target key start
LH: loop header
LB: loop body
LE: loop exit
PB: predicated region body
PF: predicated region fallthrough
CT: control target
= control target key end

     0   :  { %v145_v0 = vmov 0   ;;  %s214_s1 = inlined_call_operand.vmem [shape: f32[16,1], index: 1, kind: input, shape index: {}]   ;;  %s215_s2 = inlined_call_operand.vmem [shape: f32[16,1], index: 2, kind: input, shape index: {}]   ;;  %s216_s0 = inlined_call_operand.vmem [shape: f32[16,512], index: 0, kind: input, shape index: {}]   ;;  %s217_s3 = inlined_call_operand.vmem [shape: bf16[16,512], index: 3, kind: output, shape index: {}]  }
   0x1   :  { %139 = vset.pattern.permute.xlu0 %v145_v0  ;;  %v14_v1 = vld [vmem:[%s214_s1] sm:$0xff]  ;;  %v15_v2 = vld [vmem:[%s214_s1 + $0x8] sm:$0xff]  ;;  %140 = vset.pattern.permute.xlu1 %v145_v0  ;;  %v32_v20 = vld [vmem:[%s216_s0 + $0x10] sm:$0xff] }
   0x2   :  { %v18_v3 = vld [vmem:[%s215_s2] sm:$0xff]  ;;  %v16_v4 = vmul.f32 0.001953125, %v14_v1  ;;  %v19_v5 = vld [vmem:[%s215_s2 + $0x8] sm:$0xff]  ;;  %v17_v7 = vmul.f32 0.001953125, %v15_v2  ;;  %v33_v21 = vld [vmem:[%s216_s0 + $0x18] sm:$0xff] }
   0x3   :  { %v20_v6 = vmul.f32 0.001953125, %v18_v3  ;;  %v21_v8 = vmul.f32 0.001953125, %v19_v5  ;;  %v30_v18 = vld [vmem:[%s216_s0] sm:$0xff]  ;;  %v31_v19 = vld [vmem:[%s216_s0 + $0x8] sm:$0xff]  ;;  %v36_v29 = vld [vmem:[%s216_s0 + $0x30] sm:$0xff] }
   0x4   :  { %40 = vperm.xlu0 %139, %v16_v4   ;;  %v22_v9 = vmul.f32 %v16_v4, %v16_v4  ;;  %v23_v10 = vmul.f32 %v17_v7, %v17_v7  ;;  %v34_v27 = vld [vmem:[%s216_s0 + $0x20] sm:$0xff]  ;;  %v35_v28 = vld [vmem:[%s216_s0 + $0x28] sm:$0xff]  ;;  %v37_v31 = vld [vmem:[%s216_s0 + $0x38] sm:$0xff] }
   0x6   :  { %v24_v11 = vsub.f32 %v20_v6, %v22_v9  ;;  %v25_v12 = vsub.f32 %v21_v8, %v23_v10 }
   0x8   :  { %v26_v13 = vadd.f32 1e-05, %v24_v11  ;;  %v27_v14 = vadd.f32 1e-05, %v25_v12  ;;  %45 = vperm.xlu0 %139, %v17_v7  }
   0xa   :  { %141 = vrsqrt.f32 %v26_v13 }
   0xb   :  { %143 = vrsqrt.f32 %v27_v14 }
  0x14   :  { %v142_v15 = vpop.eup %141 }
  0x15   :  { %58 = vperm.xlu1 %140, %v142_v15   ;;  %v144_v16 = vpop.eup %143 }
  0x19   :  { %63 = vperm.xlu1 %140, %v144_v16  }
  0x83   :  { %v41_v17 = vpop.permute.xlu0 %40 }
  0x84   :  { %v48_v22 = vsub.f32 %v30_v18, %v41_v17  ;;  %v49_v23 = vsub.f32 %v31_v19, %v41_v17  ;;  %v50_v24 = vsub.f32 %v32_v20, %v41_v17  ;;  %v51_v25 = vsub.f32 %v33_v21, %v41_v17 }
  0x87   :  { %v46_v26 = vpop.permute.xlu0 %45 }
  0x88   :  { %v52_v36 = vsub.f32 %v34_v27, %v46_v26  ;;  %v53_v37 = vsub.f32 %v35_v28, %v46_v26  ;;  %v54_v38 = vsub.f32 %v36_v29, %v46_v26  ;;  %v55_v39 = vsub.f32 %v37_v31, %v46_v26 }
  0x94   :  { %v59_v30 = vpop.permute.xlu1 %58 }
  0x95   :  { %v66_v32 = vmul.f32 %v59_v30, %v48_v22  ;;  %v67_v33 = vmul.f32 %v59_v30, %v49_v23  ;;  %v68_v34 = vmul.f32 %v59_v30, %v50_v24  ;;  %v69_v35 = vmul.f32 %v59_v30, %v51_v25 }
  0x97   :  { %vm74_vm0 = vcmp.ge.f32.partialorder %v66_v32, 0.0  ;;  %vm75_vm1 = vcmp.ge.f32.partialorder %v67_v33, 0.0  ;;  %vm76_vm2 = vcmp.ge.f32.partialorder %v68_v34, 0.0  ;;  %vm77_vm3 = vcmp.ge.f32.partialorder %v69_v35, 0.0 }
  0x98   :  { %v82_v40 = vmul.f32 0.2, %v66_v32  ;;  %v83_v41 = vmul.f32 0.2, %v67_v33  ;;  %v84_v42 = vmul.f32 0.2, %v68_v34  ;;  %v64_v43 = vpop.permute.xlu1 %63 }
  0x99   :  { %v85_v44 = vmul.f32 0.2, %v69_v35  ;;  %v70_v45 = vmul.f32 %v64_v43, %v52_v36  ;;  %v71_v46 = vmul.f32 %v64_v43, %v53_v37  ;;  %v72_v47 = vmul.f32 %v64_v43, %v54_v38 }
  0x9a   :  { %v90_v48 = vsel %vm74_vm0, %v66_v32, %v82_v40  ;;  %v91_v49 = vsel %vm75_vm1, %v67_v33, %v83_v41  ;;  %v92_v50 = vsel %vm76_vm2, %v68_v34, %v84_v42  ;;  %v73_v51 = vmul.f32 %v64_v43, %v55_v39 }
  0x9b   :  { %v93_v52 = vsel %vm77_vm3, %v69_v35, %v85_v44  ;;  %v134_v53 = vpack.c.bf16 %v91_v49, %v90_v48  ;;  %vm78_vm4 = vcmp.ge.f32.partialorder %v70_v45, 0.0  ;;  %vm79_vm5 = vcmp.ge.f32.partialorder %v71_v46, 0.0 }
  0x9c   :  { %v135_v54 = vpack.c.bf16 %v93_v52, %v92_v50  ;;  %vm80_vm6 = vcmp.ge.f32.partialorder %v72_v47, 0.0  ;;  %vm81_vm7 = vcmp.ge.f32.partialorder %v73_v51, 0.0  ;;  %v86_v55 = vmul.f32 0.2, %v70_v45 }
  0x9d   :  { %122 = vst [vmem:[%s217_s3] sm:$0xff] %v134_v53  ;;  %v87_v56 = vmul.f32 0.2, %v71_v46  ;;  %v88_v57 = vmul.f32 0.2, %v72_v47  ;;  %v89_v58 = vmul.f32 0.2, %v73_v51 }
  0x9e   :  { %123 = vst [vmem:[%s217_s3 + $0x8] sm:$0xff] %v135_v54  ;;  %v94_v59 = vsel %vm78_vm4, %v70_v45, %v86_v55 }
  0x9f   :  { %v95_v60 = vsel %vm79_vm5, %v71_v46, %v87_v56  ;;  %v96_v61 = vsel %vm80_vm6, %v72_v47, %v88_v57  ;;  %v97_v62 = vsel %vm81_vm7, %v73_v51, %v89_v58 }
  0xa0   :  { %v136_v63 = vpack.c.bf16 %v95_v60, %v94_v59  ;;  %v137_v0 = vpack.c.bf16 %v97_v62, %v96_v61 }
  0xa2   :  { %124 = vst [vmem:[%s217_s3 + $0x10] sm:$0xff] %v136_v63  ;;  %125 = vst [vmem:[%s217_s3 + $0x18] sm:$0xff] %v137_v0 }

// kernel: unet_forward.41
= control target key start
LH: loop header
LB: loop body
LE: loop exit
PB: predicated region body
PF: predicated region fallthrough
CT: control target
= control target key end

     0   :  { %vm1363_vm0 = vcmask 785408   ;;  %vm19_vm1 = vcmask 7168   ;;  %s3121_s0 = inlined_call_operand.vmem [shape: bf16[864,512], index: 0, kind: input, shape index: {}]   ;;  %s3122_s1 = inlined_call_operand.vmem [shape: bf16[16,864], index: 1, kind: input, shape index: {}]   ;;  %s3123_s3 = inlined_call_operand.vmem [shape: f32[16,1], index: 3, kind: output, shape index: {1}]   ;;  %s3124_s2 = inlined_call_operand.vmem [shape: f32[16,512], index: 2, kind: output, shape index: {0}]   ;;  %s3125_s4 = inlined_call_operand.vmem [shape: f32[16,1], index: 4, kind: output, shape index: {2}]  }
   0x1   :  { %v2023_v0 = vld [vmem:[%s3121_s0 + $0x4] ss:$16 sps:$4 sm:$0xff]   ;;  %v2025_v1 = vld [vmem:[%s3121_s0 + $0xc] ss:$16 sps:$4 sm:$0xff]   ;;  %v2027_v2 = vld [vmem:[%s3121_s0] ss:$16 sps:$4 sm:$0xff]  }
   0x2   :  { %1367 = vmatprep.subr.bf16.mxu0 %v2023_v0  ;;  %v2028_v3 = vld [vmem:[%s3121_s0 + $0x8] ss:$16 sps:$4 sm:$0xff]   ;;  %1539 = vmatprep.subr.bf16.mxu1 %v2025_v1  ;;  %v2029_v4 = vld [vmem:[%s3121_s0 + $0x24] ss:$16 sps:$4 sm:$0xff]   ;;  %v2031_v5 = vld [vmem:[%s3121_s0 + $0x2c] ss:$16 sps:$4 sm:$0xff]  }
   0x3   :  { %1368 = vmatpush1.bf16.msra.mxu0 %v2027_v2  ;;  %1540 = vmatpush1.bf16.msra.mxu1 %v2028_v3  ;;  %v2033_v6 = vld [vmem:[%s3121_s0 + $0x20] ss:$16 sps:$4 sm:$0xff]   ;;  %v2034_v7 = vld [vmem:[%s3121_s0 + $0x28] ss:$16 sps:$4 sm:$0xff]   ;;  %v2035_v8 = vld [vmem:[%s3121_s0 + $0x44] ss:$16 sps:$4 sm:$0xff]  }
   0x4   :  { %1369 = vmatprep.subr.bf16.mxu0 %v2029_v4  ;;  %1541 = vmatprep.subr.bf16.mxu1 %v2031_v5  ;;  %v2037_v9 = vld [vmem:[%s3121_s0 + $0x4c] ss:$16 sps:$4 sm:$0xff]   ;;  %v2039_v10 = vld [vmem:[%s3121_s0 + $0x40] ss:$16 sps:$4 sm:$0xff]   ;;  %v2040_v11 = vld [vmem:[%s3121_s0 + $0x48] ss:$16 sps:$4 sm:$0xff]  }
   0x5   :  { %v2041_v12 = vld [vmem:[%s3121_s0 + $0x64] ss:$16 sps:$4 sm:$0xff]   ;;  %v2043_v13 = vld [vmem:[%s3121_s0 + $0x6c] ss:$16 sps:$4 sm:$0xff]   ;;  %v2045_v14 = vld [vmem:[%s3121_s0 + $0x60] ss:$16 sps:$4 sm:$0xff]  }
   0x6   :  { %v2046_v15 = vld [vmem:[%s3121_s0 + $0x68] ss:$16 sps:$4 sm:$0xff]   ;;  %v2047_v16 = vld [vmem:[%s3121_s0 + $0x84] ss:$16 sps:$4 sm:$0xff]   ;;  %v2049_v17 = vld [vmem:[%s3121_s0 + $0x8c] ss:$16 sps:$4 sm:$0xff]  }
   0x7   :  { %1370 = vmatpush1.bf16.msra.mxu0 %v2033_v6  ;;  %1542 = vmatpush1.bf16.msra.mxu1 %v2034_v7  ;;  %v2051_v18 = vld [vmem:[%s3121_s0 + $0x80] ss:$16 sps:$4 sm:$0xff]   ;;  %v2052_v19 = vld [vmem:[%s3121_s0 + $0x88] ss:$16 sps:$4 sm:$0xff]   ;;  %v2053_v20 = vld [vmem:[%s3121_s0 + $0xa4] ss:$16 sps:$4 sm:$0xff]  }
   0x8   :  { %1371 = vmatprep.subr.bf16.mxu0 %v2035_v8  ;;  %1543 = vmatprep.subr.bf16.mxu1 %v2037_v9  ;;  %v2055_v21 = vld [vmem:[%s3121_s0 + $0xac] ss:$16 sps:$4 sm:$0xff]   ;;  %v2057_v22 = vld [vmem:[%s3121_s0 + $0xa0] ss:$16 sps:$4 sm:$0xff]   ;;  %v2058_v23 = vld [vmem:[%s3121_s0 + $0xa8] ss:$16 sps:$4 sm:$0xff]  }
   0x9   :  { %v2059_v24 = vld [vmem:[%s3121_s0 + $0xc4] ss:$16 sps:$4 sm:$0xff]   ;;  %v2061_v25 = vld [vmem:[%s3121_s0 + $0xcc] ss:$16 sps:$4 sm:$0xff]   ;;  %v2063_v26 = vld [vmem:[%s3121_s0 + $0xc0] ss:$16 sps:$4 sm:$0xff]  }
   0xa   :  { %v2064_v27 = vld [vmem:[%s3121_s0 + $0xc8] ss:$16 sps:$4 sm:$0xff]   ;;  %v2065_v28 = vld [vmem:[%s3121_s0 + $0xe4] ss:$16 sps:$4 sm:$0xff]   ;;  %v2067_v29 = vld [vmem:[%s3121_s0 + $0xec] ss:$16 sps:$4 sm:$0xff]  }
   0xb   :  { %1372 = vmatpush1.bf16.msra.mxu0 %v2039_v10  ;;  %1544 = vmatpush1.bf16.msra.mxu1 %v2040_v11  ;;  %v2069_v30 = vld [vmem:[%s3121_s0 + $0xe0] ss:$16 sps:$4 sm:$0xff]   ;;  %v2070_v31 = vld [vmem:[%s3121_s0 + $0xe8] ss:$16 sps:$4 sm:$0xff]   ;;  %v2071_v32 = vld [vmem:[%s3121_s0 + $0x104] ss:$16 sps:$4 sm:$0xff]  }
   0xc   :  { %1373 = vmatprep.subr.bf16.mxu0 %v2041_v12  ;;  %1545 = vmatprep.subr.bf16.mxu1 %v2043_v13  ;;  %v2073_v33 = vld [vmem:[%s3121_s0 + $0x10c] ss:$16 sps:$4 sm:$0xff]   ;;  %v2075_v34 = vld [vmem:[%s3121_s0 + $0x100] ss:$16 sps:$4 sm:$0xff]   ;;  %v2076_v35 = vld [vmem:[%s3121_s0 + $0x108] ss:$16 sps:$4 sm:$0xff]  }
   0xd   :  { %v2077_v36 = vld [vmem:[%s3121_s0 + $0x124] ss:$16 sps:$4 sm:$0xff]   ;;  %v2079_v37 = vld [vmem:[%s3121_s0 + $0x12c] ss:$16 sps:$4 sm:$0xff]   ;;  %v2081_v38 = vld [vmem:[%s3121_s0 + $0x120] ss:$16 sps:$4 sm:$0xff]  }
   0xe   :  { %v2082_v39 = vld [vmem:[%s3121_s0 + $0x128] ss:$16 sps:$4 sm:$0xff]   ;;  %v2083_v40 = vld [vmem:[%s3121_s0 + $0x144] ss:$16 sps:$4 sm:$0xff]   ;;  %v2085_v41 = vld [vmem:[%s3121_s0 + $0x14c] ss:$16 sps:$4 sm:$0xff]  }
   0xf   :  { %1374 = vmatpush1.bf16.msra.mxu0 %v2045_v14  ;;  %1546 = vmatpush1.bf16.msra.mxu1 %v2046_v15  ;;  %v2087_v42 = vld [vmem:[%s3121_s0 + $0x140] ss:$16 sps:$4 sm:$0xff]   ;;  %v2088_v43 = vld [vmem:[%s3121_s0 + $0x148] ss:$16 sps:$4 sm:$0xff]   ;;  %v2089_v44 = vld [vmem:[%s3121_s0 + $0x164] ss:$16 sps:$4 sm:$0xff]  }
  0x10   :  { %1375 = vmatprep.subr.bf16.mxu0 %v2047_v16  ;;  %1547 = vmatprep.subr.bf16.mxu1 %v2049_v17  ;;  %v2091_v45 = vld [vmem:[%s3121_s0 + $0x16c] ss:$16 sps:$4 sm:$0xff]   ;;  %v2093_v46 = vld [vmem:[%s3121_s0 + $0x160] ss:$16 sps:$4 sm:$0xff]   ;;  %v2094_v47 = vld [vmem:[%s3121_s0 + $0x168] ss:$16 sps:$4 sm:$0xff]  }
  0x11   :  { %v2121_v48 = vld [vmem:[%s3122_s1 + $0x4] ss:$28 sps:$4 sm:$0xff]   ;;  %v2097_v50 = vld [vmem:[%s3121_s0 + $0x18c] ss:$16 sps:$4 sm:$0xff]   ;;  %v2100_v52 = vld [vmem:[%s3121_s0 + $0x188] ss:$16 sps:$4 sm:$0xff]  }
  0x12   :  { %v2095_v49 = vld [vmem:[%s3121_s0 + $0x184] ss:$16 sps:$4 sm:$0xff]   ;;  %1399 = vmatprep.mubr.bf16.mxu0 %v2121_v48  ;;  %1571 = vmatprep.mubr.bf16.mxu1 %v2121_v48  ;;  %v2099_v51 = vld [vmem:[%s3121_s0 + $0x180] ss:$16 sps:$4 sm:$0xff]   ;;  %v2103_v54 = vld [vmem:[%s3121_s0 + $0x1ac] ss:$16 sps:$4 sm:$0xff]  }
  0x13   :  { %1376 = vmatpush1.bf16.msra.mxu0 %v2051_v18  ;;  %1548 = vmatpush1.bf16.msra.mxu1 %v2052_v19  ;;  %v2101_v53 = vld [vmem:[%s3121_s0 + $0x1a4] ss:$16 sps:$4 sm:$0xff]   ;;  %v2105_v55 = vld [vmem:[%s3121_s0 + $0x1a0] ss:$16 sps:$4 sm:$0xff]   ;;  %v2106_v56 = vld [vmem:[%s3121_s0 + $0x1a8] ss:$16 sps:$4 sm:$0xff]  }
  0x14   :  { %1377 = vmatprep.subr.bf16.mxu0 %v2053_v20  ;;  %1549 = vmatprep.subr.bf16.mxu1 %v2055_v21  ;;  %v2107_v57 = vld [vmem:[%s3121_s0 + $0x1c4] ss:$16 sps:$4 sm:$0xff]   ;;  %v2109_v58 = vld [vmem:[%s3121_s0 + $0x1cc] ss:$16 sps:$4 sm:$0xff]   ;;  %v2111_v59 = vld [vmem:[%s3121_s0 + $0x1c0] ss:$16 sps:$4 sm:$0xff]  }
  0x15   :  { %v2112_v60 = vld [vmem:[%s3121_s0 + $0x1c8] ss:$16 sps:$4 sm:$0xff]   ;;  %v2113_v61 = vld [vmem:[%s3121_s0 + $0x1e4] ss:$16 sps:$4 sm:$0xff]   ;;  %v2115_v62 = vld [vmem:[%s3121_s0 + $0x1ec] ss:$16 sps:$4 sm:$0xff]  }
  0x16   :  { %v2117_v63 = vld [vmem:[%s3121_s0 + $0x1e0] ss:$16 sps:$4 sm:$0xff]   ;;  %v2118_v0 = vld [vmem:[%s3121_s0 + $0x1e8] ss:$16 sps:$4 sm:$0xff]   ;;  %v2124_v1 = vld [vmem:[%s3121_s0 + $0x204] ss:$16 sps:$4 sm:$0xff]  }
  0x17   :  { %1378 = vmatpush1.bf16.msra.mxu0 %v2057_v22  ;;  %1550 = vmatpush1.bf16.msra.mxu1 %v2058_v23  ;;  %v2127_v2 = vld [vmem:[%s3121_s0 + $0x20c] ss:$16 sps:$4 sm:$0xff]   ;;  %v2122_v4 = vld [vmem:[%s3121_s0 + $0x200] ss:$16 sps:$4 sm:$0xff]   ;;  %v2125_v5 = vld [vmem:[%s3121_s0 + $0x208] ss:$16 sps:$4 sm:$0xff]  }
  0x18   :  { %1379 = vmatprep.subr.bf16.mxu0 %v2059_v24  ;;  %1551 = vmatprep.subr.bf16.mxu1 %v2061_v25  ;;  %v2119_v3 = vld [vmem:[%s3122_s1] ss:$28 sps:$4 sm:$0xff]   ;;  %v2130_v6 = vld [vmem:[%s3121_s0 + $0x224] ss:$16 sps:$4 sm:$0xff]   ;;  %v2131_v9 = vld [vmem:[%s3121_s0 + $0x228] ss:$16 sps:$4 sm:$0xff]  }
  0x19   :  { %v2133_v7 = vld [vmem:[%s3121_s0 + $0x22c] ss:$16 sps:$4 sm:$0xff]   ;;  %v2128_v8 = vld [vmem:[%s3121_s0 + $0x220] ss:$16 sps:$4 sm:$0xff]   ;;  %v2136_v10 = vld [vmem:[%s3121_s0 + $0x244] ss:$16 sps:$4 sm:$0xff]  }
  0x1a   :  { %v2139_v11 = vld [vmem:[%s3121_s0 + $0x24c] ss:$16 sps:$4 sm:$0xff]   ;;  %v2134_v12 = vld [vmem:[%s3121_s0 + $0x240] ss:$16 sps:$4 sm:$0xff]   ;;  %v2137_v13 = vld [vmem:[%s3121_s0 + $0x248] ss:$16 sps:$4 sm:$0xff]  }
  0x1b   :  { %1380 = vmatpush1.bf16.msra.mxu0 %v2063_v26  ;;  %1552 = vmatpush1.bf16.msra.mxu1 %v2064_v27  ;;  %v2142_v14 = vld [vmem:[%s3121_s0 + $0x264] ss:$16 sps:$4 sm:$0xff]   ;;  %v2145_v15 = vld [vmem:[%s3121_s0 + $0x26c] ss:$16 sps:$4 sm:$0xff]   ;;  %v2140_v16 = vld [vmem:[%s3121_s0 + $0x260] ss:$16 sps:$4 sm:$0xff]  }
  0x1c   :  { %1381 = vmatprep.subr.bf16.mxu0 %v2065_v28  ;;  %1553 = vmatprep.subr.bf16.mxu1 %v2067_v29  ;;  %v2143_v17 = vld [vmem:[%s3121_s0 + $0x268] ss:$16 sps:$4 sm:$0xff]   ;;  %v2148_v18 = vld [vmem:[%s3121_s0 + $0x284] ss:$16 sps:$4 sm:$0xff]   ;;  %v2151_v19 = vld [vmem:[%s3121_s0 + $0x28c] ss:$16 sps:$4 sm:$0xff]  }
  0x1d   :  { %v2146_v20 = vld [vmem:[%s3121_s0 + $0x280] ss:$16 sps:$4 sm:$0xff]   ;;  %v2149_v21 = vld [vmem:[%s3121_s0 + $0x288] ss:$16 sps:$4 sm:$0xff]   ;;  %v2154_v22 = vld [vmem:[%s3121_s0 + $0x2a4] ss:$16 sps:$4 sm:$0xff]  }
  0x1e   :  { %v2157_v23 = vld [vmem:[%s3121_s0 + $0x2ac] ss:$16 sps:$4 sm:$0xff]   ;;  %v2152_v24 = vld [vmem:[%s3121_s0 + $0x2a0] ss:$16 sps:$4 sm:$0xff]   ;;  %v2155_v25 = vld [vmem:[%s3121_s0 + $0x2a8] ss:$16 sps:$4 sm:$0xff]  }
  0x1f   :  { %1382 = vmatpush1.bf16.msra.mxu0 %v2069_v30  ;;  %1554 = vmatpush1.bf16.msra.mxu1 %v2070_v31  ;;  %v2160_v26 = vld [vmem:[%s3121_s0 + $0x2c4] ss:$16 sps:$4 sm:$0xff]   ;;  %v2163_v27 = vld [vmem:[%s3121_s0 + $0x2cc] ss:$16 sps:$4 sm:$0xff]   ;;  %v2158_v28 = vld [vmem:[%s3121_s0 + $0x2c0] ss:$16 sps:$4 sm:$0xff]  }
  0x20   :  { %1383 = vmatprep.subr.bf16.mxu0 %v2071_v32  ;;  %1555 = vmatprep.subr.bf16.mxu1 %v2073_v33  ;;  %v2161_v29 = vld [vmem:[%s3121_s0 + $0x2c8] ss:$16 sps:$4 sm:$0xff]   ;;  %v2166_v31 = vld [vmem:[%s3121_s0 + $0x2e4] ss:$16 sps:$4 sm:$0xff]   ;;  %v2169_v32 = vld [vmem:[%s3121_s0 + $0x2ec] ss:$16 sps:$4 sm:$0xff]  }
  0x21   :  { %v2220_v30 = vld [vmem:[%s3122_s1 + $0xc] ss:$28 sps:$4 sm:$0xff]   ;;  %v2164_v33 = vld [vmem:[%s3121_s0 + $0x2e0] ss:$16 sps:$4 sm:$0xff]  }
  0x22   :  { %v2193_v48 = vld [vmem:[%s3121_s0 + $0x36c] ss:$16 sps:$4 sm:$0xff]  }
  0x23   :  { %1384 = vmatpush1.bf16.msra.mxu0 %v2075_v34  ;;  %1556 = vmatpush1.bf16.msra.mxu1 %v2076_v35  ;;  %v2167_v34 = vld [vmem:[%s3121_s0 + $0x2e8] ss:$16 sps:$4 sm:$0xff]   ;;  %v2172_v35 = vld [vmem:[%s3121_s0 + $0x304] ss:$16 sps:$4 sm:$0xff]  }
  0x24   :  { %1385 = vmatprep.subr.bf16.mxu0 %v2077_v36  ;;  %1557 = vmatprep.subr.bf16.mxu1 %v2079_v37  ;;  %v2175_v36 = vld [vmem:[%s3121_s0 + $0x30c] ss:$16 sps:$4 sm:$0xff]   ;;  %v2170_v37 = vld [vmem:[%s3121_s0 + $0x300] ss:$16 sps:$4 sm:$0xff]  }
  0x27   :  { %1386 = vmatpush1.bf16.msra.mxu0 %v2081_v38  ;;  %1558 = vmatpush1.bf16.msra.mxu1 %v2082_v39  ;;  %v2173_v38 = vld [vmem:[%s3121_s0 + $0x308] ss:$16 sps:$4 sm:$0xff]   ;;  %v2178_v39 = vld [vmem:[%s3121_s0 + $0x324] ss:$16 sps:$4 sm:$0xff]  }
  0x28   :  { %1387 = vmatprep.subr.bf16.mxu0 %v2083_v40  ;;  %1559 = vmatprep.subr.bf16.mxu1 %v2085_v41  ;;  %v2181_v40 = vld [vmem:[%s3121_s0 + $0x32c] ss:$16 sps:$4 sm:$0xff]   ;;  %v2176_v41 = vld [vmem:[%s3121_s0 + $0x320] ss:$16 sps:$4 sm:$0xff]  }
  0x2b   :  { %1388 = vmatpush1.bf16.msra.mxu0 %v2087_v42  ;;  %1560 = vmatpush1.bf16.msra.mxu1 %v2088_v43  ;;  %v2179_v42 = vld [vmem:[%s3121_s0 + $0x328] ss:$16 sps:$4 sm:$0xff]   ;;  %v2184_v43 = vld [vmem:[%s3121_s0 + $0x344] ss:$16 sps:$4 sm:$0xff]  }
  0x2c   :  { %1389 = vmatprep.subr.bf16.mxu0 %v2089_v44  ;;  %1561 = vmatprep.subr.bf16.mxu1 %v2091_v45  ;;  %v2187_v44 = vld [vmem:[%s3121_s0 + $0x34c] ss:$16 sps:$4 sm:$0xff]   ;;  %v2182_v45 = vld [vmem:[%s3121_s0 + $0x340] ss:$16 sps:$4 sm:$0xff]  }
  0x2f   :  { %1390 = vmatpush1.bf16.msra.mxu0 %v2093_v46  ;;  %1562 = vmatpush1.bf16.msra.mxu1 %v2094_v47  ;;  %v2185_v46 = vld [vmem:[%s3121_s0 + $0x348] ss:$16 sps:$4 sm:$0xff]   ;;  %v2190_v47 = vld [vmem:[%s3121_s0 + $0x364] ss:$16 sps:$4 sm:$0xff]  }
  0x30   :  { %1391 = vmatprep.subr.bf16.mxu0 %v2095_v49  ;;  %1563 = vmatprep.subr.bf16.mxu1 %v2097_v50  ;;  %v2188_v49 = vld [vmem:[%s3121_s0 + $0x360] ss:$16 sps:$4 sm:$0xff]   ;;  %v2191_v50 = vld [vmem:[%s3121_s0 + $0x368] ss:$16 sps:$4 sm:$0xff]  }
  0x33   :  { %1392 = vmatpush1.bf16.msra.mxu0 %v2099_v51  ;;  %1564 = vmatpush1.bf16.msra.mxu1 %v2100_v52  ;;  %v2196_v51 = vld [vmem:[%s3121_s0 + $0x384] ss:$16 sps:$4 sm:$0xff]   ;;  %v2199_v52 = vld [vmem:[%s3121_s0 + $0x38c] ss:$16 sps:$4 sm:$0xff]  }
  0x34   :  { %1393 = vmatprep.subr.bf16.mxu0 %v2101_v53  ;;  %1565 = vmatprep.subr.bf16.mxu1 %v2103_v54  ;;  %v2194_v53 = vld [vmem:[%s3121_s0 + $0x380] ss:$16 sps:$4 sm:$0xff]   ;;  %v2197_v54 = vld [vmem:[%s3121_s0 + $0x388] ss:$16 sps:$4 sm:$0xff]  }
  0x37   :  { %1394 = vmatpush1.bf16.msra.mxu0 %v2105_v55  ;;  %1566 = vmatpush1.bf16.msra.mxu1 %v2106_v56  ;;  %v2202_v55 = vld [vmem:[%s3121_s0 + $0x3a4] ss:$16 sps:$4 sm:$0xff]   ;;  %v2205_v56 = vld [vmem:[%s3121_s0 + $0x3ac] ss:$16 sps:$4 sm:$0xff]  }
  0x38   :  { %1395 = vmatprep.subr.bf16.mxu0 %v2107_v57  ;;  %1567 = vmatprep.subr.bf16.mxu1 %v2109_v58  ;;  %v2200_v57 = vld [vmem:[%s3121_s0 + $0x3a0] ss:$16 sps:$4 sm:$0xff]   ;;  %v2203_v58 = vld [vmem:[%s3121_s0 + $0x3a8] ss:$16 sps:$4 sm:$0xff]  }
  0x3b   :  { %1396 = vmatpush1.bf16.msra.mxu0 %v2111_v59  ;;  %1568 = vmatpush1.bf16.msra.mxu1 %v2112_v60  ;;  %v2208_v59 = vld [vmem:[%s3121_s0 + $0x3c4] ss:$16 sps:$4 sm:$0xff]   ;;  %v2211_v60 = vld [vmem:[%s3121_s0 + $0x3cc] ss:$16 sps:$4 sm:$0xff]  }
  0x3c   :  { %1397 = vmatprep.subr.bf16.mxu0 %v2113_v61  ;;  %1569 = vmatprep.subr.bf16.mxu1 %v2115_v62  ;;  %v2206_v61 = vld [vmem:[%s3121_s0 + $0x3c0] ss:$16 sps:$4 sm:$0xff]   ;;  %v2209_v62 = vld [vmem:[%s3121_s0 + $0x3c8] ss:$16 sps:$4 sm:$0xff]  }
  0x3f   :  { %1398 = vmatpush1.bf16.msra.mxu0 %v2117_v63  ;;  %1570 = vmatpush1.bf16.msra.mxu1 %v2118_v0  ;;  %v2214_v63 = vld [vmem:[%s3121_s0 + $0x3e4] ss:$16 sps:$4 sm:$0xff]   ;;  %v2217_v0 = vld [vmem:[%s3121_s0 + $0x3ec] ss:$16 sps:$4 sm:$0xff]  }
  0x40   :  { %1410 = vmatprep.subr.bf16.mxu0 %v2124_v1  ;;  %1582 = vmatprep.subr.bf16.mxu1 %v2127_v2  ;;  %v2212_v1 = vld [vmem:[%s3121_s0 + $0x3e0] ss:$16 sps:$4 sm:$0xff]   ;;  %v2215_v2 = vld [vmem:[%s3121_s0 + $0x3e8] ss:$16 sps:$4 sm:$0xff]  }
  0x42   :  { %1400 = vmatmul.mubr.bf16.vlgmr.msra.gmra.mrb[0].mxu0 %v2119_v3  ;;  %1572 = vmatmul.mubr.bf16.vlgmr.msra.gmra.mrb[0].mxu1 %v2119_v3  ;;  %v2223_v3 = vld [vmem:[%s3121_s0 + $0x404] ss:$16 sps:$4 sm:$0xff]  }
  0x43   :  { %1411 = vmatpush1.bf16.msra.mxu0 %v2122_v4  ;;  %1583 = vmatpush1.bf16.msra.mxu1 %v2125_v5  ;;  %v2226_v4 = vld [vmem:[%s3121_s0 + $0x40c] ss:$16 sps:$4 sm:$0xff]   ;;  %v2218_v5 = vld [vmem:[%s3122_s1 + $0x8] ss:$28 sps:$4 sm:$0xff]  }
  0x44   :  { %1412 = vmatprep.subr.bf16.mxu0 %v2130_v6  ;;  %1584 = vmatprep.subr.bf16.mxu1 %v2133_v7  ;;  %v2221_v6 = vld [vmem:[%s3121_s0 + $0x400] ss:$16 sps:$4 sm:$0xff]   ;;  %v2224_v7 = vld [vmem:[%s3121_s0 + $0x408] ss:$16 sps:$4 sm:$0xff]  }
  0x45   :  { %1442 = vmatprep.mubr.bf16.mxu0 %v2220_v30  ;;  %1614 = vmatprep.mubr.bf16.mxu1 %v2220_v30  ;;  %v2262_v30 = vld [vmem:[%s3121_s0 + $0x4cc] ss:$16 sps:$4 sm:$0xff]  }
  0x47   :  { %1413 = vmatpush1.bf16.msra.mxu0 %v2128_v8  ;;  %1585 = vmatpush1.bf16.msra.mxu1 %v2131_v9  ;;  %v2229_v8 = vld [vmem:[%s3121_s0 + $0x424] ss:$16 sps:$4 sm:$0xff]   ;;  %v2232_v9 = vld [vmem:[%s3121_s0 + $0x42c] ss:$16 sps:$4 sm:$0xff]  }
  0x48   :  { %1414 = vmatprep.subr.bf16.mxu0 %v2136_v10  ;;  %1586 = vmatprep.subr.bf16.mxu1 %v2139_v11  ;;  %v2227_v10 = vld [vmem:[%s3121_s0 + $0x420] ss:$16 sps:$4 sm:$0xff]   ;;  %v2230_v11 = vld [vmem:[%s3121_s0 + $0x428] ss:$16 sps:$4 sm:$0xff]  }
  0x4b   :  { %1415 = vmatpush1.bf16.msra.mxu0 %v2134_v12  ;;  %1587 = vmatpush1.bf16.msra.mxu1 %v2137_v13  ;;  %v2319_v12 = vld [vmem:[%s3122_s1 + $0x14] ss:$28 sps:$4 sm:$0xff]  }
  0x4c   :  { %1416 = vmatprep.subr.bf16.mxu0 %v2142_v14  ;;  %1588 = vmatprep.subr.bf16.mxu1 %v2145_v15  ;;  %v2235_v13 = vld [vmem:[%s3121_s0 + $0x444] ss:$16 sps:$4 sm:$0xff]   ;;  %v2238_v14 = vld [vmem:[%s3121_s0 + $0x44c] ss:$16 sps:$4 sm:$0xff]   ;;  %v2233_v15 = vld [vmem:[%s3121_s0 + $0x440] ss:$16 sps:$4 sm:$0xff]  }
  0x4f   :  { %1417 = vmatpush1.bf16.msra.mxu0 %v2140_v16  ;;  %1589 = vmatpush1.bf16.msra.mxu1 %v2143_v17  ;;  %v2236_v16 = vld [vmem:[%s3121_s0 + $0x448] ss:$16 sps:$4 sm:$0xff]   ;;  %v2241_v17 = vld [vmem:[%s3121_s0 + $0x464] ss:$16 sps:$4 sm:$0xff]  }
  0x50   :  { %1418 = vmatprep.subr.bf16.mxu0 %v2148_v18  ;;  %1590 = vmatprep.subr.bf16.mxu1 %v2151_v19  ;;  %v2244_v18 = vld [vmem:[%s3121_s0 + $0x46c] ss:$16 sps:$4 sm:$0xff]   ;;  %v2239_v19 = vld [vmem:[%s3121_s0 + $0x460] ss:$16 sps:$4 sm:$0xff]  }
  0x53   :  { %1419 = vmatpush1.bf16.msra.mxu0 %v2146_v20  ;;  %1591 = vmatpush1.bf16.msra.mxu1 %v2149_v21  ;;  %v2242_v20 = vld [vmem:[%s3121_s0 + $0x468] ss:$16 sps:$4 sm:$0xff]   ;;  %v2247_v21 = vld [vmem:[%s3121_s0 + $0x484] ss:$16 sps:$4 sm:$0xff]  }
  0x54   :  { %1420 = vmatprep.subr.bf16.mxu0 %v2154_v22  ;;  %1592 = vmatprep.subr.bf16.mxu1 %v2157_v23  ;;  %v2250_v22 = vld [vmem:[%s3121_s0 + $0x48c] ss:$16 sps:$4 sm:$0xff]   ;;  %v2245_v23 = vld [vmem:[%s3121_s0 + $0x480] ss:$16 sps:$4 sm:$0xff]  }
  0x57   :  { %1421 = vmatpush1.bf16.msra.mxu0 %v2152_v24  ;;  %1593 = vmatpush1.bf16.msra.mxu1 %v2155_v25  ;;  %v2248_v24 = vld [vmem:[%s3121_s0 + $0x488] ss:$16 sps:$4 sm:$0xff]   ;;  %v2253_v25 = vld [vmem:[%s3121_s0 + $0x4a4] ss:$16 sps:$4 sm:$0xff]  }
  0x58   :  { %1422 = vmatprep.subr.bf16.mxu0 %v2160_v26  ;;  %1594 = vmatprep.subr.bf16.mxu1 %v2163_v27  ;;  %v2256_v26 = vld [vmem:[%s3121_s0 + $0x4ac] ss:$16 sps:$4 sm:$0xff]   ;;  %v2251_v27 = vld [vmem:[%s3121_s0 + $0x4a0] ss:$16 sps:$4 sm:$0xff]  }
  0x5b   :  { %1423 = vmatpush1.bf16.msra.mxu0 %v2158_v28  ;;  %1595 = vmatpush1.bf16.msra.mxu1 %v2161_v29  ;;  %v2254_v28 = vld [vmem:[%s3121_s0 + $0x4a8] ss:$16 sps:$4 sm:$0xff]   ;;  %v2259_v29 = vld [vmem:[%s3121_s0 + $0x4c4] ss:$16 sps:$4 sm:$0xff]  }
  0x5c   :  { %1424 = vmatprep.subr.bf16.mxu0 %v2166_v31  ;;  %1596 = vmatprep.subr.bf16.mxu1 %v2169_v32  ;;  %v2257_v31 = vld [vmem:[%s3121_s0 + $0x4c0] ss:$16 sps:$4 sm:$0xff]   ;;  %v2260_v32 = vld [vmem:[%s3121_s0 + $0x4c8] ss:$16 sps:$4 sm:$0xff]  }
  0x5f   :  { %1425 = vmatpush1.bf16.msra.mxu0 %v2164_v33  ;;  %1597 = vmatpush1.bf16.msra.mxu1 %v2167_v34  ;;  %v2265_v33 = vld [vmem:[%s3121_s0 + $0x4e4] ss:$16 sps:$4 sm:$0xff]   ;;  %v2268_v34 = vld [vmem:[%s3121_s0 + $0x4ec] ss:$16 sps:$4 sm:$0xff]  }
  0x60   :  { %1426 = vmatprep.subr.bf16.mxu0 %v2172_v35  ;;  %1598 = vmatprep.subr.bf16.mxu1 %v2175_v36  ;;  %v2263_v35 = vld [vmem:[%s3121_s0 + $0x4e0] ss:$16 sps:$4 sm:$0xff]   ;;  %v2266_v36 = vld [vmem:[%s3121_s0 + $0x4e8] ss:$16 sps:$4 sm:$0xff]  }
  0x63   :  { %1427 = vmatpush1.bf16.msra.mxu0 %v2170_v37  ;;  %1599 = vmatpush1.bf16.msra.mxu1 %v2173_v38  ;;  %v2271_v37 = vld [vmem:[%s3121_s0 + $0x504] ss:$16 sps:$4 sm:$0xff]   ;;  %v2274_v38 = vld [vmem:[%s3121_s0 + $0x50c] ss:$16 sps:$4 sm:$0xff]  }
  0x64   :  { %1428 = vmatprep.subr.bf16.mxu0 %v2178_v39  ;;  %1600 = vmatprep.subr.bf16.mxu1 %v2181_v40  ;;  %v2269_v39 = vld [vmem:[%s3121_s0 + $0x500] ss:$16 sps:$4 sm:$0xff]   ;;  %v2272_v40 = vld [vmem:[%s3121_s0 + $0x508] ss:$16 sps:$4 sm:$0xff]  }
  0x67   :  { %1429 = vmatpush1.bf16.msra.mxu0 %v2176_v41  ;;  %1601 = vmatpush1.bf16.msra.mxu1 %v2179_v42  ;;  %v2277_v41 = vld [vmem:[%s3121_s0 + $0x524] ss:$16 sps:$4 sm:$0xff]   ;;  %v2280_v42 = vld [vmem:[%s3121_s0 + $0x52c] ss:$16 sps:$4 sm:$0xff]  }
  0x68   :  { %1430 = vmatprep.subr.bf16.mxu0 %v2184_v43  ;;  %1602 = vmatprep.subr.bf16.mxu1 %v2187_v44  ;;  %v2275_v43 = vld [vmem:[%s3121_s0 + $0x520] ss:$16 sps:$4 sm:$0xff]   ;;  %v2278_v44 = vld [vmem:[%s3121_s0 + $0x528] ss:$16 sps:$4 sm:$0xff]  }
  0x6b   :  { %1431 = vmatpush1.bf16.msra.mxu0 %v2182_v45  ;;  %1603 = vmatpush1.bf16.msra.mxu1 %v2185_v46  ;;  %v2283_v45 = vld [vmem:[%s3121_s0 + $0x544] ss:$16 sps:$4 sm:$0xff]   ;;  %v2286_v46 = vld [vmem:[%s3121_s0 + $0x54c] ss:$16 sps:$4 sm:$0xff]  }
  0x6c   :  { %1432 = vmatprep.subr.bf16.mxu0 %v2190_v47  ;;  %1604 = vmatprep.subr.bf16.mxu1 %v2193_v48  ;;  %v2281_v47 = vld [vmem:[%s3121_s0 + $0x540] ss:$16 sps:$4 sm:$0xff]   ;;  %v2284_v48 = vld [vmem:[%s3121_s0 + $0x548] ss:$16 sps:$4 sm:$0xff]  }
  0x6f   :  { %1433 = vmatpush1.bf16.msra.mxu0 %v2188_v49  ;;  %1605 = vmatpush1.bf16.msra.mxu1 %v2191_v50  ;;  %v2289_v49 = vld [vmem:[%s3121_s0 + $0x564] ss:$16 sps:$4 sm:$0xff]   ;;  %v2292_v50 = vld [vmem:[%s3121_s0 + $0x56c] ss:$16 sps:$4 sm:$0xff]  }
  0x70   :  { %1434 = vmatprep.subr.bf16.mxu0 %v2196_v51  ;;  %1606 = vmatprep.subr.bf16.mxu1 %v2199_v52  ;;  %v2287_v51 = vld [vmem:[%s3121_s0 + $0x560] ss:$16 sps:$4 sm:$0xff]   ;;  %v2290_v52 = vld [vmem:[%s3121_s0 + $0x568] ss:$16 sps:$4 sm:$0xff]  }
  0x73   :  { %1435 = vmatpush1.bf16.msra.mxu0 %v2194_v53  ;;  %1607 = vmatpush1.bf16.msra.mxu1 %v2197_v54  ;;  %v2295_v53 = vld [vmem:[%s3121_s0 + $0x584] ss:$16 sps:$4 sm:$0xff]   ;;  %v2298_v54 = vld [vmem:[%s3121_s0 + $0x58c] ss:$16 sps:$4 sm:$0xff]  }
  0x74   :  { %1436 = vmatprep.subr.bf16.mxu0 %v2202_v55  ;;  %1608 = vmatprep.subr.bf16.mxu1 %v2205_v56  ;;  %v2293_v55 = vld [vmem:[%s3121_s0 + $0x580] ss:$16 sps:$4 sm:$0xff]   ;;  %v2296_v56 = vld [vmem:[%s3121_s0 + $0x588] ss:$16 sps:$4 sm:$0xff]  }
  0x77   :  { %1437 = vmatpush1.bf16.msra.mxu0 %v2200_v57  ;;  %1609 = vmatpush1.bf16.msra.mxu1 %v2203_v58  ;;  %v2301_v57 = vld [vmem:[%s3121_s0 + $0x5a4] ss:$16 sps:$4 sm:$0xff]   ;;  %v2304_v58 = vld [vmem:[%s3121_s0 + $0x5ac] ss:$16 sps:$4 sm:$0xff]  }
  0x78   :  { %1438 = vmatprep.subr.bf16.mxu0 %v2208_v59  ;;  %1610 = vmatprep.subr.bf16.mxu1 %v2211_v60  ;;  %v2299_v59 = vld [vmem:[%s3121_s0 + $0x5a0] ss:$16 sps:$4 sm:$0xff]   ;;  %v2302_v60 = vld [vmem:[%s3121_s0 + $0x5a8] ss:$16 sps:$4 sm:$0xff]  }
  0x7b   :  { %1439 = vmatpush1.bf16.msra.mxu0 %v2206_v61  ;;  %1611 = vmatpush1.bf16.msra.mxu1 %v2209_v62  ;;  %v2307_v61 = vld [vmem:[%s3121_s0 + $0x5c4] ss:$16 sps:$4 sm:$0xff]   ;;  %v2310_v62 = vld [vmem:[%s3121_s0 + $0x5cc] ss:$16 sps:$4 sm:$0xff]  }
  0x7c   :  { %1440 = vmatprep.subr.bf16.mxu0 %v2214_v63  ;;  %1612 = vmatprep.subr.bf16.mxu1 %v2217_v0  ;;  %v2305_v63 = vld [vmem:[%s3121_s0 + $0x5c0] ss:$16 sps:$4 sm:$0xff]   ;;  %v2308_v0 = vld [vmem:[%s3121_s0 + $0x5c8] ss:$16 sps:$4 sm:$0xff]  }
  0x7f   :  { %1441 = vmatpush1.bf16.msra.mxu0 %v2212_v1  ;;  %1613 = vmatpush1.bf16.msra.mxu1 %v2215_v2  ;;  %v2313_v1 = vld [vmem:[%s3121_s0 + $0x5e4] ss:$16 sps:$4 sm:$0xff]   ;;  %v2316_v2 = vld [vmem:[%s3121_s0 + $0x5ec] ss:$16 sps:$4 sm:$0xff]  }
  0x80   :  { %1453 = vmatprep.subr.bf16.mxu0 %v2223_v3  ;;  %1625 = vmatprep.subr.bf16.mxu1 %v2226_v4  ;;  %v2311_v3 = vld [vmem:[%s3121_s0 + $0x5e0] ss:$16 sps:$4 sm:$0xff]   ;;  %v2314_v4 = vld [vmem:[%s3121_s0 + $0x5e8] ss:$16 sps:$4 sm:$0xff]  }
  0x82   :  { %1443 = vmatmul.mubr.bf16.vlgmr.msra.gmra.mrb[0].mxu0 %v2218_v5  ;;  %1615 = vmatmul.mubr.bf16.vlgmr.msra.gmra.mrb[0].mxu1 %v2218_v5  ;;  %v2322_v5 = vld [vmem:[%s3121_s0 + $0x604] ss:$16 sps:$4 sm:$0xff]  }
  0x83   :  { %1454 = vmatpush1.bf16.msra.mxu0 %v2221_v6  ;;  %1626 = vmatpush1.bf16.msra.mxu1 %v2224_v7  ;;  %v2325_v6 = vld [vmem:[%s3121_s0 + $0x60c] ss:$16 sps:$4 sm:$0xff]  }
  0x84   :  { %1455 = vmatprep.subr.bf16.mxu0 %v2229_v8  ;;  %1627 = vmatprep.subr.bf16.mxu1 %v2232_v9  ;;  %v2317_v7 = vld [vmem:[%s3122_s1 + $0x10] ss:$28 sps:$4 sm:$0xff]   ;;  %v2323_v9 = vld [vmem:[%s3121_s0 + $0x608] ss:$16 sps:$4 sm:$0xff]  }
  0x85   :  { %1485 = vmatprep.mubr.bf16.mxu0 %v2319_v12  ;;  %1657 = vmatprep.mubr.bf16.mxu1 %v2319_v12  ;;  %v2320_v8 = vld [vmem:[%s3121_s0 + $0x600] ss:$16 sps:$4 sm:$0xff]  }
  0x86   :  { %v2326_v12 = vld [vmem:[%s3121_s0 + $0x620] ss:$16 sps:$4 sm:$0xff]  }
  0x87   :  { %1456 = vmatpush1.bf16.msra.mxu0 %v2227_v10  ;;  %1628 = vmatpush1.bf16.msra.mxu1 %v2230_v11  ;;  %v2328_v10 = vld [vmem:[%s3121_s0 + $0x624] ss:$16 sps:$4 sm:$0xff]   ;;  %v2331_v11 = vld [vmem:[%s3121_s0 + $0x62c] ss:$16 sps:$4 sm:$0xff]  }
  0x88   :  { %1457 = vmatprep.subr.bf16.mxu0 %v2235_v13  ;;  %1629 = vmatprep.subr.bf16.mxu1 %v2238_v14  ;;  %v2329_v13 = vld [vmem:[%s3121_s0 + $0x628] ss:$16 sps:$4 sm:$0xff]   ;;  %v2334_v14 = vld [vmem:[%s3121_s0 + $0x644] ss:$16 sps:$4 sm:$0xff]  }
  0x8b   :  { %1458 = vmatpush1.bf16.msra.mxu0 %v2233_v15  ;;  %1630 = vmatpush1.bf16.msra.mxu1 %v2236_v16  ;;  %v2337_v15 = vld [vmem:[%s3121_s0 + $0x64c] ss:$16 sps:$4 sm:$0xff]   ;;  %v2357_v16 = vmov 0  }
  0x8c   :  { %1459 = vmatprep.subr.bf16.mxu0 %v2241_v17  ;;  %1631 = vmatprep.subr.bf16.mxu1 %v2244_v18  ;;  %v2332_v17 = vld [vmem:[%s3121_s0 + $0x640] ss:$16 sps:$4 sm:$0xff]   ;;  %v2335_v18 = vld [vmem:[%s3121_s0 + $0x648] ss:$16 sps:$4 sm:$0xff]  }
  0x8f   :  { %1460 = vmatpush1.bf16.msra.mxu0 %v2239_v19  ;;  %1632 = vmatpush1.bf16.msra.mxu1 %v2242_v20  ;;  %v2340_v19 = vld [vmem:[%s3121_s0 + $0x664] ss:$16 sps:$4 sm:$0xff]   ;;  %v2343_v20 = vld [vmem:[%s3121_s0 + $0x66c] ss:$16 sps:$4 sm:$0xff]  }
  0x90   :  { %1461 = vmatprep.subr.bf16.mxu0 %v2247_v21  ;;  %1633 = vmatprep.subr.bf16.mxu1 %v2250_v22  ;;  %v2338_v21 = vld [vmem:[%s3121_s0 + $0x660] ss:$16 sps:$4 sm:$0xff]   ;;  %v2341_v22 = vld [vmem:[%s3121_s0 + $0x668] ss:$16 sps:$4 sm:$0xff]  }
  0x93   :  { %1462 = vmatpush1.bf16.msra.mxu0 %v2245_v23  ;;  %1634 = vmatpush1.bf16.msra.mxu1 %v2248_v24  ;;  %v2346_v23 = vld [vmem:[%s3121_s0 + $0x684] ss:$16 sps:$4 sm:$0xff]   ;;  %v2349_v24 = vld [vmem:[%s3121_s0 + $0x68c] ss:$16 sps:$4 sm:$0xff]  }
  0x94   :  { %1463 = vmatprep.subr.bf16.mxu0 %v2253_v25  ;;  %1635 = vmatprep.subr.bf16.mxu1 %v2256_v26  ;;  %v2344_v25 = vld [vmem:[%s3121_s0 + $0x680] ss:$16 sps:$4 sm:$0xff]   ;;  %v2347_v26 = vld [vmem:[%s3121_s0 + $0x688] ss:$16 sps:$4 sm:$0xff]  }
  0x97   :  { %1464 = vmatpush1.bf16.msra.mxu0 %v2251_v27  ;;  %1636 = vmatpush1.bf16.msra.mxu1 %v2254_v28  ;;  %v2352_v27 = vld [vmem:[%s3121_s0 + $0x6a4] ss:$16 sps:$4 sm:$0xff]   ;;  %v2355_v28 = vld [vmem:[%s3121_s0 + $0x6ac] ss:$16 sps:$4 sm:$0xff]  }
  0x98   :  { %1465 = vmatprep.subr.bf16.mxu0 %v2259_v29  ;;  %1637 = vmatprep.subr.bf16.mxu1 %v2262_v30  ;;  %v2350_v29 = vld [vmem:[%s3121_s0 + $0x6a0] ss:$16 sps:$4 sm:$0xff]   ;;  %v2353_v30 = vld [vmem:[%s3121_s0 + $0x6a8] ss:$16 sps:$4 sm:$0xff]  }
  0x9b   :  { %1466 = vmatpush1.bf16.msra.mxu0 %v2257_v31  ;;  %1638 = vmatpush1.bf16.msra.mxu1 %v2260_v32  ;;  %v2356_v31 = vld [vmem:[%s3122_s1 + $0x18] ss:$28 sps:$4 sm:$0xff]   ;;  %v2358_v32 = vmov 0.0  }
  0x9c   :  { %1467 = vmatprep.subr.bf16.mxu0 %v2265_v33  ;;  %1639 = vmatprep.subr.bf16.mxu1 %v2268_v34  ;;  %20 = vst.msk [vmem:[%s3123_s3] sm:$0xff] %vm19_vm1, %v2358_v32  ;;  %21 = vst.msk [vmem:[%s3123_s3 + $0x8] sm:$0xff] %vm19_vm1, %v2358_v32 }
  0x9d   :  { %22 = vst.msk [vmem:[%s3125_s4] sm:$0xff] %vm19_vm1, %v2358_v32  ;;  %23 = vst.msk [vmem:[%s3125_s4 + $0x8] sm:$0xff] %vm19_vm1, %v2358_v32 }
  0x9f   :  { %1468 = vmatpush1.bf16.msra.mxu0 %v2263_v35  ;;  %1640 = vmatpush1.bf16.msra.mxu1 %v2266_v36 }
  0xa0   :  { %1469 = vmatprep.subr.bf16.mxu0 %v2271_v37  ;;  %1641 = vmatprep.subr.bf16.mxu1 %v2274_v38 }
  0xa3   :  { %1470 = vmatpush1.bf16.msra.mxu0 %v2269_v39  ;;  %1642 = vmatpush1.bf16.msra.mxu1 %v2272_v40 }
  0xa4   :  { %1471 = vmatprep.subr.bf16.mxu0 %v2277_v41  ;;  %1643 = vmatprep.subr.bf16.mxu1 %v2280_v42 }
  0xa7   :  { %1472 = vmatpush1.bf16.msra.mxu0 %v2275_v43  ;;  %1644 = vmatpush1.bf16.msra.mxu1 %v2278_v44 }
  0xa8   :  { %1473 = vmatprep.subr.bf16.mxu0 %v2283_v45  ;;  %1645 = vmatprep.subr.bf16.mxu1 %v2286_v46 }
  0xab   :  { %1474 = vmatpush1.bf16.msra.mxu0 %v2281_v47  ;;  %1646 = vmatpush1.bf16.msra.mxu1 %v2284_v48 }
  0xac   :  { %1475 = vmatprep.subr.bf16.mxu0 %v2289_v49  ;;  %1647 = vmatprep.subr.bf16.mxu1 %v2292_v50 }
  0xaf   :  { %1476 = vmatpush1.bf16.msra.mxu0 %v2287_v51  ;;  %1648 = vmatpush1.bf16.msra.mxu1 %v2290_v52 }
  0xb0   :  { %1477 = vmatprep.subr.bf16.mxu0 %v2295_v53  ;;  %1649 = vmatprep.subr.bf16.mxu1 %v2298_v54 }
  0xb3   :  { %1478 = vmatpush1.bf16.msra.mxu0 %v2293_v55  ;;  %1650 = vmatpush1.bf16.msra.mxu1 %v2296_v56 }
  0xb4   :  { %1479 = vmatprep.subr.bf16.mxu0 %v2301_v57  ;;  %1651 = vmatprep.subr.bf16.mxu1 %v2304_v58 }
  0xb7   :  { %1480 = vmatpush1.bf16.msra.mxu0 %v2299_v59  ;;  %1652 = vmatpush1.bf16.msra.mxu1 %v2302_v60 }
  0xb8   :  { %1481 = vmatprep.subr.bf16.mxu0 %v2307_v61  ;;  %1653 = vmatprep.subr.bf16.mxu1 %v2310_v62  ;;  %v1719_v61 = vld [vmem:[%s3123_s3] sm:$0xff] }
  0xbb   :  { %1482 = vmatpush1.bf16.msra.mxu0 %v2305_v63  ;;  %1654 = vmatpush1.bf16.msra.mxu1 %v2308_v0  ;;  %v1736_v0 = vld [vmem:[%s3125_s4] sm:$0xff] }
  0xbc   :  { %1483 = vmatprep.subr.bf16.mxu0 %v2313_v1  ;;  %1655 = vmatprep.subr.bf16.mxu1 %v2316_v2  ;;  %v1720_v1 = vld [vmem:[%s3123_s3 + $0x8] sm:$0xff] }
  0xbf   :  { %1484 = vmatpush1.bf16.msra.mxu0 %v2311_v3  ;;  %1656 = vmatpush1.bf16.msra.mxu1 %v2314_v4 }
  0xc0   :  { %1496 = vmatprep.subr.bf16.mxu0 %v2322_v5  ;;  %1668 = vmatprep.subr.bf16.mxu1 %v2325_v6  ;;  %v1737_v6 = vld [vmem:[%s3125_s4 + $0x8] sm:$0xff] }
  0xc2   :  { %1486 = vmatmul.mubr.bf16.vlgmr.msra.gmra.mrb[0].mxu0 %v2317_v7  ;;  %1658 = vmatmul.mubr.bf16.vlgmr.msra.gmra.mrb[0].mxu1 %v2317_v7 }
  0xc3   :  { %1497 = vmatpush1.bf16.msra.mxu0 %v2320_v8  ;;  %1669 = vmatpush1.bf16.msra.mxu1 %v2323_v9 }
  0xc4   :  { %1498 = vmatprep.subr.bf16.mxu0 %v2328_v10  ;;  %1670 = vmatprep.subr.bf16.mxu1 %v2331_v11 }
  0xc5   :  { %1528 = vmatprep.mubr.bf16.mxu0 %v2357_v16  ;;  %1700 = vmatprep.mubr.bf16.mxu1 %v2357_v16 }
  0xc7   :  { %1499 = vmatpush1.bf16.msra.mxu0 %v2326_v12  ;;  %1671 = vmatpush1.bf16.msra.mxu1 %v2329_v13 }
  0xc8   :  { %1500 = vmatprep.subr.bf16.mxu0 %v2334_v14  ;;  %1672 = vmatprep.subr.bf16.mxu1 %v2337_v15 }
  0xcb   :  { %1501 = vmatpush1.bf16.msra.mxu0 %v2332_v17  ;;  %1673 = vmatpush1.bf16.msra.mxu1 %v2335_v18 }
  0xcc   :  { %1502 = vmatprep.subr.bf16.mxu0 %v2340_v19  ;;  %1674 = vmatprep.subr.bf16.mxu1 %v2343_v20 }
  0xcf   :  { %1503 = vmatpush1.bf16.msra.mxu0 %v2338_v21  ;;  %1675 = vmatpush1.bf16.msra.mxu1 %v2341_v22 }
  0xd0   :  { %1504 = vmatprep.subr.bf16.mxu0 %v2346_v23  ;;  %1676 = vmatprep.subr.bf16.mxu1 %v2349_v24 }
  0xd3   :  { %1505 = vmatpush1.bf16.msra.mxu0 %v2344_v25  ;;  %1677 = vmatpush1.bf16.msra.mxu1 %v2347_v26 }
  0xd4   :  { %1506 = vmatprep.subr.bf16.mxu0 %v2352_v27  ;;  %1678 = vmatprep.subr.bf16.mxu1 %v2355_v28 }
  0xd7   :  { %1507 = vmatpush1.bf16.msra.mxu0 %v2350_v29  ;;  %1679 = vmatpush1.bf16.msra.mxu1 %v2353_v30 }
  0xda   :  { %1995 = vmatmul.mubr.msk.bf16.vlgmr.msra.gmra.mrb[0].mxu0 %vm1363_vm0, %v2356_v31  ;;  %1996 = vmatmul.mubr.msk.bf16.vlgmr.msra.gmra.mrb[0].mxu1 %vm1363_vm0, %v2356_v31 }
 0x1ad   :  { %v1530_v33 = vpop.f32.mrb[0].mxu0  ;;  %v1702_v34 = vpop.f32.mrb[0].mxu1 }
 0x1ae   :  { %1711 = vst [vmem:[%s3124_s2] sm:$0xff] %v1530_v33  ;;  %v1738_v35 = vmul.f32 %v1530_v33, %v1530_v33  ;;  %1713 = vst [vmem:[%s3124_s2 + $0x10] sm:$0xff] %v1702_v34  ;;  %v1532_v36 = vpop.f32.mrb[1].mxu0  ;;  %v1704_v37 = vpop.f32.mrb[1].mxu1  ;;  %v1740_v48 = vmul.f32 %v1702_v34, %v1702_v34 }
 0x1af   :  { %1712 = vst [vmem:[%s3124_s2 + $0x8] sm:$0xff] %v1532_v36  ;;  %v1721_v38 = vadd.f32 %v1532_v36, %v1530_v33  ;;  %v1739_v39 = vmul.f32 %v1532_v36, %v1532_v36  ;;  %1714 = vst [vmem:[%s3124_s2 + $0x18] sm:$0xff] %v1704_v37  ;;  %v1534_v40 = vpop.f32.mrb[2].mxu0  ;;  %v1706_v41 = vpop.f32.mrb[2].mxu1  ;;  %v1741_v54 = vmul.f32 %v1704_v37, %v1704_v37 }
 0x1b0   :  { %1715 = vst [vmem:[%s3124_s2 + $0x20] sm:$0xff] %v1534_v40  ;;  %v1742_v42 = vmul.f32 %v1534_v40, %v1534_v40  ;;  %1717 = vst [vmem:[%s3124_s2 + $0x30] sm:$0xff] %v1706_v41  ;;  %v1536_v43 = vpop.f32.mrb[3].mxu0  ;;  %v1708_v44 = vpop.f32.mrb[3].mxu1  ;;  %v1744_v50 = vmul.f32 %v1706_v41, %v1706_v41 }
 0x1b1   :  { %1716 = vst [vmem:[%s3124_s2 + $0x28] sm:$0xff] %v1536_v43  ;;  %v1726_v45 = vadd.f32 %v1536_v43, %v1534_v40  ;;  %v1743_v46 = vmul.f32 %v1536_v43, %v1536_v43  ;;  %1718 = vst [vmem:[%s3124_s2 + $0x38] sm:$0xff] %v1708_v44  ;;  %v1722_v47 = vadd.f32 %v1721_v38, %v1702_v34 }
 0x1b2   :  { %v1746_v49 = vadd.f32 %v1739_v39, %v1738_v35  ;;  %v1745_v56 = vmul.f32 %v1708_v44, %v1708_v44 }
 0x1b3   :  { %v1751_v51 = vadd.f32 %v1743_v46, %v1742_v42  ;;  %v1723_v52 = vadd.f32 %v1722_v47, %v1704_v37  ;;  %v1727_v53 = vadd.f32 %v1726_v45, %v1706_v41 }
 0x1b4   :  { %v1747_v55 = vadd.f32 %v1746_v49, %v1740_v48 }
 0x1b5   :  { %1724 = vadd.xlane.f32.xlu0 %v1723_v52  ;;  %v1728_v57 = vadd.f32 %v1727_v53, %v1708_v44  ;;  %v1752_v58 = vadd.f32 %v1751_v51, %v1744_v50 }
 0x1b6   :  { %v1748_v59 = vadd.f32 %v1747_v55, %v1741_v54 }
 0x1b7   :  { %v1753_v60 = vadd.f32 %v1752_v58, %v1745_v56 }
 0x1b8   :  { %1749 = vadd.xlane.f32.xlu1 %v1748_v59 }
 0x1b9   :  { %1729 = vadd.xlane.f32.xlu0 %v1728_v57 }
 0x1bc   :  { %1754 = vadd.xlane.f32.xlu1 %v1753_v60 }
 0x242   :  { %v1725_v62 = vpop.xlane.xlu0 %1724 }
 0x243   :  { %v1731_v63 = vadd.f32 %v1725_v62, %v1719_v61 }
 0x245   :  { %1734 = vst.msk [vmem:[%s3123_s3] sm:$0xff] %vm19_vm1, %v1731_v63  ;;  %v1750_v2 = vpop.xlane.xlu1 %1749 }
 0x246   :  { %v1756_v3 = vadd.f32 %v1750_v2, %v1736_v0  ;;  %v1730_v4 = vpop.xlane.xlu0 %1729 }
 0x247   :  { %v1732_v5 = vadd.f32 %v1730_v4, %v1720_v1 }
 0x248   :  { %1758 = vst.msk [vmem:[%s3125_s4] sm:$0xff] %vm19_vm1, %v1756_v3 }
 0x249   :  { %1735 = vst.msk [vmem:[%s3123_s3 + $0x8] sm:$0xff] %vm19_vm1, %v1732_v5  ;;  %v1755_v7 = vpop.xlane.xlu1 %1754 }
 0x24a   :  { %v1757_v8 = vadd.f32 %v1755_v7, %v1737_v6 }
 0x24c   :  { %1759 = vst.msk [vmem:[%s3125_s4 + $0x8] sm:$0xff] %vm19_vm1, %v1757_v8 }

// kernel: unet_forward.43
= control target key start
LH: loop header
LB: loop body
LE: loop exit
PB: predicated region body
PF: predicated region fallthrough
CT: control target
= control target key end

     0   :  { %10 = vsyncpa [#allocation3], 0  ;;  %s3217_s0 = inlined_call_operand.hbm [shape: bf16[864,4096], index: 0, kind: input, shape index: {}]   ;;  %s3218_s1 = inlined_call_operand.vmem [shape: bf16[16,864], index: 1, kind: input, shape index: {}]   ;;  %s3219_s2 = inlined_call_operand.vmem [shape: f32[16,4096], index: 2, kind: output, shape index: {0}]   ;;  %s3220_s3 = inlined_call_operand.vmem [shape: f32[16,1], index: 3, kind: output, shape index: {1}]   ;;  %s3221_s4 = inlined_call_operand.vmem [shape: f32[16,1], index: 4, kind: output, shape index: {2}]  }
   0x1   :  { %12 = vsyncpa [#allocation3 + $0x1], 0  ;;  %s2811_s15 = smov 0   ;;  %s2813_s16 = smov 0  }
   0x2   :  { %s2815_s17 = smov 0   ;;  %s2817_s18 = smov 0  }
   0x3 LB: > { %s2830_s19 = sadd.s32 4294967295, %s2778_s18   ;;  %s2833_s20 = sadd.s32 1, %s2778_s18   ;;  %s2778_s18 = sphi %s2817_s18, %s3229_s18   ;;  %s2774_s17 = sphi %s2815_s17, %s3228_s17   ;;  %s2770_s16 = sphi %s2813_s16, %s3227_s16   ;;  %s2766_s15 = sphi %s2811_s15, %s3226_s15  }
   0x4   : > { %s22_s21 = ssub.s32 %s2778_s18, %s2833_s20  ;;  %s25_s22 = sadd.s32 1, %s2774_s17 }
   0x5   : > { %p23_p0 = scmp.eq.s32.totalorder %s22_s21, 0  ;;  %p32_p1 = scmp.ne.s32.totalorder %s2774_s17, %s2770_s16 }
   0x6   : > { %p33_p2 = scmp.eq.s32.totalorder %s2778_s18, 0  ;;  %p38_p3 = scmp.ne.s32.totalorder %s2770_s16, %s2766_s15 }
   0x7   : > { %s2843_s23 = scalar_select %p23_p0, %s2774_s17, %s25_s22  }
   0x8   : > { %p34_p4 = por %p33_p2, %p32_p1  ;;  %p39_p5 = scmp.eq.s32.totalorder %s2830_s19, 0 }
   0x9   : > { %p83_p6 = scmp.eq.s32.totalorder %s2830_s19, 7  ;;  %p2342_p8 = scmp.lt.s32.totalorder %s2778_s18, 8 }
   0xa   : > { %p2847_p7 = por %p39_p5, %p38_p3  ;;  %s154_s26 = sand.u32 1, %s2774_s17  }
   0xb   : > { %p2852_p9 = por %p83_p6, %p32_p1  ;;  %s2334_s27 = smul.u32 1728, %s154_s26 }
   0xc   : > { %s2308_s28 = sshll.u32 %s2778_s18, 8  ;;  %p2858_p10 = pnand %p2342_p8, %p34_p4 }
   0xd   : > { %s3223_s25 = scalar_select %p2852_p9, 1, 0 }
   0xe   : > { %s2865_s6 = scalar_lea.hbm %s3217_s0, %s2308_s28  ;;  %s158_s7 = scalar_lea.vmem [#allocation2], %s2334_s27 }
   0xf   : > { %s165_s8 = sshll.u32 %s158_s7, 4  ;;  %s2869_s9 = scalar_lea.sflag [#allocation3], %s154_s26  ;;  %s2867_s8 = int_to_ptr.vmem [resolvable:$true] %s165_s8 }
  0x10   : > { %s2714_s10 = scalar_lea.hbm %s2865_s6, 27648  ;;  %p2716_p12 = pneg %p2858_p10 }
  0x11   : > { %p2715_p11 = scmp.ne.s32.totalorder %s2865_s6, %s2714_s10  ;;  %s2719_s13 = scalar_lea.hbm %s3217_s0, 221184 }
  0x12   : > { %p2720_p1 = scmp.lt.u32.totalorder %s2865_s6, %s3217_s0  ;;  %p2721_p2 = scmp.lt.u32.totalorder %s2719_s13, %s2714_s10 }
  0x13   : > { %p2717_p13 = pnand %p2716_p12, %p2715_p11  ;;  %p2723_p4 = scmp.lt.u32.totalorder %s2714_s10, %s2865_s6 }
  0x14   : > { %p2722_p3 = por %p2721_p2, %p2720_p1 }
  0x15   : > { %p2718_p0 = pneg %p2717_p13 }
  0x16   : > { %p2724_p5 = por %p2723_p4, %p2722_p3 }
  0x18   : > { %p2725_p6 = pnand %p2724_p5, %p2718_p0 }
  0x1a   : > { %2728 = shalt.err (!%p2725_p6)
}
  0x1b   : > { %s2729_s21 = scalar_lea.vmem %s2867_s8, 27648  ;;  %s2780_s22 = smov [#allocation2]  }
  0x1c   : > { %p2730_p8 = scmp.ne.s32.totalorder %s2867_s8, %s2729_s21  ;;  %s2734_s26 = sshll.u32 %s2780_s22, 4  ;;  %s2735_s26 = int_to_ptr.vmem [resolvable:$false] %s2734_s26 }
  0x1d   : > { %s2736_s27 = scalar_lea.vmem %s2735_s26, 55296  ;;  %p2737_p9 = scmp.lt.s32.totalorder %s2867_s8, %s2735_s26 }
  0x1e   : > { %p2732_p11 = pnand %p2730_p8, %p2716_p12  ;;  %p2738_p1 = scmp.lt.s32.totalorder %s2736_s27, %s2729_s21 }
  0x20   : > { %p2733_p13 = pneg %p2732_p11  ;;  %p2739_p2 = por %p2738_p1, %p2737_p9 }
  0x22   : > { %p2740_p3 = pnand %p2739_p2, %p2733_p13 }
  0x24   : > { %2743 = shalt.err (!%p2740_p3)
}
  0x25   : > { %s2781_s28 = smov 2048   ;;  %s2782_s30 = smov 256  }
  0x26   : > { %s2783_s5 = smov 16   ;;  %p2075_p12 = scmp.ge.s32.totalorder %s2778_s18, 1 }
  0x27   : > { %2341 = dma.hbm_to_vmem [thread:$0]  (!%p2858_p10), %s2865_s6, 27648, %s2867_s8, %s2869_s9, %s2781_s28, %s2782_s30, %s2783_s5  }
  0x28   : > { %p173_p0 = scmp.lt.s32.totalorder %s2778_s18, 9 }
  0x2a   : > { %p174_p4 = pnand %p2075_p12, %p173_p0 }
  0x2b   : > { %s179_s7 = sand.u32 (!%p174_p4), 1, %s2770_s16  }
  0x2c   : > { %177 = sbr.rel (%p174_p4) target bundleno = 649 (0x289), region = 28  ;;  %s180_s11 = scalar_lea.sflag (!%p174_p4), [#allocation3], %s179_s7 }
  0x2d   : > { %s2335_s10 = smul.u32 (!%p174_p4), 1728, %s179_s7 }
  0x2f   : > { %s2900_s12 = scalar_lea.vmem (!%p174_p4), [#allocation2], %s2335_s10 }
  0x33   : > { %2761 = dma.done.wait (%p2847_p7), %s180_s11, 27648  }
  0x34   : > { %2763 = vsyncadd (%p2847_p7), %s180_s11, 4294939648  ;;  %s2076_s13 = sshll.u32 %s179_s7, 6  ;;  %p2077_p9 = scmp.ne.s32.totalorder %s2830_s19, 0 }
  0x35   : > { %s2906_s14 = scalar_lea.vmem [#allocation4], %s2076_s13  ;;  %vm214_vm0 = vcmask (!%p2077_p9), 7168   ;;  %v2784_v0 = vmov (!%p2077_p9), 0.0  }
  0x36   : > { %213 = sbr.rel (%p2077_p9) target bundleno = 61 (0x3d), region = 36  ;;  %215 = vst.msk [vmem:[%s3220_s3] sm:$0xff] (!%p2077_p9), %vm214_vm0, %v2784_v0  ;;  %216 = vst.msk [vmem:[%s3220_s3 + $0x8] sm:$0xff] (!%p2077_p9), %vm214_vm0, %v2784_v0 }
  0x37   : > { %217 = vst.msk [vmem:[%s3221_s4] sm:$0xff] (!%p2077_p9), %vm214_vm0, %v2784_v0  ;;  %218 = vst.msk [vmem:[%s3221_s4 + $0x8] sm:$0xff] (!%p2077_p9), %vm214_vm0, %v2784_v0 }
  0x3d PF: > { %v2380_v1 = vld [vmem:[%s2900_s12 + $0x4] ss:$16 sps:$4 sm:$0xff]   ;;  %v2382_v2 = vld [vmem:[%s2900_s12 + $0xc] ss:$16 sps:$4 sm:$0xff]   ;;  %v2384_v3 = vld [vmem:[%s2900_s12] ss:$16 sps:$4 sm:$0xff]  }
  0x3e   : > { %1562 = vmatprep.subr.bf16.mxu0 %v2380_v1  ;;  %v2385_v4 = vld [vmem:[%s2900_s12 + $0x8] ss:$16 sps:$4 sm:$0xff]   ;;  %1734 = vmatprep.subr.bf16.mxu1 %v2382_v2  ;;  %v2386_v5 = vld [vmem:[%s2900_s12 + $0x24] ss:$16 sps:$4 sm:$0xff]   ;;  %v2388_v6 = vld [vmem:[%s2900_s12 + $0x2c] ss:$16 sps:$4 sm:$0xff]  }
  0x3f   : > { %1563 = vmatpush1.bf16.msra.mxu0 %v2384_v3  ;;  %1735 = vmatpush1.bf16.msra.mxu1 %v2385_v4  ;;  %v2390_v7 = vld [vmem:[%s2900_s12 + $0x20] ss:$16 sps:$4 sm:$0xff]   ;;  %v2391_v8 = vld [vmem:[%s2900_s12 + $0x28] ss:$16 sps:$4 sm:$0xff]   ;;  %v2392_v9 = vld [vmem:[%s2900_s12 + $0x44] ss:$16 sps:$4 sm:$0xff]  }
  0x40   : > { %1564 = vmatprep.subr.bf16.mxu0 %v2386_v5  ;;  %1736 = vmatprep.subr.bf16.mxu1 %v2388_v6  ;;  %v2394_v10 = vld [vmem:[%s2900_s12 + $0x4c] ss:$16 sps:$4 sm:$0xff]   ;;  %v2396_v11 = vld [vmem:[%s2900_s12 + $0x40] ss:$16 sps:$4 sm:$0xff]   ;;  %v2397_v12 = vld [vmem:[%s2900_s12 + $0x48] ss:$16 sps:$4 sm:$0xff]  }
  0x41   : > { %v2398_v13 = vld [vmem:[%s2900_s12 + $0x64] ss:$16 sps:$4 sm:$0xff]   ;;  %v2400_v14 = vld [vmem:[%s2900_s12 + $0x6c] ss:$16 sps:$4 sm:$0xff]   ;;  %v2402_v15 = vld [vmem:[%s2900_s12 + $0x60] ss:$16 sps:$4 sm:$0xff]  }
  0x42   : > { %v2403_v16 = vld [vmem:[%s2900_s12 + $0x68] ss:$16 sps:$4 sm:$0xff]   ;;  %v2404_v17 = vld [vmem:[%s2900_s12 + $0x84] ss:$16 sps:$4 sm:$0xff]   ;;  %v2406_v18 = vld [vmem:[%s2900_s12 + $0x8c] ss:$16 sps:$4 sm:$0xff]  }
  0x43   : > { %1565 = vmatpush1.bf16.msra.mxu0 %v2390_v7  ;;  %1737 = vmatpush1.bf16.msra.mxu1 %v2391_v8  ;;  %v2408_v19 = vld [vmem:[%s2900_s12 + $0x80] ss:$16 sps:$4 sm:$0xff]   ;;  %v2409_v20 = vld [vmem:[%s2900_s12 + $0x88] ss:$16 sps:$4 sm:$0xff]   ;;  %v2410_v21 = vld [vmem:[%s2900_s12 + $0xa4] ss:$16 sps:$4 sm:$0xff]  }
  0x44   : > { %1566 = vmatprep.subr.bf16.mxu0 %v2392_v9  ;;  %1738 = vmatprep.subr.bf16.mxu1 %v2394_v10  ;;  %v2412_v22 = vld [vmem:[%s2900_s12 + $0xac] ss:$16 sps:$4 sm:$0xff]   ;;  %v2414_v23 = vld [vmem:[%s2900_s12 + $0xa0] ss:$16 sps:$4 sm:$0xff]   ;;  %v2415_v24 = vld [vmem:[%s2900_s12 + $0xa8] ss:$16 sps:$4 sm:$0xff]  }
  0x45   : > { %v2416_v25 = vld [vmem:[%s2900_s12 + $0xc4] ss:$16 sps:$4 sm:$0xff]   ;;  %v2418_v26 = vld [vmem:[%s2900_s12 + $0xcc] ss:$16 sps:$4 sm:$0xff]   ;;  %v2420_v27 = vld [vmem:[%s2900_s12 + $0xc0] ss:$16 sps:$4 sm:$0xff]  }
  0x46   : > { %v2421_v28 = vld [vmem:[%s2900_s12 + $0xc8] ss:$16 sps:$4 sm:$0xff]   ;;  %v2422_v29 = vld [vmem:[%s2900_s12 + $0xe4] ss:$16 sps:$4 sm:$0xff]   ;;  %v2424_v30 = vld [vmem:[%s2900_s12 + $0xec] ss:$16 sps:$4 sm:$0xff]  }
  0x47   : > { %1567 = vmatpush1.bf16.msra.mxu0 %v2396_v11  ;;  %1739 = vmatpush1.bf16.msra.mxu1 %v2397_v12  ;;  %v2426_v31 = vld [vmem:[%s2900_s12 + $0xe0] ss:$16 sps:$4 sm:$0xff]   ;;  %v2427_v32 = vld [vmem:[%s2900_s12 + $0xe8] ss:$16 sps:$4 sm:$0xff]   ;;  %v2428_v33 = vld [vmem:[%s2900_s12 + $0x104] ss:$16 sps:$4 sm:$0xff]  }
  0x48   : > { %1568 = vmatprep.subr.bf16.mxu0 %v2398_v13  ;;  %1740 = vmatprep.subr.bf16.mxu1 %v2400_v14  ;;  %v2430_v34 = vld [vmem:[%s2900_s12 + $0x10c] ss:$16 sps:$4 sm:$0xff]   ;;  %v2432_v35 = vld [vmem:[%s2900_s12 + $0x100] ss:$16 sps:$4 sm:$0xff]   ;;  %v2433_v36 = vld [vmem:[%s2900_s12 + $0x108] ss:$16 sps:$4 sm:$0xff]  }
  0x49   : > { %v2434_v37 = vld [vmem:[%s2900_s12 + $0x124] ss:$16 sps:$4 sm:$0xff]   ;;  %v2436_v38 = vld [vmem:[%s2900_s12 + $0x12c] ss:$16 sps:$4 sm:$0xff]   ;;  %v2438_v39 = vld [vmem:[%s2900_s12 + $0x120] ss:$16 sps:$4 sm:$0xff]  }
  0x4a   : > { %v2439_v40 = vld [vmem:[%s2900_s12 + $0x128] ss:$16 sps:$4 sm:$0xff]   ;;  %v2440_v41 = vld [vmem:[%s2900_s12 + $0x144] ss:$16 sps:$4 sm:$0xff]   ;;  %v2442_v42 = vld [vmem:[%s2900_s12 + $0x14c] ss:$16 sps:$4 sm:$0xff]  }
  0x4b   : > { %1569 = vmatpush1.bf16.msra.mxu0 %v2402_v15  ;;  %1741 = vmatpush1.bf16.msra.mxu1 %v2403_v16  ;;  %v2444_v43 = vld [vmem:[%s2900_s12 + $0x140] ss:$16 sps:$4 sm:$0xff]   ;;  %v2445_v44 = vld [vmem:[%s2900_s12 + $0x148] ss:$16 sps:$4 sm:$0xff]   ;;  %v2446_v45 = vld [vmem:[%s2900_s12 + $0x164] ss:$16 sps:$4 sm:$0xff]  }
  0x4c   : > { %1570 = vmatprep.subr.bf16.mxu0 %v2404_v17  ;;  %1742 = vmatprep.subr.bf16.mxu1 %v2406_v18  ;;  %v2448_v46 = vld [vmem:[%s2900_s12 + $0x16c] ss:$16 sps:$4 sm:$0xff]   ;;  %v2450_v47 = vld [vmem:[%s2900_s12 + $0x160] ss:$16 sps:$4 sm:$0xff]   ;;  %v2451_v48 = vld [vmem:[%s2900_s12 + $0x168] ss:$16 sps:$4 sm:$0xff]  }
  0x4d   : > { %v2478_v49 = vld [vmem:[%s3218_s1 + $0x4] ss:$28 sps:$4 sm:$0xff]   ;;  %v2454_v51 = vld [vmem:[%s2900_s12 + $0x18c] ss:$16 sps:$4 sm:$0xff]   ;;  %v2457_v53 = vld [vmem:[%s2900_s12 + $0x188] ss:$16 sps:$4 sm:$0xff]  }
  0x4e   : > { %v2452_v50 = vld [vmem:[%s2900_s12 + $0x184] ss:$16 sps:$4 sm:$0xff]   ;;  %1594 = vmatprep.mubr.bf16.mxu0 %v2478_v49  ;;  %1766 = vmatprep.mubr.bf16.mxu1 %v2478_v49  ;;  %v2456_v52 = vld [vmem:[%s2900_s12 + $0x180] ss:$16 sps:$4 sm:$0xff]   ;;  %v2460_v55 = vld [vmem:[%s2900_s12 + $0x1ac] ss:$16 sps:$4 sm:$0xff]  }
  0x4f   : > { %1571 = vmatpush1.bf16.msra.mxu0 %v2408_v19  ;;  %1743 = vmatpush1.bf16.msra.mxu1 %v2409_v20  ;;  %v2458_v54 = vld [vmem:[%s2900_s12 + $0x1a4] ss:$16 sps:$4 sm:$0xff]   ;;  %v2462_v56 = vld [vmem:[%s2900_s12 + $0x1a0] ss:$16 sps:$4 sm:$0xff]   ;;  %v2463_v57 = vld [vmem:[%s2900_s12 + $0x1a8] ss:$16 sps:$4 sm:$0xff]  }
  0x50   : > { %1572 = vmatprep.subr.bf16.mxu0 %v2410_v21  ;;  %1744 = vmatprep.subr.bf16.mxu1 %v2412_v22  ;;  %v2464_v58 = vld [vmem:[%s2900_s12 + $0x1c4] ss:$16 sps:$4 sm:$0xff]   ;;  %v2466_v59 = vld [vmem:[%s2900_s12 + $0x1cc] ss:$16 sps:$4 sm:$0xff]   ;;  %v2468_v60 = vld [vmem:[%s2900_s12 + $0x1c0] ss:$16 sps:$4 sm:$0xff]  }
  0x51   : > { %v2469_v61 = vld [vmem:[%s2900_s12 + $0x1c8] ss:$16 sps:$4 sm:$0xff]   ;;  %v2470_v62 = vld [vmem:[%s2900_s12 + $0x1e4] ss:$16 sps:$4 sm:$0xff]   ;;  %v2472_v63 = vld [vmem:[%s2900_s12 + $0x1ec] ss:$16 sps:$4 sm:$0xff]  }
  0x52   : > { %v2474_v0 = vld [vmem:[%s2900_s12 + $0x1e0] ss:$16 sps:$4 sm:$0xff]   ;;  %v2475_v1 = vld [vmem:[%s2900_s12 + $0x1e8] ss:$16 sps:$4 sm:$0xff]   ;;  %v2481_v2 = vld [vmem:[%s2900_s12 + $0x204] ss:$16 sps:$4 sm:$0xff]  }
  0x53   : > { %1573 = vmatpush1.bf16.msra.mxu0 %v2414_v23  ;;  %1745 = vmatpush1.bf16.msra.mxu1 %v2415_v24  ;;  %v2484_v3 = vld [vmem:[%s2900_s12 + $0x20c] ss:$16 sps:$4 sm:$0xff]   ;;  %v2479_v5 = vld [vmem:[%s2900_s12 + $0x200] ss:$16 sps:$4 sm:$0xff]   ;;  %v2482_v6 = vld [vmem:[%s2900_s12 + $0x208] ss:$16 sps:$4 sm:$0xff]  }
  0x54   : > { %1574 = vmatprep.subr.bf16.mxu0 %v2416_v25  ;;  %1746 = vmatprep.subr.bf16.mxu1 %v2418_v26  ;;  %v2476_v4 = vld [vmem:[%s3218_s1] ss:$28 sps:$4 sm:$0xff]   ;;  %v2487_v7 = vld [vmem:[%s2900_s12 + $0x224] ss:$16 sps:$4 sm:$0xff]   ;;  %v2488_v10 = vld [vmem:[%s2900_s12 + $0x228] ss:$16 sps:$4 sm:$0xff]  }
  0x55   : > { %v2490_v8 = vld [vmem:[%s2900_s12 + $0x22c] ss:$16 sps:$4 sm:$0xff]   ;;  %v2485_v9 = vld [vmem:[%s2900_s12 + $0x220] ss:$16 sps:$4 sm:$0xff]   ;;  %v2493_v11 = vld [vmem:[%s2900_s12 + $0x244] ss:$16 sps:$4 sm:$0xff]  }
  0x56   : > { %v2496_v12 = vld [vmem:[%s2900_s12 + $0x24c] ss:$16 sps:$4 sm:$0xff]   ;;  %v2491_v13 = vld [vmem:[%s2900_s12 + $0x240] ss:$16 sps:$4 sm:$0xff]   ;;  %v2494_v14 = vld [vmem:[%s2900_s12 + $0x248] ss:$16 sps:$4 sm:$0xff]  }
  0x57   : > { %1575 = vmatpush1.bf16.msra.mxu0 %v2420_v27  ;;  %1747 = vmatpush1.bf16.msra.mxu1 %v2421_v28  ;;  %v2499_v15 = vld [vmem:[%s2900_s12 + $0x264] ss:$16 sps:$4 sm:$0xff]   ;;  %v2502_v16 = vld [vmem:[%s2900_s12 + $0x26c] ss:$16 sps:$4 sm:$0xff]   ;;  %v2497_v17 = vld [vmem:[%s2900_s12 + $0x260] ss:$16 sps:$4 sm:$0xff]  }
  0x58   : > { %1576 = vmatprep.subr.bf16.mxu0 %v2422_v29  ;;  %1748 = vmatprep.subr.bf16.mxu1 %v2424_v30  ;;  %v2500_v18 = vld [vmem:[%s2900_s12 + $0x268] ss:$16 sps:$4 sm:$0xff]   ;;  %v2505_v19 = vld [vmem:[%s2900_s12 + $0x284] ss:$16 sps:$4 sm:$0xff]   ;;  %v2508_v20 = vld [vmem:[%s2900_s12 + $0x28c] ss:$16 sps:$4 sm:$0xff]  }
  0x59   : > { %v2503_v21 = vld [vmem:[%s2900_s12 + $0x280] ss:$16 sps:$4 sm:$0xff]   ;;  %v2506_v22 = vld [vmem:[%s2900_s12 + $0x288] ss:$16 sps:$4 sm:$0xff]   ;;  %v2511_v23 = vld [vmem:[%s2900_s12 + $0x2a4] ss:$16 sps:$4 sm:$0xff]  }
  0x5a   : > { %v2514_v24 = vld [vmem:[%s2900_s12 + $0x2ac] ss:$16 sps:$4 sm:$0xff]   ;;  %v2509_v25 = vld [vmem:[%s2900_s12 + $0x2a0] ss:$16 sps:$4 sm:$0xff]   ;;  %v2512_v26 = vld [vmem:[%s2900_s12 + $0x2a8] ss:$16 sps:$4 sm:$0xff]  }
  0x5b   : > { %1577 = vmatpush1.bf16.msra.mxu0 %v2426_v31  ;;  %1749 = vmatpush1.bf16.msra.mxu1 %v2427_v32  ;;  %v2517_v27 = vld [vmem:[%s2900_s12 + $0x2c4] ss:$16 sps:$4 sm:$0xff]   ;;  %v2520_v28 = vld [vmem:[%s2900_s12 + $0x2cc] ss:$16 sps:$4 sm:$0xff]   ;;  %v2515_v29 = vld [vmem:[%s2900_s12 + $0x2c0] ss:$16 sps:$4 sm:$0xff]  }
  0x5c   : > { %1578 = vmatprep.subr.bf16.mxu0 %v2428_v33  ;;  %1750 = vmatprep.subr.bf16.mxu1 %v2430_v34  ;;  %v2518_v30 = vld [vmem:[%s2900_s12 + $0x2c8] ss:$16 sps:$4 sm:$0xff]   ;;  %v2523_v32 = vld [vmem:[%s2900_s12 + $0x2e4] ss:$16 sps:$4 sm:$0xff]   ;;  %v2526_v33 = vld [vmem:[%s2900_s12 + $0x2ec] ss:$16 sps:$4 sm:$0xff]  }
  0x5d   : > { %v2577_v31 = vld [vmem:[%s3218_s1 + $0xc] ss:$28 sps:$4 sm:$0xff]   ;;  %v2521_v34 = vld [vmem:[%s2900_s12 + $0x2e0] ss:$16 sps:$4 sm:$0xff]   ;;  %vm1558_vm1 = vcmask 785408   ;;  %vm1928_vm2 = vcmask 7168  }
  0x5e   : > { %v2550_v49 = vld [vmem:[%s2900_s12 + $0x36c] ss:$16 sps:$4 sm:$0xff]   ;;  %p3225_p7 = scmp.ne.s32.totalorder %s3223_s25, 0 }
  0x5f   : > { %1579 = vmatpush1.bf16.msra.mxu0 %v2432_v35  ;;  %1751 = vmatpush1.bf16.msra.mxu1 %v2433_v36  ;;  %v2524_v35 = vld [vmem:[%s2900_s12 + $0x2e8] ss:$16 sps:$4 sm:$0xff]   ;;  %v2529_v36 = vld [vmem:[%s2900_s12 + $0x304] ss:$16 sps:$4 sm:$0xff]   ;;  %s2309_s29 = sshll.u32 (%p3225_p7), %s2830_s19, 5 }
  0x60   : > { %1580 = vmatprep.subr.bf16.mxu0 %v2434_v37  ;;  %1752 = vmatprep.subr.bf16.mxu1 %v2436_v38  ;;  %v2532_v37 = vld [vmem:[%s2900_s12 + $0x30c] ss:$16 sps:$4 sm:$0xff]   ;;  %v2527_v38 = vld [vmem:[%s2900_s12 + $0x300] ss:$16 sps:$4 sm:$0xff]  }
  0x63   : > { %1581 = vmatpush1.bf16.msra.mxu0 %v2438_v39  ;;  %1753 = vmatpush1.bf16.msra.mxu1 %v2439_v40  ;;  %v2530_v39 = vld [vmem:[%s2900_s12 + $0x308] ss:$16 sps:$4 sm:$0xff]   ;;  %v2535_v40 = vld [vmem:[%s2900_s12 + $0x324] ss:$16 sps:$4 sm:$0xff]  }
  0x64   : > { %1582 = vmatprep.subr.bf16.mxu0 %v2440_v41  ;;  %1754 = vmatprep.subr.bf16.mxu1 %v2442_v42  ;;  %v2538_v41 = vld [vmem:[%s2900_s12 + $0x32c] ss:$16 sps:$4 sm:$0xff]   ;;  %v2533_v42 = vld [vmem:[%s2900_s12 + $0x320] ss:$16 sps:$4 sm:$0xff]  }
  0x67   : > { %1583 = vmatpush1.bf16.msra.mxu0 %v2444_v43  ;;  %1755 = vmatpush1.bf16.msra.mxu1 %v2445_v44  ;;  %v2536_v43 = vld [vmem:[%s2900_s12 + $0x328] ss:$16 sps:$4 sm:$0xff]   ;;  %v2541_v44 = vld [vmem:[%s2900_s12 + $0x344] ss:$16 sps:$4 sm:$0xff]  }
  0x68   : > { %1584 = vmatprep.subr.bf16.mxu0 %v2446_v45  ;;  %1756 = vmatprep.subr.bf16.mxu1 %v2448_v46  ;;  %v2544_v45 = vld [vmem:[%s2900_s12 + $0x34c] ss:$16 sps:$4 sm:$0xff]   ;;  %v2539_v46 = vld [vmem:[%s2900_s12 + $0x340] ss:$16 sps:$4 sm:$0xff]  }
  0x6b   : > { %1585 = vmatpush1.bf16.msra.mxu0 %v2450_v47  ;;  %1757 = vmatpush1.bf16.msra.mxu1 %v2451_v48  ;;  %v2542_v47 = vld [vmem:[%s2900_s12 + $0x348] ss:$16 sps:$4 sm:$0xff]   ;;  %v2547_v48 = vld [vmem:[%s2900_s12 + $0x364] ss:$16 sps:$4 sm:$0xff]  }
  0x6c   : > { %1586 = vmatprep.subr.bf16.mxu0 %v2452_v50  ;;  %1758 = vmatprep.subr.bf16.mxu1 %v2454_v51  ;;  %v2545_v50 = vld [vmem:[%s2900_s12 + $0x360] ss:$16 sps:$4 sm:$0xff]   ;;  %v2548_v51 = vld [vmem:[%s2900_s12 + $0x368] ss:$16 sps:$4 sm:$0xff]  }
  0x6f   : > { %1587 = vmatpush1.bf16.msra.mxu0 %v2456_v52  ;;  %1759 = vmatpush1.bf16.msra.mxu1 %v2457_v53  ;;  %v2553_v52 = vld [vmem:[%s2900_s12 + $0x384] ss:$16 sps:$4 sm:$0xff]   ;;  %v2556_v53 = vld [vmem:[%s2900_s12 + $0x38c] ss:$16 sps:$4 sm:$0xff]  }
  0x70   : > { %1588 = vmatprep.subr.bf16.mxu0 %v2458_v54  ;;  %1760 = vmatprep.subr.bf16.mxu1 %v2460_v55  ;;  %v2551_v54 = vld [vmem:[%s2900_s12 + $0x380] ss:$16 sps:$4 sm:$0xff]   ;;  %v2554_v55 = vld [vmem:[%s2900_s12 + $0x388] ss:$16 sps:$4 sm:$0xff]  }
  0x73   : > { %1589 = vmatpush1.bf16.msra.mxu0 %v2462_v56  ;;  %1761 = vmatpush1.bf16.msra.mxu1 %v2463_v57  ;;  %v2559_v56 = vld [vmem:[%s2900_s12 + $0x3a4] ss:$16 sps:$4 sm:$0xff]   ;;  %v2562_v57 = vld [vmem:[%s2900_s12 + $0x3ac] ss:$16 sps:$4 sm:$0xff]  }
  0x74   : > { %1590 = vmatprep.subr.bf16.mxu0 %v2464_v58  ;;  %1762 = vmatprep.subr.bf16.mxu1 %v2466_v59  ;;  %v2557_v58 = vld [vmem:[%s2900_s12 + $0x3a0] ss:$16 sps:$4 sm:$0xff]   ;;  %v2560_v59 = vld [vmem:[%s2900_s12 + $0x3a8] ss:$16 sps:$4 sm:$0xff]  }
  0x77   : > { %1591 = vmatpush1.bf16.msra.mxu0 %v2468_v60  ;;  %1763 = vmatpush1.bf16.msra.mxu1 %v2469_v61  ;;  %v2565_v60 = vld [vmem:[%s2900_s12 + $0x3c4] ss:$16 sps:$4 sm:$0xff]   ;;  %v2568_v61 = vld [vmem:[%s2900_s12 + $0x3cc] ss:$16 sps:$4 sm:$0xff]  }
  0x78   : > { %1592 = vmatprep.subr.bf16.mxu0 %v2470_v62  ;;  %1764 = vmatprep.subr.bf16.mxu1 %v2472_v63  ;;  %v2563_v62 = vld [vmem:[%s2900_s12 + $0x3c0] ss:$16 sps:$4 sm:$0xff]   ;;  %v2566_v63 = vld [vmem:[%s2900_s12 + $0x3c8] ss:$16 sps:$4 sm:$0xff]  }
  0x7b   : > { %1593 = vmatpush1.bf16.msra.mxu0 %v2474_v0  ;;  %1765 = vmatpush1.bf16.msra.mxu1 %v2475_v1  ;;  %v2571_v0 = vld [vmem:[%s2900_s12 + $0x3e4] ss:$16 sps:$4 sm:$0xff]   ;;  %v2574_v1 = vld [vmem:[%s2900_s12 + $0x3ec] ss:$16 sps:$4 sm:$0xff]  }
  0x7c   : > { %1605 = vmatprep.subr.bf16.mxu0 %v2481_v2  ;;  %1777 = vmatprep.subr.bf16.mxu1 %v2484_v3  ;;  %v2569_v2 = vld [vmem:[%s2900_s12 + $0x3e0] ss:$16 sps:$4 sm:$0xff]   ;;  %v2572_v3 = vld [vmem:[%s2900_s12 + $0x3e8] ss:$16 sps:$4 sm:$0xff]  }
  0x7e   : > { %1595 = vmatmul.mubr.bf16.vlgmr.msra.gmra.mrb[0].mxu0 %v2476_v4  ;;  %1767 = vmatmul.mubr.bf16.vlgmr.msra.gmra.mrb[0].mxu1 %v2476_v4  ;;  %v2580_v4 = vld [vmem:[%s2900_s12 + $0x404] ss:$16 sps:$4 sm:$0xff]  }
  0x7f   : > { %1606 = vmatpush1.bf16.msra.mxu0 %v2479_v5  ;;  %1778 = vmatpush1.bf16.msra.mxu1 %v2482_v6  ;;  %v2583_v5 = vld [vmem:[%s2900_s12 + $0x40c] ss:$16 sps:$4 sm:$0xff]   ;;  %v2575_v6 = vld [vmem:[%s3218_s1 + $0x8] ss:$28 sps:$4 sm:$0xff]  }
  0x80   : > { %1607 = vmatprep.subr.bf16.mxu0 %v2487_v7  ;;  %1779 = vmatprep.subr.bf16.mxu1 %v2490_v8  ;;  %v2578_v7 = vld [vmem:[%s2900_s12 + $0x400] ss:$16 sps:$4 sm:$0xff]   ;;  %v2581_v8 = vld [vmem:[%s2900_s12 + $0x408] ss:$16 sps:$4 sm:$0xff]  }
  0x81   : > { %1637 = vmatprep.mubr.bf16.mxu0 %v2577_v31  ;;  %1809 = vmatprep.mubr.bf16.mxu1 %v2577_v31  ;;  %v2619_v31 = vld [vmem:[%s2900_s12 + $0x4cc] ss:$16 sps:$4 sm:$0xff]  }
  0x83   : > { %1608 = vmatpush1.bf16.msra.mxu0 %v2485_v9  ;;  %1780 = vmatpush1.bf16.msra.mxu1 %v2488_v10  ;;  %v2586_v9 = vld [vmem:[%s2900_s12 + $0x424] ss:$16 sps:$4 sm:$0xff]   ;;  %v2589_v10 = vld [vmem:[%s2900_s12 + $0x42c] ss:$16 sps:$4 sm:$0xff]  }
  0x84   : > { %1609 = vmatprep.subr.bf16.mxu0 %v2493_v11  ;;  %1781 = vmatprep.subr.bf16.mxu1 %v2496_v12  ;;  %v2584_v11 = vld [vmem:[%s2900_s12 + $0x420] ss:$16 sps:$4 sm:$0xff]   ;;  %v2587_v12 = vld [vmem:[%s2900_s12 + $0x428] ss:$16 sps:$4 sm:$0xff]  }
  0x87   : > { %1610 = vmatpush1.bf16.msra.mxu0 %v2491_v13  ;;  %1782 = vmatpush1.bf16.msra.mxu1 %v2494_v14  ;;  %v2676_v13 = vld [vmem:[%s3218_s1 + $0x14] ss:$28 sps:$4 sm:$0xff]  }
  0x88   : > { %1611 = vmatprep.subr.bf16.mxu0 %v2499_v15  ;;  %1783 = vmatprep.subr.bf16.mxu1 %v2502_v16  ;;  %v2592_v14 = vld [vmem:[%s2900_s12 + $0x444] ss:$16 sps:$4 sm:$0xff]   ;;  %v2595_v15 = vld [vmem:[%s2900_s12 + $0x44c] ss:$16 sps:$4 sm:$0xff]   ;;  %v2590_v16 = vld [vmem:[%s2900_s12 + $0x440] ss:$16 sps:$4 sm:$0xff]  }
  0x8b   : > { %1612 = vmatpush1.bf16.msra.mxu0 %v2497_v17  ;;  %1784 = vmatpush1.bf16.msra.mxu1 %v2500_v18  ;;  %v2593_v17 = vld [vmem:[%s2900_s12 + $0x448] ss:$16 sps:$4 sm:$0xff]   ;;  %v2598_v18 = vld [vmem:[%s2900_s12 + $0x464] ss:$16 sps:$4 sm:$0xff]  }
  0x8c   : > { %1613 = vmatprep.subr.bf16.mxu0 %v2505_v19  ;;  %1785 = vmatprep.subr.bf16.mxu1 %v2508_v20  ;;  %v2601_v19 = vld [vmem:[%s2900_s12 + $0x46c] ss:$16 sps:$4 sm:$0xff]   ;;  %v2596_v20 = vld [vmem:[%s2900_s12 + $0x460] ss:$16 sps:$4 sm:$0xff]  }
  0x8f   : > { %1614 = vmatpush1.bf16.msra.mxu0 %v2503_v21  ;;  %1786 = vmatpush1.bf16.msra.mxu1 %v2506_v22  ;;  %v2599_v21 = vld [vmem:[%s2900_s12 + $0x468] ss:$16 sps:$4 sm:$0xff]   ;;  %v2604_v22 = vld [vmem:[%s2900_s12 + $0x484] ss:$16 sps:$4 sm:$0xff]  }
  0x90   : > { %1615 = vmatprep.subr.bf16.mxu0 %v2511_v23  ;;  %1787 = vmatprep.subr.bf16.mxu1 %v2514_v24  ;;  %v2607_v23 = vld [vmem:[%s2900_s12 + $0x48c] ss:$16 sps:$4 sm:$0xff]   ;;  %v2602_v24 = vld [vmem:[%s2900_s12 + $0x480] ss:$16 sps:$4 sm:$0xff]  }
  0x93   : > { %1616 = vmatpush1.bf16.msra.mxu0 %v2509_v25  ;;  %1788 = vmatpush1.bf16.msra.mxu1 %v2512_v26  ;;  %v2605_v25 = vld [vmem:[%s2900_s12 + $0x488] ss:$16 sps:$4 sm:$0xff]   ;;  %v2610_v26 = vld [vmem:[%s2900_s12 + $0x4a4] ss:$16 sps:$4 sm:$0xff]  }
  0x94   : > { %1617 = vmatprep.subr.bf16.mxu0 %v2517_v27  ;;  %1789 = vmatprep.subr.bf16.mxu1 %v2520_v28  ;;  %v2613_v27 = vld [vmem:[%s2900_s12 + $0x4ac] ss:$16 sps:$4 sm:$0xff]   ;;  %v2608_v28 = vld [vmem:[%s2900_s12 + $0x4a0] ss:$16 sps:$4 sm:$0xff]  }
  0x97   : > { %1618 = vmatpush1.bf16.msra.mxu0 %v2515_v29  ;;  %1790 = vmatpush1.bf16.msra.mxu1 %v2518_v30  ;;  %v2611_v29 = vld [vmem:[%s2900_s12 + $0x4a8] ss:$16 sps:$4 sm:$0xff]   ;;  %v2616_v30 = vld [vmem:[%s2900_s12 + $0x4c4] ss:$16 sps:$4 sm:$0xff]  }
  0x98   : > { %1619 = vmatprep.subr.bf16.mxu0 %v2523_v32  ;;  %1791 = vmatprep.subr.bf16.mxu1 %v2526_v33  ;;  %v2614_v32 = vld [vmem:[%s2900_s12 + $0x4c0] ss:$16 sps:$4 sm:$0xff]   ;;  %v2617_v33 = vld [vmem:[%s2900_s12 + $0x4c8] ss:$16 sps:$4 sm:$0xff]  }
  0x9b   : > { %1620 = vmatpush1.bf16.msra.mxu0 %v2521_v34  ;;  %1792 = vmatpush1.bf16.msra.mxu1 %v2524_v35  ;;  %v2622_v34 = vld [vmem:[%s2900_s12 + $0x4e4] ss:$16 sps:$4 sm:$0xff]   ;;  %v2625_v35 = vld [vmem:[%s2900_s12 + $0x4ec] ss:$16 sps:$4 sm:$0xff]  }
  0x9c   : > { %1621 = vmatprep.subr.bf16.mxu0 %v2529_v36  ;;  %1793 = vmatprep.subr.bf16.mxu1 %v2532_v37  ;;  %v2620_v36 = vld [vmem:[%s2900_s12 + $0x4e0] ss:$16 sps:$4 sm:$0xff]   ;;  %v2623_v37 = vld [vmem:[%s2900_s12 + $0x4e8] ss:$16 sps:$4 sm:$0xff]  }
  0x9f   : > { %1622 = vmatpush1.bf16.msra.mxu0 %v2527_v38  ;;  %1794 = vmatpush1.bf16.msra.mxu1 %v2530_v39  ;;  %v2628_v38 = vld [vmem:[%s2900_s12 + $0x504] ss:$16 sps:$4 sm:$0xff]   ;;  %v2631_v39 = vld [vmem:[%s2900_s12 + $0x50c] ss:$16 sps:$4 sm:$0xff]  }
  0xa0   : > { %1623 = vmatprep.subr.bf16.mxu0 %v2535_v40  ;;  %1795 = vmatprep.subr.bf16.mxu1 %v2538_v41  ;;  %v2626_v40 = vld [vmem:[%s2900_s12 + $0x500] ss:$16 sps:$4 sm:$0xff]   ;;  %v2629_v41 = vld [vmem:[%s2900_s12 + $0x508] ss:$16 sps:$4 sm:$0xff]  }
  0xa3   : > { %1624 = vmatpush1.bf16.msra.mxu0 %v2533_v42  ;;  %1796 = vmatpush1.bf16.msra.mxu1 %v2536_v43  ;;  %v2634_v42 = vld [vmem:[%s2900_s12 + $0x524] ss:$16 sps:$4 sm:$0xff]   ;;  %v2637_v43 = vld [vmem:[%s2900_s12 + $0x52c] ss:$16 sps:$4 sm:$0xff]  }
  0xa4   : > { %1625 = vmatprep.subr.bf16.mxu0 %v2541_v44  ;;  %1797 = vmatprep.subr.bf16.mxu1 %v2544_v45  ;;  %v2632_v44 = vld [vmem:[%s2900_s12 + $0x520] ss:$16 sps:$4 sm:$0xff]   ;;  %v2635_v45 = vld [vmem:[%s2900_s12 + $0x528] ss:$16 sps:$4 sm:$0xff]  }
  0xa7   : > { %1626 = vmatpush1.bf16.msra.mxu0 %v2539_v46  ;;  %1798 = vmatpush1.bf16.msra.mxu1 %v2542_v47  ;;  %v2640_v46 = vld [vmem:[%s2900_s12 + $0x544] ss:$16 sps:$4 sm:$0xff]   ;;  %v2643_v47 = vld [vmem:[%s2900_s12 + $0x54c] ss:$16 sps:$4 sm:$0xff]  }
  0xa8   : > { %1627 = vmatprep.subr.bf16.mxu0 %v2547_v48  ;;  %1799 = vmatprep.subr.bf16.mxu1 %v2550_v49  ;;  %v2638_v48 = vld [vmem:[%s2900_s12 + $0x540] ss:$16 sps:$4 sm:$0xff]   ;;  %v2641_v49 = vld [vmem:[%s2900_s12 + $0x548] ss:$16 sps:$4 sm:$0xff]  }
  0xab   : > { %1628 = vmatpush1.bf16.msra.mxu0 %v2545_v50  ;;  %1800 = vmatpush1.bf16.msra.mxu1 %v2548_v51  ;;  %v2646_v50 = vld [vmem:[%s2900_s12 + $0x564] ss:$16 sps:$4 sm:$0xff]   ;;  %v2649_v51 = vld [vmem:[%s2900_s12 + $0x56c] ss:$16 sps:$4 sm:$0xff]  }
  0xac   : > { %1629 = vmatprep.subr.bf16.mxu0 %v2553_v52  ;;  %1801 = vmatprep.subr.bf16.mxu1 %v2556_v53  ;;  %v2644_v52 = vld [vmem:[%s2900_s12 + $0x560] ss:$16 sps:$4 sm:$0xff]   ;;  %v2647_v53 = vld [vmem:[%s2900_s12 + $0x568] ss:$16 sps:$4 sm:$0xff]  }
  0xaf   : > { %1630 = vmatpush1.bf16.msra.mxu0 %v2551_v54  ;;  %1802 = vmatpush1.bf16.msra.mxu1 %v2554_v55  ;;  %v2652_v54 = vld [vmem:[%s2900_s12 + $0x584] ss:$16 sps:$4 sm:$0xff]   ;;  %v2655_v55 = vld [vmem:[%s2900_s12 + $0x58c] ss:$16 sps:$4 sm:$0xff]  }
  0xb0   : > { %1631 = vmatprep.subr.bf16.mxu0 %v2559_v56  ;;  %1803 = vmatprep.subr.bf16.mxu1 %v2562_v57  ;;  %v2650_v56 = vld [vmem:[%s2900_s12 + $0x580] ss:$16 sps:$4 sm:$0xff]   ;;  %v2653_v57 = vld [vmem:[%s2900_s12 + $0x588] ss:$16 sps:$4 sm:$0xff]  }
  0xb3   : > { %1632 = vmatpush1.bf16.msra.mxu0 %v2557_v58  ;;  %1804 = vmatpush1.bf16.msra.mxu1 %v2560_v59  ;;  %v2658_v58 = vld [vmem:[%s2900_s12 + $0x5a4] ss:$16 sps:$4 sm:$0xff]   ;;  %v2661_v59 = vld [vmem:[%s2900_s12 + $0x5ac] ss:$16 sps:$4 sm:$0xff]  }
  0xb4   : > { %1633 = vmatprep.subr.bf16.mxu0 %v2565_v60  ;;  %1805 = vmatprep.subr.bf16.mxu1 %v2568_v61  ;;  %v2656_v60 = vld [vmem:[%s2900_s12 + $0x5a0] ss:$16 sps:$4 sm:$0xff]   ;;  %v2659_v61 = vld [vmem:[%s2900_s12 + $0x5a8] ss:$16 sps:$4 sm:$0xff]  }
  0xb7   : > { %1634 = vmatpush1.bf16.msra.mxu0 %v2563_v62  ;;  %1806 = vmatpush1.bf16.msra.mxu1 %v2566_v63  ;;  %v2664_v62 = vld [vmem:[%s2900_s12 + $0x5c4] ss:$16 sps:$4 sm:$0xff]   ;;  %v2667_v63 = vld [vmem:[%s2900_s12 + $0x5cc] ss:$16 sps:$4 sm:$0xff]  }
  0xb8   : > { %1635 = vmatprep.subr.bf16.mxu0 %v2571_v0  ;;  %1807 = vmatprep.subr.bf16.mxu1 %v2574_v1  ;;  %v2662_v0 = vld [vmem:[%s2900_s12 + $0x5c0] ss:$16 sps:$4 sm:$0xff]   ;;  %v2665_v1 = vld [vmem:[%s2900_s12 + $0x5c8] ss:$16 sps:$4 sm:$0xff]  }
  0xbb   : > { %1636 = vmatpush1.bf16.msra.mxu0 %v2569_v2  ;;  %1808 = vmatpush1.bf16.msra.mxu1 %v2572_v3  ;;  %v2670_v2 = vld [vmem:[%s2900_s12 + $0x5e4] ss:$16 sps:$4 sm:$0xff]   ;;  %v2673_v3 = vld [vmem:[%s2900_s12 + $0x5ec] ss:$16 sps:$4 sm:$0xff]  }
  0xbc   : > { %1648 = vmatprep.subr.bf16.mxu0 %v2580_v4  ;;  %1820 = vmatprep.subr.bf16.mxu1 %v2583_v5  ;;  %v2668_v4 = vld [vmem:[%s2900_s12 + $0x5e0] ss:$16 sps:$4 sm:$0xff]   ;;  %v2671_v5 = vld [vmem:[%s2900_s12 + $0x5e8] ss:$16 sps:$4 sm:$0xff]  }
  0xbe   : > { %1638 = vmatmul.mubr.bf16.vlgmr.msra.gmra.mrb[0].mxu0 %v2575_v6  ;;  %1810 = vmatmul.mubr.bf16.vlgmr.msra.gmra.mrb[0].mxu1 %v2575_v6  ;;  %v2679_v6 = vld [vmem:[%s2900_s12 + $0x604] ss:$16 sps:$4 sm:$0xff]  }
  0xbf   : > { %1649 = vmatpush1.bf16.msra.mxu0 %v2578_v7  ;;  %1821 = vmatpush1.bf16.msra.mxu1 %v2581_v8  ;;  %v2682_v7 = vld [vmem:[%s2900_s12 + $0x60c] ss:$16 sps:$4 sm:$0xff]  }
  0xc0   : > { %1650 = vmatprep.subr.bf16.mxu0 %v2586_v9  ;;  %1822 = vmatprep.subr.bf16.mxu1 %v2589_v10  ;;  %v2674_v8 = vld [vmem:[%s3218_s1 + $0x10] ss:$28 sps:$4 sm:$0xff]   ;;  %v2680_v10 = vld [vmem:[%s2900_s12 + $0x608] ss:$16 sps:$4 sm:$0xff]  }
  0xc1   : > { %1680 = vmatprep.mubr.bf16.mxu0 %v2676_v13  ;;  %1852 = vmatprep.mubr.bf16.mxu1 %v2676_v13  ;;  %v2677_v9 = vld [vmem:[%s2900_s12 + $0x600] ss:$16 sps:$4 sm:$0xff]  }
  0xc2   : > { %v2683_v13 = vld [vmem:[%s2900_s12 + $0x620] ss:$16 sps:$4 sm:$0xff]  }
  0xc3   : > { %1651 = vmatpush1.bf16.msra.mxu0 %v2584_v11  ;;  %1823 = vmatpush1.bf16.msra.mxu1 %v2587_v12  ;;  %v2685_v11 = vld [vmem:[%s2900_s12 + $0x624] ss:$16 sps:$4 sm:$0xff]   ;;  %v2688_v12 = vld [vmem:[%s2900_s12 + $0x62c] ss:$16 sps:$4 sm:$0xff]  }
  0xc4   : > { %1652 = vmatprep.subr.bf16.mxu0 %v2592_v14  ;;  %1824 = vmatprep.subr.bf16.mxu1 %v2595_v15  ;;  %v2686_v14 = vld [vmem:[%s2900_s12 + $0x628] ss:$16 sps:$4 sm:$0xff]   ;;  %v2691_v15 = vld [vmem:[%s2900_s12 + $0x644] ss:$16 sps:$4 sm:$0xff]  }
  0xc7   : > { %1653 = vmatpush1.bf16.msra.mxu0 %v2590_v16  ;;  %1825 = vmatpush1.bf16.msra.mxu1 %v2593_v17  ;;  %v2694_v16 = vld [vmem:[%s2900_s12 + $0x64c] ss:$16 sps:$4 sm:$0xff]   ;;  %v2785_v17 = vmov 0  }
  0xc8   : > { %1654 = vmatprep.subr.bf16.mxu0 %v2598_v18  ;;  %1826 = vmatprep.subr.bf16.mxu1 %v2601_v19  ;;  %v2689_v18 = vld [vmem:[%s2900_s12 + $0x640] ss:$16 sps:$4 sm:$0xff]   ;;  %v2692_v19 = vld [vmem:[%s2900_s12 + $0x648] ss:$16 sps:$4 sm:$0xff]  }
  0xcb   : > { %1655 = vmatpush1.bf16.msra.mxu0 %v2596_v20  ;;  %1827 = vmatpush1.bf16.msra.mxu1 %v2599_v21  ;;  %v2697_v20 = vld [vmem:[%s2900_s12 + $0x664] ss:$16 sps:$4 sm:$0xff]   ;;  %v2700_v21 = vld [vmem:[%s2900_s12 + $0x66c] ss:$16 sps:$4 sm:$0xff]  }
  0xcc   : > { %1656 = vmatprep.subr.bf16.mxu0 %v2604_v22  ;;  %1828 = vmatprep.subr.bf16.mxu1 %v2607_v23  ;;  %v2695_v22 = vld [vmem:[%s2900_s12 + $0x660] ss:$16 sps:$4 sm:$0xff]   ;;  %v2698_v23 = vld [vmem:[%s2900_s12 + $0x668] ss:$16 sps:$4 sm:$0xff]  }
  0xcf   : > { %1657 = vmatpush1.bf16.msra.mxu0 %v2602_v24  ;;  %1829 = vmatpush1.bf16.msra.mxu1 %v2605_v25  ;;  %v2703_v24 = vld [vmem:[%s2900_s12 + $0x684] ss:$16 sps:$4 sm:$0xff]   ;;  %v2706_v25 = vld [vmem:[%s2900_s12 + $0x68c] ss:$16 sps:$4 sm:$0xff]  }
  0xd0   : > { %1658 = vmatprep.subr.bf16.mxu0 %v2610_v26  ;;  %1830 = vmatprep.subr.bf16.mxu1 %v2613_v27  ;;  %v2701_v26 = vld [vmem:[%s2900_s12 + $0x680] ss:$16 sps:$4 sm:$0xff]   ;;  %v2704_v27 = vld [vmem:[%s2900_s12 + $0x688] ss:$16 sps:$4 sm:$0xff]  }
  0xd3   : > { %1659 = vmatpush1.bf16.msra.mxu0 %v2608_v28  ;;  %1831 = vmatpush1.bf16.msra.mxu1 %v2611_v29  ;;  %v2709_v28 = vld [vmem:[%s2900_s12 + $0x6a4] ss:$16 sps:$4 sm:$0xff]   ;;  %v2712_v29 = vld [vmem:[%s2900_s12 + $0x6ac] ss:$16 sps:$4 sm:$0xff]  }
  0xd4   : > { %1660 = vmatprep.subr.bf16.mxu0 %v2616_v30  ;;  %1832 = vmatprep.subr.bf16.mxu1 %v2619_v31  ;;  %v2707_v30 = vld [vmem:[%s2900_s12 + $0x6a0] ss:$16 sps:$4 sm:$0xff]   ;;  %v2710_v31 = vld [vmem:[%s2900_s12 + $0x6a8] ss:$16 sps:$4 sm:$0xff]   ;;  %s1964_s12 = scalar_lea.vmem (%p3225_p7), %s3219_s2, %s2309_s29 }
  0xd7   : > { %1661 = vmatpush1.bf16.msra.mxu0 %v2614_v32  ;;  %1833 = vmatpush1.bf16.msra.mxu1 %v2617_v33  ;;  %v2713_v32 = vld [vmem:[%s3218_s1 + $0x18] ss:$28 sps:$4 sm:$0xff]  }
  0xd8   : > { %1662 = vmatprep.subr.bf16.mxu0 %v2622_v34  ;;  %1834 = vmatprep.subr.bf16.mxu1 %v2625_v35 }
  0xdb   : > { %1663 = vmatpush1.bf16.msra.mxu0 %v2620_v36  ;;  %1835 = vmatpush1.bf16.msra.mxu1 %v2623_v37 }
  0xdc   : > { %1664 = vmatprep.subr.bf16.mxu0 %v2628_v38  ;;  %1836 = vmatprep.subr.bf16.mxu1 %v2631_v39 }
  0xdf   : > { %1665 = vmatpush1.bf16.msra.mxu0 %v2626_v40  ;;  %1837 = vmatpush1.bf16.msra.mxu1 %v2629_v41 }
  0xe0   : > { %1666 = vmatprep.subr.bf16.mxu0 %v2634_v42  ;;  %1838 = vmatprep.subr.bf16.mxu1 %v2637_v43 }
  0xe3   : > { %1667 = vmatpush1.bf16.msra.mxu0 %v2632_v44  ;;  %1839 = vmatpush1.bf16.msra.mxu1 %v2635_v45 }
  0xe4   : > { %1668 = vmatprep.subr.bf16.mxu0 %v2640_v46  ;;  %1840 = vmatprep.subr.bf16.mxu1 %v2643_v47 }
  0xe7   : > { %1669 = vmatpush1.bf16.msra.mxu0 %v2638_v48  ;;  %1841 = vmatpush1.bf16.msra.mxu1 %v2641_v49 }
  0xe8   : > { %1670 = vmatprep.subr.bf16.mxu0 %v2646_v50  ;;  %1842 = vmatprep.subr.bf16.mxu1 %v2649_v51 }
  0xeb   : > { %1671 = vmatpush1.bf16.msra.mxu0 %v2644_v52  ;;  %1843 = vmatpush1.bf16.msra.mxu1 %v2647_v53 }
  0xec   : > { %1672 = vmatprep.subr.bf16.mxu0 %v2652_v54  ;;  %1844 = vmatprep.subr.bf16.mxu1 %v2655_v55 }
  0xef   : > { %1673 = vmatpush1.bf16.msra.mxu0 %v2650_v56  ;;  %1845 = vmatpush1.bf16.msra.mxu1 %v2653_v57 }
  0xf0   : > { %1674 = vmatprep.subr.bf16.mxu0 %v2658_v58  ;;  %1846 = vmatprep.subr.bf16.mxu1 %v2661_v59 }
  0xf3   : > { %1675 = vmatpush1.bf16.msra.mxu0 %v2656_v60  ;;  %1847 = vmatpush1.bf16.msra.mxu1 %v2659_v61  ;;  %v1914_v61 = vld [vmem:[%s3220_s3] sm:$0xff] }
  0xf4   : > { %1676 = vmatprep.subr.bf16.mxu0 %v2664_v62  ;;  %1848 = vmatprep.subr.bf16.mxu1 %v2667_v63 }
  0xf7   : > { %1677 = vmatpush1.bf16.msra.mxu0 %v2662_v0  ;;  %1849 = vmatpush1.bf16.msra.mxu1 %v2665_v1  ;;  %v1931_v0 = vld [vmem:[%s3221_s4] sm:$0xff]  ;;  %v1915_v1 = vld [vmem:[%s3220_s3 + $0x8] sm:$0xff] }
  0xf8   : > { %1678 = vmatprep.subr.bf16.mxu0 %v2670_v2  ;;  %1850 = vmatprep.subr.bf16.mxu1 %v2673_v3 }
  0xfb   : > { %1679 = vmatpush1.bf16.msra.mxu0 %v2668_v4  ;;  %1851 = vmatpush1.bf16.msra.mxu1 %v2671_v5 }
  0xfc   : > { %1691 = vmatprep.subr.bf16.mxu0 %v2679_v6  ;;  %1863 = vmatprep.subr.bf16.mxu1 %v2682_v7  ;;  %v1932_v6 = vld [vmem:[%s3221_s4 + $0x8] sm:$0xff] }
  0xfe   : > { %1681 = vmatmul.mubr.bf16.vlgmr.msra.gmra.mrb[0].mxu0 %v2674_v8  ;;  %1853 = vmatmul.mubr.bf16.vlgmr.msra.gmra.mrb[0].mxu1 %v2674_v8 }
  0xff   : > { %1692 = vmatpush1.bf16.msra.mxu0 %v2677_v9  ;;  %1864 = vmatpush1.bf16.msra.mxu1 %v2680_v10 }
 0x100   : > { %1693 = vmatprep.subr.bf16.mxu0 %v2685_v11  ;;  %1865 = vmatprep.subr.bf16.mxu1 %v2688_v12 }
 0x101   : > { %1723 = vmatprep.mubr.bf16.mxu0 %v2785_v17  ;;  %1895 = vmatprep.mubr.bf16.mxu1 %v2785_v17 }
 0x103   : > { %1694 = vmatpush1.bf16.msra.mxu0 %v2683_v13  ;;  %1866 = vmatpush1.bf16.msra.mxu1 %v2686_v14 }
 0x104   : > { %1695 = vmatprep.subr.bf16.mxu0 %v2691_v15  ;;  %1867 = vmatprep.subr.bf16.mxu1 %v2694_v16 }
 0x107   : > { %1696 = vmatpush1.bf16.msra.mxu0 %v2689_v18  ;;  %1868 = vmatpush1.bf16.msra.mxu1 %v2692_v19 }
 0x108   : > { %1697 = vmatprep.subr.bf16.mxu0 %v2697_v20  ;;  %1869 = vmatprep.subr.bf16.mxu1 %v2700_v21 }
 0x10b   : > { %1698 = vmatpush1.bf16.msra.mxu0 %v2695_v22  ;;  %1870 = vmatpush1.bf16.msra.mxu1 %v2698_v23 }
 0x10c   : > { %1699 = vmatprep.subr.bf16.mxu0 %v2703_v24  ;;  %1871 = vmatprep.subr.bf16.mxu1 %v2706_v25 }
 0x10f   : > { %1700 = vmatpush1.bf16.msra.mxu0 %v2701_v26  ;;  %1872 = vmatpush1.bf16.msra.mxu1 %v2704_v27 }
 0x110   : > { %1701 = vmatprep.subr.bf16.mxu0 %v2709_v28  ;;  %1873 = vmatprep.subr.bf16.mxu1 %v2712_v29 }
 0x113   : > { %1702 = vmatpush1.bf16.msra.mxu0 %v2707_v30  ;;  %1874 = vmatpush1.bf16.msra.mxu1 %v2710_v31 }
 0x116   : > { %2301 = vmatmul.mubr.msk.bf16.vlgmr.msra.gmra.mrb[0].mxu0 %vm1558_vm1, %v2713_v32  ;;  %2302 = vmatmul.mubr.msk.bf16.vlgmr.msra.gmra.mrb[0].mxu1 %vm1558_vm1, %v2713_v32 }
 0x1e9   : > { %v1725_v33 = vpop.f32.mrb[0].mxu0  ;;  %v1897_v34 = vpop.f32.mrb[0].mxu1 }
 0x1ea   : > { %1906 = vst [vmem:[%s2906_s14] sm:$0xff] %v1725_v33  ;;  %v1933_v35 = vmul.f32 %v1725_v33, %v1725_v33  ;;  %1908 = vst [vmem:[%s2906_s14 + $0x10] sm:$0xff] %v1897_v34  ;;  %v1727_v36 = vpop.f32.mrb[1].mxu0  ;;  %v1899_v37 = vpop.f32.mrb[1].mxu1  ;;  %v1935_v48 = vmul.f32 %v1897_v34, %v1897_v34 }
 0x1eb   : > { %1907 = vst [vmem:[%s2906_s14 + $0x8] sm:$0xff] %v1727_v36  ;;  %v1916_v38 = vadd.f32 %v1727_v36, %v1725_v33  ;;  %v1934_v39 = vmul.f32 %v1727_v36, %v1727_v36  ;;  %1909 = vst [vmem:[%s2906_s14 + $0x18] sm:$0xff] %v1899_v37  ;;  %v1729_v40 = vpop.f32.mrb[2].mxu0  ;;  %v1901_v41 = vpop.f32.mrb[2].mxu1  ;;  %v1936_v54 = vmul.f32 %v1899_v37, %v1899_v37 }
 0x1ec   : > { %1910 = vst [vmem:[%s2906_s14 + $0x20] sm:$0xff] %v1729_v40  ;;  %v1937_v42 = vmul.f32 %v1729_v40, %v1729_v40  ;;  %1912 = vst [vmem:[%s2906_s14 + $0x30] sm:$0xff] %v1901_v41  ;;  %v1731_v43 = vpop.f32.mrb[3].mxu0  ;;  %v1903_v44 = vpop.f32.mrb[3].mxu1  ;;  %v1939_v50 = vmul.f32 %v1901_v41, %v1901_v41 }
 0x1ed   : > { %1911 = vst [vmem:[%s2906_s14 + $0x28] sm:$0xff] %v1731_v43  ;;  %v1921_v45 = vadd.f32 %v1731_v43, %v1729_v40  ;;  %v1938_v46 = vmul.f32 %v1731_v43, %v1731_v43  ;;  %1913 = vst [vmem:[%s2906_s14 + $0x38] sm:$0xff] %v1903_v44  ;;  %v1917_v47 = vadd.f32 %v1916_v38, %v1897_v34 }
 0x1ee   : > { %v1941_v49 = vadd.f32 %v1934_v39, %v1933_v35  ;;  %v1940_v56 = vmul.f32 %v1903_v44, %v1903_v44 }
 0x1ef   : > { %v1946_v51 = vadd.f32 %v1938_v46, %v1937_v42  ;;  %v1918_v52 = vadd.f32 %v1917_v47, %v1899_v37  ;;  %v1922_v53 = vadd.f32 %v1921_v45, %v1901_v41 }
 0x1f0   : > { %v1942_v55 = vadd.f32 %v1941_v49, %v1935_v48 }
 0x1f1   : > { %1919 = vadd.xlane.f32.xlu0 %v1918_v52  ;;  %v1923_v57 = vadd.f32 %v1922_v53, %v1903_v44  ;;  %v1947_v58 = vadd.f32 %v1946_v51, %v1939_v50  ;;  %v1977_v9 = vld [vmem:[%s2906_s14] sm:$0xff] (%p3225_p7)  ;;  %v1981_v11 = vld [vmem:[%s2906_s14 + $0x10] sm:$0xff] (%p3225_p7) }
 0x1f2   : > { %v1943_v59 = vadd.f32 %v1942_v55, %v1936_v54  ;;  %v1979_v10 = vld [vmem:[%s2906_s14 + $0x8] sm:$0xff] (%p3225_p7)  ;;  %v1983_v12 = vld [vmem:[%s2906_s14 + $0x18] sm:$0xff] (%p3225_p7)  ;;  %1978 = vst [vmem:[%s1964_s12] sm:$0xff] (%p3225_p7), %v1977_v9  ;;  %1982 = vst [vmem:[%s1964_s12 + $0x10] sm:$0xff] (%p3225_p7), %v1981_v11 }
 0x1f3   : > { %v1948_v60 = vadd.f32 %v1947_v58, %v1940_v56  ;;  %v1985_v13 = vld [vmem:[%s2906_s14 + $0x20] sm:$0xff] (%p3225_p7)  ;;  %1980 = vst [vmem:[%s1964_s12 + $0x8] sm:$0xff] (%p3225_p7), %v1979_v10  ;;  %1984 = vst [vmem:[%s1964_s12 + $0x18] sm:$0xff] (%p3225_p7), %v1983_v12  ;;  %v1989_v15 = vld [vmem:[%s2906_s14 + $0x30] sm:$0xff] (%p3225_p7) }
 0x1f4   : > { %1944 = vadd.xlane.f32.xlu1 %v1943_v59  ;;  %v1987_v14 = vld [vmem:[%s2906_s14 + $0x28] sm:$0xff] (%p3225_p7)  ;;  %1986 = vst [vmem:[%s1964_s12 + $0x100] sm:$0xff] (%p3225_p7), %v1985_v13  ;;  %v1991_v16 = vld [vmem:[%s2906_s14 + $0x38] sm:$0xff] (%p3225_p7)  ;;  %1990 = vst [vmem:[%s1964_s12 + $0x110] sm:$0xff] (%p3225_p7), %v1989_v15 }
 0x1f5   : > { %1924 = vadd.xlane.f32.xlu0 %v1923_v57  ;;  %1988 = vst [vmem:[%s1964_s12 + $0x108] sm:$0xff] (%p3225_p7), %v1987_v14  ;;  %1992 = vst [vmem:[%s1964_s12 + $0x118] sm:$0xff] (%p3225_p7), %v1991_v16 }
 0x1f8   : > { %1949 = vadd.xlane.f32.xlu1 %v1948_v60 }
 0x27e   : > { %v1920_v62 = vpop.xlane.xlu0 %1919 }
 0x27f   : > { %v1926_v63 = vadd.f32 %v1920_v62, %v1914_v61 }
 0x281   : > { %1929 = vst.msk [vmem:[%s3220_s3] sm:$0xff] %vm1928_vm2, %v1926_v63  ;;  %v1945_v2 = vpop.xlane.xlu1 %1944 }
 0x282   : > { %v1951_v3 = vadd.f32 %v1945_v2, %v1931_v0  ;;  %v1925_v4 = vpop.xlane.xlu0 %1924  ;;  %1961 = sbr.rel (!%p3225_p7) target bundleno = 649 (0x289), region = 40 }
 0x283   : > { %v1927_v5 = vadd.f32 %v1925_v4, %v1915_v1 }
 0x284   : > { %1953 = vst.msk [vmem:[%s3221_s4] sm:$0xff] %vm1928_vm2, %v1951_v3 }
 0x285   : > { %1930 = vst.msk [vmem:[%s3220_s3 + $0x8] sm:$0xff] %vm1928_vm2, %v1927_v5  ;;  %v1950_v7 = vpop.xlane.xlu1 %1949 }
 0x286   : > { %v1952_v8 = vadd.f32 %v1950_v7, %v1932_v6 }
 0x288   : > { %1954 = vst.msk [vmem:[%s3221_s4 + $0x8] sm:$0xff] %vm1928_vm2, %v1952_v8 }
 0x289 PF: > { %p15_p10 = scmp.ge.s32.totalorder %s2833_s20, 10   ;;  %s3226_s15 = smov %s2770_s16 }
 0x28a   : > { %s3227_s16 = smov %s2774_s17  ;;  %s3228_s17 = smov %s2843_s23 }
 0x28b   : > { %s3229_s18 = smov %s2833_s20  ;;  %17 = sbr.rel (!%p15_p10) target bundleno = 3 (0x3), region = 111 }
 0x292   :  { %2020 = vsyncpa [#allocation3], 1 }
 0x293   :  { %2022 = vsyncpa [#allocation3 + $0x1], 1 }

// kernel: unet_forward.45
= control target key start
LH: loop header
LB: loop body
LE: loop exit
PB: predicated region body
PF: predicated region fallthrough
CT: control target
= control target key end

     0   :  { %s1696_s12 = smov 0   ;;  %s1698_s13 = smov 0   ;;  %s2105_s0 = inlined_call_operand.vmem [shape: bf16[432,4096], index: 0, kind: input, shape index: {}]   ;;  %s2106_s1 = inlined_call_operand.vmem [shape: bf16[3,432], index: 1, kind: input, shape index: {}]   ;;  %s2107_s2 = inlined_call_operand.vmem [shape: f32[3,1], index: 2, kind: input, shape index: {}]   ;;  %s2108_s3 = inlined_call_operand.vmem [shape: f32[3,4096], index: 3, kind: output, shape index: {}]  }
   0x1   :  { %s1700_s14 = smov 0  }
   0x2 LB: > { %s1324_s15 = sadd.s32 4294967295, %s1672_s14   ;;  %s1713_s16 = sadd.s32 1, %s1672_s14   ;;  %s1672_s14 = sphi %s1700_s14, %s2111_s14   ;;  %s1668_s13 = sphi %s1698_s13, %s2110_s13   ;;  %s1664_s12 = sphi %s1696_s12, %s2109_s12  }
   0x3   : > { %s17_s17 = ssub.s32 %s1672_s14, %s1713_s16  ;;  %s20_s18 = sadd.s32 1, %s1668_s13 }
   0x4   : > { %p18_p0 = scmp.eq.s32.totalorder %s17_s17, 0  ;;  %p27_p1 = scmp.ne.s32.totalorder %s1668_s13, %s1664_s12 }
   0x5   : > { %p28_p2 = scmp.eq.s32.totalorder %s1672_s14, 0  ;;  %p1327_p4 = scmp.ge.s32.totalorder %s1672_s14, 8 }
   0x6   : > { %s1722_s19 = scalar_select %p18_p0, %s1668_s13, %s20_s18  }
   0x7   : > { %p29_p3 = por %p28_p2, %p27_p1  ;;  %127 = sbr.rel (%p1327_p4) target bundleno = 72 (0x48), region = 24 }
   0xe   : > { %130 = sbr.rel (!%p29_p3) target bundleno = 72 (0x48), region = 28  ;;  %s132_s20 = sand.u32 (%p29_p3), 1, %s1668_s13  }
   0xf   : > { %s1445_s21 = sshll.u32 (%p29_p3), %s1672_s14, 4  ;;  %s1458_s22 = smul.u32 (%p29_p3), 864, %s132_s20 }
  0x10   : > { %s1730_s25 = scalar_lea.vmem (%p29_p3), %s2105_s0, %s1445_s21 }
  0x11   : > { %v150_v0 = vld [vmem:[%s1730_s25] sm:$0xff] (%p29_p3)  ;;  %v152_v1 = vld [vmem:[%s1730_s25 + $0x8] sm:$0xff] (%p29_p3)  ;;  %s1738_s26 = scalar_lea.vmem (%p29_p3), [#allocation2], %s1458_s22 }
  0x12   : > { %v154_v2 = vld [vmem:[%s1730_s25 + $0x80] sm:$0xff] (%p29_p3)  ;;  %v156_v3 = vld [vmem:[%s1730_s25 + $0x88] sm:$0xff] (%p29_p3)  ;;  %151 = vst [vmem:[%s1738_s26] sm:$0xff] (%p29_p3), %v150_v0  ;;  %153 = vst [vmem:[%s1738_s26 + $0x8] sm:$0xff] (%p29_p3), %v152_v1 }
  0x13   : > { %v158_v4 = vld [vmem:[%s1730_s25 + $0x100] sm:$0xff] (%p29_p3)  ;;  %v160_v5 = vld [vmem:[%s1730_s25 + $0x108] sm:$0xff] (%p29_p3)  ;;  %155 = vst [vmem:[%s1738_s26 + $0x10] sm:$0xff] (%p29_p3), %v154_v2  ;;  %157 = vst [vmem:[%s1738_s26 + $0x18] sm:$0xff] (%p29_p3), %v156_v3 }
  0x14   : > { %159 = vst [vmem:[%s1738_s26 + $0x20] sm:$0xff] (%p29_p3), %v158_v4  ;;  %161 = vst [vmem:[%s1738_s26 + $0x28] sm:$0xff] (%p29_p3), %v160_v5  ;;  %v162_v6 = vld [vmem:[%s1730_s25 + $0x180] sm:$0xff] (%p29_p3)  ;;  %v164_v7 = vld [vmem:[%s1730_s25 + $0x188] sm:$0xff] (%p29_p3) }
  0x15   : > { %v166_v8 = vld [vmem:[%s1730_s25 + $0x200] sm:$0xff]  ;;  %163 = vst [vmem:[%s1738_s26 + $0x30] sm:$0xff] %v162_v6  ;;  %165 = vst [vmem:[%s1738_s26 + $0x38] sm:$0xff] %v164_v7  ;;  %v168_v9 = vld [vmem:[%s1730_s25 + $0x208] sm:$0xff] }
  0x16   : > { %167 = vst [vmem:[%s1738_s26 + $0x40] sm:$0xff] %v166_v8  ;;  %v170_v10 = vld [vmem:[%s1730_s25 + $0x280] sm:$0xff]  ;;  %v172_v11 = vld [vmem:[%s1730_s25 + $0x288] sm:$0xff]  ;;  %169 = vst [vmem:[%s1738_s26 + $0x48] sm:$0xff] %v168_v9 }
  0x17   : > { %171 = vst [vmem:[%s1738_s26 + $0x50] sm:$0xff] %v170_v10  ;;  %173 = vst [vmem:[%s1738_s26 + $0x58] sm:$0xff] %v172_v11  ;;  %v174_v12 = vld [vmem:[%s1730_s25 + $0x300] sm:$0xff]  ;;  %v176_v13 = vld [vmem:[%s1730_s25 + $0x308] sm:$0xff] }
  0x18   : > { %v178_v14 = vld [vmem:[%s1730_s25 + $0x380] sm:$0xff]  ;;  %175 = vst [vmem:[%s1738_s26 + $0x60] sm:$0xff] %v174_v12  ;;  %177 = vst [vmem:[%s1738_s26 + $0x68] sm:$0xff] %v176_v13  ;;  %v180_v15 = vld [vmem:[%s1730_s25 + $0x388] sm:$0xff] }
  0x19   : > { %179 = vst [vmem:[%s1738_s26 + $0x70] sm:$0xff] %v178_v14  ;;  %v182_v16 = vld [vmem:[%s1730_s25 + $0x400] sm:$0xff]  ;;  %v184_v17 = vld [vmem:[%s1730_s25 + $0x408] sm:$0xff]  ;;  %181 = vst [vmem:[%s1738_s26 + $0x78] sm:$0xff] %v180_v15 }
  0x1a   : > { %183 = vst [vmem:[%s1738_s26 + $0x80] sm:$0xff] %v182_v16  ;;  %185 = vst [vmem:[%s1738_s26 + $0x88] sm:$0xff] %v184_v17  ;;  %v186_v18 = vld [vmem:[%s1730_s25 + $0x480] sm:$0xff]  ;;  %v188_v19 = vld [vmem:[%s1730_s25 + $0x488] sm:$0xff] }
  0x1b   : > { %v190_v20 = vld [vmem:[%s1730_s25 + $0x500] sm:$0xff]  ;;  %187 = vst [vmem:[%s1738_s26 + $0x90] sm:$0xff] %v186_v18  ;;  %189 = vst [vmem:[%s1738_s26 + $0x98] sm:$0xff] %v188_v19  ;;  %v192_v21 = vld [vmem:[%s1730_s25 + $0x508] sm:$0xff] }
  0x1c   : > { %191 = vst [vmem:[%s1738_s26 + $0xa0] sm:$0xff] %v190_v20  ;;  %v194_v22 = vld [vmem:[%s1730_s25 + $0x580] sm:$0xff]  ;;  %v196_v23 = vld [vmem:[%s1730_s25 + $0x588] sm:$0xff]  ;;  %193 = vst [vmem:[%s1738_s26 + $0xa8] sm:$0xff] %v192_v21 }
  0x1d   : > { %195 = vst [vmem:[%s1738_s26 + $0xb0] sm:$0xff] %v194_v22  ;;  %197 = vst [vmem:[%s1738_s26 + $0xb8] sm:$0xff] %v196_v23  ;;  %v198_v24 = vld [vmem:[%s1730_s25 + $0x600] sm:$0xff]  ;;  %v200_v25 = vld [vmem:[%s1730_s25 + $0x608] sm:$0xff] }
  0x1e   : > { %v202_v26 = vld [vmem:[%s1730_s25 + $0x680] sm:$0xff]  ;;  %199 = vst [vmem:[%s1738_s26 + $0xc0] sm:$0xff] %v198_v24  ;;  %201 = vst [vmem:[%s1738_s26 + $0xc8] sm:$0xff] %v200_v25  ;;  %v204_v27 = vld [vmem:[%s1730_s25 + $0x688] sm:$0xff] }
  0x1f   : > { %203 = vst [vmem:[%s1738_s26 + $0xd0] sm:$0xff] %v202_v26  ;;  %v206_v28 = vld [vmem:[%s1730_s25 + $0x700] sm:$0xff]  ;;  %v208_v29 = vld [vmem:[%s1730_s25 + $0x708] sm:$0xff]  ;;  %205 = vst [vmem:[%s1738_s26 + $0xd8] sm:$0xff] %v204_v27 }
  0x20   : > { %207 = vst [vmem:[%s1738_s26 + $0xe0] sm:$0xff] %v206_v28  ;;  %209 = vst [vmem:[%s1738_s26 + $0xe8] sm:$0xff] %v208_v29  ;;  %v210_v30 = vld [vmem:[%s1730_s25 + $0x780] sm:$0xff]  ;;  %v212_v31 = vld [vmem:[%s1730_s25 + $0x788] sm:$0xff] }
  0x21   : > { %v214_v32 = vld [vmem:[%s1730_s25 + $0x800] sm:$0xff]  ;;  %211 = vst [vmem:[%s1738_s26 + $0xf0] sm:$0xff] %v210_v30  ;;  %213 = vst [vmem:[%s1738_s26 + $0xf8] sm:$0xff] %v212_v31  ;;  %v216_v33 = vld [vmem:[%s1730_s25 + $0x808] sm:$0xff] }
  0x22   : > { %215 = vst [vmem:[%s1738_s26 + $0x100] sm:$0xff] %v214_v32  ;;  %v218_v34 = vld [vmem:[%s1730_s25 + $0x880] sm:$0xff]  ;;  %v220_v35 = vld [vmem:[%s1730_s25 + $0x888] sm:$0xff]  ;;  %217 = vst [vmem:[%s1738_s26 + $0x108] sm:$0xff] %v216_v33 }
  0x23   : > { %219 = vst [vmem:[%s1738_s26 + $0x110] sm:$0xff] %v218_v34  ;;  %221 = vst [vmem:[%s1738_s26 + $0x118] sm:$0xff] %v220_v35  ;;  %v222_v36 = vld [vmem:[%s1730_s25 + $0x900] sm:$0xff]  ;;  %v224_v37 = vld [vmem:[%s1730_s25 + $0x908] sm:$0xff] }
  0x24   : > { %v226_v38 = vld [vmem:[%s1730_s25 + $0x980] sm:$0xff]  ;;  %223 = vst [vmem:[%s1738_s26 + $0x120] sm:$0xff] %v222_v36  ;;  %225 = vst [vmem:[%s1738_s26 + $0x128] sm:$0xff] %v224_v37  ;;  %v228_v39 = vld [vmem:[%s1730_s25 + $0x988] sm:$0xff] }
  0x25   : > { %227 = vst [vmem:[%s1738_s26 + $0x130] sm:$0xff] %v226_v38  ;;  %v230_v40 = vld [vmem:[%s1730_s25 + $0xa00] sm:$0xff]  ;;  %v232_v41 = vld [vmem:[%s1730_s25 + $0xa08] sm:$0xff]  ;;  %229 = vst [vmem:[%s1738_s26 + $0x138] sm:$0xff] %v228_v39 }
  0x26   : > { %231 = vst [vmem:[%s1738_s26 + $0x140] sm:$0xff] %v230_v40  ;;  %233 = vst [vmem:[%s1738_s26 + $0x148] sm:$0xff] %v232_v41  ;;  %v234_v42 = vld [vmem:[%s1730_s25 + $0xa80] sm:$0xff]  ;;  %v236_v43 = vld [vmem:[%s1730_s25 + $0xa88] sm:$0xff] }
  0x27   : > { %v238_v44 = vld [vmem:[%s1730_s25 + $0xb00] sm:$0xff]  ;;  %235 = vst [vmem:[%s1738_s26 + $0x150] sm:$0xff] %v234_v42  ;;  %237 = vst [vmem:[%s1738_s26 + $0x158] sm:$0xff] %v236_v43  ;;  %v240_v45 = vld [vmem:[%s1730_s25 + $0xb08] sm:$0xff] }
  0x28   : > { %239 = vst [vmem:[%s1738_s26 + $0x160] sm:$0xff] %v238_v44  ;;  %v242_v46 = vld [vmem:[%s1730_s25 + $0xb80] sm:$0xff]  ;;  %v244_v47 = vld [vmem:[%s1730_s25 + $0xb88] sm:$0xff]  ;;  %241 = vst [vmem:[%s1738_s26 + $0x168] sm:$0xff] %v240_v45 }
  0x29   : > { %243 = vst [vmem:[%s1738_s26 + $0x170] sm:$0xff] %v242_v46  ;;  %245 = vst [vmem:[%s1738_s26 + $0x178] sm:$0xff] %v244_v47  ;;  %v246_v48 = vld [vmem:[%s1730_s25 + $0xc00] sm:$0xff]  ;;  %v248_v49 = vld [vmem:[%s1730_s25 + $0xc08] sm:$0xff] }
  0x2a   : > { %v250_v50 = vld [vmem:[%s1730_s25 + $0xc80] sm:$0xff]  ;;  %247 = vst [vmem:[%s1738_s26 + $0x180] sm:$0xff] %v246_v48  ;;  %249 = vst [vmem:[%s1738_s26 + $0x188] sm:$0xff] %v248_v49  ;;  %v252_v51 = vld [vmem:[%s1730_s25 + $0xc88] sm:$0xff] }
  0x2b   : > { %251 = vst [vmem:[%s1738_s26 + $0x190] sm:$0xff] %v250_v50  ;;  %v254_v52 = vld [vmem:[%s1730_s25 + $0xd00] sm:$0xff]  ;;  %v256_v53 = vld [vmem:[%s1730_s25 + $0xd08] sm:$0xff]  ;;  %253 = vst [vmem:[%s1738_s26 + $0x198] sm:$0xff] %v252_v51 }
  0x2c   : > { %255 = vst [vmem:[%s1738_s26 + $0x1a0] sm:$0xff] %v254_v52  ;;  %257 = vst [vmem:[%s1738_s26 + $0x1a8] sm:$0xff] %v256_v53  ;;  %v258_v54 = vld [vmem:[%s1730_s25 + $0xd80] sm:$0xff]  ;;  %v260_v55 = vld [vmem:[%s1730_s25 + $0xd88] sm:$0xff] }
  0x2d   : > { %v262_v56 = vld [vmem:[%s1730_s25 + $0xe00] sm:$0xff]  ;;  %259 = vst [vmem:[%s1738_s26 + $0x1b0] sm:$0xff] %v258_v54  ;;  %261 = vst [vmem:[%s1738_s26 + $0x1b8] sm:$0xff] %v260_v55  ;;  %v264_v57 = vld [vmem:[%s1730_s25 + $0xe08] sm:$0xff] }
  0x2e   : > { %263 = vst [vmem:[%s1738_s26 + $0x1c0] sm:$0xff] %v262_v56  ;;  %v266_v58 = vld [vmem:[%s1730_s25 + $0xe80] sm:$0xff]  ;;  %v268_v59 = vld [vmem:[%s1730_s25 + $0xe88] sm:$0xff]  ;;  %265 = vst [vmem:[%s1738_s26 + $0x1c8] sm:$0xff] %v264_v57 }
  0x2f   : > { %267 = vst [vmem:[%s1738_s26 + $0x1d0] sm:$0xff] %v266_v58  ;;  %269 = vst [vmem:[%s1738_s26 + $0x1d8] sm:$0xff] %v268_v59  ;;  %v270_v60 = vld [vmem:[%s1730_s25 + $0xf00] sm:$0xff]  ;;  %v272_v61 = vld [vmem:[%s1730_s25 + $0xf08] sm:$0xff] }
  0x30   : > { %v274_v62 = vld [vmem:[%s1730_s25 + $0xf80] sm:$0xff]  ;;  %271 = vst [vmem:[%s1738_s26 + $0x1e0] sm:$0xff] %v270_v60  ;;  %273 = vst [vmem:[%s1738_s26 + $0x1e8] sm:$0xff] %v272_v61  ;;  %v276_v63 = vld [vmem:[%s1730_s25 + $0xf88] sm:$0xff] }
  0x31   : > { %275 = vst [vmem:[%s1738_s26 + $0x1f0] sm:$0xff] %v274_v62  ;;  %v278_v0 = vld [vmem:[%s1730_s25 + $0x1000] sm:$0xff]  ;;  %v280_v1 = vld [vmem:[%s1730_s25 + $0x1008] sm:$0xff]  ;;  %277 = vst [vmem:[%s1738_s26 + $0x1f8] sm:$0xff] %v276_v63 }
  0x32   : > { %279 = vst [vmem:[%s1738_s26 + $0x200] sm:$0xff] %v278_v0  ;;  %281 = vst [vmem:[%s1738_s26 + $0x208] sm:$0xff] %v280_v1  ;;  %v282_v2 = vld [vmem:[%s1730_s25 + $0x1080] sm:$0xff]  ;;  %v284_v3 = vld [vmem:[%s1730_s25 + $0x1088] sm:$0xff] }
  0x33   : > { %v286_v4 = vld [vmem:[%s1730_s25 + $0x1100] sm:$0xff]  ;;  %283 = vst [vmem:[%s1738_s26 + $0x210] sm:$0xff] %v282_v2  ;;  %285 = vst [vmem:[%s1738_s26 + $0x218] sm:$0xff] %v284_v3  ;;  %v288_v5 = vld [vmem:[%s1730_s25 + $0x1108] sm:$0xff] }
  0x34   : > { %287 = vst [vmem:[%s1738_s26 + $0x220] sm:$0xff] %v286_v4  ;;  %v290_v6 = vld [vmem:[%s1730_s25 + $0x1180] sm:$0xff]  ;;  %v292_v7 = vld [vmem:[%s1730_s25 + $0x1188] sm:$0xff]  ;;  %289 = vst [vmem:[%s1738_s26 + $0x228] sm:$0xff] %v288_v5 }
  0x35   : > { %291 = vst [vmem:[%s1738_s26 + $0x230] sm:$0xff] %v290_v6  ;;  %293 = vst [vmem:[%s1738_s26 + $0x238] sm:$0xff] %v292_v7  ;;  %v294_v8 = vld [vmem:[%s1730_s25 + $0x1200] sm:$0xff]  ;;  %v296_v9 = vld [vmem:[%s1730_s25 + $0x1208] sm:$0xff] }
  0x36   : > { %v298_v10 = vld [vmem:[%s1730_s25 + $0x1280] sm:$0xff]  ;;  %295 = vst [vmem:[%s1738_s26 + $0x240] sm:$0xff] %v294_v8  ;;  %297 = vst [vmem:[%s1738_s26 + $0x248] sm:$0xff] %v296_v9  ;;  %v300_v11 = vld [vmem:[%s1730_s25 + $0x1288] sm:$0xff] }
  0x37   : > { %299 = vst [vmem:[%s1738_s26 + $0x250] sm:$0xff] %v298_v10  ;;  %v302_v12 = vld [vmem:[%s1730_s25 + $0x1300] sm:$0xff]  ;;  %v304_v13 = vld [vmem:[%s1730_s25 + $0x1308] sm:$0xff]  ;;  %301 = vst [vmem:[%s1738_s26 + $0x258] sm:$0xff] %v300_v11 }
  0x38   : > { %303 = vst [vmem:[%s1738_s26 + $0x260] sm:$0xff] %v302_v12  ;;  %305 = vst [vmem:[%s1738_s26 + $0x268] sm:$0xff] %v304_v13  ;;  %v306_v14 = vld [vmem:[%s1730_s25 + $0x1380] sm:$0xff]  ;;  %v308_v15 = vld [vmem:[%s1730_s25 + $0x1388] sm:$0xff] }
  0x39   : > { %v310_v16 = vld [vmem:[%s1730_s25 + $0x1400] sm:$0xff]  ;;  %307 = vst [vmem:[%s1738_s26 + $0x270] sm:$0xff] %v306_v14  ;;  %309 = vst [vmem:[%s1738_s26 + $0x278] sm:$0xff] %v308_v15  ;;  %v312_v17 = vld [vmem:[%s1730_s25 + $0x1408] sm:$0xff] }
  0x3a   : > { %311 = vst [vmem:[%s1738_s26 + $0x280] sm:$0xff] %v310_v16  ;;  %v314_v18 = vld [vmem:[%s1730_s25 + $0x1480] sm:$0xff]  ;;  %v316_v19 = vld [vmem:[%s1730_s25 + $0x1488] sm:$0xff]  ;;  %313 = vst [vmem:[%s1738_s26 + $0x288] sm:$0xff] %v312_v17 }
  0x3b   : > { %315 = vst [vmem:[%s1738_s26 + $0x290] sm:$0xff] %v314_v18  ;;  %317 = vst [vmem:[%s1738_s26 + $0x298] sm:$0xff] %v316_v19  ;;  %v318_v20 = vld [vmem:[%s1730_s25 + $0x1500] sm:$0xff]  ;;  %v320_v21 = vld [vmem:[%s1730_s25 + $0x1508] sm:$0xff] }
  0x3c   : > { %v322_v22 = vld [vmem:[%s1730_s25 + $0x1580] sm:$0xff]  ;;  %319 = vst [vmem:[%s1738_s26 + $0x2a0] sm:$0xff] %v318_v20  ;;  %321 = vst [vmem:[%s1738_s26 + $0x2a8] sm:$0xff] %v320_v21  ;;  %v324_v23 = vld [vmem:[%s1730_s25 + $0x1588] sm:$0xff] }
  0x3d   : > { %323 = vst [vmem:[%s1738_s26 + $0x2b0] sm:$0xff] %v322_v22  ;;  %v326_v24 = vld [vmem:[%s1730_s25 + $0x1600] sm:$0xff]  ;;  %v328_v25 = vld [vmem:[%s1730_s25 + $0x1608] sm:$0xff]  ;;  %325 = vst [vmem:[%s1738_s26 + $0x2b8] sm:$0xff] %v324_v23 }
  0x3e   : > { %327 = vst [vmem:[%s1738_s26 + $0x2c0] sm:$0xff] %v326_v24  ;;  %329 = vst [vmem:[%s1738_s26 + $0x2c8] sm:$0xff] %v328_v25  ;;  %v330_v26 = vld [vmem:[%s1730_s25 + $0x1680] sm:$0xff]  ;;  %v332_v27 = vld [vmem:[%s1730_s25 + $0x1688] sm:$0xff] }
  0x3f   : > { %v334_v28 = vld [vmem:[%s1730_s25 + $0x1700] sm:$0xff]  ;;  %331 = vst [vmem:[%s1738_s26 + $0x2d0] sm:$0xff] %v330_v26  ;;  %333 = vst [vmem:[%s1738_s26 + $0x2d8] sm:$0xff] %v332_v27  ;;  %v336_v29 = vld [vmem:[%s1730_s25 + $0x1708] sm:$0xff] }
  0x40   : > { %335 = vst [vmem:[%s1738_s26 + $0x2e0] sm:$0xff] %v334_v28  ;;  %v338_v30 = vld [vmem:[%s1730_s25 + $0x1780] sm:$0xff]  ;;  %v340_v31 = vld [vmem:[%s1730_s25 + $0x1788] sm:$0xff]  ;;  %337 = vst [vmem:[%s1738_s26 + $0x2e8] sm:$0xff] %v336_v29 }
  0x41   : > { %339 = vst [vmem:[%s1738_s26 + $0x2f0] sm:$0xff] %v338_v30  ;;  %341 = vst [vmem:[%s1738_s26 + $0x2f8] sm:$0xff] %v340_v31  ;;  %v342_v32 = vld [vmem:[%s1730_s25 + $0x1800] sm:$0xff]  ;;  %v344_v33 = vld [vmem:[%s1730_s25 + $0x1808] sm:$0xff] }
  0x42   : > { %v346_v34 = vld [vmem:[%s1730_s25 + $0x1880] sm:$0xff]  ;;  %343 = vst [vmem:[%s1738_s26 + $0x300] sm:$0xff] %v342_v32  ;;  %345 = vst [vmem:[%s1738_s26 + $0x308] sm:$0xff] %v344_v33  ;;  %v348_v35 = vld [vmem:[%s1730_s25 + $0x1888] sm:$0xff] }
  0x43   : > { %347 = vst [vmem:[%s1738_s26 + $0x310] sm:$0xff] %v346_v34  ;;  %v350_v36 = vld [vmem:[%s1730_s25 + $0x1900] sm:$0xff]  ;;  %v352_v37 = vld [vmem:[%s1730_s25 + $0x1908] sm:$0xff]  ;;  %349 = vst [vmem:[%s1738_s26 + $0x318] sm:$0xff] %v348_v35 }
  0x44   : > { %351 = vst [vmem:[%s1738_s26 + $0x320] sm:$0xff] %v350_v36  ;;  %353 = vst [vmem:[%s1738_s26 + $0x328] sm:$0xff] %v352_v37  ;;  %v354_v38 = vld [vmem:[%s1730_s25 + $0x1980] sm:$0xff]  ;;  %v356_v39 = vld [vmem:[%s1730_s25 + $0x1988] sm:$0xff] }
  0x45   : > { %v358_v40 = vld [vmem:[%s1730_s25 + $0x1a00] sm:$0xff]  ;;  %355 = vst [vmem:[%s1738_s26 + $0x330] sm:$0xff] %v354_v38  ;;  %357 = vst [vmem:[%s1738_s26 + $0x338] sm:$0xff] %v356_v39  ;;  %v360_v41 = vld [vmem:[%s1730_s25 + $0x1a08] sm:$0xff] }
  0x46   : > { %359 = vst [vmem:[%s1738_s26 + $0x340] sm:$0xff] %v358_v40  ;;  %v362_v42 = vld [vmem:[%s1730_s25 + $0x1a80] sm:$0xff]  ;;  %v364_v43 = vld [vmem:[%s1730_s25 + $0x1a88] sm:$0xff]  ;;  %361 = vst [vmem:[%s1738_s26 + $0x348] sm:$0xff] %v360_v41 }
  0x47   : > { %363 = vst [vmem:[%s1738_s26 + $0x350] sm:$0xff] %v362_v42  ;;  %365 = vst [vmem:[%s1738_s26 + $0x358] sm:$0xff] %v364_v43 }
  0x48 PF: > { %p1330_p5 = scmp.ge.s32.totalorder %s1672_s14, 1  ;;  %p370_p6 = scmp.lt.s32.totalorder %s1672_s14, 9 }
  0x4a   : > { %p371_p7 = pnand %p1330_p5, %p370_p6 }
  0x4b   : > { %s377_s27 = sand.u32 (!%p371_p7), 1, %s1664_s12   ;;  %v528_v44 = vlaneseq (!%p371_p7)  ;;  %v1674_v45 = vmov (!%p371_p7), 1983009808   ;;  %v1675_v47 = vmov (!%p371_p7), 0   ;;  %v517_v48 = vld [vmem:[%s2107_s2] sm:$0x7] (!%p371_p7) }
  0x4c   : > { %374 = sbr.rel (%p371_p7) target bundleno = 408 (0x198), region = 51  ;;  %v526_v46 = vunpack.c.l.s4 (!%p371_p7), %v1674_v45  ;;  %1486 = vset.pattern.permute.xlu0 (!%p371_p7), %v1675_v47  ;;  %v1959_v50 = vld [vmem:[%s2106_s1] sm:$0xff] (!%p371_p7)  ;;  %vm1084_vm0 = vcmask (!%p371_p7), 392192   ;;  %s1331_s7 = sshll.u32 (!%p371_p7), %s1324_s15, 2 }
  0x4d   : > { %s1459_s28 = smul.u32 (!%p371_p7), 864, %s377_s27  ;;  %v529_v49 = vshrl.u32 (!%p371_p7), %v528_v44, 7  ;;  %520 = vperm.xlu0 (!%p371_p7), %1486, %v517_v48   ;;  %p402_p8 = scmp.lt.s32.totalorder (!%p371_p7), %s1331_s7, 31 }
  0x4e   : > { %v527_v51 = vunpack.c.0.s8 (!%p371_p7), %v526_v46 }
  0x4f   : > { %s1961_s6 = scalar_lea.vmem (!%p371_p7), [#allocation2], %s1459_s28 }
  0x50   : > { %v1487_v52 = vld [vmem:[%s1961_s6 + $0x4] ss:$16 sps:$4 sm:$0xff] (!%p371_p7)   ;;  %v1489_v53 = vld [vmem:[%s1961_s6 + $0xc] ss:$16 sps:$4 sm:$0xff] (!%p371_p7)   ;;  %v1965_v54 = vsub.s32 (!%p371_p7), %v527_v51, %v529_v49  ;;  %v1491_v55 = vld [vmem:[%s1961_s6] ss:$16 sps:$4 sm:$0xff] (!%p371_p7)  }
  0x51   : > { %1088 = vmatprep.subr.bf16.mxu0 (!%p371_p7), %v1487_v52  ;;  %v1492_v56 = vld [vmem:[%s1961_s6 + $0x8] ss:$16 sps:$4 sm:$0xff] (!%p371_p7)   ;;  %1170 = vmatprep.subr.bf16.mxu1 (!%p371_p7), %v1489_v53  ;;  %v1493_v57 = vld [vmem:[%s1961_s6 + $0x24] ss:$16 sps:$4 sm:$0xff] (!%p371_p7)   ;;  %v1495_v59 = vld [vmem:[%s1961_s6 + $0x2c] ss:$16 sps:$4 sm:$0xff] (!%p371_p7)  }
  0x52   : > { %v1972_v58 = vrot.slane (!%p371_p7), %v1959_v50, %v1965_v54  ;;  %1089 = vmatpush1.bf16.msra.mxu0 (!%p371_p7), %v1491_v55  ;;  %1171 = vmatpush1.bf16.msra.mxu1 (!%p371_p7), %v1492_v56  ;;  %v1497_v60 = vld [vmem:[%s1961_s6 + $0x20] ss:$16 sps:$4 sm:$0xff] (!%p371_p7)   ;;  %v1498_v61 = vld [vmem:[%s1961_s6 + $0x28] ss:$16 sps:$4 sm:$0xff] (!%p371_p7)   ;;  %v1499_v63 = vld [vmem:[%s1961_s6 + $0x44] ss:$16 sps:$4 sm:$0xff] (!%p371_p7)   ;;  %v524_v55 = vcombine.high (!%p371_p7), %v1959_v50, %v1959_v50 }
  0x53   : > { %1090 = vmatprep.subr.bf16.mxu0 %v1493_v57  ;;  %1172 = vmatprep.subr.bf16.mxu1 %v1495_v59  ;;  %v1501_v0 = vld [vmem:[%s1961_s6 + $0x4c] ss:$16 sps:$4 sm:$0xff]   ;;  %v1503_v1 = vld [vmem:[%s1961_s6 + $0x40] ss:$16 sps:$4 sm:$0xff]   ;;  %v1504_v2 = vld [vmem:[%s1961_s6 + $0x48] ss:$16 sps:$4 sm:$0xff]  }
  0x54   : > { %v539_v62 = vcombine.high %v1972_v58, %v1972_v58  ;;  %v1505_v3 = vld [vmem:[%s1961_s6 + $0x64] ss:$16 sps:$4 sm:$0xff]   ;;  %v1507_v4 = vld [vmem:[%s1961_s6 + $0x6c] ss:$16 sps:$4 sm:$0xff]   ;;  %v1509_v5 = vld [vmem:[%s1961_s6 + $0x60] ss:$16 sps:$4 sm:$0xff]  }
  0x55   : > { %v1510_v6 = vld [vmem:[%s1961_s6 + $0x68] ss:$16 sps:$4 sm:$0xff]   ;;  %v1511_v7 = vld [vmem:[%s1961_s6 + $0x84] ss:$16 sps:$4 sm:$0xff]   ;;  %v1513_v8 = vld [vmem:[%s1961_s6 + $0x8c] ss:$16 sps:$4 sm:$0xff]  }
  0x56   : > { %1120 = vmatprep.mubr.bf16.mxu0 %v539_v62  ;;  %1202 = vmatprep.mubr.bf16.mxu1 %v539_v62  ;;  %v1515_v9 = vld [vmem:[%s1961_s6 + $0x80] ss:$16 sps:$4 sm:$0xff]   ;;  %v1516_v10 = vld [vmem:[%s1961_s6 + $0x88] ss:$16 sps:$4 sm:$0xff]   ;;  %v1517_v11 = vld [vmem:[%s1961_s6 + $0xa4] ss:$16 sps:$4 sm:$0xff]  }
  0x57   : > { %1091 = vmatpush1.bf16.msra.mxu0 %v1497_v60  ;;  %1173 = vmatpush1.bf16.msra.mxu1 %v1498_v61  ;;  %v1519_v12 = vld [vmem:[%s1961_s6 + $0xac] ss:$16 sps:$4 sm:$0xff]   ;;  %v1521_v13 = vld [vmem:[%s1961_s6 + $0xa0] ss:$16 sps:$4 sm:$0xff]   ;;  %v1522_v14 = vld [vmem:[%s1961_s6 + $0xa8] ss:$16 sps:$4 sm:$0xff]   ;;  %v2040_v61 = vrot.slane %v524_v55, %v1965_v54 }
  0x58   : > { %1092 = vmatprep.subr.bf16.mxu0 %v1499_v63  ;;  %1174 = vmatprep.subr.bf16.mxu1 %v1501_v0  ;;  %v1523_v15 = vld [vmem:[%s1961_s6 + $0xc4] ss:$16 sps:$4 sm:$0xff]   ;;  %v1525_v16 = vld [vmem:[%s1961_s6 + $0xcc] ss:$16 sps:$4 sm:$0xff]   ;;  %v1527_v17 = vld [vmem:[%s1961_s6 + $0xc0] ss:$16 sps:$4 sm:$0xff]  }
  0x59   : > { %v1528_v18 = vld [vmem:[%s1961_s6 + $0xc8] ss:$16 sps:$4 sm:$0xff]   ;;  %v1529_v19 = vld [vmem:[%s1961_s6 + $0xe4] ss:$16 sps:$4 sm:$0xff]   ;;  %v1531_v20 = vld [vmem:[%s1961_s6 + $0xec] ss:$16 sps:$4 sm:$0xff]  }
  0x5a   : > { %v1533_v21 = vld [vmem:[%s1961_s6 + $0xe0] ss:$16 sps:$4 sm:$0xff]   ;;  %v1534_v22 = vld [vmem:[%s1961_s6 + $0xe8] ss:$16 sps:$4 sm:$0xff]   ;;  %v1535_v23 = vld [vmem:[%s1961_s6 + $0x104] ss:$16 sps:$4 sm:$0xff]  }
  0x5b   : > { %1093 = vmatpush1.bf16.msra.mxu0 %v1503_v1  ;;  %1175 = vmatpush1.bf16.msra.mxu1 %v1504_v2  ;;  %v1537_v24 = vld [vmem:[%s1961_s6 + $0x10c] ss:$16 sps:$4 sm:$0xff]   ;;  %v1539_v25 = vld [vmem:[%s1961_s6 + $0x100] ss:$16 sps:$4 sm:$0xff]   ;;  %v1540_v26 = vld [vmem:[%s1961_s6 + $0x108] ss:$16 sps:$4 sm:$0xff]   ;;  %v540_v1 = vcombine.high %v2040_v61, %v2040_v61 }
  0x5c   : > { %1094 = vmatprep.subr.bf16.mxu0 %v1505_v3  ;;  %1176 = vmatprep.subr.bf16.mxu1 %v1507_v4  ;;  %v1541_v27 = vld [vmem:[%s1961_s6 + $0x124] ss:$16 sps:$4 sm:$0xff]   ;;  %v1543_v28 = vld [vmem:[%s1961_s6 + $0x12c] ss:$16 sps:$4 sm:$0xff]   ;;  %v1545_v29 = vld [vmem:[%s1961_s6 + $0x120] ss:$16 sps:$4 sm:$0xff]  }
  0x5d   : > { %v1546_v30 = vld [vmem:[%s1961_s6 + $0x128] ss:$16 sps:$4 sm:$0xff]   ;;  %v1547_v31 = vld [vmem:[%s1961_s6 + $0x144] ss:$16 sps:$4 sm:$0xff]   ;;  %v1549_v32 = vld [vmem:[%s1961_s6 + $0x14c] ss:$16 sps:$4 sm:$0xff]  }
  0x5e   : > { %v1551_v33 = vld [vmem:[%s1961_s6 + $0x140] ss:$16 sps:$4 sm:$0xff]   ;;  %v1552_v34 = vld [vmem:[%s1961_s6 + $0x148] ss:$16 sps:$4 sm:$0xff]   ;;  %v1553_v35 = vld [vmem:[%s1961_s6 + $0x164] ss:$16 sps:$4 sm:$0xff]  }
  0x5f   : > { %1095 = vmatpush1.bf16.msra.mxu0 %v1509_v5  ;;  %1177 = vmatpush1.bf16.msra.mxu1 %v1510_v6  ;;  %v1555_v36 = vld [vmem:[%s1961_s6 + $0x16c] ss:$16 sps:$4 sm:$0xff]   ;;  %v1557_v37 = vld [vmem:[%s1961_s6 + $0x160] ss:$16 sps:$4 sm:$0xff]   ;;  %v1558_v38 = vld [vmem:[%s1961_s6 + $0x168] ss:$16 sps:$4 sm:$0xff]  }
  0x60   : > { %1096 = vmatprep.subr.bf16.mxu0 %v1511_v7  ;;  %1178 = vmatprep.subr.bf16.mxu1 %v1513_v8  ;;  %v1559_v39 = vld [vmem:[%s1961_s6 + $0x184] ss:$16 sps:$4 sm:$0xff]   ;;  %v1561_v40 = vld [vmem:[%s1961_s6 + $0x18c] ss:$16 sps:$4 sm:$0xff]   ;;  %v1563_v41 = vld [vmem:[%s1961_s6 + $0x180] ss:$16 sps:$4 sm:$0xff]  }
  0x61   : > { %v1564_v42 = vld [vmem:[%s1961_s6 + $0x188] ss:$16 sps:$4 sm:$0xff]   ;;  %v1565_v43 = vld [vmem:[%s1961_s6 + $0x1a4] ss:$16 sps:$4 sm:$0xff]   ;;  %v1567_v44 = vld [vmem:[%s1961_s6 + $0x1ac] ss:$16 sps:$4 sm:$0xff]  }
  0x62   : > { %v1569_v45 = vld [vmem:[%s1961_s6 + $0x1a0] ss:$16 sps:$4 sm:$0xff]   ;;  %v1570_v46 = vld [vmem:[%s1961_s6 + $0x1a8] ss:$16 sps:$4 sm:$0xff]   ;;  %v1571_v47 = vld [vmem:[%s1961_s6 + $0x1c4] ss:$16 sps:$4 sm:$0xff]  }
  0x63   : > { %1097 = vmatpush1.bf16.msra.mxu0 %v1515_v9  ;;  %1179 = vmatpush1.bf16.msra.mxu1 %v1516_v10  ;;  %v1573_v48 = vld [vmem:[%s1961_s6 + $0x1cc] ss:$16 sps:$4 sm:$0xff]   ;;  %v1575_v49 = vld [vmem:[%s1961_s6 + $0x1c0] ss:$16 sps:$4 sm:$0xff]   ;;  %v1576_v51 = vld [vmem:[%s1961_s6 + $0x1c8] ss:$16 sps:$4 sm:$0xff]  }
  0x64   : > { %1098 = vmatprep.subr.bf16.mxu0 %v1517_v11  ;;  %1180 = vmatprep.subr.bf16.mxu1 %v1519_v12  ;;  %v1577_v52 = vld [vmem:[%s1961_s6 + $0x1e4] ss:$16 sps:$4 sm:$0xff]   ;;  %v1579_v53 = vld [vmem:[%s1961_s6 + $0x1ec] ss:$16 sps:$4 sm:$0xff]   ;;  %v1581_v56 = vld [vmem:[%s1961_s6 + $0x1e0] ss:$16 sps:$4 sm:$0xff]  }
  0x65   : > { %v1582_v57 = vld [vmem:[%s1961_s6 + $0x1e8] ss:$16 sps:$4 sm:$0xff]   ;;  %v1586_v59 = vld [vmem:[%s1961_s6 + $0x204] ss:$16 sps:$4 sm:$0xff]   ;;  %v1589_v60 = vld [vmem:[%s1961_s6 + $0x20c] ss:$16 sps:$4 sm:$0xff]  }
  0x66   : > { %v1584_v62 = vld [vmem:[%s1961_s6 + $0x200] ss:$16 sps:$4 sm:$0xff]   ;;  %v1587_v63 = vld [vmem:[%s1961_s6 + $0x208] ss:$16 sps:$4 sm:$0xff]   ;;  %v1592_v50 = vld [vmem:[%s1961_s6 + $0x224] ss:$16 sps:$4 sm:$0xff]  }
  0x67   : > { %1099 = vmatpush1.bf16.msra.mxu0 %v1521_v13  ;;  %1181 = vmatpush1.bf16.msra.mxu1 %v1522_v14  ;;  %v1595_v0 = vld [vmem:[%s1961_s6 + $0x22c] ss:$16 sps:$4 sm:$0xff]   ;;  %v1590_v54 = vld [vmem:[%s1961_s6 + $0x220] ss:$16 sps:$4 sm:$0xff]   ;;  %v1593_v2 = vld [vmem:[%s1961_s6 + $0x228] ss:$16 sps:$4 sm:$0xff]  }
  0x68   : > { %1100 = vmatprep.subr.bf16.mxu0 %v1523_v15  ;;  %1182 = vmatprep.subr.bf16.mxu1 %v1525_v16  ;;  %v1598_v3 = vld [vmem:[%s1961_s6 + $0x244] ss:$16 sps:$4 sm:$0xff]   ;;  %v1601_v4 = vld [vmem:[%s1961_s6 + $0x24c] ss:$16 sps:$4 sm:$0xff]   ;;  %v1599_v5 = vld [vmem:[%s1961_s6 + $0x248] ss:$16 sps:$4 sm:$0xff]  }
  0x69   : > { %v1604_v6 = vld [vmem:[%s1961_s6 + $0x264] ss:$16 sps:$4 sm:$0xff]   ;;  %v1607_v7 = vld [vmem:[%s1961_s6 + $0x26c] ss:$16 sps:$4 sm:$0xff]   ;;  %v1602_v8 = vld [vmem:[%s1961_s6 + $0x260] ss:$16 sps:$4 sm:$0xff]  }
  0x6a   : > { %v1605_v9 = vld [vmem:[%s1961_s6 + $0x268] ss:$16 sps:$4 sm:$0xff]   ;;  %v1610_v10 = vld [vmem:[%s1961_s6 + $0x284] ss:$16 sps:$4 sm:$0xff]   ;;  %v1613_v11 = vld [vmem:[%s1961_s6 + $0x28c] ss:$16 sps:$4 sm:$0xff]  }
  0x6b   : > { %1101 = vmatpush1.bf16.msra.mxu0 %v1527_v17  ;;  %1183 = vmatpush1.bf16.msra.mxu1 %v1528_v18  ;;  %v1608_v12 = vld [vmem:[%s1961_s6 + $0x280] ss:$16 sps:$4 sm:$0xff]   ;;  %v1611_v13 = vld [vmem:[%s1961_s6 + $0x288] ss:$16 sps:$4 sm:$0xff]   ;;  %v1616_v14 = vld [vmem:[%s1961_s6 + $0x2a4] ss:$16 sps:$4 sm:$0xff]  }
  0x6c   : > { %1102 = vmatprep.subr.bf16.mxu0 %v1529_v19  ;;  %1184 = vmatprep.subr.bf16.mxu1 %v1531_v20  ;;  %v1619_v15 = vld [vmem:[%s1961_s6 + $0x2ac] ss:$16 sps:$4 sm:$0xff]   ;;  %v1614_v16 = vld [vmem:[%s1961_s6 + $0x2a0] ss:$16 sps:$4 sm:$0xff]   ;;  %v1617_v17 = vld [vmem:[%s1961_s6 + $0x2a8] ss:$16 sps:$4 sm:$0xff]  }
  0x6d   : > { %v1622_v18 = vld [vmem:[%s1961_s6 + $0x2c4] ss:$16 sps:$4 sm:$0xff]   ;;  %v1625_v19 = vld [vmem:[%s1961_s6 + $0x2cc] ss:$16 sps:$4 sm:$0xff]   ;;  %v1620_v20 = vld [vmem:[%s1961_s6 + $0x2c0] ss:$16 sps:$4 sm:$0xff]  }
  0x6e   : > { %s2113_s7 = smov (!%p402_p8, %s1331_s7), 31 }
  0x6f   : > { %1103 = vmatpush1.bf16.msra.mxu0 %v1533_v21  ;;  %1185 = vmatpush1.bf16.msra.mxu1 %v1534_v22  ;;  %v1623_v21 = vld [vmem:[%s1961_s6 + $0x2c8] ss:$16 sps:$4 sm:$0xff]   ;;  %v1628_v22 = vld [vmem:[%s1961_s6 + $0x2e4] ss:$16 sps:$4 sm:$0xff]   ;;  %s1332_s8 = sshll.u32 %s2113_s7, 2 }
  0x70   : > { %1104 = vmatprep.subr.bf16.mxu0 %v1535_v23  ;;  %1186 = vmatprep.subr.bf16.mxu1 %v1537_v24  ;;  %v1631_v23 = vld [vmem:[%s1961_s6 + $0x2ec] ss:$16 sps:$4 sm:$0xff]   ;;  %v1626_v24 = vld [vmem:[%s1961_s6 + $0x2e0] ss:$16 sps:$4 sm:$0xff]   ;;  %s405_s11 = scalar_lea.vmem %s2108_s3, %s1332_s8 }
  0x73   : > { %1105 = vmatpush1.bf16.msra.mxu0 %v1539_v25  ;;  %1187 = vmatpush1.bf16.msra.mxu1 %v1540_v26  ;;  %v1629_v25 = vld [vmem:[%s1961_s6 + $0x2e8] ss:$16 sps:$4 sm:$0xff]   ;;  %v1634_v26 = vld [vmem:[%s1961_s6 + $0x304] ss:$16 sps:$4 sm:$0xff]  }
  0x74   : > { %1106 = vmatprep.subr.bf16.mxu0 %v1541_v27  ;;  %1188 = vmatprep.subr.bf16.mxu1 %v1543_v28  ;;  %v1637_v27 = vld [vmem:[%s1961_s6 + $0x30c] ss:$16 sps:$4 sm:$0xff]   ;;  %v1632_v28 = vld [vmem:[%s1961_s6 + $0x300] ss:$16 sps:$4 sm:$0xff]  }
  0x77   : > { %1107 = vmatpush1.bf16.msra.mxu0 %v1545_v29  ;;  %1189 = vmatpush1.bf16.msra.mxu1 %v1546_v30  ;;  %v1635_v29 = vld [vmem:[%s1961_s6 + $0x308] ss:$16 sps:$4 sm:$0xff]   ;;  %v1640_v30 = vld [vmem:[%s1961_s6 + $0x324] ss:$16 sps:$4 sm:$0xff]  }
  0x78   : > { %1108 = vmatprep.subr.bf16.mxu0 %v1547_v31  ;;  %1190 = vmatprep.subr.bf16.mxu1 %v1549_v32  ;;  %v1643_v31 = vld [vmem:[%s1961_s6 + $0x32c] ss:$16 sps:$4 sm:$0xff]   ;;  %v1638_v32 = vld [vmem:[%s1961_s6 + $0x320] ss:$16 sps:$4 sm:$0xff]  }
  0x7b   : > { %1109 = vmatpush1.bf16.msra.mxu0 %v1551_v33  ;;  %1191 = vmatpush1.bf16.msra.mxu1 %v1552_v34  ;;  %v1641_v33 = vld [vmem:[%s1961_s6 + $0x328] ss:$16 sps:$4 sm:$0xff]   ;;  %v1646_v34 = vld [vmem:[%s1961_s6 + $0x344] ss:$16 sps:$4 sm:$0xff]  }
  0x7c   : > { %1110 = vmatprep.subr.bf16.mxu0 %v1553_v35  ;;  %1192 = vmatprep.subr.bf16.mxu1 %v1555_v36  ;;  %v1649_v35 = vld [vmem:[%s1961_s6 + $0x34c] ss:$16 sps:$4 sm:$0xff]   ;;  %v1644_v36 = vld [vmem:[%s1961_s6 + $0x340] ss:$16 sps:$4 sm:$0xff]  }
  0x7f   : > { %1111 = vmatpush1.bf16.msra.mxu0 %v1557_v37  ;;  %1193 = vmatpush1.bf16.msra.mxu1 %v1558_v38  ;;  %v1647_v37 = vld [vmem:[%s1961_s6 + $0x348] ss:$16 sps:$4 sm:$0xff]  }
  0x80   : > { %1112 = vmatprep.subr.bf16.mxu0 %v1559_v39  ;;  %1194 = vmatprep.subr.bf16.mxu1 %v1561_v40 }
  0x83   : > { %1113 = vmatpush1.bf16.msra.mxu0 %v1563_v41  ;;  %1195 = vmatpush1.bf16.msra.mxu1 %v1564_v42 }
  0x84   : > { %1114 = vmatprep.subr.bf16.mxu0 %v1565_v43  ;;  %1196 = vmatprep.subr.bf16.mxu1 %v1567_v44 }
  0x87   : > { %1115 = vmatpush1.bf16.msra.mxu0 %v1569_v45  ;;  %1197 = vmatpush1.bf16.msra.mxu1 %v1570_v46 }
  0x88   : > { %1116 = vmatprep.subr.bf16.mxu0 %v1571_v47  ;;  %1198 = vmatprep.subr.bf16.mxu1 %v1573_v48 }
  0x8b   : > { %1117 = vmatpush1.bf16.msra.mxu0 %v1575_v49  ;;  %1199 = vmatpush1.bf16.msra.mxu1 %v1576_v51 }
  0x8c   : > { %1118 = vmatprep.subr.bf16.mxu0 %v1577_v52  ;;  %1200 = vmatprep.subr.bf16.mxu1 %v1579_v53 }
  0x8f   : > { %1119 = vmatpush1.bf16.msra.mxu0 %v1581_v56  ;;  %1201 = vmatpush1.bf16.msra.mxu1 %v1582_v57 }
  0x90   : > { %1129 = vmatprep.subr.bf16.mxu0 %v1586_v59  ;;  %1211 = vmatprep.subr.bf16.mxu1 %v1589_v60 }
  0x92   : > { %1121 = vmatmul.mubr.bf16.vlgmr.msra.gmra.mrb[0].mxu0 %v1972_v58  ;;  %1203 = vmatmul.mubr.bf16.vlgmr.msra.gmra.mrb[0].mxu1 %v1972_v58  ;;  %v1596_v58 = vld [vmem:[%s1961_s6 + $0x240] ss:$16 sps:$4 sm:$0xff]  }
  0x93   : > { %1130 = vmatpush1.bf16.msra.mxu0 %v1584_v62  ;;  %1212 = vmatpush1.bf16.msra.mxu1 %v1587_v63 }
  0x94   : > { %1131 = vmatprep.subr.bf16.mxu0 %v1592_v50  ;;  %1213 = vmatprep.subr.bf16.mxu1 %v1595_v0 }
  0x95   : > { %1441 = vmatprep.mubr.msk.bf16.mxu0 %vm1084_vm0, %v540_v1  ;;  %1442 = vmatprep.mubr.msk.bf16.mxu1 %vm1084_vm0, %v540_v1 }
  0x97   : > { %1132 = vmatpush1.bf16.msra.mxu0 %v1590_v54  ;;  %1214 = vmatpush1.bf16.msra.mxu1 %v1593_v2 }
  0x98   : > { %1133 = vmatprep.subr.bf16.mxu0 %v1598_v3  ;;  %1215 = vmatprep.subr.bf16.mxu1 %v1601_v4 }
  0x9b   : > { %1134 = vmatpush1.bf16.msra.mxu0 %v1596_v58  ;;  %1216 = vmatpush1.bf16.msra.mxu1 %v1599_v5 }
  0x9c   : > { %1135 = vmatprep.subr.bf16.mxu0 %v1604_v6  ;;  %1217 = vmatprep.subr.bf16.mxu1 %v1607_v7 }
  0x9f   : > { %1136 = vmatpush1.bf16.msra.mxu0 %v1602_v8  ;;  %1218 = vmatpush1.bf16.msra.mxu1 %v1605_v9 }
  0xa0   : > { %1137 = vmatprep.subr.bf16.mxu0 %v1610_v10  ;;  %1219 = vmatprep.subr.bf16.mxu1 %v1613_v11 }
  0xa3   : > { %1138 = vmatpush1.bf16.msra.mxu0 %v1608_v12  ;;  %1220 = vmatpush1.bf16.msra.mxu1 %v1611_v13 }
  0xa4   : > { %1139 = vmatprep.subr.bf16.mxu0 %v1616_v14  ;;  %1221 = vmatprep.subr.bf16.mxu1 %v1619_v15 }
  0xa7   : > { %1140 = vmatpush1.bf16.msra.mxu0 %v1614_v16  ;;  %1222 = vmatpush1.bf16.msra.mxu1 %v1617_v17 }
  0xa8   : > { %1141 = vmatprep.subr.bf16.mxu0 %v1622_v18  ;;  %1223 = vmatprep.subr.bf16.mxu1 %v1625_v19 }
  0xab   : > { %1142 = vmatpush1.bf16.msra.mxu0 %v1620_v20  ;;  %1224 = vmatpush1.bf16.msra.mxu1 %v1623_v21 }
  0xac   : > { %1143 = vmatprep.subr.bf16.mxu0 %v1628_v22  ;;  %1225 = vmatprep.subr.bf16.mxu1 %v1631_v23 }
  0xaf   : > { %1144 = vmatpush1.bf16.msra.mxu0 %v1626_v24  ;;  %1226 = vmatpush1.bf16.msra.mxu1 %v1629_v25 }
  0xb0   : > { %1145 = vmatprep.subr.bf16.mxu0 %v1634_v26  ;;  %1227 = vmatprep.subr.bf16.mxu1 %v1637_v27 }
  0xb3   : > { %1146 = vmatpush1.bf16.msra.mxu0 %v1632_v28  ;;  %1228 = vmatpush1.bf16.msra.mxu1 %v1635_v29 }
  0xb4   : > { %1147 = vmatprep.subr.bf16.mxu0 %v1640_v30  ;;  %1229 = vmatprep.subr.bf16.mxu1 %v1643_v31 }
  0xb7   : > { %1148 = vmatpush1.bf16.msra.mxu0 %v1638_v32  ;;  %1230 = vmatpush1.bf16.msra.mxu1 %v1641_v33 }
  0xb8   : > { %1149 = vmatprep.subr.bf16.mxu0 %v1646_v34  ;;  %1231 = vmatprep.subr.bf16.mxu1 %v1649_v35 }
  0xbb   : > { %1150 = vmatpush1.bf16.msra.mxu0 %v1644_v36  ;;  %1232 = vmatpush1.bf16.msra.mxu1 %v1647_v37 }
  0xbe   : > { %1162 = vmatmul.mubr.bf16.vlgmr.msra.gmra.mrb[0].mxu0 %v2040_v61  ;;  %1244 = vmatmul.mubr.bf16.vlgmr.msra.gmra.mrb[0].mxu1 %v2040_v61 }
  0xcc   : > { %v521_v38 = vpop.permute.xlu0 %520 }
 0x191   : > { %v1163_v39 = vpop.f32.mrb[0].mxu0  ;;  %v1245_v40 = vpop.f32.mrb[0].mxu1 }
 0x192   : > { %v1446_v41 = vadd.f32 %v1163_v39, %v521_v38  ;;  %v1448_v42 = vadd.f32 %v1245_v40, %v521_v38  ;;  %v1165_v43 = vpop.f32.mrb[1].mxu0  ;;  %v1247_v44 = vpop.f32.mrb[1].mxu1 }
 0x193   : > { %v1447_v45 = vadd.f32 %v1165_v43, %v521_v38  ;;  %v1449_v46 = vadd.f32 %v1247_v44, %v521_v38  ;;  %v1167_v47 = vpop.f32.mrb[2].mxu0  ;;  %v1249_v48 = vpop.f32.mrb[2].mxu1 }
 0x194   : > { %v1168_v49 = vpop.f32.mrb[3].mxu0  ;;  %v1250_v51 = vpop.f32.mrb[3].mxu1 }
 0x195   : > { %v1256_v52 = vcombine.low %v1446_v41, %v1447_v45  ;;  %v1257_v53 = vcombine.low %v1448_v42, %v1449_v46 }
 0x197   : > { %1260 = vst [vmem:[%s405_s11] sm:$0x77] %v1256_v52  ;;  %1261 = vst [vmem:[%s405_s11 + $0x8] sm:$0x77] %v1257_v53 }
 0x198 PF: > { %p10_p9 = scmp.ge.s32.totalorder %s1713_s16, 10   ;;  %s2109_s12 = smov %s1668_s13 }
 0x199   : > { %s2110_s13 = smov %s1722_s19  ;;  %s2111_s14 = smov %s1713_s16 }
 0x19a   :  { %12 = sbr.rel (!%p10_p9) target bundleno = 2 (0x2), region = 90 }

</bundles_post_ra>
